<compile_context>
chip_gen: v5e
topology: v5e:2x2
jax: 0.10.0
libtpu: 0.0.40
codegen_flags: <defaults>
</compile_context>

<pallas_src>
import jax
import jax.numpy as jnp
from jax import lax
from jax.experimental import pallas as pl
from jax.experimental.pallas import tpu as pltpu


def _round_up(x, m):
    return (x + m - 1) // m * m


def _pick_tiles(M, K, N):
    """Per-layer GEMM tile selection (trace-time Python)."""
    # M tile: large for the big conv1 GEMM, 256 otherwise so the tiny conv3-5
    # GEMMs (M=338 @ batch 2) still keep 2 parallel M blocks (v7x megacore).
    tm = 512 if M >= 2048 else (256 if M > 128 else 128)
    # N tile: 256 when it divides exactly, else 128 (keeps >=2 N blocks for
    # Cout=192/384 layers and avoids extra lane padding).
    tn = 256 if (N % 256 == 0) else 128
    # K tile: largest of {512,384,256,128} whose zero-padding waste is <= ~30%.
    kp0 = _round_up(K, 128)
    tk = 128
    for cand in (512, 384, 256, 128):
        if _round_up(K, cand) <= 1.3 * kp0:
            tk = cand
            break
    return tm, tn, tk


# ---------------- Pallas GEMM + bias + ReLU (the conv hot path) ---------------
def _gemm_bias_relu_kernel(x_ref, w_ref, b_ref, o_ref, acc_ref):
    k = pl.program_id(2)

    @pl.when(k == 0)
    def _():
        acc_ref[...] = jnp.zeros_like(acc_ref)

    # bf16 x bf16 -> f32 accumulation on the MXU.
    acc_ref[...] += jnp.dot(x_ref[...], w_ref[...],
                            preferred_element_type=jnp.float32)

    @pl.when(k == pl.num_programs(2) - 1)
    def _():
        # Epilogue math stays in f32 on the accumulator (v5e-friendly); only the
        # final store casts to the (bf16) output dtype.
        o_ref[...] = jnp.maximum(acc_ref[...] + b_ref[...], 0.0).astype(o_ref.dtype)


def gemm_bias_relu(x, w, b, *, out_dtype=jnp.bfloat16):
    """(M,K) @ (K,N) + b, ReLU. Inputs cast to bf16, f32 accumulation."""
    M, K = x.shape
    _, N = w.shape
    tm, tn, tk = _pick_tiles(M, K, N)
    Mp, Kp, Np = _round_up(M, tm), _round_up(K, tk), _round_up(N, tn)

    xp = jnp.pad(x.astype(jnp.bfloat16), ((0, Mp - M), (0, Kp - K)))
    wp = jnp.pad(w.astype(jnp.bfloat16), ((0, Kp - K), (0, Np - N)))
    bp = jnp.pad(b.astype(jnp.float32), (0, Np - N)).reshape(1, Np)

    out = pl.pallas_call(
        _gemm_bias_relu_kernel,
        out_shape=jax.ShapeDtypeStruct((Mp, Np), out_dtype),
        grid_spec=pltpu.PrefetchScalarGridSpec(
            num_scalar_prefetch=0,
            grid=(Mp // tm, Np // tn, Kp // tk),
            in_specs=[
                pl.BlockSpec((tm, tk), lambda i, j, k: (i, k)),
                pl.BlockSpec((tk, tn), lambda i, j, k: (k, j)),
                pl.BlockSpec((1, tn), lambda i, j, k: (0, j)),
            ],
            out_specs=pl.BlockSpec((tm, tn), lambda i, j, k: (i, j)),
            scratch_shapes=[pltpu.VMEM((tm, tn), jnp.float32)],
        ),
        compiler_params=pltpu.CompilerParams(
            dimension_semantics=("parallel", "parallel", "arbitrary"),
            vmem_limit_bytes=32 * 1024 * 1024,
        ),
    )(xp, wp, bp)
    return out[:M, :N]


# ---------------- 3x3 / stride-2 max-pool -------------------------------------
def maxpool_3x3_s2(x):
    # x: (N, H, W, C). lax.reduce_window reads the input once (no 9-slab HBM
    # blowup); matches nn.MaxPool2d(kernel_size=3, stride=2) with no padding.
    init = jnp.array(-jnp.inf, dtype=x.dtype)
    return lax.reduce_window(x, init, lax.max,
                             window_dimensions=(1, 3, 3, 1),
                             window_strides=(1, 2, 2, 1),
                             padding="VALID")


# ---------------- Conv2d (+bias+ReLU) via im2col + Pallas GEMM ----------------
def conv2d_bias_relu(x, w, b, *, stride, padding):
    # x: (N, H, W, C) NHWC bf16; w: (Cout, Cin, KH, KW) PyTorch layout; b: (Cout,)
    N, H, W, C = x.shape
    O, Ci, KH, KW = w.shape
    xp = jnp.pad(x, ((0, 0), (padding, padding), (padding, padding), (0, 0)))
    Hp, Wp = H + 2 * padding, W + 2 * padding
    OH = (Hp - KH) // stride + 1
    OW = (Wp - KW) // stride + 1
    cols = []
    for i in range(KH):
        for j in range(KW):
            cols.append(lax.slice(
                xp, (0, i, j, 0),
                (N, i + stride * (OH - 1) + 1, j + stride * (OW - 1) + 1, C),
                (1, stride, stride, 1)))
    # K ordering (kh, kw, cin) matches the (2, 3, 1, 0) weight transpose below.
    patches = jnp.concatenate(cols, axis=-1).reshape(N * OH * OW, KH * KW * C)
    wmat = jnp.transpose(w, (2, 3, 1, 0)).reshape(KH * KW * Ci, O)
    y = gemm_bias_relu(patches, wmat, b)            # bf16 activations out
    return y.reshape(N, OH, OW, O)


# ---------------- MyAlexNet feature extractor --------------------------------
def init_params(key):
    # TODO(synk): original module loads pretrained torchvision weights; here we
    # initialize the same-shaped parameters deterministically instead.
    shapes = [
        (64, 3, 11, 11),
        (192, 64, 5, 5),
        (384, 192, 3, 3),
        (256, 384, 3, 3),
        (256, 256, 3, 3),
    ]
    params = []
    for i, s in enumerate(shapes):
        kw, kb = jax.random.split(jax.random.fold_in(key, i))
        w = 0.02 * jax.random.normal(kw, s, jnp.float32)
        b = 0.01 * jax.random.normal(kb, (s[0],), jnp.float32)
        params.append((w, b))
    return params


@jax.jit
def my_alexnet_features(x_nchw, params):
    # NCHW f32 -> NHWC bf16 (bf16 activations throughout the feature stack).
    x = jnp.transpose(x_nchw, (0, 2, 3, 1)).astype(jnp.bfloat16)
    (w1, b1), (w2, b2), (w3, b3), (w4, b4), (w5, b5) = params
    x = conv2d_bias_relu(x, w1, b1, stride=4, padding=2)   # Conv(3->64, 11, s4, p2)+ReLU
    x = maxpool_3x3_s2(x)                                  # MaxPool(3, 2)
    x = conv2d_bias_relu(x, w2, b2, stride=1, padding=2)   # Conv(64->192, 5, p2)+ReLU
    x = maxpool_3x3_s2(x)                                  # MaxPool(3, 2)
    x = conv2d_bias_relu(x, w3, b3, stride=1, padding=1)   # Conv(192->384, 3, p1)+ReLU
    x = conv2d_bias_relu(x, w4, b4, stride=1, padding=1)   # Conv(384->256, 3, p1)+ReLU
    x = conv2d_bias_relu(x, w5, b5, stride=1, padding=1)   # Conv(256->256, 3, p1)+ReLU
    x = maxpool_3x3_s2(x)                                  # MaxPool(3, 2) -> (N, 6, 6, 256)
    # PyTorch's x.view(N, 256*6*6) flattens NCHW order -> transpose back first.
    x = jnp.transpose(x, (0, 3, 1, 2)).reshape(x.shape[0], 256 * 6 * 6)
    return x.astype(jnp.float32)


if __name__ == "__main__":
    key = jax.random.PRNGKey(0)
    kx, kp = jax.random.split(key)
    # AlexNet features require 3x224x224 input so the final view(N, 256*6*6) holds.
    x = jax.random.normal(kx, (2, 3, 224, 224), jnp.float32)  # NCHW, like PyTorch
    params = init_params(kp)
    out = my_alexnet_features(x, params)
    out = jax.block_until_ready(out)
    assert out.shape == (2, 256 * 6 * 6), out.shape
    assert bool(jnp.all(jnp.isfinite(out)))
    print("KERNEL_OK")
</pallas_src>

<mosaic_0001>
module attributes {stable_mosaic.version = 11 : i64} {
  func.func @_gemm_bias_relu_kernel(%arg0: i32, %arg1: i32, %arg2: i32, %arg3: memref<512x384xbf16, #tpu.memory_space<vmem>>, %arg4: memref<384x128xbf16, #tpu.memory_space<vmem>>, %arg5: memref<1x128xf32, #tpu.memory_space<vmem>>, %arg6: memref<512x128xbf16, #tpu.memory_space<vmem>>, %arg7: memref<512x128xf32, #tpu.memory_space<vmem>>) attributes {dimension_semantics = [#tpu.dimension_semantics<parallel>, #tpu.dimension_semantics<parallel>, #tpu.dimension_semantics<arbitrary>], iteration_bounds = array<i64: 12, 1, 1>, scalar_prefetch = 0 : i64, scratch_operands = 1 : i64, tpu.core_type = #tpu.core_type<tc>, window_params = [{transform_indices = @transform_0, window_bounds = array<i64: 512, 384>}, {transform_indices = @transform_1, window_bounds = array<i64: 384, 128>}, {transform_indices = @transform_2, window_bounds = array<i64: 1, 128>}, {transform_indices = @transform_3, window_bounds = array<i64: 512, 128>}]} {
    %c0_i32 = arith.constant 0 : i32
    %0 = arith.cmpi eq, %arg2, %c0_i32 : i32
    %1 = arith.extui %0 : i1 to i32
    %c0_i32_0 = arith.constant 0 : i32
    %2 = arith.cmpi ne, %1, %c0_i32_0 : i32
    scf.if %2 {
      %cst_10 = arith.constant 0.000000e+00 : f32
      %12 = vector.broadcast %cst_10 : f32 to vector<512x128xf32>
      %c0_11 = arith.constant 0 : index
      %c0_12 = arith.constant 0 : index
      %13 = vector.load %arg7[%c0_11, %c0_12] : memref<512x128xf32, #tpu.memory_space<vmem>>, vector<512x128xf32>
      tpu.vector_store %arg7[%c0_11, %c0_12], %12 {strides = array<i32>} : memref<512x128xf32, #tpu.memory_space<vmem>>, vector<512x128xf32>,
    } else {
    }
    %c0 = arith.constant 0 : index
    %c0_1 = arith.constant 0 : index
    %3 = vector.load %arg7[%c0, %c0_1] : memref<512x128xf32, #tpu.memory_space<vmem>>, vector<512x128xf32>
    %c0_2 = arith.constant 0 : index
    %c0_3 = arith.constant 0 : index
    %4 = vector.load %arg3[%c0_2, %c0_3] : memref<512x384xbf16, #tpu.memory_space<vmem>>, vector<512x384xbf16>
    %c0_4 = arith.constant 0 : index
    %c0_5 = arith.constant 0 : index
    %5 = vector.load %arg4[%c0_4, %c0_5] : memref<384x128xbf16, #tpu.memory_space<vmem>>, vector<384x128xbf16>
    %cst = arith.constant dense<0.000000e+00> : vector<512x128xf32>
    %6 = tpu.matmul %4, %5, %cst {dimension_numbers = #tpu.dot_dimension_numbers<[1], [0], [0], [1], [0, 0, 1, 1], [], []>} : vector<512x384xbf16>, vector<384x128xbf16>, vector<512x128xf32> -> vector<512x128xf32>
    %7 = arith.addf %3, %6 : vector<512x128xf32>
    %c0_6 = arith.constant 0 : index
    %c0_7 = arith.constant 0 : index
    %8 = vector.load %arg7[%c0_6, %c0_7] : memref<512x128xf32, #tpu.memory_space<vmem>>, vector<512x128xf32>
    tpu.vector_store %arg7[%c0_6, %c0_7], %7 {strides = array<i32>} : memref<512x128xf32, #tpu.memory_space<vmem>>, vector<512x128xf32>,
    %c0_i32_8 = arith.constant 0 : i32
    %9 = arith.cmpi eq, %arg2, %c0_i32_8 : i32
    %10 = arith.extui %9 : i1 to i32
    %c0_i32_9 = arith.constant 0 : i32
    %11 = arith.cmpi ne, %10, %c0_i32_9 : i32
    scf.if %11 {
      %c0_10 = arith.constant 0 : index
      %c0_11 = arith.constant 0 : index
      %12 = vector.load %arg7[%c0_10, %c0_11] : memref<512x128xf32, #tpu.memory_space<vmem>>, vector<512x128xf32>
      %c0_12 = arith.constant 0 : index
      %c0_13 = arith.constant 0 : index
      %13 = vector.load %arg5[%c0_12, %c0_13] : memref<1x128xf32, #tpu.memory_space<vmem>>, vector<1x128xf32>
      %14 = vector.broadcast %13 : vector<1x128xf32> to vector<512x128xf32>
      %15 = arith.addf %12, %14 : vector<512x128xf32>
      %cst_14 = arith.constant 0.000000e+00 : f32
      %16 = vector.broadcast %cst_14 : f32 to vector<512x128xf32>
      %17 = arith.maximumf %15, %16 : vector<512x128xf32>
      %18 = arith.truncf %17 : vector<512x128xf32> to vector<512x128xbf16>
      %c0_15 = arith.constant 0 : index
      %c0_16 = arith.constant 0 : index
      %19 = vector.load %arg6[%c0_15, %c0_16] : memref<512x128xbf16, #tpu.memory_space<vmem>>, vector<512x128xbf16>
      tpu.vector_store %arg6[%c0_15, %c0_16], %18 {strides = array<i32>} : memref<512x128xbf16, #tpu.memory_space<vmem>>, vector<512x128xbf16>,
    } else {
    }
    return
  }
  func.func @transform_0(%arg0: i32, %arg1: i32, %arg2: i32) -> (i32, i32) {
    %c0_i32 = arith.constant 0 : i32
    return %arg0, %arg2 : i32, i32
  }
  func.func @transform_1(%arg0: i32, %arg1: i32, %arg2: i32) -> (i32, i32) {
    %c0_i32 = arith.constant 0 : i32
    return %arg2, %arg1 : i32, i32
  }
  func.func @transform_2(%arg0: i32, %arg1: i32, %arg2: i32) -> (i32, i32) {
    %c0_i32 = arith.constant 0 : i32
    %c0_i32_0 = arith.constant 0 : i32
    return %c0_i32, %arg1 : i32, i32
  }
  func.func @transform_3(%arg0: i32, %arg1: i32, %arg2: i32) -> (i32, i32) {
    %c0_i32 = arith.constant 0 : i32
    return %arg0, %arg1 : i32, i32
  }
}

module attributes {stable_mosaic.version = 11 : i64} {
  func.func @_gemm_bias_relu_kernel(%arg0: i32, %arg1: i32, %arg2: i32, %arg3: memref<256x512xbf16, #tpu.memory_space<vmem>>, %arg4: memref<512x128xbf16, #tpu.memory_space<vmem>>, %arg5: memref<1x128xf32, #tpu.memory_space<vmem>>, %arg6: memref<256x128xbf16, #tpu.memory_space<vmem>>, %arg7: memref<256x128xf32, #tpu.memory_space<vmem>>) attributes {dimension_semantics = [#tpu.dimension_semantics<parallel>, #tpu.dimension_semantics<parallel>, #tpu.dimension_semantics<arbitrary>], iteration_bounds = array<i64: 6, 2, 4>, scalar_prefetch = 0 : i64, scratch_operands = 1 : i64, tpu.core_type = #tpu.core_type<tc>, window_params = [{transform_indices = @transform_0, window_bounds = array<i64: 256, 512>}, {transform_indices = @transform_1, window_bounds = array<i64: 512, 128>}, {transform_indices = @transform_2, window_bounds = array<i64: 1, 128>}, {transform_indices = @transform_3, window_bounds = array<i64: 256, 128>}]} {
    %c0_i32 = arith.constant 0 : i32
    %0 = arith.cmpi eq, %arg2, %c0_i32 : i32
    %1 = arith.extui %0 : i1 to i32
    %c0_i32_0 = arith.constant 0 : i32
    %2 = arith.cmpi ne, %1, %c0_i32_0 : i32
    scf.if %2 {
      %cst_9 = arith.constant 0.000000e+00 : f32
      %12 = vector.broadcast %cst_9 : f32 to vector<256x128xf32>
      %c0_10 = arith.constant 0 : index
      %c0_11 = arith.constant 0 : index
      %13 = vector.load %arg7[%c0_10, %c0_11] : memref<256x128xf32, #tpu.memory_space<vmem>>, vector<256x128xf32>
      tpu.vector_store %arg7[%c0_10, %c0_11], %12 {strides = array<i32>} : memref<256x128xf32, #tpu.memory_space<vmem>>, vector<256x128xf32>,
    } else {
    }
    %c0 = arith.constant 0 : index
    %c0_1 = arith.constant 0 : index
    %3 = vector.load %arg7[%c0, %c0_1] : memref<256x128xf32, #tpu.memory_space<vmem>>, vector<256x128xf32>
    %c0_2 = arith.constant 0 : index
    %c0_3 = arith.constant 0 : index
    %4 = vector.load %arg3[%c0_2, %c0_3] : memref<256x512xbf16, #tpu.memory_space<vmem>>, vector<256x512xbf16>
    %c0_4 = arith.constant 0 : index
    %c0_5 = arith.constant 0 : index
    %5 = vector.load %arg4[%c0_4, %c0_5] : memref<512x128xbf16, #tpu.memory_space<vmem>>, vector<512x128xbf16>
    %cst = arith.constant dense<0.000000e+00> : vector<256x128xf32>
    %6 = tpu.matmul %4, %5, %cst {dimension_numbers = #tpu.dot_dimension_numbers<[1], [0], [0], [1], [0, 0, 1, 1], [], []>} : vector<256x512xbf16>, vector<512x128xbf16>, vector<256x128xf32> -> vector<256x128xf32>
    %7 = arith.addf %3, %6 : vector<256x128xf32>
    %c0_6 = arith.constant 0 : index
    %c0_7 = arith.constant 0 : index
    %8 = vector.load %arg7[%c0_6, %c0_7] : memref<256x128xf32, #tpu.memory_space<vmem>>, vector<256x128xf32>
    tpu.vector_store %arg7[%c0_6, %c0_7], %7 {strides = array<i32>} : memref<256x128xf32, #tpu.memory_space<vmem>>, vector<256x128xf32>,
    %c3_i32 = arith.constant 3 : i32
    %9 = arith.cmpi eq, %arg2, %c3_i32 : i32
    %10 = arith.extui %9 : i1 to i32
    %c0_i32_8 = arith.constant 0 : i32
    %11 = arith.cmpi ne, %10, %c0_i32_8 : i32
    scf.if %11 {
      %c0_9 = arith.constant 0 : index
      %c0_10 = arith.constant 0 : index
      %12 = vector.load %arg7[%c0_9, %c0_10] : memref<256x128xf32, #tpu.memory_space<vmem>>, vector<256x128xf32>
      %c0_11 = arith.constant 0 : index
      %c0_12 = arith.constant 0 : index
      %13 = vector.load %arg5[%c0_11, %c0_12] : memref<1x128xf32, #tpu.memory_space<vmem>>, vector<1x128xf32>
      %14 = vector.broadcast %13 : vector<1x128xf32> to vector<256x128xf32>
      %15 = arith.addf %12, %14 : vector<256x128xf32>
      %cst_13 = arith.constant 0.000000e+00 : f32
      %16 = vector.broadcast %cst_13 : f32 to vector<256x128xf32>
      %17 = arith.maximumf %15, %16 : vector<256x128xf32>
      %18 = arith.truncf %17 : vector<256x128xf32> to vector<256x128xbf16>
      %c0_14 = arith.constant 0 : index
      %c0_15 = arith.constant 0 : index
      %19 = vector.load %arg6[%c0_14, %c0_15] : memref<256x128xbf16, #tpu.memory_space<vmem>>, vector<256x128xbf16>
      tpu.vector_store %arg6[%c0_14, %c0_15], %18 {strides = array<i32>} : memref<256x128xbf16, #tpu.memory_space<vmem>>, vector<256x128xbf16>,
    } else {
    }
    return
  }
  func.func @transform_0(%arg0: i32, %arg1: i32, %arg2: i32) -> (i32, i32) {
    %c0_i32 = arith.constant 0 : i32
    return %arg0, %arg2 : i32, i32
  }
  func.func @transform_1(%arg0: i32, %arg1: i32, %arg2: i32) -> (i32, i32) {
    %c0_i32 = arith.constant 0 : i32
    return %arg2, %arg1 : i32, i32
  }
  func.func @transform_2(%arg0: i32, %arg1: i32, %arg2: i32) -> (i32, i32) {
    %c0_i32 = arith.constant 0 : i32
    %c0_i32_0 = arith.constant 0 : i32
    return %c0_i32, %arg1 : i32, i32
  }
  func.func @transform_3(%arg0: i32, %arg1: i32, %arg2: i32) -> (i32, i32) {
    %c0_i32 = arith.constant 0 : i32
    return %arg0, %arg1 : i32, i32
  }
}

module attributes {stable_mosaic.version = 11 : i64} {
  func.func @_gemm_bias_relu_kernel(%arg0: i32, %arg1: i32, %arg2: i32, %arg3: memref<256x512xbf16, #tpu.memory_space<vmem>>, %arg4: memref<512x128xbf16, #tpu.memory_space<vmem>>, %arg5: memref<1x128xf32, #tpu.memory_space<vmem>>, %arg6: memref<256x128xbf16, #tpu.memory_space<vmem>>, %arg7: memref<256x128xf32, #tpu.memory_space<vmem>>) attributes {dimension_semantics = [#tpu.dimension_semantics<parallel>, #tpu.dimension_semantics<parallel>, #tpu.dimension_semantics<arbitrary>], iteration_bounds = array<i64: 2, 3, 4>, scalar_prefetch = 0 : i64, scratch_operands = 1 : i64, tpu.core_type = #tpu.core_type<tc>, window_params = [{transform_indices = @transform_0, window_bounds = array<i64: 256, 512>}, {transform_indices = @transform_1, window_bounds = array<i64: 512, 128>}, {transform_indices = @transform_2, window_bounds = array<i64: 1, 128>}, {transform_indices = @transform_3, window_bounds = array<i64: 256, 128>}]} {
    %c0_i32 = arith.constant 0 : i32
    %0 = arith.cmpi eq, %arg2, %c0_i32 : i32
    %1 = arith.extui %0 : i1 to i32
    %c0_i32_0 = arith.constant 0 : i32
    %2 = arith.cmpi ne, %1, %c0_i32_0 : i32
    scf.if %2 {
      %cst_9 = arith.constant 0.000000e+00 : f32
      %12 = vector.broadcast %cst_9 : f32 to vector<256x128xf32>
      %c0_10 = arith.constant 0 : index
      %c0_11 = arith.constant 0 : index
      %13 = vector.load %arg7[%c0_10, %c0_11] : memref<256x128xf32, #tpu.memory_space<vmem>>, vector<256x128xf32>
      tpu.vector_store %arg7[%c0_10, %c0_11], %12 {strides = array<i32>} : memref<256x128xf32, #tpu.memory_space<vmem>>, vector<256x128xf32>,
    } else {
    }
    %c0 = arith.constant 0 : index
    %c0_1 = arith.constant 0 : index
    %3 = vector.load %arg7[%c0, %c0_1] : memref<256x128xf32, #tpu.memory_space<vmem>>, vector<256x128xf32>
    %c0_2 = arith.constant 0 : index
    %c0_3 = arith.constant 0 : index
    %4 = vector.load %arg3[%c0_2, %c0_3] : memref<256x512xbf16, #tpu.memory_space<vmem>>, vector<256x512xbf16>
    %c0_4 = arith.constant 0 : index
    %c0_5 = arith.constant 0 : index
    %5 = vector.load %arg4[%c0_4, %c0_5] : memref<512x128xbf16, #tpu.memory_space<vmem>>, vector<512x128xbf16>
    %cst = arith.constant dense<0.000000e+00> : vector<256x128xf32>
    %6 = tpu.matmul %4, %5, %cst {dimension_numbers = #tpu.dot_dimension_numbers<[1], [0], [0], [1], [0, 0, 1, 1], [], []>} : vector<256x512xbf16>, vector<512x128xbf16>, vector<256x128xf32> -> vector<256x128xf32>
    %7 = arith.addf %3, %6 : vector<256x128xf32>
    %c0_6 = arith.constant 0 : index
    %c0_7 = arith.constant 0 : index
    %8 = vector.load %arg7[%c0_6, %c0_7] : memref<256x128xf32, #tpu.memory_space<vmem>>, vector<256x128xf32>
    tpu.vector_store %arg7[%c0_6, %c0_7], %7 {strides = array<i32>} : memref<256x128xf32, #tpu.memory_space<vmem>>, vector<256x128xf32>,
    %c3_i32 = arith.constant 3 : i32
    %9 = arith.cmpi eq, %arg2, %c3_i32 : i32
    %10 = arith.extui %9 : i1 to i32
    %c0_i32_8 = arith.constant 0 : i32
    %11 = arith.cmpi ne, %10, %c0_i32_8 : i32
    scf.if %11 {
      %c0_9 = arith.constant 0 : index
      %c0_10 = arith.constant 0 : index
      %12 = vector.load %arg7[%c0_9, %c0_10] : memref<256x128xf32, #tpu.memory_space<vmem>>, vector<256x128xf32>
      %c0_11 = arith.constant 0 : index
      %c0_12 = arith.constant 0 : index
      %13 = vector.load %arg5[%c0_11, %c0_12] : memref<1x128xf32, #tpu.memory_space<vmem>>, vector<1x128xf32>
      %14 = vector.broadcast %13 : vector<1x128xf32> to vector<256x128xf32>
      %15 = arith.addf %12, %14 : vector<256x128xf32>
      %cst_13 = arith.constant 0.000000e+00 : f32
      %16 = vector.broadcast %cst_13 : f32 to vector<256x128xf32>
      %17 = arith.maximumf %15, %16 : vector<256x128xf32>
      %18 = arith.truncf %17 : vector<256x128xf32> to vector<256x128xbf16>
      %c0_14 = arith.constant 0 : index
      %c0_15 = arith.constant 0 : index
      %19 = vector.load %arg6[%c0_14, %c0_15] : memref<256x128xbf16, #tpu.memory_space<vmem>>, vector<256x128xbf16>
      tpu.vector_store %arg6[%c0_14, %c0_15], %18 {strides = array<i32>} : memref<256x128xbf16, #tpu.memory_space<vmem>>, vector<256x128xbf16>,
    } else {
    }
    return
  }
  func.func @transform_0(%arg0: i32, %arg1: i32, %arg2: i32) -> (i32, i32) {
    %c0_i32 = arith.constant 0 : i32
    return %arg0, %arg2 : i32, i32
  }
  func.func @transform_1(%arg0: i32, %arg1: i32, %arg2: i32) -> (i32, i32) {
    %c0_i32 = arith.constant 0 : i32
    return %arg2, %arg1 : i32, i32
  }
  func.func @transform_2(%arg0: i32, %arg1: i32, %arg2: i32) -> (i32, i32) {
    %c0_i32 = arith.constant 0 : i32
    %c0_i32_0 = arith.constant 0 : i32
    return %c0_i32, %arg1 : i32, i32
  }
  func.func @transform_3(%arg0: i32, %arg1: i32, %arg2: i32) -> (i32, i32) {
    %c0_i32 = arith.constant 0 : i32
    return %arg0, %arg1 : i32, i32
  }
}

module attributes {stable_mosaic.version = 11 : i64} {
  func.func @_gemm_bias_relu_kernel(%arg0: i32, %arg1: i32, %arg2: i32, %arg3: memref<256x512xbf16, #tpu.memory_space<vmem>>, %arg4: memref<512x256xbf16, #tpu.memory_space<vmem>>, %arg5: memref<1x256xf32, #tpu.memory_space<vmem>>, %arg6: memref<256x256xbf16, #tpu.memory_space<vmem>>, %arg7: memref<256x256xf32, #tpu.memory_space<vmem>>) attributes {dimension_semantics = [#tpu.dimension_semantics<parallel>, #tpu.dimension_semantics<parallel>, #tpu.dimension_semantics<arbitrary>], iteration_bounds = array<i64: 2, 1, 7>, scalar_prefetch = 0 : i64, scratch_operands = 1 : i64, tpu.core_type = #tpu.core_type<tc>, window_params = [{transform_indices = @transform_0, window_bounds = array<i64: 256, 512>}, {transform_indices = @transform_1, window_bounds = array<i64: 512, 256>}, {transform_indices = @transform_2, window_bounds = array<i64: 1, 256>}, {transform_indices = @transform_3, window_bounds = array<i64: 256, 256>}]} {
    %c0_i32 = arith.constant 0 : i32
    %0 = arith.cmpi eq, %arg2, %c0_i32 : i32
    %1 = arith.extui %0 : i1 to i32
    %c0_i32_0 = arith.constant 0 : i32
    %2 = arith.cmpi ne, %1, %c0_i32_0 : i32
    scf.if %2 {
      %cst_9 = arith.constant 0.000000e+00 : f32
      %12 = vector.broadcast %cst_9 : f32 to vector<256x256xf32>
      %c0_10 = arith.constant 0 : index
      %c0_11 = arith.constant 0 : index
      %13 = vector.load %arg7[%c0_10, %c0_11] : memref<256x256xf32, #tpu.memory_space<vmem>>, vector<256x256xf32>
      tpu.vector_store %arg7[%c0_10, %c0_11], %12 {strides = array<i32>} : memref<256x256xf32, #tpu.memory_space<vmem>>, vector<256x256xf32>,
    } else {
    }
    %c0 = arith.constant 0 : index
    %c0_1 = arith.constant 0 : index
    %3 = vector.load %arg7[%c0, %c0_1] : memref<256x256xf32, #tpu.memory_space<vmem>>, vector<256x256xf32>
    %c0_2 = arith.constant 0 : index
    %c0_3 = arith.constant 0 : index
    %4 = vector.load %arg3[%c0_2, %c0_3] : memref<256x512xbf16, #tpu.memory_space<vmem>>, vector<256x512xbf16>
    %c0_4 = arith.constant 0 : index
    %c0_5 = arith.constant 0 : index
    %5 = vector.load %arg4[%c0_4, %c0_5] : memref<512x256xbf16, #tpu.memory_space<vmem>>, vector<512x256xbf16>
    %cst = arith.constant dense<0.000000e+00> : vector<256x256xf32>
    %6 = tpu.matmul %4, %5, %cst {dimension_numbers = #tpu.dot_dimension_numbers<[1], [0], [0], [1], [0, 0, 1, 1], [], []>} : vector<256x512xbf16>, vector<512x256xbf16>, vector<256x256xf32> -> vector<256x256xf32>
    %7 = arith.addf %3, %6 : vector<256x256xf32>
    %c0_6 = arith.constant 0 : index
    %c0_7 = arith.constant 0 : index
    %8 = vector.load %arg7[%c0_6, %c0_7] : memref<256x256xf32, #tpu.memory_space<vmem>>, vector<256x256xf32>
    tpu.vector_store %arg7[%c0_6, %c0_7], %7 {strides = array<i32>} : memref<256x256xf32, #tpu.memory_space<vmem>>, vector<256x256xf32>,
    %c6_i32 = arith.constant 6 : i32
    %9 = arith.cmpi eq, %arg2, %c6_i32 : i32
    %10 = arith.extui %9 : i1 to i32
    %c0_i32_8 = arith.constant 0 : i32
    %11 = arith.cmpi ne, %10, %c0_i32_8 : i32
    scf.if %11 {
      %c0_9 = arith.constant 0 : index
      %c0_10 = arith.constant 0 : index
      %12 = vector.load %arg7[%c0_9, %c0_10] : memref<256x256xf32, #tpu.memory_space<vmem>>, vector<256x256xf32>
      %c0_11 = arith.constant 0 : index
      %c0_12 = arith.constant 0 : index
      %13 = vector.load %arg5[%c0_11, %c0_12] : memref<1x256xf32, #tpu.memory_space<vmem>>, vector<1x256xf32>
      %14 = vector.broadcast %13 : vector<1x256xf32> to vector<256x256xf32>
      %15 = arith.addf %12, %14 : vector<256x256xf32>
      %cst_13 = arith.constant 0.000000e+00 : f32
      %16 = vector.broadcast %cst_13 : f32 to vector<256x256xf32>
      %17 = arith.maximumf %15, %16 : vector<256x256xf32>
      %18 = arith.truncf %17 : vector<256x256xf32> to vector<256x256xbf16>
      %c0_14 = arith.constant 0 : index
      %c0_15 = arith.constant 0 : index
      %19 = vector.load %arg6[%c0_14, %c0_15] : memref<256x256xbf16, #tpu.memory_space<vmem>>, vector<256x256xbf16>
      tpu.vector_store %arg6[%c0_14, %c0_15], %18 {strides = array<i32>} : memref<256x256xbf16, #tpu.memory_space<vmem>>, vector<256x256xbf16>,
    } else {
    }
    return
  }
  func.func @transform_0(%arg0: i32, %arg1: i32, %arg2: i32) -> (i32, i32) {
    %c0_i32 = arith.constant 0 : i32
    return %arg0, %arg2 : i32, i32
  }
  func.func @transform_1(%arg0: i32, %arg1: i32, %arg2: i32) -> (i32, i32) {
    %c0_i32 = arith.constant 0 : i32
    return %arg2, %arg1 : i32, i32
  }
  func.func @transform_2(%arg0: i32, %arg1: i32, %arg2: i32) -> (i32, i32) {
    %c0_i32 = arith.constant 0 : i32
    %c0_i32_0 = arith.constant 0 : i32
    return %c0_i32, %arg1 : i32, i32
  }
  func.func @transform_3(%arg0: i32, %arg1: i32, %arg2: i32) -> (i32, i32) {
    %c0_i32 = arith.constant 0 : i32
    return %arg0, %arg1 : i32, i32
  }
}

module attributes {stable_mosaic.version = 11 : i64} {
  func.func @_gemm_bias_relu_kernel(%arg0: i32, %arg1: i32, %arg2: i32, %arg3: memref<256x512xbf16, #tpu.memory_space<vmem>>, %arg4: memref<512x256xbf16, #tpu.memory_space<vmem>>, %arg5: memref<1x256xf32, #tpu.memory_space<vmem>>, %arg6: memref<256x256xbf16, #tpu.memory_space<vmem>>, %arg7: memref<256x256xf32, #tpu.memory_space<vmem>>) attributes {dimension_semantics = [#tpu.dimension_semantics<parallel>, #tpu.dimension_semantics<parallel>, #tpu.dimension_semantics<arbitrary>], iteration_bounds = array<i64: 2, 1, 5>, scalar_prefetch = 0 : i64, scratch_operands = 1 : i64, tpu.core_type = #tpu.core_type<tc>, window_params = [{transform_indices = @transform_0, window_bounds = array<i64: 256, 512>}, {transform_indices = @transform_1, window_bounds = array<i64: 512, 256>}, {transform_indices = @transform_2, window_bounds = array<i64: 1, 256>}, {transform_indices = @transform_3, window_bounds = array<i64: 256, 256>}]} {
    %c0_i32 = arith.constant 0 : i32
    %0 = arith.cmpi eq, %arg2, %c0_i32 : i32
    %1 = arith.extui %0 : i1 to i32
    %c0_i32_0 = arith.constant 0 : i32
    %2 = arith.cmpi ne, %1, %c0_i32_0 : i32
    scf.if %2 {
      %cst_9 = arith.constant 0.000000e+00 : f32
      %12 = vector.broadcast %cst_9 : f32 to vector<256x256xf32>
      %c0_10 = arith.constant 0 : index
      %c0_11 = arith.constant 0 : index
      %13 = vector.load %arg7[%c0_10, %c0_11] : memref<256x256xf32, #tpu.memory_space<vmem>>, vector<256x256xf32>
      tpu.vector_store %arg7[%c0_10, %c0_11], %12 {strides = array<i32>} : memref<256x256xf32, #tpu.memory_space<vmem>>, vector<256x256xf32>,
    } else {
    }
    %c0 = arith.constant 0 : index
    %c0_1 = arith.constant 0 : index
    %3 = vector.load %arg7[%c0, %c0_1] : memref<256x256xf32, #tpu.memory_space<vmem>>, vector<256x256xf32>
    %c0_2 = arith.constant 0 : index
    %c0_3 = arith.constant 0 : index
    %4 = vector.load %arg3[%c0_2, %c0_3] : memref<256x512xbf16, #tpu.memory_space<vmem>>, vector<256x512xbf16>
    %c0_4 = arith.constant 0 : index
    %c0_5 = arith.constant 0 : index
    %5 = vector.load %arg4[%c0_4, %c0_5] : memref<512x256xbf16, #tpu.memory_space<vmem>>, vector<512x256xbf16>
    %cst = arith.constant dense<0.000000e+00> : vector<256x256xf32>
    %6 = tpu.matmul %4, %5, %cst {dimension_numbers = #tpu.dot_dimension_numbers<[1], [0], [0], [1], [0, 0, 1, 1], [], []>} : vector<256x512xbf16>, vector<512x256xbf16>, vector<256x256xf32> -> vector<256x256xf32>
    %7 = arith.addf %3, %6 : vector<256x256xf32>
    %c0_6 = arith.constant 0 : index
    %c0_7 = arith.constant 0 : index
    %8 = vector.load %arg7[%c0_6, %c0_7] : memref<256x256xf32, #tpu.memory_space<vmem>>, vector<256x256xf32>
    tpu.vector_store %arg7[%c0_6, %c0_7], %7 {strides = array<i32>} : memref<256x256xf32, #tpu.memory_space<vmem>>, vector<256x256xf32>,
    %c4_i32 = arith.constant 4 : i32
    %9 = arith.cmpi eq, %arg2, %c4_i32 : i32
    %10 = arith.extui %9 : i1 to i32
    %c0_i32_8 = arith.constant 0 : i32
    %11 = arith.cmpi ne, %10, %c0_i32_8 : i32
    scf.if %11 {
      %c0_9 = arith.constant 0 : index
      %c0_10 = arith.constant 0 : index
      %12 = vector.load %arg7[%c0_9, %c0_10] : memref<256x256xf32, #tpu.memory_space<vmem>>, vector<256x256xf32>
      %c0_11 = arith.constant 0 : index
      %c0_12 = arith.constant 0 : index
      %13 = vector.load %arg5[%c0_11, %c0_12] : memref<1x256xf32, #tpu.memory_space<vmem>>, vector<1x256xf32>
      %14 = vector.broadcast %13 : vector<1x256xf32> to vector<256x256xf32>
      %15 = arith.addf %12, %14 : vector<256x256xf32>
      %cst_13 = arith.constant 0.000000e+00 : f32
      %16 = vector.broadcast %cst_13 : f32 to vector<256x256xf32>
      %17 = arith.maximumf %15, %16 : vector<256x256xf32>
      %18 = arith.truncf %17 : vector<256x256xf32> to vector<256x256xbf16>
      %c0_14 = arith.constant 0 : index
      %c0_15 = arith.constant 0 : index
      %19 = vector.load %arg6[%c0_14, %c0_15] : memref<256x256xbf16, #tpu.memory_space<vmem>>, vector<256x256xbf16>
      tpu.vector_store %arg6[%c0_14, %c0_15], %18 {strides = array<i32>} : memref<256x256xbf16, #tpu.memory_space<vmem>>, vector<256x256xbf16>,
    } else {
    }
    return
  }
  func.func @transform_0(%arg0: i32, %arg1: i32, %arg2: i32) -> (i32, i32) {
    %c0_i32 = arith.constant 0 : i32
    return %arg0, %arg2 : i32, i32
  }
  func.func @transform_1(%arg0: i32, %arg1: i32, %arg2: i32) -> (i32, i32) {
    %c0_i32 = arith.constant 0 : i32
    return %arg2, %arg1 : i32, i32
  }
  func.func @transform_2(%arg0: i32, %arg1: i32, %arg2: i32) -> (i32, i32) {
    %c0_i32 = arith.constant 0 : i32
    %c0_i32_0 = arith.constant 0 : i32
    return %c0_i32, %arg1 : i32, i32
  }
  func.func @transform_3(%arg0: i32, %arg1: i32, %arg2: i32) -> (i32, i32) {
    %c0_i32 = arith.constant 0 : i32
    return %arg0, %arg1 : i32, i32
  }
}

</mosaic_0001>

<bundles_post_ra>
// kernel: my_alexnet_features.5
= control target key start
LH: loop header
LB: loop body
LE: loop exit
PB: predicated region body
PF: predicated region fallthrough
CT: control target
= control target key end

     0   :  { %s3206_s12 = smov 0   ;;  %s3208_s13 = smov 0   ;;  %s3764_s0 = inlined_call_operand.vmem [shape: bf16[6144,384], index: 0, kind: input, shape index: {}]   ;;  %s3765_s1 = inlined_call_operand.vmem [shape: bf16[384,128], index: 1, kind: input, shape index: {}]   ;;  %s3766_s2 = inlined_call_operand.vmem [shape: f32[1,128], index: 2, kind: input, shape index: {}]   ;;  %s3767_s3 = inlined_call_operand.vmem [shape: bf16[6144,128], index: 3, kind: output, shape index: {}]  }
   0x1   :  { %s3210_s14 = smov 0  }
   0x2 LB: > { %s32_s15 = sadd.s32 1, %s3180_s13  ;;  %p2313_p0 = scmp.ge.s32.totalorder %s3184_s14, 1  ;;  %s3184_s14 = sphi %s3210_s14, %s13_s14   ;;  %s3180_s13 = sphi %s3208_s13, %s3769_s13   ;;  %s3176_s12 = sphi %s3206_s12, %s3768_s12  }
   0x3   : > { %p34_p1 = scmp.ge.s32.totalorder %s32_s15, 12  ;;  %p191_p2 = scmp.lt.s32.totalorder %s3184_s14, 13 }
   0x5   : > { %s3771_s15 = smov (%p34_p1, %s32_s15), 0  ;;  %p192_p3 = pnand %p2313_p0, %p191_p2 }
   0x6   : > { %s2314_s7 = sshll.u32 (!%p192_p3), %s3176_s12, 6 }
   0x7   : > { %195 = sbr.rel (%p192_p3) target bundleno = 563 (0x233), region = 32  ;;  %p236_p4 = scmp.lt.s32.totalorder (!%p192_p3), %s2314_s7, 767 }
   0xc   : > { %v2903_v0 = vld [vmem:[%s3765_s1 + $0x38] sm:$0xff]  ;;  %v2902_v3 = vld [vmem:[%s3765_s1 + $0x30] sm:$0xff]  ;;  %v2901_v6 = vld [vmem:[%s3765_s1 + $0x28] sm:$0xff]  ;;  %s3773_s7 = smov (!%p236_p4, %s2314_s7), 767 }
   0xd   : > { %v3232_v1 = vld [vmem:[%s3765_s1 + $0x78] sm:$0xff]  ;;  %1231 = vmatpush.bf16.msra.mxu0 %v2903_v0  ;;  %3111 = vmatpush.bf16.msra.mxu3 %v2903_v0  ;;  %v3247_v4 = vld [vmem:[%s3765_s1 + $0x70] sm:$0xff]  ;;  %v3262_v7 = vld [vmem:[%s3765_s1 + $0x68] sm:$0xff]  ;;  %s3135_s25 = smul.u32 12, %s3773_s7  ;;  %s2317_s24 = sshll.u32 %s3773_s7, 2 }
   0xe   : > { %v3237_v2 = vld [vmem:[%s3765_s1 + $0xb8] sm:$0xff]  ;;  %1400 = vmatpush.bf16.msra.mxu1 %v3232_v1  ;;  %v3252_v5 = vld [vmem:[%s3765_s1 + $0xb0] sm:$0xff]  ;;  %v3267_v8 = vld [vmem:[%s3765_s1 + $0xa8] sm:$0xff]  ;;  %s3450_s27 = scalar_lea.vmem %s3767_s3, %s2317_s24 }
   0xf   : > { %1569 = vmatpush.bf16.msra.mxu2 %v3237_v2  ;;  %v2900_v9 = vld [vmem:[%s3765_s1 + $0x20] sm:$0xff]  ;;  %v2899_v12 = vld [vmem:[%s3765_s1 + $0x18] sm:$0xff]  ;;  %v2898_v15 = vld [vmem:[%s3765_s1 + $0x10] sm:$0xff]  ;;  %s3319_s8 = scalar_lea.vmem %s3764_s0, %s3135_s25 }
  0x10   : > { %v3278_v10 = vld [vmem:[%s3765_s1 + $0x60] sm:$0xff]  ;;  %v2907_v13 = vld [vmem:[%s3765_s1 + $0x58] sm:$0xff]  ;;  %v2906_v16 = vld [vmem:[%s3765_s1 + $0x50] sm:$0xff] }
  0x11   : > { %1232 = vmatpush.bf16.msra.mxu0 %v2902_v3  ;;  %3112 = vmatpush.bf16.msra.mxu3 %v2902_v3  ;;  %v3283_v11 = vld [vmem:[%s3765_s1 + $0xa0] sm:$0xff]  ;;  %v3298_v14 = vld [vmem:[%s3765_s1 + $0x98] sm:$0xff]  ;;  %v3311_v17 = vld [vmem:[%s3765_s1 + $0x90] sm:$0xff] }
  0x12   : > { %1401 = vmatpush.bf16.msra.mxu1 %v3247_v4  ;;  %v2897_v18 = vld [vmem:[%s3765_s1 + $0x8] sm:$0xff]  ;;  %v2896_v21 = vld [vmem:[%s3765_s1] sm:$0xff]  ;;  %v2322_v29 = vld [vmem:[%s3319_s8 + $0xc] sm:$0xf0] }
  0x13   : > { %1570 = vmatpush.bf16.msra.mxu2 %v3252_v5  ;;  %v2905_v19 = vld [vmem:[%s3765_s1 + $0x48] sm:$0xff]  ;;  %v2904_v22 = vld [vmem:[%s3765_s1 + $0x40] sm:$0xff]  ;;  %v2802_v31 = vld [vmem:[%s3319_s8 + $0x10] sm:$0xf0] }
  0x14   : > { %v3328_v20 = vld [vmem:[%s3765_s1 + $0x88] sm:$0xff]  ;;  %v3339_v23 = vld [vmem:[%s3765_s1 + $0x80] sm:$0xff]  ;;  %v2332_v36 = vld [vmem:[%s3319_s8 + $0x18] sm:$0xf] }
  0x15   : > { %1233 = vmatpush.bf16.msra.mxu0 %v2901_v6  ;;  %3113 = vmatpush.bf16.msra.mxu3 %v2901_v6  ;;  %v2320_v24 = vld [vmem:[%s3319_s8] sm:$0xf]  ;;  %v2801_v25 = vld [vmem:[%s3319_s8 + $0x8] sm:$0xf0]  ;;  %v2800_v28 = vld [vmem:[%s3319_s8 + $0x4] sm:$0xf] }
  0x16   : > { %1402 = vmatpush.bf16.msra.mxu1 %v3262_v7  ;;  %v2608_v26 = vld [vmem:[%s3319_s8 + $0x240] sm:$0xf]  ;;  %v2873_v27 = vld [vmem:[%s3319_s8 + $0x248] sm:$0xf0]  ;;  %v2328_v30 = vld [vmem:[%s3319_s8 + $0x8] sm:$0xf]  ;;  %v2321_v32 = vor.u32 %v2801_v25, %v2320_v24  ;;  %v2325_v34 = vor.u32 %v2800_v28, %v2322_v29 }
  0x17   : > { %1571 = vmatpush.bf16.msra.mxu2 %v3267_v8  ;;  %v2609_v33 = vor.u32 %v2873_v27, %v2608_v26  ;;  %v2329_v35 = vor.u32 %v2802_v31, %v2328_v30  ;;  %v2804_v37 = vld [vmem:[%s3319_s8 + $0x20] sm:$0xf0]  ;;  %v2620_v38 = vld [vmem:[%s3319_s8 + $0x258] sm:$0xf]  ;;  %v2803_v40 = vld [vmem:[%s3319_s8 + $0x1c] sm:$0xf] }
  0x18   : > { %v2876_v39 = vld [vmem:[%s3319_s8 + $0x260] sm:$0xf0]  ;;  %v2334_v41 = vld [vmem:[%s3319_s8 + $0x24] sm:$0xf0]  ;;  %v2340_v42 = vld [vmem:[%s3319_s8 + $0x20] sm:$0xf]  ;;  %v2333_v44 = vor.u32 %v2804_v37, %v2332_v36 }
  0x19   : > { %1234 = vmatpush.bf16.msra.mxu0 %v2900_v9  ;;  %3114 = vmatpush.bf16.msra.mxu3 %v2900_v9  ;;  %v2805_v43 = vld [vmem:[%s3319_s8 + $0x28] sm:$0xf0]  ;;  %v2621_v45 = vor.u32 %v2876_v39, %v2620_v38  ;;  %v2337_v46 = vor.u32 %v2803_v40, %v2334_v41  ;;  %v2344_v48 = vld [vmem:[%s3319_s8 + $0x30] sm:$0xf]  ;;  %v2807_v49 = vld [vmem:[%s3319_s8 + $0x38] sm:$0xf0] }
  0x1a   : > { %1403 = vmatpush.bf16.msra.mxu1 %v3278_v10  ;;  %v2341_v47 = vor.u32 %v2805_v43, %v2340_v42  ;;  %v2632_v50 = vld [vmem:[%s3319_s8 + $0x270] sm:$0xf]  ;;  %v2879_v51 = vld [vmem:[%s3319_s8 + $0x278] sm:$0xf0]  ;;  %v2806_v52 = vld [vmem:[%s3319_s8 + $0x34] sm:$0xf]  ;;  %v2345_v56 = vor.u32 %v2807_v49, %v2344_v48 }
  0x1b   : > { %1572 = vmatpush.bf16.msra.mxu2 %v3283_v11  ;;  %v2346_v53 = vld [vmem:[%s3319_s8 + $0x3c] sm:$0xf0]  ;;  %v2352_v54 = vld [vmem:[%s3319_s8 + $0x38] sm:$0xf]  ;;  %v2808_v55 = vld [vmem:[%s3319_s8 + $0x40] sm:$0xf0]  ;;  %v2633_v57 = vor.u32 %v2879_v51, %v2632_v50 }
  0x1c   : > { %v2349_v58 = vor.u32 %v2806_v52, %v2346_v53  ;;  %v2353_v59 = vor.u32 %v2808_v55, %v2352_v54  ;;  %v2356_v60 = vld [vmem:[%s3319_s8 + $0x48] sm:$0xf]  ;;  %v2810_v61 = vld [vmem:[%s3319_s8 + $0x50] sm:$0xf0]  ;;  %v2809_v0 = vld [vmem:[%s3319_s8 + $0x4c] sm:$0xf] }
  0x1d   : > { %1235 = vmatpush.bf16.msra.mxu0 %v2899_v12  ;;  %3115 = vmatpush.bf16.msra.mxu3 %v2899_v12  ;;  %v2644_v62 = vld [vmem:[%s3319_s8 + $0x288] sm:$0xf]  ;;  %v2882_v63 = vld [vmem:[%s3319_s8 + $0x290] sm:$0xf0]  ;;  %v2811_v3 = vld [vmem:[%s3319_s8 + $0x58] sm:$0xf0] }
  0x1e   : > { %1404 = vmatpush.bf16.msra.mxu1 %v2907_v13  ;;  %v2813_v9 = vld [vmem:[%s3319_s8 + $0x68] sm:$0xf0]  ;;  %v2812_v12 = vld [vmem:[%s3319_s8 + $0x64] sm:$0xf]  ;;  %v2815_v25 = vld [vmem:[%s3319_s8 + $0x7c] sm:$0xf] }
  0x1f   : > { %1573 = vmatpush.bf16.msra.mxu2 %v3298_v14  ;;  %v2888_v24 = vld [vmem:[%s3319_s8 + $0x2c0] sm:$0xf0]  ;;  %v2388_v26 = vld [vmem:[%s3319_s8 + $0x80] sm:$0xf]  ;;  %v2817_v27 = vld [vmem:[%s3319_s8 + $0x88] sm:$0xf0] }
  0x20   : > { %v2389_v31 = vor.u32 %v2817_v27, %v2388_v26  ;;  %v2818_v36 = vld [vmem:[%s3319_s8 + $0x94] sm:$0xf]  ;;  %v2394_v37 = vld [vmem:[%s3319_s8 + $0x9c] sm:$0xf0]  ;;  %v2400_v38 = vld [vmem:[%s3319_s8 + $0x98] sm:$0xf] }
  0x21   : > { %1236 = vmatpush.bf16.msra.mxu0 %v2898_v15  ;;  %3116 = vmatpush.bf16.msra.mxu3 %v2898_v15  ;;  %v2814_v15 = vld [vmem:[%s3319_s8 + $0x70] sm:$0xf0]  ;;  %v2820_v39 = vld [vmem:[%s3319_s8 + $0xa0] sm:$0xf0]  ;;  %v2397_v42 = vor.u32 %v2818_v36, %v2394_v37  ;;  %v2821_v48 = vld [vmem:[%s3319_s8 + $0xac] sm:$0xf] }
  0x22   : > { %1405 = vmatpush.bf16.msra.mxu1 %v2906_v16  ;;  %v2401_v43 = vor.u32 %v2820_v39, %v2400_v38  ;;  %v2406_v49 = vld [vmem:[%s3319_s8 + $0xb4] sm:$0xf0]  ;;  %v2412_v50 = vld [vmem:[%s3319_s8 + $0xb0] sm:$0xf]  ;;  %v2823_v51 = vld [vmem:[%s3319_s8 + $0xb8] sm:$0xf0] }
  0x23   : > { %1574 = vmatpush.bf16.msra.mxu2 %v3311_v17  ;;  %v2409_v54 = vor.u32 %v2821_v48, %v2406_v49  ;;  %v2413_v55 = vor.u32 %v2823_v51, %v2412_v50  ;;  %v2448_v48 = vld [vmem:[%s3319_s8 + $0xf8] sm:$0xf]  ;;  %v2832_v49 = vld [vmem:[%s3319_s8 + $0x100] sm:$0xf0] }
  0x25   : > { %1237 = vmatpush.bf16.msra.mxu0 %v2897_v18  ;;  %3117 = vmatpush.bf16.msra.mxu3 %v2897_v18 }
  0x26   : > { %1406 = vmatpush.bf16.msra.mxu1 %v2905_v19 }
  0x27   : > { %1575 = vmatpush.bf16.msra.mxu2 %v3328_v20 }
  0x29   : > { %1238 = vmatpush.bf16.msra.mxu0 %v2896_v21  ;;  %3118 = vmatpush.bf16.msra.mxu3 %v2896_v21  ;;  %v2816_v21 = vld [vmem:[%s3319_s8 + $0x80] sm:$0xf0] }
  0x2a   : > { %1407 = vmatpush.bf16.msra.mxu1 %v2904_v22 }
  0x2b   : > { %1576 = vmatpush.bf16.msra.mxu2 %v3339_v23 }
  0x2c   : > { %1239 = vmatmul.bf16.vlgmr.msra.gmra.mxu0 %v2321_v32  ;;  %1359 = vmatmul.bf16.vlgmr.msra.gmra.mxu3 %v2609_v33  ;;  %v2392_v32 = vld [vmem:[%s3319_s8 + $0x90] sm:$0xf]  ;;  %v2819_v33 = vld [vmem:[%s3319_s8 + $0x98] sm:$0xf0] }
  0x2d   : > { %3119 = vmatpush.bf16.msrb.mxu3 %v3232_v1  ;;  %1408 = vmatmul.bf16.vlgmr.msra.gmra.mxu1 %v2325_v34  ;;  %v2358_v1 = vld [vmem:[%s3319_s8 + $0x54] sm:$0xf0]  ;;  %v2680_v34 = vld [vmem:[%s3319_s8 + $0x2d0] sm:$0xf]  ;;  %v2393_v40 = vor.u32 %v2819_v33, %v2392_v32 }
  0x2e   : > { %1577 = vmatmul.bf16.vlgmr.msra.gmra.mxu2 %v2329_v35  ;;  %v2361_v6 = vor.u32 %v2809_v0, %v2358_v1  ;;  %v2891_v35 = vld [vmem:[%s3319_s8 + $0x2d8] sm:$0xf0] }
  0x2f   : > { %v2681_v41 = vor.u32 %v2891_v35, %v2680_v34 }
  0x31   : > { %3120 = vmatpush.bf16.msrb.mxu3 %v3247_v4  ;;  %v2357_v4 = vor.u32 %v2810_v61, %v2356_v60  ;;  %v2610_v60 = vld [vmem:[%s3319_s8 + $0x24c] sm:$0xf0] }
  0x32   : > { %v2418_v61 = vld [vmem:[%s3319_s8 + $0xcc] sm:$0xf0] }
  0x35   : > { %3121 = vmatpush.bf16.msrb.mxu3 %v3262_v7 }
  0x39   : > { %3122 = vmatpush.bf16.msrb.mxu3 %v3278_v10  ;;  %v2656_v10 = vld [vmem:[%s3319_s8 + $0x2a0] sm:$0xf] }
  0x3c   : > { %1244 = vmatmul.bf16.gmra.mxu0 %v2333_v44  ;;  %1364 = vmatmul.bf16.gmra.mxu3 %v2621_v45  ;;  %v2404_v44 = vld [vmem:[%s3319_s8 + $0xa8] sm:$0xf]  ;;  %v2822_v45 = vld [vmem:[%s3319_s8 + $0xb0] sm:$0xf0] }
  0x3d   : > { %3123 = vmatpush.bf16.msrb.mxu3 %v2907_v13  ;;  %1413 = vmatmul.bf16.gmra.mxu1 %v2337_v46  ;;  %v2370_v13 = vld [vmem:[%s3319_s8 + $0x6c] sm:$0xf0]  ;;  %v2692_v46 = vld [vmem:[%s3319_s8 + $0x2e8] sm:$0xf]  ;;  %v2405_v52 = vor.u32 %v2822_v45, %v2404_v44  ;;  %v2830_v44 = vld [vmem:[%s3319_s8 + $0xf4] sm:$0xf] }
  0x3e   : > { %1582 = vmatmul.bf16.gmra.mxu2 %v2341_v47  ;;  %v2373_v18 = vor.u32 %v2812_v12, %v2370_v13  ;;  %v2894_v47 = vld [vmem:[%s3319_s8 + $0x2f0] sm:$0xf0]  ;;  %v2428_v12 = vld [vmem:[%s3319_s8 + $0xd8] sm:$0xf]  ;;  %v2828_v13 = vld [vmem:[%s3319_s8 + $0xe0] sm:$0xf0] }
  0x3f   : > { %v2693_v53 = vor.u32 %v2894_v47, %v2692_v46  ;;  %v2878_v45 = vld [vmem:[%s3319_s8 + $0x274] sm:$0xf]  ;;  %v2634_v46 = vld [vmem:[%s3319_s8 + $0x27c] sm:$0xf0] }
  0x40   : > { %v2442_v47 = vld [vmem:[%s3319_s8 + $0xfc] sm:$0xf0] }
  0x41   : > { %3124 = vmatpush.bf16.msrb.mxu3 %v2906_v16 }
  0x45   : > { %3125 = vmatpush.bf16.msrb.mxu3 %v2905_v19 }
  0x49   : > { %3126 = vmatpush.bf16.msrb.mxu3 %v2904_v22  ;;  %v2668_v22 = vld [vmem:[%s3319_s8 + $0x2b8] sm:$0xf] }
  0x4a   : > { %v2669_v29 = vor.u32 %v2888_v24, %v2668_v22 }
  0x4c   : > { %1249 = vmatmul.bf16.gmra.mxu0 %v2345_v56  ;;  %1369 = vmatmul.bf16.gmra.mxu3 %v2633_v57  ;;  %v2416_v56 = vld [vmem:[%s3319_s8 + $0xc0] sm:$0xf]  ;;  %v2825_v57 = vld [vmem:[%s3319_s8 + $0xc8] sm:$0xf0] }
  0x4d   : > { %3127 = vmatpush.bf16.msra.mxu3 %v3237_v2  ;;  %1418 = vmatmul.bf16.gmra.mxu1 %v2349_v58  ;;  %v2364_v2 = vld [vmem:[%s3319_s8 + $0x50] sm:$0xf]  ;;  %v2824_v58 = vld [vmem:[%s3319_s8 + $0xc4] sm:$0xf]  ;;  %v2417_v0 = vor.u32 %v2825_v57, %v2416_v56 }
  0x4e   : > { %1587 = vmatmul.bf16.gmra.mxu2 %v2353_v59  ;;  %v2365_v7 = vor.u32 %v2811_v3, %v2364_v2  ;;  %v2872_v59 = vld [vmem:[%s3319_s8 + $0x244] sm:$0xf]  ;;  %v2421_v3 = vor.u32 %v2824_v58, %v2418_v61  ;;  %v2445_v58 = vor.u32 %v2830_v44, %v2442_v47  ;;  %v2658_v44 = vld [vmem:[%s3319_s8 + $0x2ac] sm:$0xf0]  ;;  %v2838_v47 = vld [vmem:[%s3319_s8 + $0x130] sm:$0xf0] }
  0x4f   : > { %v2613_v1 = vor.u32 %v2872_v59, %v2610_v60  ;;  %v2449_v59 = vor.u32 %v2832_v49, %v2448_v48 }
  0x51   : > { %3128 = vmatpush.bf16.msra.mxu3 %v3252_v5  ;;  %v2645_v5 = vor.u32 %v2882_v63, %v2644_v62  ;;  %v2424_v62 = vld [vmem:[%s3319_s8 + $0xc8] sm:$0xf]  ;;  %v2826_v63 = vld [vmem:[%s3319_s8 + $0xd0] sm:$0xf0] }
  0x55   : > { %3129 = vmatpush.bf16.msra.mxu3 %v3267_v8  ;;  %v2368_v8 = vld [vmem:[%s3319_s8 + $0x60] sm:$0xf] }
  0x56   : > { %v2369_v16 = vor.u32 %v2813_v9, %v2368_v8 }
  0x59   : > { %3130 = vmatpush.bf16.msra.mxu3 %v3283_v11  ;;  %v2885_v11 = vld [vmem:[%s3319_s8 + $0x2a8] sm:$0xf0] }
  0x5c   : > { %1254 = vmatmul.bf16.gmra.mxu0 %v2357_v4  ;;  %1374 = vmatmul.bf16.gmra.mxu3 %v2645_v5  ;;  %v2425_v4 = vor.u32 %v2826_v63, %v2424_v62 }
  0x5d   : > { %3131 = vmatpush.bf16.msra.mxu3 %v3298_v14  ;;  %1423 = vmatmul.bf16.gmra.mxu1 %v2361_v6  ;;  %v2376_v14 = vld [vmem:[%s3319_s8 + $0x68] sm:$0xf] }
  0x5e   : > { %1592 = vmatmul.bf16.gmra.mxu2 %v2365_v7  ;;  %v2377_v19 = vor.u32 %v2814_v15, %v2376_v14  ;;  %v2827_v15 = vld [vmem:[%s3319_s8 + $0xdc] sm:$0xf] }
  0x61   : > { %3132 = vmatpush.bf16.msra.mxu3 %v3311_v17  ;;  %v2657_v17 = vor.u32 %v2885_v11, %v2656_v10  ;;  %v3432_v11 = vld [vmem:[%s3766_s2] ss:$0 sm:$0xff] }
  0x65   : > { %3133 = vmatpush.bf16.msra.mxu3 %v3328_v20  ;;  %v2380_v20 = vld [vmem:[%s3319_s8 + $0x78] sm:$0xf] }
  0x66   : > { %v2381_v28 = vor.u32 %v2816_v21, %v2380_v20  ;;  %v2829_v20 = vld [vmem:[%s3319_s8 + $0xe8] sm:$0xf0] }
  0x69   : > { %3134 = vmatpush.bf16.msra.mxu3 %v3339_v23  ;;  %v2382_v23 = vld [vmem:[%s3319_s8 + $0x84] sm:$0xf0] }
  0x6a   : > { %v2385_v30 = vor.u32 %v2815_v25, %v2382_v23  ;;  %v2429_v25 = vor.u32 %v2828_v13, %v2428_v12  ;;  %v2881_v12 = vld [vmem:[%s3319_s8 + $0x28c] sm:$0xf]  ;;  %v2646_v13 = vld [vmem:[%s3319_s8 + $0x294] sm:$0xf0] }
  0x6c   : > { %1259 = vmatmul.bf16.gmra.mxu0 %v2369_v16  ;;  %1379 = vmatmul.bf16.gmra.mxu3 %v2657_v17  ;;  %v2875_v16 = vld [vmem:[%s3319_s8 + $0x25c] sm:$0xf]  ;;  %v2622_v17 = vld [vmem:[%s3319_s8 + $0x264] sm:$0xf0] }
  0x6d   : > { %1428 = vmatmul.bf16.gmra.mxu1 %v2373_v18  ;;  %v2430_v18 = vld [vmem:[%s3319_s8 + $0xe4] sm:$0xf0]  ;;  %v2625_v23 = vor.u32 %v2875_v16, %v2622_v17  ;;  %v2835_v16 = vld [vmem:[%s3319_s8 + $0x118] sm:$0xf0] }
  0x6e   : > { %1597 = vmatmul.bf16.gmra.mxu2 %v2377_v19  ;;  %v2436_v19 = vld [vmem:[%s3319_s8 + $0xe0] sm:$0xf] }
  0x7c   : > { %1264 = vmatmul.bf16.gmra.mxu0 %v2381_v28  ;;  %1384 = vmatmul.bf16.gmra.mxu3 %v2669_v29  ;;  %v2433_v29 = vor.u32 %v2827_v15, %v2430_v18  ;;  %v2460_v15 = vld [vmem:[%s3319_s8 + $0x110] sm:$0xf] }
  0x7d   : > { %1433 = vmatmul.bf16.gmra.mxu1 %v2385_v30  ;;  %v2437_v30 = vor.u32 %v2829_v20, %v2436_v19 }
  0x7e   : > { %1602 = vmatmul.bf16.gmra.mxu2 %v2389_v31 }
  0x8c   : > { %1269 = vmatmul.bf16.gmra.mxu0 %v2393_v40  ;;  %1389 = vmatmul.bf16.gmra.mxu3 %v2681_v41  ;;  %v2440_v41 = vld [vmem:[%s3319_s8 + $0xf0] sm:$0xf] }
  0x8d   : > { %1438 = vmatmul.bf16.gmra.mxu1 %v2397_v42  ;;  %v2831_v42 = vld [vmem:[%s3319_s8 + $0xf8] sm:$0xf0] }
  0x8e   : > { %1607 = vmatmul.bf16.gmra.mxu2 %v2401_v43 }
  0x9c   : > { %1274 = vmatmul.bf16.gmra.mxu0 %v2405_v52  ;;  %1394 = vmatmul.bf16.gmra.mxu3 %v2693_v53  ;;  %v2441_v53 = vor.u32 %v2831_v42, %v2440_v41  ;;  %v2836_v42 = vld [vmem:[%s3319_s8 + $0x124] sm:$0xf] }
  0x9d   : > { %1443 = vmatmul.bf16.gmra.mxu1 %v2409_v54  ;;  %v2637_v54 = vor.u32 %v2878_v45, %v2634_v46  ;;  %v2466_v45 = vld [vmem:[%s3319_s8 + $0x12c] sm:$0xf0]  ;;  %v2472_v46 = vld [vmem:[%s3319_s8 + $0x128] sm:$0xf] }
  0x9e   : > { %1612 = vmatmul.bf16.gmra.mxu2 %v2413_v55 }
  0xa9   : > { %v1240_v2 = vpop.f32.mrf.mxu0 }
  0xaa   : > { %v1409_v5 = vpop.f32.mrf.mxu1 }
  0xab   : > { %v1410_v8 = vadd.f32 %v1409_v5, %v1240_v2 }
  0xac   : > { %1279 = vmatmul.bf16.gmra.mxu0 %v2417_v0  ;;  %1528 = vmatmul.bf16.vlgmr.msrb.gmra.mxu3 %v2613_v1 }
  0xad   : > { %1448 = vmatmul.bf16.gmra.mxu1 %v2421_v3 }
  0xae   : > { %1617 = vmatmul.bf16.gmra.mxu2 %v2425_v4 }
  0xaf   : > { %v3427_v6 = vpop.f32.mrf.mxu3 }
  0xb1   : > { %v1578_v7 = vpop.f32.mrf.mxu2  ;;  %v1242_v9 = vpop.f32.mrf.mxu0 }
  0xb2   : > { %v1411_v10 = vpop.f32.mrf.mxu1  ;;  %v1579_v14 = vadd.f32 %v1578_v7, %v1410_v8  ;;  %v2452_v7 = vld [vmem:[%s3319_s8 + $0x108] sm:$0xf]  ;;  %v2834_v8 = vld [vmem:[%s3319_s8 + $0x110] sm:$0xf0] }
  0xb3   : > { %v1412_v21 = vadd.f32 %v1411_v10, %v1242_v9  ;;  %v2833_v10 = vld [vmem:[%s3319_s8 + $0x10c] sm:$0xf]  ;;  %v2453_v20 = vor.u32 %v2834_v8, %v2452_v7  ;;  %v2476_v7 = vld [vmem:[%s3319_s8 + $0x138] sm:$0xf]  ;;  %v2840_v8 = vld [vmem:[%s3319_s8 + $0x140] sm:$0xf0] }
  0xb4   : > { %v1937_v26 = vadd.f32 %v3432_v11, %v1579_v14  ;;  %v2454_v14 = vld [vmem:[%s3319_s8 + $0x114] sm:$0xf0] }
  0xb6   : > { %v2001_v33 = vmax.f32 %v1937_v26, 0.0  ;;  %v2457_v26 = vor.u32 %v2833_v10, %v2454_v14  ;;  %v2839_v10 = vld [vmem:[%s3319_s8 + $0x13c] sm:$0xf]  ;;  %v2478_v14 = vld [vmem:[%s3319_s8 + $0x144] sm:$0xf0] }
  0xb7   : > { %v3442_v22 = vpop.f32.mrf.mxu3 }
  0xb9   : > { %v1580_v24 = vpop.f32.mrf.mxu2  ;;  %v1245_v28 = vpop.f32.mrf.mxu0 }
  0xba   : > { %v1581_v27 = vadd.f32 %v1580_v24, %v1412_v21  ;;  %v1414_v31 = vpop.f32.mrf.mxu1  ;;  %v2649_v21 = vor.u32 %v2881_v12, %v2646_v13  ;;  %v2887_v12 = vld [vmem:[%s3319_s8 + $0x2bc] sm:$0xf]  ;;  %v2670_v13 = vld [vmem:[%s3319_s8 + $0x2c4] sm:$0xf0] }
  0xbb   : > { %v1415_v38 = vadd.f32 %v1414_v31, %v1245_v28 }
  0xbc   : > { %v1938_v32 = vadd.f32 %v3432_v11, %v1581_v27  ;;  %1284 = vmatmul.bf16.gmra.mxu0 %v2429_v25  ;;  %1533 = vmatmul.bf16.gmra.mxu3 %v2625_v23  ;;  %v2461_v27 = vor.u32 %v2835_v16, %v2460_v15  ;;  %v2484_v15 = vld [vmem:[%s3319_s8 + $0x140] sm:$0xf]  ;;  %v2841_v16 = vld [vmem:[%s3319_s8 + $0x148] sm:$0xf0] }
  0xbd   : > { %1453 = vmatmul.bf16.gmra.mxu1 %v2433_v29 }
  0xbe   : > { %v2002_v34 = vmax.f32 %v1938_v32, 0.0  ;;  %1622 = vmatmul.bf16.gmra.mxu2 %v2437_v30 }
  0xbf   : > { %v3452_v36 = vpop.f32.mrf.mxu3 }
  0xc0   : > { %v2923_v35 = vpack.c.bf16 %v2002_v34, %v2001_v33 }
  0xc1   : > { %v1583_v37 = vpop.f32.mrf.mxu2  ;;  %v1247_v39 = vpop.f32.mrf.mxu0 }
  0xc2   : > { %2924 = vst [vmem:[%s3450_s27] sm:$0xff] %v2923_v35   ;;  %v1416_v40 = vpop.f32.mrf.mxu1  ;;  %v1584_v43 = vadd.f32 %v1583_v37, %v1415_v38 }
  0xc3   : > { %v1417_v50 = vadd.f32 %v1416_v40, %v1247_v39  ;;  %v2464_v39 = vld [vmem:[%s3319_s8 + $0x120] sm:$0xf]  ;;  %v2837_v40 = vld [vmem:[%s3319_s8 + $0x128] sm:$0xf0] }
  0xc4   : > { %v1939_v55 = vadd.f32 %v3432_v11, %v1584_v43  ;;  %v2884_v43 = vld [vmem:[%s3319_s8 + $0x2a4] sm:$0xf] }
  0xc6   : > { %v2003_v62 = vmax.f32 %v1939_v55, 0.0 }
  0xc7   : > { %v3463_v51 = vpop.f32.mrf.mxu3 }
  0xc9   : > { %v1585_v52 = vpop.f32.mrf.mxu2  ;;  %v1250_v57 = vpop.f32.mrf.mxu0 }
  0xca   : > { %v1586_v56 = vadd.f32 %v1585_v52, %v1417_v50  ;;  %v1419_v60 = vpop.f32.mrf.mxu1  ;;  %v2465_v52 = vor.u32 %v2837_v40, %v2464_v39 }
  0xcb   : > { %v1420_v3 = vadd.f32 %v1419_v60, %v1250_v57  ;;  %v2469_v57 = vor.u32 %v2836_v42, %v2466_v45  ;;  %v2843_v42 = vld [vmem:[%s3319_s8 + $0x158] sm:$0xf0]  ;;  %v2890_v45 = vld [vmem:[%s3319_s8 + $0x2d4] sm:$0xf] }
  0xcc   : > { %v1940_v61 = vadd.f32 %v3432_v11, %v1586_v56  ;;  %1289 = vmatmul.bf16.gmra.mxu0 %v2441_v53  ;;  %1538 = vmatmul.bf16.gmra.mxu3 %v2637_v54  ;;  %v2661_v53 = vor.u32 %v2884_v43, %v2658_v44  ;;  %v2842_v44 = vld [vmem:[%s3319_s8 + $0x154] sm:$0xf] }
  0xcd   : > { %1458 = vmatmul.bf16.gmra.mxu1 %v2445_v58  ;;  %v2473_v58 = vor.u32 %v2838_v47, %v2472_v46  ;;  %v2682_v46 = vld [vmem:[%s3319_s8 + $0x2dc] sm:$0xf0] }
  0xce   : > { %v2004_v63 = vmax.f32 %v1940_v61, 0.0  ;;  %1627 = vmatmul.bf16.gmra.mxu2 %v2449_v59  ;;  %v2490_v47 = vld [vmem:[%s3319_s8 + $0x15c] sm:$0xf0] }
  0xcf   : > { %v3467_v1 = vpop.f32.mrf.mxu3 }
  0xd0   : > { %v2928_v0 = vpack.c.bf16 %v2004_v63, %v2003_v62 }
  0xd1   : > { %v1588_v2 = vpop.f32.mrf.mxu2  ;;  %v1252_v4 = vpop.f32.mrf.mxu0 }
  0xd2   : > { %3080 = vst [vmem:[%s3450_s27 + $0x8] sm:$0xff] %v2928_v0   ;;  %v1421_v5 = vpop.f32.mrf.mxu1  ;;  %v1589_v9 = vadd.f32 %v1588_v2, %v1420_v3 }
  0xd3   : > { %v1422_v17 = vadd.f32 %v1421_v5, %v1252_v4 }
  0xd4   : > { %v1941_v24 = vadd.f32 %v3432_v11, %v1589_v9 }
  0xd6   : > { %v2005_v30 = vmax.f32 %v1941_v24, 0.0  ;;  %v2673_v24 = vor.u32 %v2887_v12, %v2670_v13  ;;  %v2500_v12 = vld [vmem:[%s3319_s8 + $0x168] sm:$0xf]  ;;  %v2846_v13 = vld [vmem:[%s3319_s8 + $0x170] sm:$0xf0] }
  0xd7   : > { %v3478_v18 = vpop.f32.mrf.mxu3 }
  0xd9   : > { %v1590_v19 = vpop.f32.mrf.mxu2  ;;  %v1255_v23 = vpop.f32.mrf.mxu0 }
  0xda   : > { %v1591_v25 = vadd.f32 %v1590_v19, %v1422_v17  ;;  %v1424_v28 = vpop.f32.mrf.mxu1 }
  0xdb   : > { %v1425_v35 = vadd.f32 %v1424_v28, %v1255_v23  ;;  %v2485_v28 = vor.u32 %v2841_v16, %v2484_v15  ;;  %v2845_v15 = vld [vmem:[%s3319_s8 + $0x16c] sm:$0xf] }
  0xdc   : > { %v1942_v29 = vadd.f32 %v3432_v11, %v1591_v25  ;;  %1294 = vmatmul.bf16.gmra.mxu0 %v2453_v20  ;;  %1543 = vmatmul.bf16.gmra.mxu3 %v2649_v21  ;;  %v2477_v21 = vor.u32 %v2840_v8, %v2476_v7  ;;  %v2893_v16 = vld [vmem:[%s3319_s8 + $0x2ec] sm:$0xf] }
  0xdd   : > { %1463 = vmatmul.bf16.gmra.mxu1 %v2457_v26 }
  0xde   : > { %v2006_v31 = vmax.f32 %v1942_v29, 0.0  ;;  %1632 = vmatmul.bf16.gmra.mxu2 %v2461_v27  ;;  %v2481_v27 = vor.u32 %v2839_v10, %v2478_v14 }
  0xdf   : > { %v3482_v33 = vpop.f32.mrf.mxu3 }
  0xe0   : > { %v2933_v32 = vpack.c.bf16 %v2006_v31, %v2005_v30 }
  0xe1   : > { %v1593_v34 = vpop.f32.mrf.mxu2  ;;  %v1257_v37 = vpop.f32.mrf.mxu0 }
  0xe2   : > { %3081 = vst [vmem:[%s3450_s27 + $0x10] sm:$0xff] %v2933_v32   ;;  %v1426_v38 = vpop.f32.mrf.mxu1  ;;  %v1594_v41 = vadd.f32 %v1593_v34, %v1425_v35 }
  0xe3   : > { %v1427_v48 = vadd.f32 %v1426_v38, %v1257_v37 }
  0xe4   : > { %v1943_v54 = vadd.f32 %v3432_v11, %v1594_v41  ;;  %v2488_v41 = vld [vmem:[%s3319_s8 + $0x150] sm:$0xf] }
  0xe6   : > { %v2007_v61 = vmax.f32 %v1943_v54, 0.0 }
  0xe7   : > { %v3493_v49 = vpop.f32.mrf.mxu3 }
  0xe9   : > { %v1595_v50 = vpop.f32.mrf.mxu2  ;;  %v1260_v56 = vpop.f32.mrf.mxu0 }
  0xea   : > { %v1596_v55 = vadd.f32 %v1595_v50, %v1427_v48  ;;  %v1429_v59 = vpop.f32.mrf.mxu1  ;;  %v2496_v48 = vld [vmem:[%s3319_s8 + $0x158] sm:$0xf]  ;;  %v2844_v50 = vld [vmem:[%s3319_s8 + $0x160] sm:$0xf0] }
  0xeb   : > { %v1430_v3 = vadd.f32 %v1429_v59, %v1260_v56  ;;  %v2685_v56 = vor.u32 %v2890_v45, %v2682_v46 }
  0xec   : > { %v1944_v60 = vadd.f32 %v3432_v11, %v1596_v55  ;;  %1299 = vmatmul.bf16.gmra.mxu0 %v2465_v52  ;;  %1548 = vmatmul.bf16.gmra.mxu3 %v2661_v53  ;;  %v2489_v55 = vor.u32 %v2843_v42, %v2488_v41 }
  0xed   : > { %1468 = vmatmul.bf16.gmra.mxu1 %v2469_v57 }
  0xee   : > { %v2008_v62 = vmax.f32 %v1944_v60, 0.0  ;;  %1637 = vmatmul.bf16.gmra.mxu2 %v2473_v58  ;;  %v2493_v60 = vor.u32 %v2842_v44, %v2490_v47  ;;  %v2512_v47 = vld [vmem:[%s3319_s8 + $0x180] sm:$0xf] }
  0xef   : > { %v3497_v0 = vpop.f32.mrf.mxu3 }
  0xf0   : > { %v2938_v63 = vpack.c.bf16 %v2008_v62, %v2007_v61  ;;  %v2497_v61 = vor.u32 %v2844_v50, %v2496_v48  ;;  %v2849_v48 = vld [vmem:[%s3319_s8 + $0x188] sm:$0xf0] }
  0xf1   : > { %v1598_v2 = vpop.f32.mrf.mxu2  ;;  %v1262_v4 = vpop.f32.mrf.mxu0 }
  0xf2   : > { %3082 = vst [vmem:[%s3450_s27 + $0x18] sm:$0xff] %v2938_v63   ;;  %v1431_v5 = vpop.f32.mrf.mxu1  ;;  %v1599_v9 = vadd.f32 %v1598_v2, %v1430_v3 }
  0xf3   : > { %v1432_v17 = vadd.f32 %v1431_v5, %v1262_v4 }
  0xf4   : > { %v1945_v25 = vadd.f32 %v3432_v11, %v1599_v9 }
  0xf6   : > { %v2009_v31 = vmax.f32 %v1945_v25, 0.0 }
  0xf7   : > { %v3508_v19 = vpop.f32.mrf.mxu3 }
  0xf9   : > { %v1600_v20 = vpop.f32.mrf.mxu2  ;;  %v1265_v26 = vpop.f32.mrf.mxu0 }
  0xfa   : > { %v1601_v23 = vadd.f32 %v1600_v20, %v1432_v17  ;;  %v1434_v29 = vpop.f32.mrf.mxu1  ;;  %v2694_v17 = vld [vmem:[%s3319_s8 + $0x2f4] sm:$0xf0] }
  0xfb   : > { %v1435_v38 = vadd.f32 %v1434_v29, %v1265_v26  ;;  %v2502_v20 = vld [vmem:[%s3319_s8 + $0x174] sm:$0xf0] }
  0xfc   : > { %v1946_v30 = vadd.f32 %v3432_v11, %v1601_v23  ;;  %1304 = vmatmul.bf16.gmra.mxu0 %v2477_v21  ;;  %1553 = vmatmul.bf16.gmra.mxu3 %v2673_v24  ;;  %v2508_v21 = vld [vmem:[%s3319_s8 + $0x170] sm:$0xf]  ;;  %v2847_v24 = vld [vmem:[%s3319_s8 + $0x178] sm:$0xf0] }
  0xfd   : > { %1473 = vmatmul.bf16.gmra.mxu1 %v2481_v27  ;;  %v2501_v27 = vor.u32 %v2846_v13, %v2500_v12 }
  0xfe   : > { %v2010_v32 = vmax.f32 %v1946_v30, 0.0  ;;  %1642 = vmatmul.bf16.gmra.mxu2 %v2485_v28  ;;  %v2697_v28 = vor.u32 %v2893_v16, %v2694_v17 }
  0xff   : > { %v3512_v35 = vpop.f32.mrf.mxu3 }
 0x100   : > { %v2943_v34 = vpack.c.bf16 %v2010_v32, %v2009_v31  ;;  %v2505_v32 = vor.u32 %v2845_v15, %v2502_v20 }
 0x101   : > { %v1603_v37 = vpop.f32.mrf.mxu2  ;;  %v1267_v39 = vpop.f32.mrf.mxu0 }
 0x102   : > { %3083 = vst [vmem:[%s3450_s27 + $0x20] sm:$0xff] %v2943_v34   ;;  %v1436_v40 = vpop.f32.mrf.mxu1  ;;  %v1604_v43 = vadd.f32 %v1603_v37, %v1435_v38  ;;  %v2509_v34 = vor.u32 %v2847_v24, %v2508_v21  ;;  %v2524_v24 = vld [vmem:[%s3319_s8 + $0x198] sm:$0xf] }
 0x103   : > { %v1437_v52 = vadd.f32 %v1436_v40, %v1267_v39 }
 0x104   : > { %v1947_v57 = vadd.f32 %v3432_v11, %v1604_v43 }
 0x106   : > { %v2011_v2 = vmax.f32 %v1947_v57, 0.0  ;;  %v2520_v57 = vld [vmem:[%s3319_s8 + $0x188] sm:$0xf] }
 0x107   : > { %v3523_v53 = vpop.f32.mrf.mxu3 }
 0x109   : > { %v1605_v54 = vpop.f32.mrf.mxu2  ;;  %v1270_v59 = vpop.f32.mrf.mxu0 }
 0x10a   : > { %v1606_v58 = vadd.f32 %v1605_v54, %v1437_v52  ;;  %v1439_v62 = vpop.f32.mrf.mxu1  ;;  %v2848_v52 = vld [vmem:[%s3319_s8 + $0x184] sm:$0xf]  ;;  %v2616_v54 = vld [vmem:[%s3319_s8 + $0x248] sm:$0xf] }
 0x10b   : > { %v1440_v8 = vadd.f32 %v1439_v62, %v1270_v59  ;;  %v2513_v62 = vor.u32 %v2849_v48, %v2512_v47 }
 0x10c   : > { %v1948_v63 = vadd.f32 %v3432_v11, %v1606_v58  ;;  %1309 = vmatmul.bf16.gmra.mxu0 %v2489_v55  ;;  %1558 = vmatmul.bf16.gmra.mxu3 %v2685_v56  ;;  %v2874_v55 = vld [vmem:[%s3319_s8 + $0x250] sm:$0xf0]  ;;  %v2514_v56 = vld [vmem:[%s3319_s8 + $0x18c] sm:$0xf0] }
 0x10d   : > { %1478 = vmatmul.bf16.gmra.mxu1 %v2493_v60  ;;  %v2850_v58 = vld [vmem:[%s3319_s8 + $0x190] sm:$0xf0] }
 0x10e   : > { %v2012_v3 = vmax.f32 %v1948_v63, 0.0  ;;  %1647 = vmatmul.bf16.gmra.mxu2 %v2497_v61  ;;  %v2617_v63 = vor.u32 %v2874_v55, %v2616_v54 }
 0x10f   : > { %v3527_v5 = vpop.f32.mrf.mxu3 }
 0x110   : > { %v2948_v4 = vpack.c.bf16 %v2012_v3, %v2011_v2 }
 0x111   : > { %v1608_v7 = vpop.f32.mrf.mxu2  ;;  %v1272_v9 = vpop.f32.mrf.mxu0 }
 0x112   : > { %3084 = vst [vmem:[%s3450_s27 + $0x28] sm:$0xff] %v2948_v4   ;;  %v1441_v10 = vpop.f32.mrf.mxu1  ;;  %v1609_v14 = vadd.f32 %v1608_v7, %v1440_v8  ;;  %v2517_v7 = vor.u32 %v2848_v52, %v2514_v56  ;;  %v2521_v8 = vor.u32 %v2850_v58, %v2520_v57 }
 0x113   : > { %v1442_v25 = vadd.f32 %v1441_v10, %v1272_v9 }
 0x114   : > { %v1949_v29 = vadd.f32 %v3432_v11, %v1609_v14 }
 0x116   : > { %v2013_v39 = vmax.f32 %v1949_v29, 0.0  ;;  %v2877_v29 = vld [vmem:[%s3319_s8 + $0x268] sm:$0xf0] }
 0x117   : > { %v3538_v23 = vpop.f32.mrf.mxu3 }
 0x119   : > { %v1610_v26 = vpop.f32.mrf.mxu2  ;;  %v1275_v31 = vpop.f32.mrf.mxu0 }
 0x11a   : > { %v1611_v30 = vadd.f32 %v1610_v26, %v1442_v25  ;;  %v1444_v37 = vpop.f32.mrf.mxu1  ;;  %v2852_v25 = vld [vmem:[%s3319_s8 + $0x1a0] sm:$0xf0] }
 0x11b   : > { %v1445_v44 = vadd.f32 %v1444_v37, %v1275_v31  ;;  %v2532_v31 = vld [vmem:[%s3319_s8 + $0x1a0] sm:$0xf] }
 0x11c   : > { %v1950_v38 = vadd.f32 %v3432_v11, %v1611_v30  ;;  %1314 = vmatmul.bf16.gmra.mxu0 %v2501_v27  ;;  %1563 = vmatmul.bf16.gmra.mxu3 %v2697_v28  ;;  %v2851_v27 = vld [vmem:[%s3319_s8 + $0x19c] sm:$0xf]  ;;  %v2628_v28 = vld [vmem:[%s3319_s8 + $0x260] sm:$0xf]  ;;  %v2526_v30 = vld [vmem:[%s3319_s8 + $0x1a4] sm:$0xf0] }
 0x11d   : > { %1483 = vmatmul.bf16.gmra.mxu1 %v2505_v32  ;;  %v2853_v32 = vld [vmem:[%s3319_s8 + $0x1a8] sm:$0xf0] }
 0x11e   : > { %v2014_v40 = vmax.f32 %v1950_v38, 0.0  ;;  %1652 = vmatmul.bf16.gmra.mxu2 %v2509_v34 }
 0x11f   : > { %v3542_v42 = vpop.f32.mrf.mxu3 }
 0x120   : > { %v2953_v41 = vpack.c.bf16 %v2014_v40, %v2013_v39  ;;  %v2525_v39 = vor.u32 %v2852_v25, %v2524_v24  ;;  %v2629_v40 = vor.u32 %v2877_v29, %v2628_v28 }
 0x121   : > { %v1613_v43 = vpop.f32.mrf.mxu2  ;;  %v1277_v45 = vpop.f32.mrf.mxu0 }
 0x122   : > { %3085 = vst [vmem:[%s3450_s27 + $0x30] sm:$0xff] %v2953_v41   ;;  %v1446_v46 = vpop.f32.mrf.mxu1  ;;  %v1614_v50 = vadd.f32 %v1613_v43, %v1445_v44 }
 0x123   : > { %v1447_v59 = vadd.f32 %v1446_v46, %v1277_v45  ;;  %v2529_v45 = vor.u32 %v2851_v27, %v2526_v30  ;;  %v2533_v46 = vor.u32 %v2853_v32, %v2532_v31 }
 0x124   : > { %v1951_v2 = vadd.f32 %v3432_v11, %v1614_v50 }
 0x126   : > { %v2015_v12 = vmax.f32 %v1951_v2, 0.0  ;;  %v2854_v2 = vld [vmem:[%s3319_s8 + $0x1b4] sm:$0xf] }
 0x127   : > { %v3553_v60 = vpop.f32.mrf.mxu3 }
 0x129   : > { %v1615_v61 = vpop.f32.mrf.mxu2  ;;  %v1280_v4 = vpop.f32.mrf.mxu0 }
 0x12a   : > { %v1616_v3 = vadd.f32 %v1615_v61, %v1447_v59  ;;  %v1449_v9 = vpop.f32.mrf.mxu1  ;;  %v2536_v61 = vld [vmem:[%s3319_s8 + $0x1b0] sm:$0xf] }
 0x12b   : > { %v1450_v17 = vadd.f32 %v1449_v9, %v1280_v4  ;;  %v2880_v4 = vld [vmem:[%s3319_s8 + $0x280] sm:$0xf0] }
 0x12c   : > { %v1952_v10 = vadd.f32 %v3432_v11, %v1616_v3  ;;  %1319 = vmatmul.bf16.gmra.mxu0 %v2513_v62  ;;  %1697 = vmatmul.bf16.vlgmr.msra.gmra.mxu3 %v2617_v63  ;;  %v2855_v62 = vld [vmem:[%s3319_s8 + $0x1b8] sm:$0xf0]  ;;  %v2640_v3 = vld [vmem:[%s3319_s8 + $0x278] sm:$0xf]  ;;  %v2856_v9 = vld [vmem:[%s3319_s8 + $0x1c0] sm:$0xf0] }
 0x12d   : > { %1488 = vmatmul.bf16.gmra.mxu1 %v2517_v7  ;;  %v2538_v7 = vld [vmem:[%s3319_s8 + $0x1bc] sm:$0xf0] }
 0x12e   : > { %v2016_v13 = vmax.f32 %v1952_v10, 0.0  ;;  %1657 = vmatmul.bf16.gmra.mxu2 %v2521_v8  ;;  %v2544_v8 = vld [vmem:[%s3319_s8 + $0x1b8] sm:$0xf]  ;;  %v2541_v24 = vor.u32 %v2854_v2, %v2538_v7 }
 0x12f   : > { %v3557_v15 = vpop.f32.mrf.mxu3  ;;  %v2545_v25 = vor.u32 %v2856_v9, %v2544_v8 }
 0x130   : > { %v2958_v14 = vpack.c.bf16 %v2016_v13, %v2015_v12 }
 0x131   : > { %v1618_v16 = vpop.f32.mrf.mxu2  ;;  %v1282_v20 = vpop.f32.mrf.mxu0 }
 0x132   : > { %3086 = vst [vmem:[%s3450_s27 + $0x38] sm:$0xff] %v2958_v14   ;;  %v1451_v21 = vpop.f32.mrf.mxu1  ;;  %v1619_v26 = vadd.f32 %v1618_v16, %v1450_v17  ;;  %v2537_v14 = vor.u32 %v2855_v62, %v2536_v61  ;;  %v2641_v16 = vor.u32 %v2880_v4, %v2640_v3 }
 0x133   : > { %v1452_v34 = vadd.f32 %v1451_v21, %v1282_v20 }
 0x134   : > { %v1953_v41 = vadd.f32 %v3432_v11, %v1619_v26 }
 0x136   : > { %v2017_v50 = vmax.f32 %v1953_v41, 0.0  ;;  %v2858_v41 = vld [vmem:[%s3319_s8 + $0x1d0] sm:$0xf0] }
 0x137   : > { %v3568_v37 = vpop.f32.mrf.mxu3 }
 0x139   : > { %v1620_v38 = vpop.f32.mrf.mxu2  ;;  %v1285_v44 = vpop.f32.mrf.mxu0 }
 0x13a   : > { %v1621_v43 = vadd.f32 %v1620_v38, %v1452_v34  ;;  %v1454_v47 = vpop.f32.mrf.mxu1 }
 0x13b   : > { %v1455_v57 = vadd.f32 %v1454_v47, %v1285_v44  ;;  %v2857_v44 = vld [vmem:[%s3319_s8 + $0x1cc] sm:$0xf]  ;;  %v2550_v47 = vld [vmem:[%s3319_s8 + $0x1d4] sm:$0xf0] }
 0x13c   : > { %v1954_v48 = vadd.f32 %v3432_v11, %v1621_v43  ;;  %1324 = vmatmul.bf16.gmra.mxu0 %v2525_v39  ;;  %1702 = vmatmul.bf16.gmra.mxu3 %v2629_v40  ;;  %v2548_v40 = vld [vmem:[%s3319_s8 + $0x1c8] sm:$0xf] }
 0x13d   : > { %1493 = vmatmul.bf16.gmra.mxu1 %v2529_v45  ;;  %v2652_v45 = vld [vmem:[%s3319_s8 + $0x290] sm:$0xf] }
 0x13e   : > { %v2018_v52 = vmax.f32 %v1954_v48, 0.0  ;;  %1662 = vmatmul.bf16.gmra.mxu2 %v2533_v46  ;;  %v2883_v46 = vld [vmem:[%s3319_s8 + $0x298] sm:$0xf0]  ;;  %v2556_v48 = vld [vmem:[%s3319_s8 + $0x1d0] sm:$0xf] }
 0x13f   : > { %v3572_v55 = vpop.f32.mrf.mxu3 }
 0x140   : > { %v2963_v54 = vpack.c.bf16 %v2018_v52, %v2017_v50  ;;  %v2859_v50 = vld [vmem:[%s3319_s8 + $0x1d8] sm:$0xf0] }
 0x141   : > { %v1623_v56 = vpop.f32.mrf.mxu2  ;;  %v1287_v58 = vpop.f32.mrf.mxu0  ;;  %v2557_v2 = vor.u32 %v2859_v50, %v2556_v48 }
 0x142   : > { %3087 = vst [vmem:[%s3450_s27 + $0x40] sm:$0xff] %v2963_v54   ;;  %v1456_v59 = vpop.f32.mrf.mxu1  ;;  %v1624_v63 = vadd.f32 %v1623_v56, %v1455_v57  ;;  %v2549_v57 = vor.u32 %v2858_v41, %v2548_v40 }
 0x143   : > { %v1457_v10 = vadd.f32 %v1456_v59, %v1287_v58  ;;  %v2653_v58 = vor.u32 %v2883_v46, %v2652_v45 }
 0x144   : > { %v1955_v17 = vadd.f32 %v3432_v11, %v1624_v63  ;;  %v2553_v63 = vor.u32 %v2857_v44, %v2550_v47 }
 0x146   : > { %v2019_v28 = vmax.f32 %v1955_v17, 0.0 }
 0x147   : > { %v3583_v12 = vpop.f32.mrf.mxu3 }
 0x149   : > { %v1625_v13 = vpop.f32.mrf.mxu2  ;;  %v1290_v21 = vpop.f32.mrf.mxu0 }
 0x14a   : > { %v1626_v20 = vadd.f32 %v1625_v13, %v1457_v10  ;;  %v1459_v26 = vpop.f32.mrf.mxu1 }
 0x14b   : > { %v1460_v34 = vadd.f32 %v1459_v26, %v1290_v21  ;;  %v2861_v21 = vld [vmem:[%s3319_s8 + $0x1e8] sm:$0xf0]  ;;  %v2664_v26 = vld [vmem:[%s3319_s8 + $0x2a8] sm:$0xf] }
 0x14c   : > { %v1956_v27 = vadd.f32 %v3432_v11, %v1626_v20  ;;  %1329 = vmatmul.bf16.gmra.mxu0 %v2537_v14  ;;  %1707 = vmatmul.bf16.gmra.mxu3 %v2641_v16  ;;  %v2560_v20 = vld [vmem:[%s3319_s8 + $0x1e0] sm:$0xf] }
 0x14d   : > { %1498 = vmatmul.bf16.gmra.mxu1 %v2541_v24 }
 0x14e   : > { %v2020_v29 = vmax.f32 %v1956_v27, 0.0  ;;  %1667 = vmatmul.bf16.gmra.mxu2 %v2545_v25  ;;  %v2860_v25 = vld [vmem:[%s3319_s8 + $0x1e4] sm:$0xf]  ;;  %v2886_v27 = vld [vmem:[%s3319_s8 + $0x2b0] sm:$0xf0] }
 0x14f   : > { %v3587_v31 = vpop.f32.mrf.mxu3  ;;  %v2665_v40 = vor.u32 %v2886_v27, %v2664_v26 }
 0x150   : > { %v2968_v30 = vpack.c.bf16 %v2020_v29, %v2019_v28  ;;  %v2562_v28 = vld [vmem:[%s3319_s8 + $0x1ec] sm:$0xf0]  ;;  %v2568_v29 = vld [vmem:[%s3319_s8 + $0x1e8] sm:$0xf] }
 0x151   : > { %v1628_v32 = vpop.f32.mrf.mxu2  ;;  %v1292_v38 = vpop.f32.mrf.mxu0  ;;  %v2565_v45 = vor.u32 %v2860_v25, %v2562_v28 }
 0x152   : > { %3088 = vst [vmem:[%s3450_s27 + $0x48] sm:$0xff] %v2968_v30   ;;  %v1461_v39 = vpop.f32.mrf.mxu1  ;;  %v1629_v43 = vadd.f32 %v1628_v32, %v1460_v34  ;;  %v2862_v30 = vld [vmem:[%s3319_s8 + $0x1f0] sm:$0xf0] }
 0x153   : > { %v1462_v52 = vadd.f32 %v1461_v39, %v1292_v38  ;;  %v2561_v39 = vor.u32 %v2861_v21, %v2560_v20  ;;  %v2569_v46 = vor.u32 %v2862_v30, %v2568_v29 }
 0x154   : > { %v1957_v59 = vadd.f32 %v3432_v11, %v1629_v43 }
 0x156   : > { %v2021_v7 = vmax.f32 %v1957_v59, 0.0 }
 0x157   : > { %v3598_v54 = vpop.f32.mrf.mxu3 }
 0x159   : > { %v1630_v56 = vpop.f32.mrf.mxu2  ;;  %v1295_v62 = vpop.f32.mrf.mxu0 }
 0x15a   : > { %v1631_v61 = vadd.f32 %v1630_v56, %v1462_v52  ;;  %v1464_v3 = vpop.f32.mrf.mxu1 }
 0x15b   : > { %v1465_v14 = vadd.f32 %v1464_v3, %v1295_v62 }
 0x15c   : > { %v1958_v4 = vadd.f32 %v3432_v11, %v1631_v61  ;;  %1334 = vmatmul.bf16.gmra.mxu0 %v2549_v57  ;;  %1712 = vmatmul.bf16.gmra.mxu3 %v2653_v58 }
 0x15d   : > { %1503 = vmatmul.bf16.gmra.mxu1 %v2553_v63  ;;  %v2572_v63 = vld [vmem:[%s3319_s8 + $0x1f8] sm:$0xf] }
 0x15e   : > { %v2022_v8 = vmax.f32 %v1958_v4, 0.0  ;;  %1672 = vmatmul.bf16.gmra.mxu2 %v2557_v2  ;;  %v2864_v2 = vld [vmem:[%s3319_s8 + $0x200] sm:$0xf0]  ;;  %v2863_v4 = vld [vmem:[%s3319_s8 + $0x1fc] sm:$0xf] }
 0x15f   : > { %v3602_v10 = vpop.f32.mrf.mxu3  ;;  %v2573_v21 = vor.u32 %v2864_v2, %v2572_v63 }
 0x160   : > { %v2973_v9 = vpack.c.bf16 %v2022_v8, %v2021_v7  ;;  %v2676_v7 = vld [vmem:[%s3319_s8 + $0x2c0] sm:$0xf]  ;;  %v2889_v8 = vld [vmem:[%s3319_s8 + $0x2c8] sm:$0xf0] }
 0x161   : > { %v1633_v13 = vpop.f32.mrf.mxu2  ;;  %v1297_v16 = vpop.f32.mrf.mxu0 }
 0x162   : > { %3089 = vst [vmem:[%s3450_s27 + $0x50] sm:$0xff] %v2973_v9   ;;  %v1466_v17 = vpop.f32.mrf.mxu1  ;;  %v1634_v24 = vadd.f32 %v1633_v13, %v1465_v14  ;;  %v2574_v9 = vld [vmem:[%s3319_s8 + $0x204] sm:$0xf0]  ;;  %v2580_v13 = vld [vmem:[%s3319_s8 + $0x200] sm:$0xf] }
 0x163   : > { %v1467_v32 = vadd.f32 %v1466_v17, %v1297_v16  ;;  %v2865_v14 = vld [vmem:[%s3319_s8 + $0x208] sm:$0xf0]  ;;  %v2577_v28 = vor.u32 %v2863_v4, %v2574_v9 }
 0x164   : > { %v1959_v41 = vadd.f32 %v3432_v11, %v1634_v24  ;;  %v2677_v24 = vor.u32 %v2889_v8, %v2676_v7  ;;  %v2581_v29 = vor.u32 %v2865_v14, %v2580_v13 }
 0x166   : > { %v2023_v50 = vmax.f32 %v1959_v41, 0.0 }
 0x167   : > { %v3613_v34 = vpop.f32.mrf.mxu3 }
 0x169   : > { %v1635_v38 = vpop.f32.mrf.mxu2  ;;  %v1300_v44 = vpop.f32.mrf.mxu0 }
 0x16a   : > { %v1636_v43 = vadd.f32 %v1635_v38, %v1467_v32  ;;  %v1469_v47 = vpop.f32.mrf.mxu1 }
 0x16b   : > { %v1470_v59 = vadd.f32 %v1469_v47, %v1300_v44  ;;  %v2584_v47 = vld [vmem:[%s3319_s8 + $0x210] sm:$0xf] }
 0x16c   : > { %v1960_v48 = vadd.f32 %v3432_v11, %v1636_v43  ;;  %1339 = vmatmul.bf16.gmra.mxu0 %v2561_v39  ;;  %1717 = vmatmul.bf16.gmra.mxu3 %v2665_v40 }
 0x16d   : > { %1508 = vmatmul.bf16.gmra.mxu1 %v2565_v45 }
 0x16e   : > { %v2024_v52 = vmax.f32 %v1960_v48, 0.0  ;;  %1677 = vmatmul.bf16.gmra.mxu2 %v2569_v46  ;;  %v2867_v48 = vld [vmem:[%s3319_s8 + $0x218] sm:$0xf0] }
 0x16f   : > { %v3617_v57 = vpop.f32.mrf.mxu3  ;;  %v2585_v4 = vor.u32 %v2867_v48, %v2584_v47  ;;  %v2604_v47 = vld [vmem:[%s3319_s8 + $0x230] sm:$0xf]  ;;  %v2871_v48 = vld [vmem:[%s3319_s8 + $0x238] sm:$0xf0] }
 0x170   : > { %v2978_v56 = vpack.c.bf16 %v2024_v52, %v2023_v50  ;;  %v2866_v52 = vld [vmem:[%s3319_s8 + $0x214] sm:$0xf] }
 0x171   : > { %v1638_v58 = vpop.f32.mrf.mxu2  ;;  %v1302_v61 = vpop.f32.mrf.mxu0 }
 0x172   : > { %3090 = vst [vmem:[%s3450_s27 + $0x58] sm:$0xff] %v2978_v56   ;;  %v1471_v62 = vpop.f32.mrf.mxu1  ;;  %v1639_v3 = vadd.f32 %v1638_v58, %v1470_v59  ;;  %v2688_v56 = vld [vmem:[%s3319_s8 + $0x2d8] sm:$0xf]  ;;  %v2892_v58 = vld [vmem:[%s3319_s8 + $0x2e0] sm:$0xf0] }
 0x173   : > { %v1472_v16 = vadd.f32 %v1471_v62, %v1302_v61  ;;  %v2586_v59 = vld [vmem:[%s3319_s8 + $0x21c] sm:$0xf0]  ;;  %v2592_v61 = vld [vmem:[%s3319_s8 + $0x218] sm:$0xf]  ;;  %v2868_v62 = vld [vmem:[%s3319_s8 + $0x220] sm:$0xf0]  ;;  %v2689_v7 = vor.u32 %v2892_v58, %v2688_v56 }
 0x174   : > { %v1961_v25 = vadd.f32 %v3432_v11, %v1639_v3  ;;  %v2589_v14 = vor.u32 %v2866_v52, %v2586_v59 }
 0x176   : > { %v2025_v38 = vmax.f32 %v1961_v25, 0.0 }
 0x177   : > { %v3628_v17 = vpop.f32.mrf.mxu3 }
 0x179   : > { %v1640_v20 = vpop.f32.mrf.mxu2  ;;  %v1305_v27 = vpop.f32.mrf.mxu0 }
 0x17a   : > { %v1641_v26 = vadd.f32 %v1640_v20, %v1472_v16  ;;  %v1474_v30 = vpop.f32.mrf.mxu1  ;;  %v2593_v16 = vor.u32 %v2868_v62, %v2592_v61 }
 0x17b   : > { %v1475_v44 = vadd.f32 %v1474_v30, %v1305_v27 }
 0x17c   : > { %v1962_v32 = vadd.f32 %v3432_v11, %v1641_v26  ;;  %1344 = vmatmul.bf16.gmra.mxu0 %v2573_v21  ;;  %1722 = vmatmul.bf16.gmra.mxu3 %v2677_v24 }
 0x17d   : > { %1513 = vmatmul.bf16.gmra.mxu1 %v2577_v28 }
 0x17e   : > { %v2026_v39 = vmax.f32 %v1962_v32, 0.0  ;;  %1682 = vmatmul.bf16.gmra.mxu2 %v2581_v29 }
 0x17f   : > { %v3632_v41 = vpop.f32.mrf.mxu3 }
 0x180   : > { %v2983_v40 = vpack.c.bf16 %v2026_v39, %v2025_v38  ;;  %v2596_v38 = vld [vmem:[%s3319_s8 + $0x228] sm:$0xf]  ;;  %v2870_v39 = vld [vmem:[%s3319_s8 + $0x230] sm:$0xf0] }
 0x181   : > { %v1643_v43 = vpop.f32.mrf.mxu2  ;;  %v1307_v45 = vpop.f32.mrf.mxu0  ;;  %v2597_v58 = vor.u32 %v2870_v39, %v2596_v38 }
 0x182   : > { %3091 = vst [vmem:[%s3450_s27 + $0x60] sm:$0xff] %v2983_v40   ;;  %v1476_v46 = vpop.f32.mrf.mxu1  ;;  %v1644_v50 = vadd.f32 %v1643_v43, %v1475_v44  ;;  %v2869_v43 = vld [vmem:[%s3319_s8 + $0x22c] sm:$0xf]  ;;  %v2700_v44 = vld [vmem:[%s3319_s8 + $0x2f0] sm:$0xf] }
 0x183   : > { %v1477_v63 = vadd.f32 %v1476_v46, %v1307_v45  ;;  %v2895_v45 = vld [vmem:[%s3319_s8 + $0x2f8] sm:$0xf0]  ;;  %v2598_v46 = vld [vmem:[%s3319_s8 + $0x234] sm:$0xf0] }
 0x184   : > { %v1963_v8 = vadd.f32 %v3432_v11, %v1644_v50  ;;  %v2701_v59 = vor.u32 %v2895_v45, %v2700_v44 }
 0x186   : > { %v2027_v24 = vmax.f32 %v1963_v8, 0.0 }
 0x187   : > { %v3643_v2 = vpop.f32.mrf.mxu3 }
 0x189   : > { %v1645_v3 = vpop.f32.mrf.mxu2  ;;  %v1310_v13 = vpop.f32.mrf.mxu0 }
 0x18a   : > { %v1646_v9 = vadd.f32 %v1645_v3, %v1477_v63  ;;  %v1479_v20 = vpop.f32.mrf.mxu1  ;;  %v2601_v3 = vor.u32 %v2869_v43, %v2598_v46 }
 0x18b   : > { %v1480_v29 = vadd.f32 %v1479_v20, %v1310_v13 }
 0x18c   : > { %v1964_v21 = vadd.f32 %v3432_v11, %v1646_v9  ;;  %1349 = vmatmul.bf16.gmra.mxu0 %v2585_v4  ;;  %1727 = vmatmul.bf16.gmra.mxu3 %v2689_v7  ;;  %v2605_v4 = vor.u32 %v2871_v48, %v2604_v47 }
 0x18d   : > { %1518 = vmatmul.bf16.gmra.mxu1 %v2589_v14 }
 0x18e   : > { %v2028_v25 = vmax.f32 %v1964_v21, 0.0  ;;  %1687 = vmatmul.bf16.gmra.mxu2 %v2593_v16 }
 0x18f   : > { %v3647_v27 = vpop.f32.mrf.mxu3 }
 0x190   : > { %v2988_v26 = vpack.c.bf16 %v2028_v25, %v2027_v24 }
 0x191   : > { %v1648_v28 = vpop.f32.mrf.mxu2  ;;  %v1312_v30 = vpop.f32.mrf.mxu0 }
 0x192   : > { %3092 = vst [vmem:[%s3450_s27 + $0x68] sm:$0xff] %v2988_v26   ;;  %v1481_v32 = vpop.f32.mrf.mxu1  ;;  %v1649_v40 = vadd.f32 %v1648_v28, %v1480_v29 }
 0x193   : > { %v1482_v50 = vadd.f32 %v1481_v32, %v1312_v30  ;;  %v3670_v30 = vld [vmem:[%s3766_s2] ss:$0 sm:$0xff] }
 0x194   : > { %v1965_v61 = vadd.f32 %v3432_v11, %v1649_v40 }
 0x196   : > { %v2029_v9 = vmax.f32 %v1965_v61, 0.0 }
 0x197   : > { %v3658_v52 = vpop.f32.mrf.mxu3 }
 0x199   : > { %v1650_v56 = vpop.f32.mrf.mxu2  ;;  %v1315_v63 = vpop.f32.mrf.mxu0 }
 0x19a   : > { %v1651_v62 = vadd.f32 %v1650_v56, %v1482_v50  ;;  %v1484_v7 = vpop.f32.mrf.mxu1 }
 0x19b   : > { %v1485_v21 = vadd.f32 %v1484_v7, %v1315_v63  ;;  %v1532_v63 = vadd.f32 %v3568_v37, %v3442_v22 }
 0x19c   : > { %v1966_v8 = vadd.f32 %v3432_v11, %v1651_v62  ;;  %1354 = vmatmul.bf16.gmra.mxu0 %v2597_v58  ;;  %1732 = vmatmul.bf16.gmra.mxu3 %v2701_v59  ;;  %v1530_v58 = vadd.f32 %v3557_v15, %v3427_v6 }
 0x19d   : > { %1523 = vmatmul.bf16.gmra.mxu1 %v2601_v3 }
 0x19e   : > { %v2030_v13 = vmax.f32 %v1966_v8, 0.0  ;;  %1692 = vmatmul.bf16.gmra.mxu2 %v2605_v4 }
 0x19f   : > { %v3662_v16 = vpop.f32.mrf.mxu3 }
 0x1a0   : > { %v2993_v14 = vpack.c.bf16 %v2030_v13, %v2029_v9 }
 0x1a1   : > { %v1653_v20 = vpop.f32.mrf.mxu2  ;;  %v1317_v24 = vpop.f32.mrf.mxu0 }
 0x1a2   : > { %3093 = vst [vmem:[%s3450_s27 + $0x70] sm:$0xff] %v2993_v14   ;;  %v1486_v25 = vpop.f32.mrf.mxu1  ;;  %v1654_v26 = vadd.f32 %v1653_v20, %v1485_v21 }
 0x1a3   : > { %v1487_v28 = vadd.f32 %v1486_v25, %v1317_v24 }
 0x1a4   : > { %v1967_v32 = vadd.f32 %v3670_v30, %v1654_v26 }
 0x1a6   : > { %v2031_v44 = vmax.f32 %v1967_v32, 0.0 }
 0x1a7   : > { %v3665_v29 = vpop.f32.mrf.mxu3 }
 0x1a9   : > { %v1655_v11 = vpop.f32.mrf.mxu2  ;;  %v1320_v39 = vpop.f32.mrf.mxu0 }
 0x1aa   : > { %v1656_v38 = vadd.f32 %v1655_v11, %v1487_v28  ;;  %v1489_v40 = vpop.f32.mrf.mxu1 }
 0x1ab   : > { %v1490_v50 = vadd.f32 %v1489_v40, %v1320_v39  ;;  %v1535_v40 = vadd.f32 %v3572_v55, %v3452_v36 }
 0x1ac   : > { %v1968_v43 = vadd.f32 %v3670_v30, %v1656_v38 }
 0x1ae   : > { %v2032_v45 = vmax.f32 %v1968_v43, 0.0 }
 0x1af   : > { %v1698_v47 = vpop.f32.mrf.mxu3 }
 0x1b0   : > { %v2998_v46 = vpack.c.bf16 %v2032_v45, %v2031_v44  ;;  %v1699_v61 = vadd.f32 %v1698_v47, %v1530_v58 }
 0x1b1   : > { %v1658_v48 = vpop.f32.mrf.mxu2  ;;  %v1322_v56 = vpop.f32.mrf.mxu0 }
 0x1b2   : > { %3094 = vst [vmem:[%s3450_s27 + $0x78] sm:$0xff] %v2998_v46   ;;  %v1491_v59 = vpop.f32.mrf.mxu1  ;;  %v1659_v62 = vadd.f32 %v1658_v48, %v1490_v50  ;;  %v1985_v7 = vadd.f32 %v3670_v30, %v1699_v61  ;;  %v1537_v46 = vadd.f32 %v3583_v12, %v3463_v51 }
 0x1b3   : > { %v1492_v3 = vadd.f32 %v1491_v59, %v1322_v56 }
 0x1b4   : > { %v1969_v13 = vadd.f32 %v3670_v30, %v1659_v62  ;;  %v2049_v24 = vmax.f32 %v1985_v7, 0.0 }
 0x1b6   : > { %v2033_v22 = vmax.f32 %v1969_v13, 0.0 }
 0x1b7   : > { %v1700_v4 = vpop.f32.mrf.mxu3 }
 0x1b8   : > { %v1701_v9 = vadd.f32 %v1700_v4, %v1532_v63 }
 0x1b9   : > { %v1660_v8 = vpop.f32.mrf.mxu2  ;;  %v1325_v20 = vpop.f32.mrf.mxu0 }
 0x1ba   : > { %v1661_v14 = vadd.f32 %v1660_v8, %v1492_v3  ;;  %v1986_v6 = vadd.f32 %v3670_v30, %v1701_v9  ;;  %v1494_v15 = vpop.f32.mrf.mxu1 }
 0x1bb   : > { %v1495_v38 = vadd.f32 %v1494_v15, %v1325_v20 }
 0x1bc   : > { %v1970_v21 = vadd.f32 %v3670_v30, %v1661_v14  ;;  %v2050_v25 = vmax.f32 %v1986_v6, 0.0  ;;  %v1540_v6 = vadd.f32 %v3587_v31, %v3467_v1 }
 0x1be   : > { %v2034_v37 = vmax.f32 %v1970_v21, 0.0  ;;  %v3043_v26 = vpack.c.bf16 %v2050_v25, %v2049_v24  ;;  %v1542_v25 = vadd.f32 %v3598_v54, %v3478_v18 }
 0x1bf   : > { %v1703_v11 = vpop.f32.mrf.mxu3 }
 0x1c0   : > { %v3003_v28 = vpack.c.bf16 %v2034_v37, %v2033_v22  ;;  %3103 = vst [vmem:[%s3450_s27 + $0xc0] sm:$0xff] %v3043_v26   ;;  %v1704_v44 = vadd.f32 %v1703_v11, %v1535_v40 }
 0x1c1   : > { %v1663_v32 = vpop.f32.mrf.mxu2  ;;  %v1327_v39 = vpop.f32.mrf.mxu0 }
 0x1c2   : > { %3095 = vst [vmem:[%s3450_s27 + $0x80] sm:$0xff] %v3003_v28   ;;  %v1496_v43 = vpop.f32.mrf.mxu1  ;;  %v1664_v45 = vadd.f32 %v1663_v32, %v1495_v38  ;;  %v1987_v50 = vadd.f32 %v3670_v30, %v1704_v44 }
 0x1c3   : > { %v1497_v47 = vadd.f32 %v1496_v43, %v1327_v39 }
 0x1c4   : > { %v1971_v59 = vadd.f32 %v3670_v30, %v1664_v45  ;;  %v2051_v3 = vmax.f32 %v1987_v50, 0.0 }
 0x1c6   : > { %v2035_v51 = vmax.f32 %v1971_v59, 0.0 }
 0x1c7   : > { %v1705_v48 = vpop.f32.mrf.mxu3 }
 0x1c8   : > { %v1706_v58 = vadd.f32 %v1705_v48, %v1537_v46 }
 0x1c9   : > { %v1665_v56 = vpop.f32.mrf.mxu2  ;;  %v1330_v62 = vpop.f32.mrf.mxu0 }
 0x1ca   : > { %v1666_v61 = vadd.f32 %v1665_v56, %v1497_v47  ;;  %v1988_v36 = vadd.f32 %v3670_v30, %v1706_v58  ;;  %v1499_v55 = vpop.f32.mrf.mxu1  ;;  %v1545_v58 = vadd.f32 %v3602_v10, %v3482_v33 }
 0x1cb   : > { %v1500_v14 = vadd.f32 %v1499_v55, %v1330_v62 }
 0x1cc   : > { %v1972_v63 = vadd.f32 %v3670_v30, %v1666_v61  ;;  %v2052_v4 = vmax.f32 %v1988_v36, 0.0  ;;  %v1547_v36 = vadd.f32 %v3613_v34, %v3493_v49 }
 0x1ce   : > { %v2036_v12 = vmax.f32 %v1972_v63, 0.0  ;;  %v3048_v7 = vpack.c.bf16 %v2052_v4, %v2051_v3 }
 0x1cf   : > { %v1708_v9 = vpop.f32.mrf.mxu3 }
 0x1d0   : > { %v3008_v8 = vpack.c.bf16 %v2036_v12, %v2035_v51  ;;  %3104 = vst [vmem:[%s3450_s27 + $0xc8] sm:$0xff] %v3048_v7   ;;  %v1709_v21 = vadd.f32 %v1708_v9, %v1540_v6 }
 0x1d1   : > { %v1668_v13 = vpop.f32.mrf.mxu2  ;;  %v1332_v20 = vpop.f32.mrf.mxu0 }
 0x1d2   : > { %3096 = vst [vmem:[%s3450_s27 + $0x88] sm:$0xff] %v3008_v8   ;;  %v1501_v15 = vpop.f32.mrf.mxu1  ;;  %v1669_v24 = vadd.f32 %v1668_v13, %v1500_v14  ;;  %v1989_v26 = vadd.f32 %v3670_v30, %v1709_v21 }
 0x1d3   : > { %v1502_v22 = vadd.f32 %v1501_v15, %v1332_v20 }
 0x1d4   : > { %v1973_v32 = vadd.f32 %v3670_v30, %v1669_v24  ;;  %v2053_v43 = vmax.f32 %v1989_v26, 0.0 }
 0x1d6   : > { %v2037_v18 = vmax.f32 %v1973_v32, 0.0 }
 0x1d7   : > { %v1710_v37 = vpop.f32.mrf.mxu3 }
 0x1d8   : > { %v1711_v11 = vadd.f32 %v1710_v37, %v1542_v25 }
 0x1d9   : > { %v1670_v28 = vpop.f32.mrf.mxu2  ;;  %v1335_v39 = vpop.f32.mrf.mxu0 }
 0x1da   : > { %v1671_v38 = vadd.f32 %v1670_v28, %v1502_v22  ;;  %v1990_v1 = vadd.f32 %v3670_v30, %v1711_v11  ;;  %v1504_v31 = vpop.f32.mrf.mxu1  ;;  %v1550_v22 = vadd.f32 %v3617_v57, %v3497_v0  ;;  %v1552_v11 = vadd.f32 %v3628_v17, %v3508_v19 }
 0x1db   : > { %v1505_v50 = vadd.f32 %v1504_v31, %v1335_v39 }
 0x1dc   : > { %v1974_v40 = vadd.f32 %v3670_v30, %v1671_v38  ;;  %v2054_v44 = vmax.f32 %v1990_v1, 0.0 }
 0x1de   : > { %v2038_v54 = vmax.f32 %v1974_v40, 0.0  ;;  %v3053_v45 = vpack.c.bf16 %v2054_v44, %v2053_v43 }
 0x1df   : > { %v1713_v47 = vpop.f32.mrf.mxu3 }
 0x1e0   : > { %v3013_v46 = vpack.c.bf16 %v2038_v54, %v2037_v18  ;;  %3105 = vst [vmem:[%s3450_s27 + $0xd0] sm:$0xff] %v3053_v45   ;;  %v1714_v61 = vadd.f32 %v1713_v47, %v1545_v58 }
 0x1e1   : > { %v1673_v48 = vpop.f32.mrf.mxu2  ;;  %v1337_v56 = vpop.f32.mrf.mxu0 }
 0x1e2   : > { %3097 = vst [vmem:[%s3450_s27 + $0x90] sm:$0xff] %v3013_v46   ;;  %v1506_v59 = vpop.f32.mrf.mxu1  ;;  %v1674_v62 = vadd.f32 %v1673_v48, %v1505_v50  ;;  %v1991_v3 = vadd.f32 %v3670_v30, %v1714_v61 }
 0x1e3   : > { %v1507_v55 = vadd.f32 %v1506_v59, %v1337_v56  ;;  %v1555_v59 = vadd.f32 %v3632_v41, %v3512_v35 }
 0x1e4   : > { %v1975_v12 = vadd.f32 %v3670_v30, %v1674_v62  ;;  %v2055_v13 = vmax.f32 %v1991_v3, 0.0 }
 0x1e6   : > { %v2039_v49 = vmax.f32 %v1975_v12, 0.0 }
 0x1e7   : > { %v1715_v63 = vpop.f32.mrf.mxu3 }
 0x1e8   : > { %v1716_v51 = vadd.f32 %v1715_v63, %v1547_v36 }
 0x1e9   : > { %v1675_v4 = vpop.f32.mrf.mxu2  ;;  %v1340_v8 = vpop.f32.mrf.mxu0 }
 0x1ea   : > { %v1676_v7 = vadd.f32 %v1675_v4, %v1507_v55  ;;  %v1992_v33 = vadd.f32 %v3670_v30, %v1716_v51  ;;  %v1509_v10 = vpop.f32.mrf.mxu1  ;;  %v1557_v55 = vadd.f32 %v3643_v2, %v3523_v53 }
 0x1eb   : > { %v1510_v24 = vadd.f32 %v1509_v10, %v1340_v8 }
 0x1ec   : > { %v1976_v9 = vadd.f32 %v3670_v30, %v1676_v7  ;;  %v2056_v14 = vmax.f32 %v1992_v33, 0.0 }
 0x1ee   : > { %v2040_v34 = vmax.f32 %v1976_v9, 0.0  ;;  %v3058_v20 = vpack.c.bf16 %v2056_v14, %v2055_v13 }
 0x1ef   : > { %v1718_v15 = vpop.f32.mrf.mxu3 }
 0x1f0   : > { %v3018_v6 = vpack.c.bf16 %v2040_v34, %v2039_v49  ;;  %3106 = vst [vmem:[%s3450_s27 + $0xd8] sm:$0xff] %v3058_v20   ;;  %v1719_v26 = vadd.f32 %v1718_v15, %v1550_v22 }
 0x1f1   : > { %v1678_v21 = vpop.f32.mrf.mxu2  ;;  %v1342_v25 = vpop.f32.mrf.mxu0 }
 0x1f2   : > { %3098 = vst [vmem:[%s3450_s27 + $0x98] sm:$0xff] %v3018_v6   ;;  %v1511_v37 = vpop.f32.mrf.mxu1  ;;  %v1679_v28 = vadd.f32 %v1678_v21, %v1510_v24  ;;  %v1993_v39 = vadd.f32 %v3670_v30, %v1719_v26  ;;  %v1560_v21 = vadd.f32 %v3647_v27, %v3527_v5 }
 0x1f3   : > { %v1512_v32 = vadd.f32 %v1511_v37, %v1342_v25  ;;  %v1562_v37 = vadd.f32 %v3658_v52, %v3538_v23 }
 0x1f4   : > { %v1977_v40 = vadd.f32 %v3670_v30, %v1679_v28  ;;  %v2057_v54 = vmax.f32 %v1993_v39, 0.0 }
 0x1f6   : > { %v2041_v19 = vmax.f32 %v1977_v40, 0.0 }
 0x1f7   : > { %v1720_v38 = vpop.f32.mrf.mxu3 }
 0x1f8   : > { %v1721_v31 = vadd.f32 %v1720_v38, %v1552_v11 }
 0x1f9   : > { %v1680_v1 = vpop.f32.mrf.mxu2  ;;  %v1345_v44 = vpop.f32.mrf.mxu0 }
 0x1fa   : > { %v1681_v43 = vadd.f32 %v1680_v1, %v1512_v32  ;;  %v1994_v0 = vadd.f32 %v3670_v30, %v1721_v31  ;;  %v1514_v57 = vpop.f32.mrf.mxu1 }
 0x1fb   : > { %v1515_v56 = vadd.f32 %v1514_v57, %v1345_v44 }
 0x1fc   : > { %v1978_v18 = vadd.f32 %v3670_v30, %v1681_v43  ;;  %v2058_v45 = vmax.f32 %v1994_v0, 0.0 }
 0x1fe   : > { %v2042_v17 = vmax.f32 %v1978_v18, 0.0  ;;  %v3063_v46 = vpack.c.bf16 %v2058_v45, %v2057_v54 }
 0x1ff   : > { %v1723_v48 = vpop.f32.mrf.mxu3 }
 0x200   : > { %v3023_v47 = vpack.c.bf16 %v2042_v17, %v2041_v19  ;;  %3107 = vst [vmem:[%s3450_s27 + $0xe0] sm:$0xff] %v3063_v46   ;;  %v1724_v62 = vadd.f32 %v1723_v48, %v1555_v59  ;;  %v1565_v19 = vadd.f32 %v3662_v16, %v3542_v42 }
 0x201   : > { %v1683_v50 = vpop.f32.mrf.mxu2  ;;  %v1347_v58 = vpop.f32.mrf.mxu0 }
 0x202   : > { %3099 = vst [vmem:[%s3450_s27 + $0xa0] sm:$0xff] %v3023_v47   ;;  %v1516_v61 = vpop.f32.mrf.mxu1  ;;  %v1684_v36 = vadd.f32 %v1683_v50, %v1515_v56  ;;  %v1995_v4 = vadd.f32 %v3670_v30, %v1724_v62  ;;  %v1567_v50 = vadd.f32 %v3665_v29, %v3553_v60 }
 0x203   : > { %v1517_v63 = vadd.f32 %v1516_v61, %v1347_v58 }
 0x204   : > { %v1979_v7 = vadd.f32 %v3670_v30, %v1684_v36  ;;  %v2059_v9 = vmax.f32 %v1995_v4, 0.0 }
 0x206   : > { %v2043_v53 = vmax.f32 %v1979_v7, 0.0 }
 0x207   : > { %v1725_v3 = vpop.f32.mrf.mxu3 }
 0x208   : > { %v1726_v12 = vadd.f32 %v1725_v3, %v1557_v55 }
 0x209   : > { %v1685_v51 = vpop.f32.mrf.mxu2  ;;  %v1350_v33 = vpop.f32.mrf.mxu0 }
 0x20a   : > { %v1686_v8 = vadd.f32 %v1685_v51, %v1517_v63  ;;  %v1996_v35 = vadd.f32 %v3670_v30, %v1726_v12  ;;  %v1519_v41 = vpop.f32.mrf.mxu1 }
 0x20b   : > { %v1520_v6 = vadd.f32 %v1519_v41, %v1350_v33 }
 0x20c   : > { %v1980_v10 = vadd.f32 %v3670_v30, %v1686_v8  ;;  %v2060_v13 = vmax.f32 %v1996_v35, 0.0 }
 0x20e   : > { %v2044_v2 = vmax.f32 %v1980_v10, 0.0  ;;  %v3068_v14 = vpack.c.bf16 %v2060_v13, %v2059_v9 }
 0x20f   : > { %v1728_v34 = vpop.f32.mrf.mxu3 }
 0x210   : > { %v3028_v49 = vpack.c.bf16 %v2044_v2, %v2043_v53  ;;  %3108 = vst [vmem:[%s3450_s27 + $0xe8] sm:$0xff] %v3068_v14   ;;  %v1729_v25 = vadd.f32 %v1728_v34, %v1560_v21 }
 0x211   : > { %v1688_v20 = vpop.f32.mrf.mxu2  ;;  %v1352_v15 = vpop.f32.mrf.mxu0 }
 0x212   : > { %3100 = vst [vmem:[%s3450_s27 + $0xa8] sm:$0xff] %v3028_v49   ;;  %v1521_v24 = vpop.f32.mrf.mxu1  ;;  %v1689_v22 = vadd.f32 %v1688_v20, %v1520_v6  ;;  %v1997_v11 = vadd.f32 %v3670_v30, %v1729_v25 }
 0x213   : > { %v1522_v26 = vadd.f32 %v1521_v24, %v1352_v15 }
 0x214   : > { %v1981_v39 = vadd.f32 %v3670_v30, %v1689_v22  ;;  %v2061_v43 = vmax.f32 %v1997_v11, 0.0 }
 0x216   : > { %v2045_v23 = vmax.f32 %v1981_v39, 0.0 }
 0x217   : > { %v1730_v28 = vpop.f32.mrf.mxu3 }
 0x218   : > { %v1731_v38 = vadd.f32 %v1730_v28, %v1562_v37 }
 0x219   : > { %v1690_v32 = vpop.f32.mrf.mxu2  ;;  %v1355_v5 = vpop.f32.mrf.mxu0 }
 0x21a   : > { %v1691_v1 = vadd.f32 %v1690_v32, %v1522_v26  ;;  %v1998_v31 = vadd.f32 %v3670_v30, %v1731_v38  ;;  %v1524_v27 = vpop.f32.mrf.mxu1 }
 0x21b   : > { %v1525_v45 = vadd.f32 %v1524_v27, %v1355_v5 }
 0x21c   : > { %v1982_v40 = vadd.f32 %v3670_v30, %v1691_v1  ;;  %v2062_v44 = vmax.f32 %v1998_v31, 0.0 }
 0x21e   : > { %v2046_v52 = vmax.f32 %v1982_v40, 0.0  ;;  %v3073_v0 = vpack.c.bf16 %v2062_v44, %v2061_v43 }
 0x21f   : > { %v1733_v18 = vpop.f32.mrf.mxu3 }
 0x220   : > { %v3033_v57 = vpack.c.bf16 %v2046_v52, %v2045_v23  ;;  %3109 = vst [vmem:[%s3450_s27 + $0xf0] sm:$0xff] %v3073_v0   ;;  %v1734_v17 = vadd.f32 %v1733_v18, %v1565_v19 }
 0x221   : > { %v1693_v54 = vpop.f32.mrf.mxu2  ;;  %v1357_v46 = vpop.f32.mrf.mxu0 }
 0x222   : > { %3101 = vst [vmem:[%s3450_s27 + $0xb0] sm:$0xff] %v3033_v57   ;;  %v1526_v47 = vpop.f32.mrf.mxu1  ;;  %v1694_v48 = vadd.f32 %v1693_v54, %v1525_v45  ;;  %v1999_v59 = vadd.f32 %v3670_v30, %v1734_v17 }
 0x223   : > { %v1527_v56 = vadd.f32 %v1526_v47, %v1357_v46 }
 0x224   : > { %v1983_v36 = vadd.f32 %v3670_v30, %v1694_v48  ;;  %v2063_v63 = vmax.f32 %v1999_v59, 0.0 }
 0x226   : > { %v2047_v4 = vmax.f32 %v1983_v36, 0.0 }
 0x227   : > { %v1735_v58 = vpop.f32.mrf.mxu3 }
 0x228   : > { %v1736_v62 = vadd.f32 %v1735_v58, %v1567_v50 }
 0x229   : > { %v1695_v61 = vpop.f32.mrf.mxu2 }
 0x22a   : > { %v1696_v55 = vadd.f32 %v1695_v61, %v1527_v56  ;;  %v2000_v42 = vadd.f32 %v3670_v30, %v1736_v62 }
 0x22c   : > { %v1984_v16 = vadd.f32 %v3670_v30, %v1696_v55  ;;  %v2064_v3 = vmax.f32 %v2000_v42, 0.0 }
 0x22e   : > { %v2048_v51 = vmax.f32 %v1984_v16, 0.0  ;;  %v3078_v60 = vpack.c.bf16 %v2064_v3, %v2063_v63 }
 0x230   : > { %v3038_v29 = vpack.c.bf16 %v2048_v51, %v2047_v4  ;;  %3110 = vst [vmem:[%s3450_s27 + $0xf8] sm:$0xff] %v3078_v60  }
 0x232   : > { %3102 = vst [vmem:[%s3450_s27 + $0xb8] sm:$0xff] %v3038_v29  }
 0x233 PF: > { %s13_s14 = sadd.s32 1, %s3184_s14   ;;  %s3768_s12 = smov %s3180_s13 }
 0x234   : > { %p10_p5 = scmp.ge.s32.totalorder %s13_s14, 14   ;;  %s3769_s13 = smov %s3771_s15 }
 0x236   :  { %12 = sbr.rel (!%p10_p5) target bundleno = 2 (0x2), region = 76 }

// kernel: my_alexnet_features.6
= control target key start
LH: loop header
LB: loop body
LE: loop exit
PB: predicated region body
PF: predicated region fallthrough
CT: control target
= control target key end

     0   :  { %s3841_s0 = inlined_call_operand.vmem [shape: bf16[1536,2048], index: 0, kind: input, shape index: {}]   ;;  %s3842_s1 = inlined_call_operand.vmem [shape: bf16[2048,256], index: 1, kind: input, shape index: {}]   ;;  %s3843_s2 = inlined_call_operand.vmem [shape: f32[1,256], index: 2, kind: input, shape index: {}]   ;;  %s3844_s3 = inlined_call_operand.vmem [shape: bf16[1536,256], index: 3, kind: output, shape index: {}]  }
   0x1   :  { %3847 = sst [smem:[#allocation9_spill]] %s3841_s0 }
   0x2   :  { %3848 = sst [smem:[#allocation10_spill]] %s3842_s1 }
   0x3   :  { %3849 = sst [smem:[#allocation11_spill]] %s3844_s3 }
   0x4   :  { %s3090_s12 = smov 0   ;;  %s3092_s13 = smov 0  }
   0x5   :  { %s3094_s14 = smov 0   ;;  %s3096_s15 = smov 0  }
   0x6   :  { %s3098_s16 = smov 0   ;;  %s3100_s17 = smov 0  }
   0x7   :  { %s3102_s18 = smov 0   ;;  %s3104_s19 = smov 0  }
   0x8   :  { %s3106_s20 = smov 0   ;;  %s3108_s21 = smov 0  }
   0x9   :  { %s3110_s22 = smov 0   ;;  %s3112_s23 = smov 0  }
   0xa   :  { %s3114_s24 = smov 0  }
   0xb LB: > { %3850 = sst [smem:[#allocation6_spill]] %s3051_s20  ;;  %s25_s26 = sadd.s32 1, %s3055_s21  ;;  %s3067_s24 = sphi %s3114_s24, %s13_s24   ;;  %s3063_s23 = sphi %s3112_s23, %s3876_s23   ;;  %s3059_s22 = sphi %s3110_s22, %s3875_s22   ;;  %s3055_s21 = sphi %s3108_s21, %s3874_s21   ;;  %s3051_s20 = sphi %s3106_s20, %s3873_s20   ;;  %s3047_s19 = sphi %s3104_s19, %s3872_s19   ;;  %s3043_s18 = sphi %s3102_s18, %s3871_s18   ;;  %s3039_s17 = sphi %s3100_s17, %s3870_s17   ;;  %s3035_s16 = sphi %s3098_s16, %s3869_s16   ;;  %s3031_s15 = sphi %s3096_s15, %s3868_s15   ;;  %s3027_s14 = sphi %s3094_s14, %s3867_s14   ;;  %s3023_s13 = sphi %s3092_s13, %s3866_s13   ;;  %s3019_s12 = sphi %s3090_s12, %s3865_s12  }
   0xc   : > { %p26_p0 = scmp.ge.s32.totalorder %s25_s26, 4  ;;  %s28_s27 = sadd.s32 1, %s3059_s22 }
   0xd   : > { %s32_s28 = sadd.s32 1, %s3063_s23  ;;  %s41_s29 = sadd.s32 1, %s3039_s17 }
   0xe   : > { %s3878_s26 = smov (%p26_p0, %s25_s26), 0  ;;  %s3880_s27 = smov (!%p26_p0, %s28_s27), %s3059_s22 }
   0xf   : > { %3851 = sst [smem:[#allocation7_spill]] %s3878_s26  ;;  %s37_s30 = ssub.s32 %s3055_s21, %s3878_s26 }
  0x10   : > { %p48_p1 = scmp.ne.s32.totalorder %s3039_s17, %s3035_s16  ;;  %p30_p2 = scmp.ge.s32.totalorder %s3880_s27, 2 }
  0x11   : > { %p49_p3 = scmp.eq.s32.totalorder %s3067_s24, 0  ;;  %s69_s4 = sadd.s32 1, %s3031_s15 }
  0x12   : > { %p76_p4 = scmp.ne.s32.totalorder %s3031_s15, %s3027_s14  ;;  %s3882_s27 = smov (%p30_p2, %s3880_s27), 0 }
  0x13   : > { %3852 = sst [smem:[#allocation8_spill]] %s3882_s27  ;;  %s3884_s28 = smov (!%p30_p2, %s32_s28), %s3063_s23 }
  0x14   : > { %p3174_p5 = por %p49_p3, %p48_p1  ;;  %s65_s6 = ssub.s32 %s3059_s22, %s3882_s27 }
  0x15   : > { %p34_p6 = scmp.ge.s32.totalorder %s3884_s28, 6  ;;  %s66_s7 = sor.u32 %s65_s6, %s37_s30 }
  0x16   : > { %p67_p7 = scmp.eq.s32.totalorder %s66_s7, 0  ;;  %p3180_p8 = por %p76_p4, %p49_p3 }
  0x17   : > { %s3886_s28 = smov (%p34_p6, %s3884_s28), 0  ;;  %s123_s11 = sadd.s32 1, %s3023_s13 }
  0x18   : > { %s3187_s9 = scalar_select %p67_p7, %s3031_s15, %s69_s4  }
  0x19   : > { %s36_s10 = ssub.s32 %s3063_s23, %s3886_s28  ;;  %p133_p11 = scmp.ne.s32.totalorder %s3023_s13, %s3019_s12 }
  0x1a   : > { %s38_s25 = sor.u32 %s37_s30, %s36_s10  ;;  %s120_s26 = sor.u32 %s65_s6, %s36_s10 }
  0x1b   : > { %p39_p9 = scmp.eq.s32.totalorder %s38_s25, 0  ;;  %p121_p10 = scmp.eq.s32.totalorder %s120_s26, 0 }
  0x1c   : > { %s3855_s27 = sadd.s32 4294967295, %s3067_s24   ;;  %p2259_p0 = scmp.ge.s32.totalorder %s3067_s24, 48 }
  0x1d   : > { %p134_p12 = scmp.eq.s32.totalorder %s3855_s27, 47 }
  0x1e   : > { %s3197_s3 = scalar_select %p39_p9, %s3039_s17, %s41_s29  }
  0x1f   : > { %s3200_s7 = scalar_select %p121_p10, %s3023_s13, %s123_s11  }
  0x20   : > { %p3202_p13 = por %p134_p12, %p133_p11  ;;  %156 = sbr.rel (%p2259_p0) target bundleno = 185 (0xb9), region = 16 }
  0x25   : > { %159 = sbr.rel (!%p3174_p5) target bundleno = 111 (0x6f), region = 20  ;;  %s161_s25 = sand.u32 (%p3174_p5), 1, %s3039_s17  }
  0x26   : > { %s2262_s26 = sshll.u32 (%p3174_p5), %s3055_s21, 2  ;;  %s2260_s27 = sshll.u32 (%p3174_p5), %s161_s25, 9 }
  0x27   : > { %s2665_s29 = sshll.u32 (%p3174_p5), %s3063_s23, 9  ;;  %s3857_s0 = sld [smem:[#allocation9_spill]] (%p3174_p5) }
  0x28   : > { %s167_s30 = sadd.s32 (%p3174_p5), %s2665_s29, %s2262_s26  ;;  %s3220_s5 = scalar_lea.vmem (%p3174_p5), [#allocation3], %s2260_s27 }
  0x29   : > { %s2264_s4 = sshll.u32 (%p3174_p5), %s167_s30, 2 }
  0x2d   : > { %s3215_s11 = scalar_lea.vmem %s3857_s0, %s2264_s4 }
  0x2e   : > { %v182_v0 = vld [vmem:[%s3215_s11] sm:$0xff]  ;;  %v184_v1 = vld [vmem:[%s3215_s11 + $0x8] sm:$0xff] }
  0x2f   : > { %v186_v2 = vld [vmem:[%s3215_s11 + $0x40] sm:$0xff]  ;;  %183 = vst [vmem:[%s3220_s5] sm:$0xff] %v182_v0  ;;  %v188_v3 = vld [vmem:[%s3215_s11 + $0x48] sm:$0xff] }
  0x30   : > { %185 = vst [vmem:[%s3220_s5 + $0x8] sm:$0xff] %v184_v1  ;;  %v190_v4 = vld [vmem:[%s3215_s11 + $0x80] sm:$0xff]  ;;  %v192_v5 = vld [vmem:[%s3215_s11 + $0x88] sm:$0xff] }
  0x31   : > { %187 = vst [vmem:[%s3220_s5 + $0x10] sm:$0xff] %v186_v2  ;;  %v194_v6 = vld [vmem:[%s3215_s11 + $0xc0] sm:$0xff]  ;;  %v196_v7 = vld [vmem:[%s3215_s11 + $0xc8] sm:$0xff] }
  0x32   : > { %189 = vst [vmem:[%s3220_s5 + $0x18] sm:$0xff] %v188_v3  ;;  %v198_v8 = vld [vmem:[%s3215_s11 + $0x100] sm:$0xff]  ;;  %v200_v9 = vld [vmem:[%s3215_s11 + $0x108] sm:$0xff] }
  0x33   : > { %191 = vst [vmem:[%s3220_s5 + $0x20] sm:$0xff] %v190_v4  ;;  %v202_v10 = vld [vmem:[%s3215_s11 + $0x140] sm:$0xff]  ;;  %v204_v11 = vld [vmem:[%s3215_s11 + $0x148] sm:$0xff] }
  0x34   : > { %193 = vst [vmem:[%s3220_s5 + $0x28] sm:$0xff] %v192_v5  ;;  %v206_v12 = vld [vmem:[%s3215_s11 + $0x180] sm:$0xff]  ;;  %v208_v13 = vld [vmem:[%s3215_s11 + $0x188] sm:$0xff] }
  0x35   : > { %195 = vst [vmem:[%s3220_s5 + $0x30] sm:$0xff] %v194_v6  ;;  %v210_v14 = vld [vmem:[%s3215_s11 + $0x1c0] sm:$0xff]  ;;  %v212_v15 = vld [vmem:[%s3215_s11 + $0x1c8] sm:$0xff] }
  0x36   : > { %197 = vst [vmem:[%s3220_s5 + $0x38] sm:$0xff] %v196_v7  ;;  %v214_v16 = vld [vmem:[%s3215_s11 + $0x200] sm:$0xff]  ;;  %v216_v17 = vld [vmem:[%s3215_s11 + $0x208] sm:$0xff] }
  0x37   : > { %199 = vst [vmem:[%s3220_s5 + $0x40] sm:$0xff] %v198_v8  ;;  %v218_v18 = vld [vmem:[%s3215_s11 + $0x240] sm:$0xff]  ;;  %v220_v19 = vld [vmem:[%s3215_s11 + $0x248] sm:$0xff] }
  0x38   : > { %201 = vst [vmem:[%s3220_s5 + $0x48] sm:$0xff] %v200_v9  ;;  %v222_v20 = vld [vmem:[%s3215_s11 + $0x280] sm:$0xff]  ;;  %v224_v21 = vld [vmem:[%s3215_s11 + $0x288] sm:$0xff] }
  0x39   : > { %203 = vst [vmem:[%s3220_s5 + $0x50] sm:$0xff] %v202_v10  ;;  %v226_v22 = vld [vmem:[%s3215_s11 + $0x2c0] sm:$0xff]  ;;  %v228_v23 = vld [vmem:[%s3215_s11 + $0x2c8] sm:$0xff] }
  0x3a   : > { %205 = vst [vmem:[%s3220_s5 + $0x58] sm:$0xff] %v204_v11  ;;  %v230_v24 = vld [vmem:[%s3215_s11 + $0x300] sm:$0xff]  ;;  %v232_v25 = vld [vmem:[%s3215_s11 + $0x308] sm:$0xff] }
  0x3b   : > { %207 = vst [vmem:[%s3220_s5 + $0x60] sm:$0xff] %v206_v12  ;;  %v234_v26 = vld [vmem:[%s3215_s11 + $0x340] sm:$0xff]  ;;  %v236_v27 = vld [vmem:[%s3215_s11 + $0x348] sm:$0xff] }
  0x3c   : > { %209 = vst [vmem:[%s3220_s5 + $0x68] sm:$0xff] %v208_v13  ;;  %v238_v28 = vld [vmem:[%s3215_s11 + $0x380] sm:$0xff]  ;;  %v240_v29 = vld [vmem:[%s3215_s11 + $0x388] sm:$0xff] }
  0x3d   : > { %211 = vst [vmem:[%s3220_s5 + $0x70] sm:$0xff] %v210_v14  ;;  %v242_v30 = vld [vmem:[%s3215_s11 + $0x3c0] sm:$0xff]  ;;  %v244_v31 = vld [vmem:[%s3215_s11 + $0x3c8] sm:$0xff] }
  0x3e   : > { %213 = vst [vmem:[%s3220_s5 + $0x78] sm:$0xff] %v212_v15  ;;  %v246_v32 = vld [vmem:[%s3215_s11 + $0x400] sm:$0xff]  ;;  %v248_v33 = vld [vmem:[%s3215_s11 + $0x408] sm:$0xff] }
  0x3f   : > { %215 = vst [vmem:[%s3220_s5 + $0x80] sm:$0xff] %v214_v16  ;;  %v250_v34 = vld [vmem:[%s3215_s11 + $0x440] sm:$0xff]  ;;  %v252_v35 = vld [vmem:[%s3215_s11 + $0x448] sm:$0xff] }
  0x40   : > { %217 = vst [vmem:[%s3220_s5 + $0x88] sm:$0xff] %v216_v17  ;;  %v254_v36 = vld [vmem:[%s3215_s11 + $0x480] sm:$0xff]  ;;  %v256_v37 = vld [vmem:[%s3215_s11 + $0x488] sm:$0xff] }
  0x41   : > { %219 = vst [vmem:[%s3220_s5 + $0x90] sm:$0xff] %v218_v18  ;;  %v258_v38 = vld [vmem:[%s3215_s11 + $0x4c0] sm:$0xff]  ;;  %v260_v39 = vld [vmem:[%s3215_s11 + $0x4c8] sm:$0xff] }
  0x42   : > { %221 = vst [vmem:[%s3220_s5 + $0x98] sm:$0xff] %v220_v19  ;;  %v262_v40 = vld [vmem:[%s3215_s11 + $0x500] sm:$0xff]  ;;  %v264_v41 = vld [vmem:[%s3215_s11 + $0x508] sm:$0xff] }
  0x43   : > { %223 = vst [vmem:[%s3220_s5 + $0xa0] sm:$0xff] %v222_v20  ;;  %v266_v42 = vld [vmem:[%s3215_s11 + $0x540] sm:$0xff]  ;;  %v268_v43 = vld [vmem:[%s3215_s11 + $0x548] sm:$0xff] }
  0x44   : > { %225 = vst [vmem:[%s3220_s5 + $0xa8] sm:$0xff] %v224_v21  ;;  %v270_v44 = vld [vmem:[%s3215_s11 + $0x580] sm:$0xff]  ;;  %v272_v45 = vld [vmem:[%s3215_s11 + $0x588] sm:$0xff] }
  0x45   : > { %227 = vst [vmem:[%s3220_s5 + $0xb0] sm:$0xff] %v226_v22  ;;  %v274_v46 = vld [vmem:[%s3215_s11 + $0x5c0] sm:$0xff]  ;;  %v276_v47 = vld [vmem:[%s3215_s11 + $0x5c8] sm:$0xff] }
  0x46   : > { %229 = vst [vmem:[%s3220_s5 + $0xb8] sm:$0xff] %v228_v23  ;;  %v278_v48 = vld [vmem:[%s3215_s11 + $0x600] sm:$0xff]  ;;  %v280_v49 = vld [vmem:[%s3215_s11 + $0x608] sm:$0xff] }
  0x47   : > { %231 = vst [vmem:[%s3220_s5 + $0xc0] sm:$0xff] %v230_v24  ;;  %v282_v50 = vld [vmem:[%s3215_s11 + $0x640] sm:$0xff]  ;;  %v284_v51 = vld [vmem:[%s3215_s11 + $0x648] sm:$0xff] }
  0x48   : > { %233 = vst [vmem:[%s3220_s5 + $0xc8] sm:$0xff] %v232_v25  ;;  %v286_v52 = vld [vmem:[%s3215_s11 + $0x680] sm:$0xff]  ;;  %v288_v53 = vld [vmem:[%s3215_s11 + $0x688] sm:$0xff] }
  0x49   : > { %235 = vst [vmem:[%s3220_s5 + $0xd0] sm:$0xff] %v234_v26  ;;  %v290_v54 = vld [vmem:[%s3215_s11 + $0x6c0] sm:$0xff]  ;;  %v292_v55 = vld [vmem:[%s3215_s11 + $0x6c8] sm:$0xff] }
  0x4a   : > { %237 = vst [vmem:[%s3220_s5 + $0xd8] sm:$0xff] %v236_v27  ;;  %v294_v56 = vld [vmem:[%s3215_s11 + $0x700] sm:$0xff]  ;;  %v296_v57 = vld [vmem:[%s3215_s11 + $0x708] sm:$0xff] }
  0x4b   : > { %239 = vst [vmem:[%s3220_s5 + $0xe0] sm:$0xff] %v238_v28  ;;  %v298_v58 = vld [vmem:[%s3215_s11 + $0x740] sm:$0xff]  ;;  %v300_v59 = vld [vmem:[%s3215_s11 + $0x748] sm:$0xff] }
  0x4c   : > { %241 = vst [vmem:[%s3220_s5 + $0xe8] sm:$0xff] %v240_v29  ;;  %v302_v60 = vld [vmem:[%s3215_s11 + $0x780] sm:$0xff]  ;;  %v304_v61 = vld [vmem:[%s3215_s11 + $0x788] sm:$0xff] }
  0x4d   : > { %243 = vst [vmem:[%s3220_s5 + $0xf0] sm:$0xff] %v242_v30  ;;  %v306_v62 = vld [vmem:[%s3215_s11 + $0x7c0] sm:$0xff]  ;;  %v308_v63 = vld [vmem:[%s3215_s11 + $0x7c8] sm:$0xff] }
  0x4e   : > { %245 = vst [vmem:[%s3220_s5 + $0xf8] sm:$0xff] %v244_v31 }
  0x4f   : > { %247 = vst [vmem:[%s3220_s5 + $0x100] sm:$0xff] %v246_v32 }
  0x50   : > { %249 = vst [vmem:[%s3220_s5 + $0x108] sm:$0xff] %v248_v33 }
  0x51   : > { %251 = vst [vmem:[%s3220_s5 + $0x110] sm:$0xff] %v250_v34 }
  0x52   : > { %253 = vst [vmem:[%s3220_s5 + $0x118] sm:$0xff] %v252_v35 }
  0x53   : > { %255 = vst [vmem:[%s3220_s5 + $0x120] sm:$0xff] %v254_v36 }
  0x54   : > { %257 = vst [vmem:[%s3220_s5 + $0x128] sm:$0xff] %v256_v37 }
  0x55   : > { %259 = vst [vmem:[%s3220_s5 + $0x130] sm:$0xff] %v258_v38 }
  0x56   : > { %261 = vst [vmem:[%s3220_s5 + $0x138] sm:$0xff] %v260_v39 }
  0x57   : > { %263 = vst [vmem:[%s3220_s5 + $0x140] sm:$0xff] %v262_v40 }
  0x58   : > { %265 = vst [vmem:[%s3220_s5 + $0x148] sm:$0xff] %v264_v41 }
  0x59   : > { %267 = vst [vmem:[%s3220_s5 + $0x150] sm:$0xff] %v266_v42 }
  0x5a   : > { %269 = vst [vmem:[%s3220_s5 + $0x158] sm:$0xff] %v268_v43 }
  0x5b   : > { %271 = vst [vmem:[%s3220_s5 + $0x160] sm:$0xff] %v270_v44 }
  0x5c   : > { %273 = vst [vmem:[%s3220_s5 + $0x168] sm:$0xff] %v272_v45 }
  0x5d   : > { %275 = vst [vmem:[%s3220_s5 + $0x170] sm:$0xff] %v274_v46 }
  0x5e   : > { %277 = vst [vmem:[%s3220_s5 + $0x178] sm:$0xff] %v276_v47 }
  0x5f   : > { %279 = vst [vmem:[%s3220_s5 + $0x180] sm:$0xff] %v278_v48 }
  0x60   : > { %281 = vst [vmem:[%s3220_s5 + $0x188] sm:$0xff] %v280_v49 }
  0x61   : > { %283 = vst [vmem:[%s3220_s5 + $0x190] sm:$0xff] %v282_v50 }
  0x62   : > { %285 = vst [vmem:[%s3220_s5 + $0x198] sm:$0xff] %v284_v51 }
  0x63   : > { %287 = vst [vmem:[%s3220_s5 + $0x1a0] sm:$0xff] %v286_v52 }
  0x64   : > { %289 = vst [vmem:[%s3220_s5 + $0x1a8] sm:$0xff] %v288_v53 }
  0x65   : > { %291 = vst [vmem:[%s3220_s5 + $0x1b0] sm:$0xff] %v290_v54 }
  0x66   : > { %293 = vst [vmem:[%s3220_s5 + $0x1b8] sm:$0xff] %v292_v55 }
  0x67   : > { %295 = vst [vmem:[%s3220_s5 + $0x1c0] sm:$0xff] %v294_v56 }
  0x68   : > { %297 = vst [vmem:[%s3220_s5 + $0x1c8] sm:$0xff] %v296_v57 }
  0x69   : > { %299 = vst [vmem:[%s3220_s5 + $0x1d0] sm:$0xff] %v298_v58 }
  0x6a   : > { %301 = vst [vmem:[%s3220_s5 + $0x1d8] sm:$0xff] %v300_v59 }
  0x6b   : > { %303 = vst [vmem:[%s3220_s5 + $0x1e0] sm:$0xff] %v302_v60 }
  0x6c   : > { %305 = vst [vmem:[%s3220_s5 + $0x1e8] sm:$0xff] %v304_v61 }
  0x6d   : > { %307 = vst [vmem:[%s3220_s5 + $0x1f0] sm:$0xff] %v306_v62 }
  0x6e   : > { %309 = vst [vmem:[%s3220_s5 + $0x1f8] sm:$0xff] %v308_v63 }
  0x6f PF: > { %315 = sbr.rel (!%p3180_p8) target bundleno = 185 (0xb9), region = 43  ;;  %s317_s25 = sand.u32 (%p3180_p8), 1, %s3031_s15  }
  0x70   : > { %s2666_s26 = sshll.u32 (%p3180_p8), %s3055_s21, 7  ;;  %s2265_s27 = sshll.u32 (%p3180_p8), %s317_s25, 8 }
  0x71   : > { %s322_s29 = sadd.s32 (%p3180_p8), %s3059_s22, %s2666_s26  ;;  %s3858_s1 = sld [smem:[#allocation10_spill]] (%p3180_p8) }
  0x72   : > { %s2268_s30 = sshll.u32 (%p3180_p8), %s322_s29, 2  ;;  %s3360_s8 = scalar_lea.vmem (%p3180_p8), [#allocation4], %s2265_s27 }
  0x77   : > { %s3355_s10 = scalar_lea.vmem %s3858_s1, %s2268_s30 }
  0x78   : > { %v341_v0 = vld [vmem:[%s3355_s10] sm:$0xf]  ;;  %v343_v1 = vld [vmem:[%s3355_s10 + $0x8] sm:$0xf]  ;;  %v345_v2 = vld [vmem:[%s3355_s10 + $0x10] sm:$0xf] }
  0x79   : > { %342 = vst [vmem:[%s3360_s8] sm:$0xf] %v341_v0  ;;  %v347_v3 = vld [vmem:[%s3355_s10 + $0x18] sm:$0xf]  ;;  %v349_v4 = vld [vmem:[%s3355_s10 + $0x20] sm:$0xf] }
  0x7a   : > { %344 = vst [vmem:[%s3360_s8 + $0x4] sm:$0xf] %v343_v1  ;;  %v351_v5 = vld [vmem:[%s3355_s10 + $0x28] sm:$0xf]  ;;  %v353_v6 = vld [vmem:[%s3355_s10 + $0x30] sm:$0xf] }
  0x7b   : > { %346 = vst [vmem:[%s3360_s8 + $0x8] sm:$0xf] %v345_v2  ;;  %v355_v7 = vld [vmem:[%s3355_s10 + $0x38] sm:$0xf]  ;;  %v357_v8 = vld [vmem:[%s3355_s10 + $0x40] sm:$0xf] }
  0x7c   : > { %348 = vst [vmem:[%s3360_s8 + $0xc] sm:$0xf] %v347_v3  ;;  %v359_v9 = vld [vmem:[%s3355_s10 + $0x48] sm:$0xf]  ;;  %v361_v10 = vld [vmem:[%s3355_s10 + $0x50] sm:$0xf] }
  0x7d   : > { %350 = vst [vmem:[%s3360_s8 + $0x10] sm:$0xf] %v349_v4  ;;  %v363_v11 = vld [vmem:[%s3355_s10 + $0x58] sm:$0xf]  ;;  %v365_v12 = vld [vmem:[%s3355_s10 + $0x60] sm:$0xf] }
  0x7e   : > { %352 = vst [vmem:[%s3360_s8 + $0x14] sm:$0xf] %v351_v5  ;;  %v367_v13 = vld [vmem:[%s3355_s10 + $0x68] sm:$0xf]  ;;  %v369_v14 = vld [vmem:[%s3355_s10 + $0x70] sm:$0xf] }
  0x7f   : > { %354 = vst [vmem:[%s3360_s8 + $0x18] sm:$0xf] %v353_v6  ;;  %v371_v15 = vld [vmem:[%s3355_s10 + $0x78] sm:$0xf]  ;;  %v373_v16 = vld [vmem:[%s3355_s10 + $0x80] sm:$0xf] }
  0x80   : > { %356 = vst [vmem:[%s3360_s8 + $0x1c] sm:$0xf] %v355_v7  ;;  %v375_v17 = vld [vmem:[%s3355_s10 + $0x88] sm:$0xf]  ;;  %v377_v18 = vld [vmem:[%s3355_s10 + $0x90] sm:$0xf] }
  0x81   : > { %358 = vst [vmem:[%s3360_s8 + $0x20] sm:$0xf] %v357_v8  ;;  %v379_v19 = vld [vmem:[%s3355_s10 + $0x98] sm:$0xf]  ;;  %v381_v20 = vld [vmem:[%s3355_s10 + $0xa0] sm:$0xf] }
  0x82   : > { %360 = vst [vmem:[%s3360_s8 + $0x24] sm:$0xf] %v359_v9  ;;  %v383_v21 = vld [vmem:[%s3355_s10 + $0xa8] sm:$0xf]  ;;  %v385_v22 = vld [vmem:[%s3355_s10 + $0xb0] sm:$0xf] }
  0x83   : > { %362 = vst [vmem:[%s3360_s8 + $0x28] sm:$0xf] %v361_v10  ;;  %v387_v23 = vld [vmem:[%s3355_s10 + $0xb8] sm:$0xf]  ;;  %v389_v24 = vld [vmem:[%s3355_s10 + $0xc0] sm:$0xf] }
  0x84   : > { %364 = vst [vmem:[%s3360_s8 + $0x2c] sm:$0xf] %v363_v11  ;;  %v391_v25 = vld [vmem:[%s3355_s10 + $0xc8] sm:$0xf]  ;;  %v393_v26 = vld [vmem:[%s3355_s10 + $0xd0] sm:$0xf] }
  0x85   : > { %366 = vst [vmem:[%s3360_s8 + $0x30] sm:$0xf] %v365_v12  ;;  %v395_v27 = vld [vmem:[%s3355_s10 + $0xd8] sm:$0xf]  ;;  %v397_v28 = vld [vmem:[%s3355_s10 + $0xe0] sm:$0xf] }
  0x86   : > { %368 = vst [vmem:[%s3360_s8 + $0x34] sm:$0xf] %v367_v13  ;;  %v399_v29 = vld [vmem:[%s3355_s10 + $0xe8] sm:$0xf]  ;;  %v401_v30 = vld [vmem:[%s3355_s10 + $0xf0] sm:$0xf] }
  0x87   : > { %370 = vst [vmem:[%s3360_s8 + $0x38] sm:$0xf] %v369_v14  ;;  %v403_v31 = vld [vmem:[%s3355_s10 + $0xf8] sm:$0xf]  ;;  %v405_v32 = vld [vmem:[%s3355_s10 + $0x100] sm:$0xf] }
  0x88   : > { %372 = vst [vmem:[%s3360_s8 + $0x3c] sm:$0xf] %v371_v15  ;;  %v407_v33 = vld [vmem:[%s3355_s10 + $0x108] sm:$0xf]  ;;  %v409_v34 = vld [vmem:[%s3355_s10 + $0x110] sm:$0xf] }
  0x89   : > { %374 = vst [vmem:[%s3360_s8 + $0x40] sm:$0xf] %v373_v16  ;;  %v411_v35 = vld [vmem:[%s3355_s10 + $0x118] sm:$0xf]  ;;  %v413_v36 = vld [vmem:[%s3355_s10 + $0x120] sm:$0xf] }
  0x8a   : > { %376 = vst [vmem:[%s3360_s8 + $0x44] sm:$0xf] %v375_v17  ;;  %v415_v37 = vld [vmem:[%s3355_s10 + $0x128] sm:$0xf]  ;;  %v417_v38 = vld [vmem:[%s3355_s10 + $0x130] sm:$0xf] }
  0x8b   : > { %378 = vst [vmem:[%s3360_s8 + $0x48] sm:$0xf] %v377_v18  ;;  %v419_v39 = vld [vmem:[%s3355_s10 + $0x138] sm:$0xf]  ;;  %v421_v40 = vld [vmem:[%s3355_s10 + $0x140] sm:$0xf] }
  0x8c   : > { %380 = vst [vmem:[%s3360_s8 + $0x4c] sm:$0xf] %v379_v19  ;;  %v423_v41 = vld [vmem:[%s3355_s10 + $0x148] sm:$0xf]  ;;  %v425_v42 = vld [vmem:[%s3355_s10 + $0x150] sm:$0xf] }
  0x8d   : > { %382 = vst [vmem:[%s3360_s8 + $0x50] sm:$0xf] %v381_v20  ;;  %v427_v43 = vld [vmem:[%s3355_s10 + $0x158] sm:$0xf]  ;;  %v429_v44 = vld [vmem:[%s3355_s10 + $0x160] sm:$0xf] }
  0x8e   : > { %384 = vst [vmem:[%s3360_s8 + $0x54] sm:$0xf] %v383_v21  ;;  %v431_v45 = vld [vmem:[%s3355_s10 + $0x168] sm:$0xf]  ;;  %v433_v46 = vld [vmem:[%s3355_s10 + $0x170] sm:$0xf] }
  0x8f   : > { %386 = vst [vmem:[%s3360_s8 + $0x58] sm:$0xf] %v385_v22  ;;  %v435_v47 = vld [vmem:[%s3355_s10 + $0x178] sm:$0xf]  ;;  %v437_v48 = vld [vmem:[%s3355_s10 + $0x180] sm:$0xf] }
  0x90   : > { %388 = vst [vmem:[%s3360_s8 + $0x5c] sm:$0xf] %v387_v23  ;;  %v439_v49 = vld [vmem:[%s3355_s10 + $0x188] sm:$0xf]  ;;  %v441_v50 = vld [vmem:[%s3355_s10 + $0x190] sm:$0xf] }
  0x91   : > { %390 = vst [vmem:[%s3360_s8 + $0x60] sm:$0xf] %v389_v24  ;;  %v443_v51 = vld [vmem:[%s3355_s10 + $0x198] sm:$0xf]  ;;  %v445_v52 = vld [vmem:[%s3355_s10 + $0x1a0] sm:$0xf] }
  0x92   : > { %392 = vst [vmem:[%s3360_s8 + $0x64] sm:$0xf] %v391_v25  ;;  %v447_v53 = vld [vmem:[%s3355_s10 + $0x1a8] sm:$0xf]  ;;  %v449_v54 = vld [vmem:[%s3355_s10 + $0x1b0] sm:$0xf] }
  0x93   : > { %394 = vst [vmem:[%s3360_s8 + $0x68] sm:$0xf] %v393_v26  ;;  %v451_v55 = vld [vmem:[%s3355_s10 + $0x1b8] sm:$0xf]  ;;  %v453_v56 = vld [vmem:[%s3355_s10 + $0x1c0] sm:$0xf] }
  0x94   : > { %396 = vst [vmem:[%s3360_s8 + $0x6c] sm:$0xf] %v395_v27  ;;  %v455_v57 = vld [vmem:[%s3355_s10 + $0x1c8] sm:$0xf]  ;;  %v457_v58 = vld [vmem:[%s3355_s10 + $0x1d0] sm:$0xf] }
  0x95   : > { %398 = vst [vmem:[%s3360_s8 + $0x70] sm:$0xf] %v397_v28  ;;  %v459_v59 = vld [vmem:[%s3355_s10 + $0x1d8] sm:$0xf]  ;;  %v461_v60 = vld [vmem:[%s3355_s10 + $0x1e0] sm:$0xf] }
  0x96   : > { %400 = vst [vmem:[%s3360_s8 + $0x74] sm:$0xf] %v399_v29  ;;  %v463_v61 = vld [vmem:[%s3355_s10 + $0x1e8] sm:$0xf]  ;;  %v465_v62 = vld [vmem:[%s3355_s10 + $0x1f0] sm:$0xf] }
  0x97   : > { %402 = vst [vmem:[%s3360_s8 + $0x78] sm:$0xf] %v401_v30  ;;  %v467_v63 = vld [vmem:[%s3355_s10 + $0x1f8] sm:$0xf] }
  0x98   : > { %404 = vst [vmem:[%s3360_s8 + $0x7c] sm:$0xf] %v403_v31 }
  0x99   : > { %406 = vst [vmem:[%s3360_s8 + $0x80] sm:$0xf] %v405_v32 }
  0x9a   : > { %408 = vst [vmem:[%s3360_s8 + $0x84] sm:$0xf] %v407_v33 }
  0x9b   : > { %410 = vst [vmem:[%s3360_s8 + $0x88] sm:$0xf] %v409_v34 }
  0x9c   : > { %412 = vst [vmem:[%s3360_s8 + $0x8c] sm:$0xf] %v411_v35 }
  0x9d   : > { %414 = vst [vmem:[%s3360_s8 + $0x90] sm:$0xf] %v413_v36 }
  0x9e   : > { %416 = vst [vmem:[%s3360_s8 + $0x94] sm:$0xf] %v415_v37 }
  0x9f   : > { %418 = vst [vmem:[%s3360_s8 + $0x98] sm:$0xf] %v417_v38 }
  0xa0   : > { %420 = vst [vmem:[%s3360_s8 + $0x9c] sm:$0xf] %v419_v39 }
  0xa1   : > { %422 = vst [vmem:[%s3360_s8 + $0xa0] sm:$0xf] %v421_v40 }
  0xa2   : > { %424 = vst [vmem:[%s3360_s8 + $0xa4] sm:$0xf] %v423_v41 }
  0xa3   : > { %426 = vst [vmem:[%s3360_s8 + $0xa8] sm:$0xf] %v425_v42 }
  0xa4   : > { %428 = vst [vmem:[%s3360_s8 + $0xac] sm:$0xf] %v427_v43 }
  0xa5   : > { %430 = vst [vmem:[%s3360_s8 + $0xb0] sm:$0xf] %v429_v44 }
  0xa6   : > { %432 = vst [vmem:[%s3360_s8 + $0xb4] sm:$0xf] %v431_v45 }
  0xa7   : > { %434 = vst [vmem:[%s3360_s8 + $0xb8] sm:$0xf] %v433_v46 }
  0xa8   : > { %436 = vst [vmem:[%s3360_s8 + $0xbc] sm:$0xf] %v435_v47 }
  0xa9   : > { %438 = vst [vmem:[%s3360_s8 + $0xc0] sm:$0xf] %v437_v48 }
  0xaa   : > { %440 = vst [vmem:[%s3360_s8 + $0xc4] sm:$0xf] %v439_v49 }
  0xab   : > { %442 = vst [vmem:[%s3360_s8 + $0xc8] sm:$0xf] %v441_v50 }
  0xac   : > { %444 = vst [vmem:[%s3360_s8 + $0xcc] sm:$0xf] %v443_v51 }
  0xad   : > { %446 = vst [vmem:[%s3360_s8 + $0xd0] sm:$0xf] %v445_v52 }
  0xae   : > { %448 = vst [vmem:[%s3360_s8 + $0xd4] sm:$0xf] %v447_v53 }
  0xaf   : > { %450 = vst [vmem:[%s3360_s8 + $0xd8] sm:$0xf] %v449_v54 }
  0xb0   : > { %452 = vst [vmem:[%s3360_s8 + $0xdc] sm:$0xf] %v451_v55 }
  0xb1   : > { %454 = vst [vmem:[%s3360_s8 + $0xe0] sm:$0xf] %v453_v56 }
  0xb2   : > { %456 = vst [vmem:[%s3360_s8 + $0xe4] sm:$0xf] %v455_v57 }
  0xb3   : > { %458 = vst [vmem:[%s3360_s8 + $0xe8] sm:$0xf] %v457_v58 }
  0xb4   : > { %460 = vst [vmem:[%s3360_s8 + $0xec] sm:$0xf] %v459_v59 }
  0xb5   : > { %462 = vst [vmem:[%s3360_s8 + $0xf0] sm:$0xf] %v461_v60 }
  0xb6   : > { %464 = vst [vmem:[%s3360_s8 + $0xf4] sm:$0xf] %v463_v61 }
  0xb7   : > { %466 = vst [vmem:[%s3360_s8 + $0xf8] sm:$0xf] %v465_v62 }
  0xb8   : > { %468 = vst [vmem:[%s3360_s8 + $0xfc] sm:$0xf] %v467_v63 }
  0xb9 PF: > { %p2269_p1 = scmp.ge.s32.totalorder %s3067_s24, 1  ;;  %p625_p2 = scmp.lt.s32.totalorder %s3067_s24, 49 }
  0xbb   : > { %p626_p3 = pnand %p2269_p1, %p625_p2 }
  0xbc   : > { %s632_s11 = sand.u32 (!%p626_p3), 1, %s3035_s16   ;;  %s639_s5 = sand.u32 (!%p626_p3), 1, %s3027_s14  }
  0xbd   : > { %629 = sbr.rel (%p626_p3) target bundleno = 722 (0x2d2), region = 88  ;;  %s2270_s25 = sshll.u32 (!%p626_p3), %s632_s11, 9 }
  0xbe   : > { %s2271_s26 = sshll.u32 (!%p626_p3), %s639_s5, 8  ;;  %s665_s27 = sand.u32 (!%p626_p3), 1, %s3019_s12  }
  0xbf   : > { %p671_p4 = scmp.lt.s32.totalorder (!%p626_p3), %s3047_s19, 1  ;;  %s2272_s29 = sshll.u32 (!%p626_p3), %s665_s27, 7 }
  0xc0   : > { %s3500_s8 = scalar_lea.vmem (!%p626_p3), [#allocation3], %s2270_s25  ;;  %s3502_s0 = scalar_lea.vmem (!%p626_p3), [#allocation4], %s2271_s26 }
  0xc1   : > { %s3504_s1 = scalar_lea.vmem (!%p626_p3), [#allocation5], %s2272_s29  ;;  %p2273_p5 = scmp.ne.s32.totalorder (!%p626_p3), %s3043_s18, 0 }
  0xc2   : > { %s3494_s30 = scalar_select %p671_p4, %s3047_s19, 1 }
  0xc3   : > { %678 = sbr.rel (%p2273_p5) target bundleno = 233 (0xe9), region = 100 }
  0xc4   : > { %s673_s10 = scalar_lea.vmem %s3843_s2, %s3494_s30 }
  0xc8   : > { %v3069_v0 = vmov 0.0  }
  0xc9   : > { %679 = vst [vmem:[#allocation2 + $0xb0] sm:$0xff] %v3069_v0 }
  0xca   : > { %680 = vst [vmem:[#allocation2] sm:$0xff] %v3069_v0 }
  0xcb   : > { %681 = vst [vmem:[#allocation2 + $0xd8] sm:$0xff] %v3069_v0 }
  0xcc   : > { %682 = vst [vmem:[#allocation2 + $0x18] sm:$0xff] %v3069_v0 }
  0xcd   : > { %683 = vst [vmem:[#allocation2 + $0x50] sm:$0xff] %v3069_v0 }
  0xce   : > { %684 = vst [vmem:[#allocation2 + $0x68] sm:$0xff] %v3069_v0 }
  0xcf   : > { %685 = vst [vmem:[#allocation2 + $0x30] sm:$0xff] %v3069_v0 }
  0xd0   : > { %686 = vst [vmem:[#allocation2 + $0x48] sm:$0xff] %v3069_v0 }
  0xd1   : > { %687 = vst [vmem:[#allocation2 + $0x80] sm:$0xff] %v3069_v0 }
  0xd2   : > { %688 = vst [vmem:[#allocation2 + $0x88] sm:$0xff] %v3069_v0 }
  0xd3   : > { %689 = vst [vmem:[#allocation2 + $0xe8] sm:$0xff] %v3069_v0 }
  0xd4   : > { %690 = vst [vmem:[#allocation2 + $0xb8] sm:$0xff] %v3069_v0 }
  0xd5   : > { %691 = vst [vmem:[#allocation2 + $0x60] sm:$0xff] %v3069_v0 }
  0xd6   : > { %692 = vst [vmem:[#allocation2 + $0xf0] sm:$0xff] %v3069_v0 }
  0xd7   : > { %693 = vst [vmem:[#allocation2 + $0x8] sm:$0xff] %v3069_v0 }
  0xd8   : > { %694 = vst [vmem:[#allocation2 + $0x78] sm:$0xff] %v3069_v0 }
  0xd9   : > { %695 = vst [vmem:[#allocation2 + $0x38] sm:$0xff] %v3069_v0 }
  0xda   : > { %696 = vst [vmem:[#allocation2 + $0x58] sm:$0xff] %v3069_v0 }
  0xdb   : > { %697 = vst [vmem:[#allocation2 + $0x40] sm:$0xff] %v3069_v0 }
  0xdc   : > { %698 = vst [vmem:[#allocation2 + $0xc8] sm:$0xff] %v3069_v0 }
  0xdd   : > { %699 = vst [vmem:[#allocation2 + $0xe0] sm:$0xff] %v3069_v0 }
  0xde   : > { %700 = vst [vmem:[#allocation2 + $0x90] sm:$0xff] %v3069_v0 }
  0xdf   : > { %701 = vst [vmem:[#allocation2 + $0x70] sm:$0xff] %v3069_v0 }
  0xe0   : > { %702 = vst [vmem:[#allocation2 + $0xc0] sm:$0xff] %v3069_v0 }
  0xe1   : > { %703 = vst [vmem:[#allocation2 + $0xa8] sm:$0xff] %v3069_v0 }
  0xe2   : > { %704 = vst [vmem:[#allocation2 + $0xd0] sm:$0xff] %v3069_v0 }
  0xe3   : > { %705 = vst [vmem:[#allocation2 + $0x10] sm:$0xff] %v3069_v0 }
  0xe4   : > { %706 = vst [vmem:[#allocation2 + $0x28] sm:$0xff] %v3069_v0 }
  0xe5   : > { %707 = vst [vmem:[#allocation2 + $0xa0] sm:$0xff] %v3069_v0 }
  0xe6   : > { %708 = vst [vmem:[#allocation2 + $0xf8] sm:$0xff] %v3069_v0 }
  0xe7   : > { %709 = vst [vmem:[#allocation2 + $0x20] sm:$0xff] %v3069_v0 }
  0xe8   : > { %710 = vst [vmem:[#allocation2 + $0x98] sm:$0xff] %v3069_v0 }
  0xe9 PF: > { %v2738_v1 = vld [vmem:[%s3502_s0 + $0x38] sm:$0xff]  ;;  %v2737_v5 = vld [vmem:[%s3502_s0 + $0x30] sm:$0xff]  ;;  %v2736_v9 = vld [vmem:[%s3502_s0 + $0x28] sm:$0xff]  ;;  %p2658_p6 = scmp.ne.s32.totalorder %s3043_s18, 3 }
  0xea   : > { %v2746_v2 = vld [vmem:[%s3502_s0 + $0x78] sm:$0xff]  ;;  %1383 = vmatpush.bf16.msra.mxu0 %v2738_v1  ;;  %v2745_v6 = vld [vmem:[%s3502_s0 + $0x70] sm:$0xff]  ;;  %v2744_v10 = vld [vmem:[%s3502_s0 + $0x68] sm:$0xff] }
  0xeb   : > { %v2754_v3 = vld [vmem:[%s3502_s0 + $0xb8] sm:$0xff]  ;;  %1472 = vmatpush.bf16.msra.mxu1 %v2746_v2  ;;  %v2753_v7 = vld [vmem:[%s3502_s0 + $0xb0] sm:$0xff]  ;;  %v2752_v11 = vld [vmem:[%s3502_s0 + $0xa8] sm:$0xff] }
  0xec   : > { %v2762_v4 = vld [vmem:[%s3502_s0 + $0xf8] sm:$0xff]  ;;  %1561 = vmatpush.bf16.msra.mxu2 %v2754_v3  ;;  %v2761_v8 = vld [vmem:[%s3502_s0 + $0xf0] sm:$0xff]  ;;  %v2760_v12 = vld [vmem:[%s3502_s0 + $0xe8] sm:$0xff] }
  0xed   : > { %1650 = vmatpush.bf16.msra.mxu3 %v2762_v4  ;;  %v2735_v13 = vld [vmem:[%s3502_s0 + $0x20] sm:$0xff]  ;;  %v2734_v17 = vld [vmem:[%s3502_s0 + $0x18] sm:$0xff]  ;;  %v2733_v21 = vld [vmem:[%s3502_s0 + $0x10] sm:$0xff] }
  0xee   : > { %1384 = vmatpush.bf16.msra.mxu0 %v2737_v5  ;;  %v2743_v14 = vld [vmem:[%s3502_s0 + $0x60] sm:$0xff]  ;;  %v2742_v18 = vld [vmem:[%s3502_s0 + $0x58] sm:$0xff]  ;;  %v2741_v22 = vld [vmem:[%s3502_s0 + $0x50] sm:$0xff] }
  0xef   : > { %1473 = vmatpush.bf16.msra.mxu1 %v2745_v6  ;;  %v2751_v15 = vld [vmem:[%s3502_s0 + $0xa0] sm:$0xff]  ;;  %v2750_v19 = vld [vmem:[%s3502_s0 + $0x98] sm:$0xff]  ;;  %v2749_v23 = vld [vmem:[%s3502_s0 + $0x90] sm:$0xff] }
  0xf0   : > { %1562 = vmatpush.bf16.msra.mxu2 %v2753_v7  ;;  %v2759_v16 = vld [vmem:[%s3502_s0 + $0xe0] sm:$0xff]  ;;  %v2758_v20 = vld [vmem:[%s3502_s0 + $0xd8] sm:$0xff]  ;;  %v2757_v24 = vld [vmem:[%s3502_s0 + $0xd0] sm:$0xff] }
  0xf1   : > { %1651 = vmatpush.bf16.msra.mxu3 %v2761_v8  ;;  %v2732_v25 = vld [vmem:[%s3502_s0 + $0x8] sm:$0xff]  ;;  %v2731_v29 = vld [vmem:[%s3502_s0] sm:$0xff]  ;;  %v2669_v34 = vld [vmem:[%s3500_s8 + $0xc] sm:$0xf0] }
  0xf2   : > { %1385 = vmatpush.bf16.msra.mxu0 %v2736_v9  ;;  %v2740_v26 = vld [vmem:[%s3502_s0 + $0x48] sm:$0xff]  ;;  %v2739_v30 = vld [vmem:[%s3502_s0 + $0x40] sm:$0xff]  ;;  %v2278_v36 = vld [vmem:[%s3500_s8 + $0x10] sm:$0xf0] }
  0xf3   : > { %1474 = vmatpush.bf16.msra.mxu1 %v2744_v10  ;;  %v2748_v27 = vld [vmem:[%s3502_s0 + $0x88] sm:$0xff]  ;;  %v2747_v31 = vld [vmem:[%s3502_s0 + $0x80] sm:$0xff]  ;;  %v2670_v38 = vld [vmem:[%s3500_s8 + $0x14] sm:$0xf0] }
  0xf4   : > { %1563 = vmatpush.bf16.msra.mxu2 %v2752_v11  ;;  %v2756_v28 = vld [vmem:[%s3502_s0 + $0xc8] sm:$0xff]  ;;  %v2755_v32 = vld [vmem:[%s3502_s0 + $0xc0] sm:$0xff]  ;;  %v2286_v40 = vld [vmem:[%s3500_s8 + $0x18] sm:$0xf0] }
  0xf5   : > { %1652 = vmatpush.bf16.msra.mxu3 %v2760_v12  ;;  %v2276_v33 = vld [vmem:[%s3500_s8] sm:$0xf]  ;;  %v2667_v35 = vld [vmem:[%s3500_s8 + $0x4] sm:$0xf]  ;;  %v2284_v37 = vld [vmem:[%s3500_s8 + $0x8] sm:$0xf] }
  0xf6   : > { %1386 = vmatpush.bf16.msra.mxu0 %v2735_v13  ;;  %v2668_v39 = vld [vmem:[%s3500_s8 + $0xc] sm:$0xf]  ;;  %v2277_v41 = vor.u32 %v2669_v34, %v2276_v33  ;;  %v2281_v42 = vor.u32 %v2667_v35, %v2278_v36  ;;  %v2285_v43 = vor.u32 %v2670_v38, %v2284_v37  ;;  %v2292_v45 = vld [vmem:[%s3500_s8 + $0x20] sm:$0xf]  ;;  %v2673_v46 = vld [vmem:[%s3500_s8 + $0x2c] sm:$0xf0] }
  0xf7   : > { %1475 = vmatpush.bf16.msra.mxu1 %v2743_v14  ;;  %v2289_v44 = vor.u32 %v2668_v39, %v2286_v40  ;;  %v2671_v47 = vld [vmem:[%s3500_s8 + $0x24] sm:$0xf]  ;;  %v2294_v48 = vld [vmem:[%s3500_s8 + $0x30] sm:$0xf0]  ;;  %v2300_v49 = vld [vmem:[%s3500_s8 + $0x28] sm:$0xf]  ;;  %v2293_v53 = vor.u32 %v2673_v46, %v2292_v45 }
  0xf8   : > { %1564 = vmatpush.bf16.msra.mxu2 %v2751_v15  ;;  %v2674_v50 = vld [vmem:[%s3500_s8 + $0x34] sm:$0xf0]  ;;  %v2672_v51 = vld [vmem:[%s3500_s8 + $0x2c] sm:$0xf]  ;;  %v2302_v52 = vld [vmem:[%s3500_s8 + $0x38] sm:$0xf0]  ;;  %v2297_v54 = vor.u32 %v2671_v47, %v2294_v48 }
  0xf9   : > { %1653 = vmatpush.bf16.msra.mxu3 %v2759_v16  ;;  %v2301_v55 = vor.u32 %v2674_v50, %v2300_v49  ;;  %v2305_v56 = vor.u32 %v2672_v51, %v2302_v52  ;;  %v2308_v57 = vld [vmem:[%s3500_s8 + $0x40] sm:$0xf]  ;;  %v2677_v58 = vld [vmem:[%s3500_s8 + $0x4c] sm:$0xf0]  ;;  %v2675_v59 = vld [vmem:[%s3500_s8 + $0x44] sm:$0xf] }
  0xfa   : > { %1387 = vmatpush.bf16.msra.mxu0 %v2734_v17  ;;  %v2310_v60 = vld [vmem:[%s3500_s8 + $0x50] sm:$0xf0]  ;;  %v2316_v61 = vld [vmem:[%s3500_s8 + $0x48] sm:$0xf]  ;;  %v2678_v62 = vld [vmem:[%s3500_s8 + $0x54] sm:$0xf0]  ;;  %v2309_v1 = vor.u32 %v2677_v58, %v2308_v57 }
  0xfb   : > { %1476 = vmatpush.bf16.msra.mxu1 %v2742_v18  ;;  %v2676_v63 = vld [vmem:[%s3500_s8 + $0x4c] sm:$0xf]  ;;  %v2318_v0 = vld [vmem:[%s3500_s8 + $0x58] sm:$0xf0]  ;;  %v2313_v2 = vor.u32 %v2675_v59, %v2310_v60  ;;  %v2317_v3 = vor.u32 %v2678_v62, %v2316_v61  ;;  %v2324_v5 = vld [vmem:[%s3500_s8 + $0x60] sm:$0xf] }
  0xfc   : > { %1565 = vmatpush.bf16.msra.mxu2 %v2750_v19  ;;  %v2321_v4 = vor.u32 %v2676_v63, %v2318_v0  ;;  %v2681_v6 = vld [vmem:[%s3500_s8 + $0x6c] sm:$0xf0]  ;;  %v2679_v7 = vld [vmem:[%s3500_s8 + $0x64] sm:$0xf]  ;;  %v2326_v8 = vld [vmem:[%s3500_s8 + $0x70] sm:$0xf0] }
  0xfd   : > { %1654 = vmatpush.bf16.msra.mxu3 %v2758_v20  ;;  %v2332_v9 = vld [vmem:[%s3500_s8 + $0x68] sm:$0xf]  ;;  %v2682_v10 = vld [vmem:[%s3500_s8 + $0x74] sm:$0xf0]  ;;  %v2680_v11 = vld [vmem:[%s3500_s8 + $0x6c] sm:$0xf]  ;;  %v2325_v13 = vor.u32 %v2681_v6, %v2324_v5  ;;  %v2329_v14 = vor.u32 %v2679_v7, %v2326_v8 }
  0xfe   : > { %1388 = vmatpush.bf16.msra.mxu0 %v2733_v21  ;;  %v2334_v12 = vld [vmem:[%s3500_s8 + $0x78] sm:$0xf0]  ;;  %v2333_v15 = vor.u32 %v2682_v10, %v2332_v9  ;;  %v2340_v17 = vld [vmem:[%s3500_s8 + $0x80] sm:$0xf]  ;;  %v2685_v18 = vld [vmem:[%s3500_s8 + $0x8c] sm:$0xf0] }
  0xff   : > { %1477 = vmatpush.bf16.msra.mxu1 %v2741_v22  ;;  %v2337_v16 = vor.u32 %v2680_v11, %v2334_v12  ;;  %v2683_v19 = vld [vmem:[%s3500_s8 + $0x84] sm:$0xf]  ;;  %v2342_v20 = vld [vmem:[%s3500_s8 + $0x90] sm:$0xf0]  ;;  %v2348_v21 = vld [vmem:[%s3500_s8 + $0x88] sm:$0xf] }
 0x100   : > { %1566 = vmatpush.bf16.msra.mxu2 %v2749_v23  ;;  %v2686_v22 = vld [vmem:[%s3500_s8 + $0x94] sm:$0xf0]  ;;  %v2684_v23 = vld [vmem:[%s3500_s8 + $0x8c] sm:$0xf]  ;;  %v2364_v33 = vld [vmem:[%s3500_s8 + $0xa8] sm:$0xf] }
 0x101   : > { %1655 = vmatpush.bf16.msra.mxu3 %v2757_v24  ;;  %v2350_v24 = vld [vmem:[%s3500_s8 + $0x98] sm:$0xf0]  ;;  %v2690_v34 = vld [vmem:[%s3500_s8 + $0xb4] sm:$0xf0]  ;;  %v2688_v35 = vld [vmem:[%s3500_s8 + $0xac] sm:$0xf] }
 0x102   : > { %1389 = vmatpush.bf16.msra.mxu0 %v2732_v25  ;;  %v2341_v25 = vor.u32 %v2685_v18, %v2340_v17  ;;  %v2366_v36 = vld [vmem:[%s3500_s8 + $0xb8] sm:$0xf0]  ;;  %v2365_v39 = vor.u32 %v2690_v34, %v2364_v33  ;;  %v2380_v45 = vld [vmem:[%s3500_s8 + $0xc8] sm:$0xf]  ;;  %v2694_v46 = vld [vmem:[%s3500_s8 + $0xd4] sm:$0xf0] }
 0x103   : > { %1478 = vmatpush.bf16.msra.mxu1 %v2740_v26  ;;  %v2345_v26 = vor.u32 %v2683_v19, %v2342_v20  ;;  %v2369_v40 = vor.u32 %v2688_v35, %v2366_v36  ;;  %v2692_v47 = vld [vmem:[%s3500_s8 + $0xcc] sm:$0xf]  ;;  %v2382_v48 = vld [vmem:[%s3500_s8 + $0xd8] sm:$0xf0]  ;;  %v2381_v51 = vor.u32 %v2694_v46, %v2380_v45  ;;  %v2396_v57 = vld [vmem:[%s3500_s8 + $0xe8] sm:$0xf] }
 0x104   : > { %1567 = vmatpush.bf16.msra.mxu2 %v2748_v27  ;;  %v2349_v27 = vor.u32 %v2686_v22, %v2348_v21  ;;  %v2385_v52 = vor.u32 %v2692_v47, %v2382_v48  ;;  %v2698_v58 = vld [vmem:[%s3500_s8 + $0xf4] sm:$0xf0]  ;;  %v2696_v59 = vld [vmem:[%s3500_s8 + $0xec] sm:$0xf]  ;;  %v2398_v60 = vld [vmem:[%s3500_s8 + $0xf8] sm:$0xf0] }
 0x105   : > { %1656 = vmatpush.bf16.msra.mxu3 %v2756_v28  ;;  %v2353_v28 = vor.u32 %v2684_v23, %v2350_v24  ;;  %v2397_v63 = vor.u32 %v2698_v58, %v2396_v57  ;;  %v2401_v0 = vor.u32 %v2696_v59, %v2398_v60  ;;  %v2412_v5 = vld [vmem:[%s3500_s8 + $0x108] sm:$0xf]  ;;  %v2702_v6 = vld [vmem:[%s3500_s8 + $0x114] sm:$0xf0]  ;;  %v2700_v7 = vld [vmem:[%s3500_s8 + $0x10c] sm:$0xf] }
 0x106   : > { %1390 = vmatpush.bf16.msra.mxu0 %v2731_v29  ;;  %v2356_v29 = vld [vmem:[%s3500_s8 + $0xa0] sm:$0xf]  ;;  %v2414_v8 = vld [vmem:[%s3500_s8 + $0x118] sm:$0xf0]  ;;  %v711_v21 = vld [vmem:[#allocation2 + $0xb0] sm:$0xff] }
 0x107   : > { %1479 = vmatpush.bf16.msra.mxu1 %v2739_v30  ;;  %v2689_v30 = vld [vmem:[%s3500_s8 + $0xac] sm:$0xf0]  ;;  %v2420_v23 = vld [vmem:[%s3500_s8 + $0x120] sm:$0xf]  ;;  %v2438_v57 = vld [vmem:[%s3500_s8 + $0x150] sm:$0xf0] }
 0x108   : > { %1568 = vmatpush.bf16.msra.mxu2 %v2747_v31  ;;  %v2687_v31 = vld [vmem:[%s3500_s8 + $0xa4] sm:$0xf]  ;;  %v2357_v37 = vor.u32 %v2689_v30, %v2356_v29  ;;  %v2705_v24 = vld [vmem:[%s3500_s8 + $0x12c] sm:$0xf0]  ;;  %v2706_v29 = vld [vmem:[%s3500_s8 + $0x134] sm:$0xf0] }
 0x109   : > { %1657 = vmatpush.bf16.msra.mxu3 %v2755_v32  ;;  %1391 = vmatmul.bf16.vlgmr.msra.gmra.mxu0 %v2277_v41  ;;  %v2358_v32 = vld [vmem:[%s3500_s8 + $0xb0] sm:$0xf0]  ;;  %v2372_v41 = vld [vmem:[%s3500_s8 + $0xc0] sm:$0xf]  ;;  %v2704_v30 = vld [vmem:[%s3500_s8 + $0x12c] sm:$0xf]  ;;  %v2421_v35 = vor.u32 %v2705_v24, %v2420_v23 }
 0x10a   : > { %1480 = vmatmul.bf16.vlgmr.msra.gmra.mxu1 %v2281_v42  ;;  %v2361_v38 = vor.u32 %v2687_v31, %v2358_v32  ;;  %v2693_v42 = vld [vmem:[%s3500_s8 + $0xcc] sm:$0xf0]  ;;  %v2430_v31 = vld [vmem:[%s3500_s8 + $0x138] sm:$0xf0]  ;;  %v2444_v58 = vld [vmem:[%s3500_s8 + $0x148] sm:$0xf] }
 0x10b   : > { %1569 = vmatmul.bf16.vlgmr.msra.gmra.mxu2 %v2285_v43  ;;  %v2691_v43 = vld [vmem:[%s3500_s8 + $0xc4] sm:$0xf]  ;;  %v2373_v49 = vor.u32 %v2693_v42, %v2372_v41  ;;  %v2433_v41 = vor.u32 %v2704_v30, %v2430_v31  ;;  %v2710_v59 = vld [vmem:[%s3500_s8 + $0x154] sm:$0xf0]  ;;  %v2708_v60 = vld [vmem:[%s3500_s8 + $0x14c] sm:$0xf] }
 0x10c   : > { %1658 = vmatmul.bf16.vlgmr.msra.gmra.mxu3 %v2289_v44  ;;  %v2374_v44 = vld [vmem:[%s3500_s8 + $0xd0] sm:$0xf0]  ;;  %v712_v42 = vld [vmem:[#allocation2] sm:$0xff]  ;;  %v2460_v24 = vld [vmem:[%s3500_s8 + $0x168] sm:$0xf] }
 0x10d   : > { %v2377_v50 = vor.u32 %v2691_v43, %v2374_v44  ;;  %v2454_v23 = vld [vmem:[%s3500_s8 + $0x170] sm:$0xf0] }
 0x119   : > { %1396 = vmatmul.bf16.gmra.mxu0 %v2293_v53  ;;  %v2388_v53 = vld [vmem:[%s3500_s8 + $0xe0] sm:$0xf] }
 0x11a   : > { %1485 = vmatmul.bf16.gmra.mxu1 %v2297_v54  ;;  %v2697_v54 = vld [vmem:[%s3500_s8 + $0xec] sm:$0xf0] }
 0x11b   : > { %1574 = vmatmul.bf16.gmra.mxu2 %v2301_v55  ;;  %v2695_v55 = vld [vmem:[%s3500_s8 + $0xe4] sm:$0xf]  ;;  %v2389_v61 = vor.u32 %v2697_v54, %v2388_v53  ;;  %v2436_v53 = vld [vmem:[%s3500_s8 + $0x140] sm:$0xf]  ;;  %v2709_v54 = vld [vmem:[%s3500_s8 + $0x14c] sm:$0xf0] }
 0x11c   : > { %1663 = vmatmul.bf16.gmra.mxu3 %v2305_v56  ;;  %v2390_v56 = vld [vmem:[%s3500_s8 + $0xf0] sm:$0xf0] }
 0x11d   : > { %v2393_v62 = vor.u32 %v2695_v55, %v2390_v56  ;;  %v2707_v56 = vld [vmem:[%s3500_s8 + $0x144] sm:$0xf] }
 0x129   : > { %1401 = vmatmul.bf16.gmra.mxu0 %v2309_v1  ;;  %v2404_v1 = vld [vmem:[%s3500_s8 + $0x100] sm:$0xf] }
 0x12a   : > { %1490 = vmatmul.bf16.gmra.mxu1 %v2313_v2  ;;  %v2701_v2 = vld [vmem:[%s3500_s8 + $0x10c] sm:$0xf0] }
 0x12b   : > { %1579 = vmatmul.bf16.gmra.mxu2 %v2317_v3  ;;  %v2699_v3 = vld [vmem:[%s3500_s8 + $0x104] sm:$0xf]  ;;  %v2405_v9 = vor.u32 %v2701_v2, %v2404_v1  ;;  %v2437_v1 = vor.u32 %v2709_v54, %v2436_v53  ;;  %v2441_v2 = vor.u32 %v2707_v56, %v2438_v57  ;;  %v2470_v53 = vld [vmem:[%s3500_s8 + $0x190] sm:$0xf0]  ;;  %v2476_v54 = vld [vmem:[%s3500_s8 + $0x188] sm:$0xf] }
 0x12c   : > { %1668 = vmatmul.bf16.gmra.mxu3 %v2321_v4  ;;  %v2406_v4 = vld [vmem:[%s3500_s8 + $0x110] sm:$0xf0]  ;;  %v2716_v56 = vld [vmem:[%s3500_s8 + $0x18c] sm:$0xf]  ;;  %v2478_v57 = vld [vmem:[%s3500_s8 + $0x198] sm:$0xf0] }
 0x12d   : > { %v2409_v10 = vor.u32 %v2699_v3, %v2406_v4 }
 0x139   : > { %1406 = vmatmul.bf16.gmra.mxu0 %v2325_v13  ;;  %v2413_v13 = vor.u32 %v2702_v6, %v2412_v5  ;;  %v2445_v6 = vor.u32 %v2710_v59, %v2444_v58 }
 0x13a   : > { %1495 = vmatmul.bf16.gmra.mxu1 %v2329_v14  ;;  %v2417_v14 = vor.u32 %v2700_v7, %v2414_v8  ;;  %v714_v8 = vld [vmem:[#allocation2 + $0x18] sm:$0xff] }
 0x13b   : > { %1584 = vmatmul.bf16.gmra.mxu2 %v2333_v15 }
 0x13c   : > { %1673 = vmatmul.bf16.gmra.mxu3 %v2337_v16 }
 0x149   : > { %1411 = vmatmul.bf16.gmra.mxu0 %v2341_v25 }
 0x14a   : > { %1500 = vmatmul.bf16.gmra.mxu1 %v2345_v26  ;;  %v2703_v26 = vld [vmem:[%s3500_s8 + $0x124] sm:$0xf] }
 0x14b   : > { %1589 = vmatmul.bf16.gmra.mxu2 %v2349_v27  ;;  %v2422_v27 = vld [vmem:[%s3500_s8 + $0x130] sm:$0xf0] }
 0x14c   : > { %1678 = vmatmul.bf16.gmra.mxu3 %v2353_v28  ;;  %v2428_v28 = vld [vmem:[%s3500_s8 + $0x128] sm:$0xf]  ;;  %v2425_v36 = vor.u32 %v2703_v26, %v2422_v27  ;;  %v2712_v26 = vld [vmem:[%s3500_s8 + $0x16c] sm:$0xf]  ;;  %v2462_v27 = vld [vmem:[%s3500_s8 + $0x178] sm:$0xf0] }
 0x159   : > { %1416 = vmatmul.bf16.gmra.mxu0 %v2357_v37 }
 0x15a   : > { %1505 = vmatmul.bf16.gmra.mxu1 %v2361_v38 }
 0x15b   : > { %1594 = vmatmul.bf16.gmra.mxu2 %v2365_v39 }
 0x15c   : > { %1683 = vmatmul.bf16.gmra.mxu3 %v2369_v40  ;;  %v2429_v40 = vor.u32 %v2706_v29, %v2428_v28 }
 0x169   : > { %1421 = vmatmul.bf16.gmra.mxu0 %v2373_v49 }
 0x16a   : > { %1510 = vmatmul.bf16.gmra.mxu1 %v2377_v50 }
 0x16b   : > { %1599 = vmatmul.bf16.gmra.mxu2 %v2381_v51  ;;  %v713_v51 = vld [vmem:[#allocation2 + $0xd8] sm:$0xff] }
 0x16c   : > { %1688 = vmatmul.bf16.gmra.mxu3 %v2385_v52 }
 0x179   : > { %1426 = vmatmul.bf16.gmra.mxu0 %v2389_v61  ;;  %v2446_v61 = vld [vmem:[%s3500_s8 + $0x158] sm:$0xf0] }
 0x17a   : > { %1515 = vmatmul.bf16.gmra.mxu1 %v2393_v62  ;;  %v2449_v7 = vor.u32 %v2708_v60, %v2446_v61 }
 0x17b   : > { %1604 = vmatmul.bf16.gmra.mxu2 %v2397_v63 }
 0x17c   : > { %1693 = vmatmul.bf16.gmra.mxu3 %v2401_v0 }
 0x186   : > { %v1392_v11 = vpop.f32.mrf.mxu0 }
 0x187   : > { %v1481_v12 = vpop.f32.mrf.mxu1 }
 0x188   : > { %v1482_v15 = vadd.f32 %v1481_v12, %v1392_v11 }
 0x189   : > { %1431 = vmatmul.bf16.gmra.mxu0 %v2405_v9 }
 0x18a   : > { %1520 = vmatmul.bf16.gmra.mxu1 %v2409_v10 }
 0x18b   : > { %1609 = vmatmul.bf16.gmra.mxu2 %v2413_v13 }
 0x18c   : > { %1698 = vmatmul.bf16.gmra.mxu3 %v2417_v14 }
 0x18e   : > { %v1570_v16 = vpop.f32.mrf.mxu2  ;;  %v1394_v19 = vpop.f32.mrf.mxu0 }
 0x18f   : > { %v1659_v17 = vpop.f32.mrf.mxu3  ;;  %v1571_v18 = vadd.f32 %v1570_v16, %v1482_v15  ;;  %v1483_v20 = vpop.f32.mrf.mxu1 }
 0x190   : > { %v1484_v32 = vadd.f32 %v1483_v20, %v1394_v19  ;;  %v2452_v19 = vld [vmem:[%s3500_s8 + $0x160] sm:$0xf]  ;;  %v2713_v20 = vld [vmem:[%s3500_s8 + $0x16c] sm:$0xf0] }
 0x191   : > { %v1660_v22 = vadd.f32 %v1659_v17, %v1571_v18  ;;  %v715_v17 = vld [vmem:[#allocation2 + $0x50] sm:$0xff]  ;;  %v2453_v31 = vor.u32 %v2713_v20, %v2452_v19  ;;  %v2492_v20 = vld [vmem:[%s3500_s8 + $0x1a8] sm:$0xf] }
 0x192   : > { %v2486_v19 = vld [vmem:[%s3500_s8 + $0x1b0] sm:$0xf0] }
 0x193   : > { %v1739_v25 = vadd.f32 %v1660_v22, %v711_v21  ;;  %v2711_v22 = vld [vmem:[%s3500_s8 + $0x164] sm:$0xf] }
 0x195   : > { %1771 = vst [vmem:[#allocation2 + $0xb0] sm:$0xff] %v1739_v25  ;;  %v2714_v25 = vld [vmem:[%s3500_s8 + $0x174] sm:$0xf0] }
 0x196   : > { %v1572_v33 = vpop.f32.mrf.mxu2  ;;  %v1397_v38 = vpop.f32.mrf.mxu0 }
 0x197   : > { %v1661_v34 = vpop.f32.mrf.mxu3  ;;  %v1573_v37 = vadd.f32 %v1572_v33, %v1484_v32  ;;  %v1486_v39 = vpop.f32.mrf.mxu1  ;;  %v2457_v32 = vor.u32 %v2711_v22, %v2454_v23  ;;  %v2720_v22 = vld [vmem:[%s3500_s8 + $0x1ac] sm:$0xf]  ;;  %v2494_v23 = vld [vmem:[%s3500_s8 + $0x1b8] sm:$0xf0] }
 0x198   : > { %v1487_v45 = vadd.f32 %v1486_v39, %v1397_v38  ;;  %v716_v38 = vld [vmem:[#allocation2 + $0x68] sm:$0xff] }
 0x199   : > { %v1662_v43 = vadd.f32 %v1661_v34, %v1573_v37  ;;  %1436 = vmatmul.bf16.gmra.mxu0 %v2421_v35  ;;  %v2465_v37 = vor.u32 %v2712_v26, %v2462_v27 }
 0x19a   : > { %1525 = vmatmul.bf16.gmra.mxu1 %v2425_v36  ;;  %v2461_v36 = vor.u32 %v2714_v25, %v2460_v24 }
 0x19b   : > { %v1740_v44 = vadd.f32 %v1662_v43, %v712_v42  ;;  %1614 = vmatmul.bf16.gmra.mxu2 %v2429_v40 }
 0x19c   : > { %1703 = vmatmul.bf16.gmra.mxu3 %v2433_v41 }
 0x19d   : > { %1772 = vst [vmem:[#allocation2] sm:$0xff] %v1740_v44 }
 0x19e   : > { %v1575_v46 = vpop.f32.mrf.mxu2  ;;  %v1399_v49 = vpop.f32.mrf.mxu0 }
 0x19f   : > { %v1664_v47 = vpop.f32.mrf.mxu3  ;;  %v1576_v48 = vadd.f32 %v1575_v46, %v1487_v45  ;;  %v1488_v50 = vpop.f32.mrf.mxu1 }
 0x1a0   : > { %v1489_v62 = vadd.f32 %v1488_v50, %v1399_v49  ;;  %v2468_v49 = vld [vmem:[%s3500_s8 + $0x180] sm:$0xf]  ;;  %v2717_v50 = vld [vmem:[%s3500_s8 + $0x18c] sm:$0xf0] }
 0x1a1   : > { %v1665_v52 = vadd.f32 %v1664_v47, %v1576_v48  ;;  %v717_v47 = vld [vmem:[#allocation2 + $0x30] sm:$0xff]  ;;  %v2469_v61 = vor.u32 %v2717_v50, %v2468_v49  ;;  %v2508_v50 = vld [vmem:[%s3500_s8 + $0x1c8] sm:$0xf] }
 0x1a2   : > { %v2502_v49 = vld [vmem:[%s3500_s8 + $0x1d0] sm:$0xf0] }
 0x1a3   : > { %v1741_v55 = vadd.f32 %v1665_v52, %v713_v51  ;;  %v2715_v52 = vld [vmem:[%s3500_s8 + $0x184] sm:$0xf] }
 0x1a5   : > { %1773 = vst [vmem:[#allocation2 + $0xd8] sm:$0xff] %v1741_v55  ;;  %v2718_v55 = vld [vmem:[%s3500_s8 + $0x194] sm:$0xf0] }
 0x1a6   : > { %v1577_v63 = vpop.f32.mrf.mxu2  ;;  %v1402_v4 = vpop.f32.mrf.mxu0 }
 0x1a7   : > { %v1666_v0 = vpop.f32.mrf.mxu3  ;;  %v1578_v3 = vadd.f32 %v1577_v63, %v1489_v62  ;;  %v1491_v5 = vpop.f32.mrf.mxu1  ;;  %v2473_v62 = vor.u32 %v2715_v52, %v2470_v53  ;;  %v2724_v52 = vld [vmem:[%s3500_s8 + $0x1cc] sm:$0xf]  ;;  %v2510_v53 = vld [vmem:[%s3500_s8 + $0x1d8] sm:$0xf0] }
 0x1a8   : > { %v1492_v11 = vadd.f32 %v1491_v5, %v1402_v4  ;;  %v718_v4 = vld [vmem:[#allocation2 + $0x48] sm:$0xff] }
 0x1a9   : > { %v1667_v9 = vadd.f32 %v1666_v0, %v1578_v3  ;;  %1441 = vmatmul.bf16.gmra.mxu0 %v2437_v1  ;;  %v2481_v3 = vor.u32 %v2716_v56, %v2478_v57 }
 0x1aa   : > { %1530 = vmatmul.bf16.gmra.mxu1 %v2441_v2  ;;  %v2477_v2 = vor.u32 %v2718_v55, %v2476_v54 }
 0x1ab   : > { %v1742_v10 = vadd.f32 %v1667_v9, %v714_v8  ;;  %1619 = vmatmul.bf16.gmra.mxu2 %v2445_v6 }
 0x1ac   : > { %1708 = vmatmul.bf16.gmra.mxu3 %v2449_v7 }
 0x1ad   : > { %1774 = vst [vmem:[#allocation2 + $0x18] sm:$0xff] %v1742_v10 }
 0x1ae   : > { %v1580_v12 = vpop.f32.mrf.mxu2  ;;  %v1404_v15 = vpop.f32.mrf.mxu0 }
 0x1af   : > { %v1669_v13 = vpop.f32.mrf.mxu3  ;;  %v1581_v14 = vadd.f32 %v1580_v12, %v1492_v11  ;;  %v1493_v16 = vpop.f32.mrf.mxu1 }
 0x1b0   : > { %v1494_v28 = vadd.f32 %v1493_v16, %v1404_v15  ;;  %v2484_v15 = vld [vmem:[%s3500_s8 + $0x1a0] sm:$0xf]  ;;  %v2721_v16 = vld [vmem:[%s3500_s8 + $0x1ac] sm:$0xf0] }
 0x1b1   : > { %v1670_v18 = vadd.f32 %v1669_v13, %v1581_v14  ;;  %v719_v13 = vld [vmem:[#allocation2 + $0x80] sm:$0xff]  ;;  %v2485_v27 = vor.u32 %v2721_v16, %v2484_v15  ;;  %v2518_v15 = vld [vmem:[%s3500_s8 + $0x1f0] sm:$0xf0]  ;;  %v2524_v16 = vld [vmem:[%s3500_s8 + $0x1e8] sm:$0xf] }
 0x1b3   : > { %v1743_v21 = vadd.f32 %v1670_v18, %v715_v17  ;;  %v2719_v18 = vld [vmem:[%s3500_s8 + $0x1a4] sm:$0xf] }
 0x1b5   : > { %1775 = vst [vmem:[#allocation2 + $0x50] sm:$0xff] %v1743_v21  ;;  %v2722_v21 = vld [vmem:[%s3500_s8 + $0x1b4] sm:$0xf0] }
 0x1b6   : > { %v1582_v29 = vpop.f32.mrf.mxu2  ;;  %v1407_v34 = vpop.f32.mrf.mxu0 }
 0x1b7   : > { %v1671_v30 = vpop.f32.mrf.mxu3  ;;  %v1583_v33 = vadd.f32 %v1582_v29, %v1494_v28  ;;  %v1496_v35 = vpop.f32.mrf.mxu1  ;;  %v2489_v28 = vor.u32 %v2719_v18, %v2486_v19  ;;  %v2728_v18 = vld [vmem:[%s3500_s8 + $0x1ec] sm:$0xf]  ;;  %v2526_v19 = vld [vmem:[%s3500_s8 + $0x1f8] sm:$0xf0] }
 0x1b8   : > { %v1497_v41 = vadd.f32 %v1496_v35, %v1407_v34  ;;  %v720_v34 = vld [vmem:[#allocation2 + $0x88] sm:$0xff] }
 0x1b9   : > { %v1672_v39 = vadd.f32 %v1671_v30, %v1583_v33  ;;  %1446 = vmatmul.bf16.gmra.mxu0 %v2453_v31  ;;  %v2497_v33 = vor.u32 %v2720_v22, %v2494_v23 }
 0x1ba   : > { %1535 = vmatmul.bf16.gmra.mxu1 %v2457_v32  ;;  %v2493_v32 = vor.u32 %v2722_v21, %v2492_v20 }
 0x1bb   : > { %v1744_v40 = vadd.f32 %v1672_v39, %v716_v38  ;;  %1624 = vmatmul.bf16.gmra.mxu2 %v2461_v36 }
 0x1bc   : > { %1713 = vmatmul.bf16.gmra.mxu3 %v2465_v37 }
 0x1bd   : > { %1776 = vst [vmem:[#allocation2 + $0x68] sm:$0xff] %v1744_v40 }
 0x1be   : > { %v1585_v42 = vpop.f32.mrf.mxu2  ;;  %v1409_v45 = vpop.f32.mrf.mxu0 }
 0x1bf   : > { %v1674_v43 = vpop.f32.mrf.mxu3  ;;  %v1586_v44 = vadd.f32 %v1585_v42, %v1497_v41  ;;  %v1498_v46 = vpop.f32.mrf.mxu1 }
 0x1c0   : > { %v1499_v58 = vadd.f32 %v1498_v46, %v1409_v45  ;;  %v2500_v45 = vld [vmem:[%s3500_s8 + $0x1c0] sm:$0xf]  ;;  %v2725_v46 = vld [vmem:[%s3500_s8 + $0x1cc] sm:$0xf0] }
 0x1c1   : > { %v1675_v48 = vadd.f32 %v1674_v43, %v1586_v44  ;;  %v721_v43 = vld [vmem:[#allocation2 + $0xe8] sm:$0xff]  ;;  %v2501_v57 = vor.u32 %v2725_v46, %v2500_v45 }
 0x1c3   : > { %v1745_v51 = vadd.f32 %v1675_v48, %v717_v47  ;;  %v2723_v48 = vld [vmem:[%s3500_s8 + $0x1c4] sm:$0xf] }
 0x1c5   : > { %1777 = vst [vmem:[#allocation2 + $0x30] sm:$0xff] %v1745_v51  ;;  %v2726_v51 = vld [vmem:[%s3500_s8 + $0x1d4] sm:$0xf0] }
 0x1c6   : > { %v1587_v59 = vpop.f32.mrf.mxu2  ;;  %v1412_v0 = vpop.f32.mrf.mxu0 }
 0x1c7   : > { %v1676_v60 = vpop.f32.mrf.mxu3  ;;  %v1588_v63 = vadd.f32 %v1587_v59, %v1499_v58  ;;  %v1501_v1 = vpop.f32.mrf.mxu1  ;;  %v2505_v58 = vor.u32 %v2723_v48, %v2502_v49  ;;  %v726_v48 = vld [vmem:[#allocation2 + $0x78] sm:$0xff] }
 0x1c8   : > { %v1502_v7 = vadd.f32 %v1501_v1, %v1412_v0  ;;  %v722_v0 = vld [vmem:[#allocation2 + $0xb8] sm:$0xff] }
 0x1c9   : > { %v1677_v5 = vadd.f32 %v1676_v60, %v1588_v63  ;;  %1451 = vmatmul.bf16.gmra.mxu0 %v2469_v61  ;;  %v2513_v63 = vor.u32 %v2724_v52, %v2510_v53 }
 0x1ca   : > { %1540 = vmatmul.bf16.gmra.mxu1 %v2473_v62  ;;  %v2509_v62 = vor.u32 %v2726_v51, %v2508_v50 }
 0x1cb   : > { %v1746_v6 = vadd.f32 %v1677_v5, %v718_v4  ;;  %1629 = vmatmul.bf16.gmra.mxu2 %v2477_v2 }
 0x1cc   : > { %1718 = vmatmul.bf16.gmra.mxu3 %v2481_v3 }
 0x1cd   : > { %1778 = vst [vmem:[#allocation2 + $0x48] sm:$0xff] %v1746_v6 }
 0x1ce   : > { %v1590_v8 = vpop.f32.mrf.mxu2  ;;  %v1414_v11 = vpop.f32.mrf.mxu0 }
 0x1cf   : > { %v1679_v9 = vpop.f32.mrf.mxu3  ;;  %v1591_v10 = vadd.f32 %v1590_v8, %v1502_v7  ;;  %v1503_v12 = vpop.f32.mrf.mxu1 }
 0x1d0   : > { %v1504_v24 = vadd.f32 %v1503_v12, %v1414_v11  ;;  %v2516_v11 = vld [vmem:[%s3500_s8 + $0x1e0] sm:$0xf]  ;;  %v2729_v12 = vld [vmem:[%s3500_s8 + $0x1ec] sm:$0xf0] }
 0x1d1   : > { %v1680_v14 = vadd.f32 %v1679_v9, %v1591_v10  ;;  %v723_v9 = vld [vmem:[#allocation2 + $0x60] sm:$0xff]  ;;  %v2517_v23 = vor.u32 %v2729_v12, %v2516_v11 }
 0x1d2   : > { %v729_v11 = vld [vmem:[#allocation2 + $0x40] sm:$0xff] }
 0x1d3   : > { %v1747_v17 = vadd.f32 %v1680_v14, %v719_v13  ;;  %v2727_v14 = vld [vmem:[%s3500_s8 + $0x1e4] sm:$0xf] }
 0x1d5   : > { %1779 = vst [vmem:[#allocation2 + $0x80] sm:$0xff] %v1747_v17  ;;  %v2730_v17 = vld [vmem:[%s3500_s8 + $0x1f4] sm:$0xf0] }
 0x1d6   : > { %v1592_v25 = vpop.f32.mrf.mxu2  ;;  %v1417_v30 = vpop.f32.mrf.mxu0 }
 0x1d7   : > { %v1681_v26 = vpop.f32.mrf.mxu3  ;;  %v1593_v29 = vadd.f32 %v1592_v25, %v1504_v24  ;;  %v1506_v31 = vpop.f32.mrf.mxu1  ;;  %v2521_v24 = vor.u32 %v2727_v14, %v2518_v15 }
 0x1d8   : > { %v1507_v37 = vadd.f32 %v1506_v31, %v1417_v30  ;;  %v724_v30 = vld [vmem:[#allocation2 + $0xf0] sm:$0xff] }
 0x1d9   : > { %v1682_v35 = vadd.f32 %v1681_v26, %v1593_v29  ;;  %1456 = vmatmul.bf16.gmra.mxu0 %v2485_v27  ;;  %v2529_v29 = vor.u32 %v2728_v18, %v2526_v19 }
 0x1da   : > { %1545 = vmatmul.bf16.gmra.mxu1 %v2489_v28  ;;  %v2525_v28 = vor.u32 %v2730_v17, %v2524_v16 }
 0x1db   : > { %v1748_v36 = vadd.f32 %v1682_v35, %v720_v34  ;;  %1634 = vmatmul.bf16.gmra.mxu2 %v2493_v32 }
 0x1dc   : > { %1723 = vmatmul.bf16.gmra.mxu3 %v2497_v33 }
 0x1dd   : > { %1780 = vst [vmem:[#allocation2 + $0x88] sm:$0xff] %v1748_v36 }
 0x1de   : > { %v1595_v38 = vpop.f32.mrf.mxu2  ;;  %v1419_v41 = vpop.f32.mrf.mxu0 }
 0x1df   : > { %v1684_v39 = vpop.f32.mrf.mxu3  ;;  %v1596_v40 = vadd.f32 %v1595_v38, %v1507_v37  ;;  %v1508_v42 = vpop.f32.mrf.mxu1 }
 0x1e0   : > { %v1509_v54 = vadd.f32 %v1508_v42, %v1419_v41 }
 0x1e1   : > { %v1685_v44 = vadd.f32 %v1684_v39, %v1596_v40  ;;  %v725_v39 = vld [vmem:[#allocation2 + $0x8] sm:$0xff] }
 0x1e3   : > { %v1749_v47 = vadd.f32 %v1685_v44, %v721_v43 }
 0x1e5   : > { %1781 = vst [vmem:[#allocation2 + $0xe8] sm:$0xff] %v1749_v47 }
 0x1e6   : > { %v1597_v55 = vpop.f32.mrf.mxu2  ;;  %v1422_v60 = vpop.f32.mrf.mxu0 }
 0x1e7   : > { %v1686_v56 = vpop.f32.mrf.mxu3  ;;  %v1598_v59 = vadd.f32 %v1597_v55, %v1509_v54  ;;  %v1511_v61 = vpop.f32.mrf.mxu1 }
 0x1e8   : > { %v1512_v3 = vadd.f32 %v1511_v61, %v1422_v60 }
 0x1e9   : > { %v1687_v1 = vadd.f32 %v1686_v56, %v1598_v59  ;;  %1461 = vmatmul.bf16.gmra.mxu0 %v2501_v57  ;;  %v727_v57 = vld [vmem:[#allocation2 + $0x38] sm:$0xff] }
 0x1ea   : > { %1550 = vmatmul.bf16.gmra.mxu1 %v2505_v58 }
 0x1eb   : > { %v1750_v2 = vadd.f32 %v1687_v1, %v722_v0  ;;  %1639 = vmatmul.bf16.gmra.mxu2 %v2509_v62 }
 0x1ec   : > { %1728 = vmatmul.bf16.gmra.mxu3 %v2513_v63 }
 0x1ed   : > { %1782 = vst [vmem:[#allocation2 + $0xb8] sm:$0xff] %v1750_v2  ;;  %v728_v2 = vld [vmem:[#allocation2 + $0x58] sm:$0xff] }
 0x1ee   : > { %v1600_v4 = vpop.f32.mrf.mxu2  ;;  %v1424_v7 = vpop.f32.mrf.mxu0 }
 0x1ef   : > { %v1689_v5 = vpop.f32.mrf.mxu3  ;;  %v1601_v6 = vadd.f32 %v1600_v4, %v1512_v3  ;;  %v1513_v8 = vpop.f32.mrf.mxu1 }
 0x1f0   : > { %v1514_v20 = vadd.f32 %v1513_v8, %v1424_v7 }
 0x1f1   : > { %v1690_v10 = vadd.f32 %v1689_v5, %v1601_v6 }
 0x1f3   : > { %v1751_v13 = vadd.f32 %v1690_v10, %v723_v9 }
 0x1f5   : > { %1783 = vst [vmem:[#allocation2 + $0x60] sm:$0xff] %v1751_v13 }
 0x1f6   : > { %v1602_v21 = vpop.f32.mrf.mxu2  ;;  %v1427_v26 = vpop.f32.mrf.mxu0 }
 0x1f7   : > { %v1691_v22 = vpop.f32.mrf.mxu3  ;;  %v1603_v25 = vadd.f32 %v1602_v21, %v1514_v20  ;;  %v1516_v27 = vpop.f32.mrf.mxu1  ;;  %v730_v20 = vld [vmem:[#allocation2 + $0xc8] sm:$0xff] }
 0x1f8   : > { %v1517_v33 = vadd.f32 %v1516_v27, %v1427_v26 }
 0x1f9   : > { %v1692_v31 = vadd.f32 %v1691_v22, %v1603_v25  ;;  %1466 = vmatmul.bf16.gmra.mxu0 %v2517_v23 }
 0x1fa   : > { %1555 = vmatmul.bf16.gmra.mxu1 %v2521_v24 }
 0x1fb   : > { %v1752_v32 = vadd.f32 %v1692_v31, %v724_v30  ;;  %1644 = vmatmul.bf16.gmra.mxu2 %v2525_v28 }
 0x1fc   : > { %1733 = vmatmul.bf16.gmra.mxu3 %v2529_v29  ;;  %v731_v29 = vld [vmem:[#allocation2 + $0xe0] sm:$0xff] }
 0x1fd   : > { %1784 = vst [vmem:[#allocation2 + $0xf0] sm:$0xff] %v1752_v32 }
 0x1fe   : > { %v1605_v34 = vpop.f32.mrf.mxu2  ;;  %v1429_v37 = vpop.f32.mrf.mxu0 }
 0x1ff   : > { %v1694_v35 = vpop.f32.mrf.mxu3  ;;  %v1606_v36 = vadd.f32 %v1605_v34, %v1517_v33  ;;  %v1518_v38 = vpop.f32.mrf.mxu1 }
 0x200   : > { %v1519_v42 = vadd.f32 %v1518_v38, %v1429_v37  ;;  %v732_v38 = vld [vmem:[#allocation2 + $0x90] sm:$0xff] }
 0x201   : > { %v1695_v40 = vadd.f32 %v1694_v35, %v1606_v36 }
 0x203   : > { %v1753_v41 = vadd.f32 %v1695_v40, %v725_v39 }
 0x205   : > { %1785 = vst [vmem:[#allocation2 + $0x8] sm:$0xff] %v1753_v41 }
 0x206   : > { %v1607_v43 = vpop.f32.mrf.mxu2  ;;  %v1432_v46 = vpop.f32.mrf.mxu0 }
 0x207   : > { %v1696_v44 = vpop.f32.mrf.mxu3  ;;  %v1608_v45 = vadd.f32 %v1607_v43, %v1519_v42  ;;  %v1521_v47 = vpop.f32.mrf.mxu1 }
 0x208   : > { %v1522_v51 = vadd.f32 %v1521_v47, %v1432_v46  ;;  %v733_v47 = vld [vmem:[#allocation2 + $0x70] sm:$0xff] }
 0x209   : > { %v1697_v49 = vadd.f32 %v1696_v44, %v1608_v45 }
 0x20b   : > { %v1754_v50 = vadd.f32 %v1697_v49, %v726_v48 }
 0x20d   : > { %1786 = vst [vmem:[#allocation2 + $0x78] sm:$0xff] %v1754_v50 }
 0x20e   : > { %v1610_v52 = vpop.f32.mrf.mxu2  ;;  %v1434_v55 = vpop.f32.mrf.mxu0 }
 0x20f   : > { %v1699_v53 = vpop.f32.mrf.mxu3  ;;  %v1611_v54 = vadd.f32 %v1610_v52, %v1522_v51  ;;  %v1523_v56 = vpop.f32.mrf.mxu1 }
 0x210   : > { %v1524_v60 = vadd.f32 %v1523_v56, %v1434_v55  ;;  %v734_v56 = vld [vmem:[#allocation2 + $0xc0] sm:$0xff] }
 0x211   : > { %v1700_v58 = vadd.f32 %v1699_v53, %v1611_v54 }
 0x213   : > { %v1755_v59 = vadd.f32 %v1700_v58, %v727_v57 }
 0x215   : > { %1787 = vst [vmem:[#allocation2 + $0x38] sm:$0xff] %v1755_v59 }
 0x216   : > { %v1612_v61 = vpop.f32.mrf.mxu2  ;;  %v1437_v0 = vpop.f32.mrf.mxu0 }
 0x217   : > { %v1701_v62 = vpop.f32.mrf.mxu3  ;;  %v1613_v63 = vadd.f32 %v1612_v61, %v1524_v60  ;;  %v1526_v1 = vpop.f32.mrf.mxu1 }
 0x218   : > { %v1527_v5 = vadd.f32 %v1526_v1, %v1437_v0  ;;  %v735_v1 = vld [vmem:[#allocation2 + $0xa8] sm:$0xff] }
 0x219   : > { %v1702_v3 = vadd.f32 %v1701_v62, %v1613_v63 }
 0x21b   : > { %v1756_v4 = vadd.f32 %v1702_v3, %v728_v2 }
 0x21d   : > { %1788 = vst [vmem:[#allocation2 + $0x58] sm:$0xff] %v1756_v4 }
 0x21e   : > { %v1615_v6 = vpop.f32.mrf.mxu2  ;;  %v1439_v9 = vpop.f32.mrf.mxu0 }
 0x21f   : > { %v1704_v7 = vpop.f32.mrf.mxu3  ;;  %v1616_v8 = vadd.f32 %v1615_v6, %v1527_v5  ;;  %v1528_v10 = vpop.f32.mrf.mxu1 }
 0x220   : > { %v1529_v14 = vadd.f32 %v1528_v10, %v1439_v9  ;;  %v736_v10 = vld [vmem:[#allocation2 + $0xd0] sm:$0xff] }
 0x221   : > { %v1705_v12 = vadd.f32 %v1704_v7, %v1616_v8 }
 0x223   : > { %v1757_v13 = vadd.f32 %v1705_v12, %v729_v11 }
 0x225   : > { %1789 = vst [vmem:[#allocation2 + $0x40] sm:$0xff] %v1757_v13 }
 0x226   : > { %v1617_v15 = vpop.f32.mrf.mxu2  ;;  %v1442_v18 = vpop.f32.mrf.mxu0 }
 0x227   : > { %v1706_v16 = vpop.f32.mrf.mxu3  ;;  %v1618_v17 = vadd.f32 %v1617_v15, %v1529_v14  ;;  %v1531_v19 = vpop.f32.mrf.mxu1 }
 0x228   : > { %v1532_v23 = vadd.f32 %v1531_v19, %v1442_v18  ;;  %v737_v19 = vld [vmem:[#allocation2 + $0x10] sm:$0xff] }
 0x229   : > { %v1707_v21 = vadd.f32 %v1706_v16, %v1618_v17 }
 0x22b   : > { %v1758_v22 = vadd.f32 %v1707_v21, %v730_v20 }
 0x22d   : > { %1790 = vst [vmem:[#allocation2 + $0xc8] sm:$0xff] %v1758_v22 }
 0x22e   : > { %v1620_v24 = vpop.f32.mrf.mxu2  ;;  %v1444_v27 = vpop.f32.mrf.mxu0 }
 0x22f   : > { %v1709_v25 = vpop.f32.mrf.mxu3  ;;  %v1621_v26 = vadd.f32 %v1620_v24, %v1532_v23  ;;  %v1533_v28 = vpop.f32.mrf.mxu1 }
 0x230   : > { %v1534_v32 = vadd.f32 %v1533_v28, %v1444_v27  ;;  %v738_v28 = vld [vmem:[#allocation2 + $0x28] sm:$0xff] }
 0x231   : > { %v1710_v30 = vadd.f32 %v1709_v25, %v1621_v26 }
 0x233   : > { %v1759_v31 = vadd.f32 %v1710_v30, %v731_v29 }
 0x235   : > { %1791 = vst [vmem:[#allocation2 + $0xe0] sm:$0xff] %v1759_v31 }
 0x236   : > { %v1622_v33 = vpop.f32.mrf.mxu2  ;;  %v1447_v36 = vpop.f32.mrf.mxu0 }
 0x237   : > { %v1711_v34 = vpop.f32.mrf.mxu3  ;;  %v1623_v35 = vadd.f32 %v1622_v33, %v1534_v32  ;;  %v1536_v37 = vpop.f32.mrf.mxu1 }
 0x238   : > { %v1537_v41 = vadd.f32 %v1536_v37, %v1447_v36  ;;  %v739_v37 = vld [vmem:[#allocation2 + $0xa0] sm:$0xff] }
 0x239   : > { %v1712_v39 = vadd.f32 %v1711_v34, %v1623_v35 }
 0x23b   : > { %v1760_v40 = vadd.f32 %v1712_v39, %v732_v38 }
 0x23d   : > { %1792 = vst [vmem:[#allocation2 + $0x90] sm:$0xff] %v1760_v40 }
 0x23e   : > { %v1625_v42 = vpop.f32.mrf.mxu2  ;;  %v1449_v45 = vpop.f32.mrf.mxu0 }
 0x23f   : > { %v1714_v43 = vpop.f32.mrf.mxu3  ;;  %v1626_v44 = vadd.f32 %v1625_v42, %v1537_v41  ;;  %v1538_v46 = vpop.f32.mrf.mxu1 }
 0x240   : > { %v1539_v50 = vadd.f32 %v1538_v46, %v1449_v45 }
 0x241   : > { %v1715_v48 = vadd.f32 %v1714_v43, %v1626_v44  ;;  %v740_v44 = vld [vmem:[#allocation2 + $0xf8] sm:$0xff] }
 0x243   : > { %v1761_v49 = vadd.f32 %v1715_v48, %v733_v47 }
 0x245   : > { %1793 = vst [vmem:[#allocation2 + $0x70] sm:$0xff] %v1761_v49 }
 0x246   : > { %v1627_v51 = vpop.f32.mrf.mxu2  ;;  %v1452_v54 = vpop.f32.mrf.mxu0 }
 0x247   : > { %v1716_v52 = vpop.f32.mrf.mxu3  ;;  %v1628_v53 = vadd.f32 %v1627_v51, %v1539_v50  ;;  %v1541_v55 = vpop.f32.mrf.mxu1 }
 0x248   : > { %v1542_v59 = vadd.f32 %v1541_v55, %v1452_v54 }
 0x249   : > { %v1717_v57 = vadd.f32 %v1716_v52, %v1628_v53  ;;  %v741_v53 = vld [vmem:[#allocation2 + $0x20] sm:$0xff] }
 0x24b   : > { %v1762_v58 = vadd.f32 %v1717_v57, %v734_v56 }
 0x24d   : > { %1794 = vst [vmem:[#allocation2 + $0xc0] sm:$0xff] %v1762_v58 }
 0x24e   : > { %v1630_v60 = vpop.f32.mrf.mxu2  ;;  %v1454_v63 = vpop.f32.mrf.mxu0 }
 0x24f   : > { %v1719_v61 = vpop.f32.mrf.mxu3  ;;  %v1631_v62 = vadd.f32 %v1630_v60, %v1542_v59  ;;  %v1543_v0 = vpop.f32.mrf.mxu1 }
 0x250   : > { %v1544_v4 = vadd.f32 %v1543_v0, %v1454_v63 }
 0x251   : > { %v1720_v2 = vadd.f32 %v1719_v61, %v1631_v62  ;;  %v742_v61 = vld [vmem:[#allocation2 + $0x98] sm:$0xff] }
 0x253   : > { %v1763_v3 = vadd.f32 %v1720_v2, %v735_v1 }
 0x255   : > { %1795 = vst [vmem:[#allocation2 + $0xa8] sm:$0xff] %v1763_v3 }
 0x256   : > { %v1632_v5 = vpop.f32.mrf.mxu2  ;;  %v1457_v8 = vpop.f32.mrf.mxu0 }
 0x257   : > { %v1721_v6 = vpop.f32.mrf.mxu3  ;;  %v1633_v7 = vadd.f32 %v1632_v5, %v1544_v4  ;;  %v1546_v9 = vpop.f32.mrf.mxu1 }
 0x258   : > { %v1547_v13 = vadd.f32 %v1546_v9, %v1457_v8 }
 0x259   : > { %v1722_v11 = vadd.f32 %v1721_v6, %v1633_v7 }
 0x25b   : > { %v1764_v12 = vadd.f32 %v1722_v11, %v736_v10 }
 0x25d   : > { %1796 = vst [vmem:[#allocation2 + $0xd0] sm:$0xff] %v1764_v12 }
 0x25e   : > { %v1635_v14 = vpop.f32.mrf.mxu2  ;;  %v1459_v17 = vpop.f32.mrf.mxu0 }
 0x25f   : > { %v1724_v15 = vpop.f32.mrf.mxu3  ;;  %v1636_v16 = vadd.f32 %v1635_v14, %v1547_v13  ;;  %v1548_v18 = vpop.f32.mrf.mxu1 }
 0x260   : > { %v1549_v22 = vadd.f32 %v1548_v18, %v1459_v17 }
 0x261   : > { %v1725_v20 = vadd.f32 %v1724_v15, %v1636_v16 }
 0x263   : > { %v1765_v21 = vadd.f32 %v1725_v20, %v737_v19 }
 0x265   : > { %1797 = vst [vmem:[#allocation2 + $0x10] sm:$0xff] %v1765_v21 }
 0x266   : > { %v1637_v23 = vpop.f32.mrf.mxu2  ;;  %v1462_v26 = vpop.f32.mrf.mxu0 }
 0x267   : > { %v1726_v24 = vpop.f32.mrf.mxu3  ;;  %v1638_v25 = vadd.f32 %v1637_v23, %v1549_v22  ;;  %v1551_v27 = vpop.f32.mrf.mxu1 }
 0x268   : > { %v1552_v31 = vadd.f32 %v1551_v27, %v1462_v26 }
 0x269   : > { %v1727_v29 = vadd.f32 %v1726_v24, %v1638_v25 }
 0x26b   : > { %v1766_v30 = vadd.f32 %v1727_v29, %v738_v28 }
 0x26d   : > { %1798 = vst [vmem:[#allocation2 + $0x28] sm:$0xff] %v1766_v30 }
 0x26e   : > { %v1640_v32 = vpop.f32.mrf.mxu2  ;;  %v1464_v35 = vpop.f32.mrf.mxu0 }
 0x26f   : > { %v1729_v33 = vpop.f32.mrf.mxu3  ;;  %v1641_v34 = vadd.f32 %v1640_v32, %v1552_v31  ;;  %v1553_v36 = vpop.f32.mrf.mxu1 }
 0x270   : > { %v1554_v40 = vadd.f32 %v1553_v36, %v1464_v35 }
 0x271   : > { %v1730_v38 = vadd.f32 %v1729_v33, %v1641_v34 }
 0x273   : > { %v1767_v39 = vadd.f32 %v1730_v38, %v739_v37 }
 0x275   : > { %1799 = vst [vmem:[#allocation2 + $0xa0] sm:$0xff] %v1767_v39 }
 0x276   : > { %v1642_v41 = vpop.f32.mrf.mxu2  ;;  %v1467_v45 = vpop.f32.mrf.mxu0 }
 0x277   : > { %v1731_v42 = vpop.f32.mrf.mxu3  ;;  %v1643_v43 = vadd.f32 %v1642_v41, %v1554_v40  ;;  %v1556_v46 = vpop.f32.mrf.mxu1 }
 0x278   : > { %v1557_v49 = vadd.f32 %v1556_v46, %v1467_v45 }
 0x279   : > { %v1732_v47 = vadd.f32 %v1731_v42, %v1643_v43 }
 0x27b   : > { %v1768_v48 = vadd.f32 %v1732_v47, %v740_v44 }
 0x27d   : > { %1800 = vst [vmem:[#allocation2 + $0xf8] sm:$0xff] %v1768_v48 }
 0x27e   : > { %v1645_v50 = vpop.f32.mrf.mxu2  ;;  %v1469_v55 = vpop.f32.mrf.mxu0 }
 0x27f   : > { %v1734_v51 = vpop.f32.mrf.mxu3  ;;  %v1646_v52 = vadd.f32 %v1645_v50, %v1557_v49  ;;  %v1558_v56 = vpop.f32.mrf.mxu1 }
 0x280   : > { %v1559_v58 = vadd.f32 %v1558_v56, %v1469_v55 }
 0x281   : > { %v1735_v54 = vadd.f32 %v1734_v51, %v1646_v52 }
 0x283   : > { %v1769_v57 = vadd.f32 %v1735_v54, %v741_v53 }
 0x285   : > { %1801 = vst [vmem:[#allocation2 + $0x20] sm:$0xff] %v1769_v57 }
 0x286   : > { %v1647_v59 = vpop.f32.mrf.mxu2 }
 0x287   : > { %v1648_v60 = vadd.f32 %v1647_v59, %v1559_v58  ;;  %v1736_v62 = vpop.f32.mrf.mxu3 }
 0x289   : > { %v1737_v63 = vadd.f32 %v1736_v62, %v1648_v60  ;;  %1806 = sbr.rel (%p2658_p6) target bundleno = 680 (0x2a8), region = 104 }
 0x28b   : > { %v1770_v0 = vadd.f32 %v1737_v63, %v742_v61 }
 0x28d   : > { %1802 = vst [vmem:[#allocation2 + $0x98] sm:$0xff] %v1770_v0 }
 0x28e   : > { %v1807_v1 = vld [vmem:[#allocation2 + $0xb0] sm:$0xff]  ;;  %v1808_v2 = vld [vmem:[#allocation2] sm:$0xff]  ;;  %v1809_v4 = vld [vmem:[#allocation2 + $0xd8] sm:$0xff] }
 0x28f   : > { %v3673_v3 = vld [vmem:[%s673_s10] ss:$0 sm:$0xff]  ;;  %v1810_v5 = vld [vmem:[#allocation2 + $0x18] sm:$0xff]  ;;  %v1811_v6 = vld [vmem:[#allocation2 + $0x50] sm:$0xff] }
 0x290   : > { %v1812_v7 = vld [vmem:[#allocation2 + $0x68] sm:$0xff]  ;;  %v1813_v8 = vld [vmem:[#allocation2 + $0x30] sm:$0xff]  ;;  %v1843_v9 = vadd.f32 %v3673_v3, %v1807_v1  ;;  %v1844_v10 = vadd.f32 %v3673_v3, %v1808_v2  ;;  %v1845_v11 = vadd.f32 %v3673_v3, %v1809_v4  ;;  %v1846_v12 = vadd.f32 %v3673_v3, %v1810_v5  ;;  %v1815_v18 = vld [vmem:[#allocation2 + $0x80] sm:$0xff] }
 0x291   : > { %v1814_v13 = vld [vmem:[#allocation2 + $0x48] sm:$0xff]  ;;  %v1847_v14 = vadd.f32 %v3673_v3, %v1811_v6  ;;  %v1848_v15 = vadd.f32 %v3673_v3, %v1812_v7  ;;  %v1849_v16 = vadd.f32 %v3673_v3, %v1813_v8  ;;  %v1818_v25 = vld [vmem:[#allocation2 + $0xb8] sm:$0xff]  ;;  %v1819_v30 = vld [vmem:[#allocation2 + $0x60] sm:$0xff]  ;;  %v1851_v34 = vadd.f32 %v3673_v3, %v1815_v18 }
 0x292   : > { %v1850_v17 = vadd.f32 %v3673_v3, %v1814_v13  ;;  %v1816_v19 = vld [vmem:[#allocation2 + $0x88] sm:$0xff]  ;;  %v1875_v20 = vmax.f32 %v1843_v9, 0.0  ;;  %v1876_v21 = vmax.f32 %v1844_v10, 0.0  ;;  %v1877_v22 = vmax.f32 %v1845_v11, 0.0  ;;  %v1820_v31 = vld [vmem:[#allocation2 + $0xf0] sm:$0xff]  ;;  %v1822_v37 = vld [vmem:[#allocation2 + $0x78] sm:$0xff] }
 0x293   : > { %v1878_v23 = vmax.f32 %v1846_v12, 0.0  ;;  %v1817_v24 = vld [vmem:[#allocation2 + $0xe8] sm:$0xff]  ;;  %v1879_v26 = vmax.f32 %v1847_v14, 0.0  ;;  %v1880_v27 = vmax.f32 %v1848_v15, 0.0  ;;  %v1881_v28 = vmax.f32 %v1849_v16, 0.0  ;;  %v1823_v42 = vld [vmem:[#allocation2 + $0x38] sm:$0xff] }
 0x294   : > { %v1882_v29 = vmax.f32 %v1850_v17, 0.0  ;;  %v2767_v32 = vpack.c.bf16 %v1876_v21, %v1875_v20  ;;  %v1852_v35 = vadd.f32 %v3673_v3, %v1816_v19  ;;  %v1821_v36 = vld [vmem:[#allocation2 + $0x8] sm:$0xff]  ;;  %v1853_v40 = vadd.f32 %v3673_v3, %v1817_v24  ;;  %v1824_v47 = vld [vmem:[#allocation2 + $0x58] sm:$0xff]  ;;  %v1825_v52 = vld [vmem:[#allocation2 + $0x40] sm:$0xff] }
 0x295   : > { %v2772_v33 = vpack.c.bf16 %v1878_v23, %v1877_v22  ;;  %v2777_v38 = vpack.c.bf16 %v1880_v27, %v1879_v26  ;;  %v1854_v41 = vadd.f32 %v3673_v3, %v1818_v25  ;;  %v1883_v43 = vmax.f32 %v1851_v34, 0.0  ;;  %v1826_v53 = vld [vmem:[#allocation2 + $0xc8] sm:$0xff]  ;;  %v1827_v58 = vld [vmem:[#allocation2 + $0xe0] sm:$0xff]  ;;  %v1828_v59 = vld [vmem:[#allocation2 + $0x90] sm:$0xff] }
 0x296   : > { %v2782_v39 = vpack.c.bf16 %v1882_v29, %v1881_v28  ;;  %2768 = vst [vmem:[%s3504_s1] sm:$0xff] %v2767_v32   ;;  %v1884_v44 = vmax.f32 %v1852_v35, 0.0  ;;  %v1855_v45 = vadd.f32 %v3673_v3, %v1819_v30  ;;  %v1856_v46 = vadd.f32 %v3673_v3, %v1820_v31  ;;  %v1829_v0 = vld [vmem:[#allocation2 + $0x70] sm:$0xff]  ;;  %v1830_v1 = vld [vmem:[#allocation2 + $0xc0] sm:$0xff]  ;;  %v1831_v7 = vld [vmem:[#allocation2 + $0xa8] sm:$0xff] }
 0x297   : > { %2844 = vst [vmem:[%s3504_s1 + $0x8] sm:$0xff] %v2772_v33   ;;  %v1885_v48 = vmax.f32 %v1853_v40, 0.0  ;;  %v1886_v49 = vmax.f32 %v1854_v41, 0.0  ;;  %v1857_v50 = vadd.f32 %v3673_v3, %v1821_v36  ;;  %v1858_v51 = vadd.f32 %v3673_v3, %v1822_v37  ;;  %v1832_v12 = vld [vmem:[#allocation2 + $0xd0] sm:$0xff]  ;;  %v1834_v18 = vld [vmem:[#allocation2 + $0x28] sm:$0xff]  ;;  %v1835_v23 = vld [vmem:[#allocation2 + $0xa0] sm:$0xff] }
 0x298   : > { %2845 = vst [vmem:[%s3504_s1 + $0x10] sm:$0xff] %v2777_v38   ;;  %v2787_v54 = vpack.c.bf16 %v1884_v44, %v1883_v43  ;;  %v1887_v55 = vmax.f32 %v1855_v45, 0.0  ;;  %v1888_v56 = vmax.f32 %v1856_v46, 0.0  ;;  %v1859_v57 = vadd.f32 %v3673_v3, %v1823_v42  ;;  %v1833_v17 = vld [vmem:[#allocation2 + $0x10] sm:$0xff]  ;;  %v1836_v24 = vld [vmem:[#allocation2 + $0xf8] sm:$0xff]  ;;  %v1837_v29 = vld [vmem:[#allocation2 + $0x20] sm:$0xff] }
 0x299   : > { %2846 = vst [vmem:[%s3504_s1 + $0x18] sm:$0xff] %v2782_v39   ;;  %v2792_v60 = vpack.c.bf16 %v1886_v49, %v1885_v48  ;;  %v1889_v61 = vmax.f32 %v1857_v50, 0.0  ;;  %v1890_v62 = vmax.f32 %v1858_v51, 0.0  ;;  %v1860_v63 = vadd.f32 %v3673_v3, %v1824_v47  ;;  %v1838_v30 = vld [vmem:[#allocation2 + $0x98] sm:$0xff] }
 0x29a   : > { %2847 = vst [vmem:[%s3504_s1 + $0x20] sm:$0xff] %v2787_v54   ;;  %v2797_v2 = vpack.c.bf16 %v1888_v56, %v1887_v55  ;;  %v1891_v4 = vmax.f32 %v1859_v57, 0.0  ;;  %v1861_v5 = vadd.f32 %v3673_v3, %v1825_v52  ;;  %v1862_v6 = vadd.f32 %v3673_v3, %v1826_v53 }
 0x29b   : > { %2848 = vst [vmem:[%s3504_s1 + $0x28] sm:$0xff] %v2792_v60   ;;  %v2802_v8 = vpack.c.bf16 %v1890_v62, %v1889_v61  ;;  %v1892_v9 = vmax.f32 %v1860_v63, 0.0  ;;  %v1863_v10 = vadd.f32 %v3673_v3, %v1827_v58  ;;  %v1864_v11 = vadd.f32 %v3673_v3, %v1828_v59 }
 0x29c   : > { %2849 = vst [vmem:[%s3504_s1 + $0x30] sm:$0xff] %v2797_v2   ;;  %v1893_v13 = vmax.f32 %v1861_v5, 0.0  ;;  %v1894_v14 = vmax.f32 %v1862_v6, 0.0  ;;  %v1865_v15 = vadd.f32 %v3673_v3, %v1829_v0  ;;  %v1866_v16 = vadd.f32 %v3673_v3, %v1830_v1 }
 0x29d   : > { %2850 = vst [vmem:[%s3504_s1 + $0x38] sm:$0xff] %v2802_v8   ;;  %v2807_v19 = vpack.c.bf16 %v1892_v9, %v1891_v4  ;;  %v1895_v20 = vmax.f32 %v1863_v10, 0.0  ;;  %v1896_v21 = vmax.f32 %v1864_v11, 0.0  ;;  %v1867_v22 = vadd.f32 %v3673_v3, %v1831_v7 }
 0x29e   : > { %v2812_v25 = vpack.c.bf16 %v1894_v14, %v1893_v13  ;;  %v1897_v26 = vmax.f32 %v1865_v15, 0.0  ;;  %v1898_v27 = vmax.f32 %v1866_v16, 0.0  ;;  %v1868_v28 = vadd.f32 %v3673_v3, %v1832_v12 }
 0x29f   : > { %2851 = vst [vmem:[%s3504_s1 + $0x40] sm:$0xff] %v2807_v19   ;;  %v2817_v31 = vpack.c.bf16 %v1896_v21, %v1895_v20  ;;  %v1899_v32 = vmax.f32 %v1867_v22, 0.0  ;;  %v1869_v33 = vadd.f32 %v3673_v3, %v1833_v17  ;;  %v1870_v34 = vadd.f32 %v3673_v3, %v1834_v18 }
 0x2a0   : > { %2852 = vst [vmem:[%s3504_s1 + $0x48] sm:$0xff] %v2812_v25   ;;  %v2822_v35 = vpack.c.bf16 %v1898_v27, %v1897_v26  ;;  %v1900_v36 = vmax.f32 %v1868_v28, 0.0  ;;  %v1871_v37 = vadd.f32 %v3673_v3, %v1835_v23  ;;  %v1872_v38 = vadd.f32 %v3673_v3, %v1836_v24 }
 0x2a1   : > { %2853 = vst [vmem:[%s3504_s1 + $0x50] sm:$0xff] %v2817_v31   ;;  %v1901_v39 = vmax.f32 %v1869_v33, 0.0  ;;  %v1902_v40 = vmax.f32 %v1870_v34, 0.0  ;;  %v1873_v41 = vadd.f32 %v3673_v3, %v1837_v29  ;;  %v1874_v42 = vadd.f32 %v3673_v3, %v1838_v30 }
 0x2a2   : > { %2854 = vst [vmem:[%s3504_s1 + $0x58] sm:$0xff] %v2822_v35   ;;  %v2827_v43 = vpack.c.bf16 %v1900_v36, %v1899_v32  ;;  %v1903_v44 = vmax.f32 %v1871_v37, 0.0  ;;  %v1904_v45 = vmax.f32 %v1872_v38, 0.0 }
 0x2a3   : > { %v2832_v46 = vpack.c.bf16 %v1902_v40, %v1901_v39  ;;  %v1905_v47 = vmax.f32 %v1873_v41, 0.0  ;;  %v1906_v48 = vmax.f32 %v1874_v42, 0.0 }
 0x2a4   : > { %2855 = vst [vmem:[%s3504_s1 + $0x60] sm:$0xff] %v2827_v43   ;;  %v2837_v49 = vpack.c.bf16 %v1904_v45, %v1903_v44 }
 0x2a5   : > { %2856 = vst [vmem:[%s3504_s1 + $0x68] sm:$0xff] %v2832_v46   ;;  %v2842_v50 = vpack.c.bf16 %v1906_v48, %v1905_v47 }
 0x2a6   : > { %2857 = vst [vmem:[%s3504_s1 + $0x70] sm:$0xff] %v2837_v49  }
 0x2a7   : > { %2858 = vst [vmem:[%s3504_s1 + $0x78] sm:$0xff] %v2842_v50  }
 0x2a8 PF: > { %1977 = sbr.rel (!%p3202_p13) target bundleno = 722 (0x2d2), region = 108  ;;  %s3859_s14 = sld [smem:[#allocation6_spill]] (%p3202_p13)  ;;  %v1999_v3 = vld [vmem:[%s3504_s1] sm:$0xf] (%p3202_p13)  ;;  %v2001_v51 = vld [vmem:[%s3504_s1 + $0x4] sm:$0xf] (%p3202_p13) }
 0x2a9   : > { %s3860_s20 = sld [smem:[#allocation11_spill]] (%p3202_p13)  ;;  %v2003_v52 = vld [vmem:[%s3504_s1 + $0x8] sm:$0xf] (%p3202_p13)  ;;  %v2005_v53 = vld [vmem:[%s3504_s1 + $0xc] sm:$0xf] (%p3202_p13) }
 0x2aa   : > { %v2007_v54 = vld [vmem:[%s3504_s1 + $0x10] sm:$0xf] (%p3202_p13)  ;;  %v2009_v55 = vld [vmem:[%s3504_s1 + $0x14] sm:$0xf] (%p3202_p13)  ;;  %v2011_v56 = vld [vmem:[%s3504_s1 + $0x18] sm:$0xf] (%p3202_p13) }
 0x2ab   : > { %v2013_v57 = vld [vmem:[%s3504_s1 + $0x1c] sm:$0xf] (%p3202_p13)  ;;  %v2015_v58 = vld [vmem:[%s3504_s1 + $0x20] sm:$0xf] (%p3202_p13)  ;;  %v2017_v59 = vld [vmem:[%s3504_s1 + $0x24] sm:$0xf] (%p3202_p13) }
 0x2ac   : > { %v2019_v60 = vld [vmem:[%s3504_s1 + $0x28] sm:$0xf] (%p3202_p13)  ;;  %v2021_v61 = vld [vmem:[%s3504_s1 + $0x2c] sm:$0xf] (%p3202_p13)  ;;  %v2023_v62 = vld [vmem:[%s3504_s1 + $0x30] sm:$0xf] (%p3202_p13) }
 0x2ad   : > { %v2025_v63 = vld [vmem:[%s3504_s1 + $0x34] sm:$0xf]  ;;  %v2027_v0 = vld [vmem:[%s3504_s1 + $0x38] sm:$0xf]  ;;  %v2029_v1 = vld [vmem:[%s3504_s1 + $0x3c] sm:$0xf] }
 0x2ae   : > { %s2763_s16 = sshll.u32 %s3859_s14, 6  ;;  %v2031_v2 = vld [vmem:[%s3504_s1 + $0x40] sm:$0xf]  ;;  %v2033_v4 = vld [vmem:[%s3504_s1 + $0x44] sm:$0xf] }
 0x2af   : > { %s1980_s18 = sadd.s32 %s3047_s19, %s2763_s16  ;;  %v2035_v5 = vld [vmem:[%s3504_s1 + $0x48] sm:$0xf]  ;;  %v2037_v6 = vld [vmem:[%s3504_s1 + $0x4c] sm:$0xf]  ;;  %v2039_v7 = vld [vmem:[%s3504_s1 + $0x50] sm:$0xf] }
 0x2b0   : > { %s2662_s11 = sshll.u32 %s1980_s18, 2  ;;  %v2041_v8 = vld [vmem:[%s3504_s1 + $0x54] sm:$0xf]  ;;  %v2043_v9 = vld [vmem:[%s3504_s1 + $0x58] sm:$0xf] }
 0x2b1   : > { %s3732_s26 = scalar_lea.vmem %s3860_s20, %s2662_s11  ;;  %v2045_v10 = vld [vmem:[%s3504_s1 + $0x5c] sm:$0xf]  ;;  %v2047_v11 = vld [vmem:[%s3504_s1 + $0x60] sm:$0xf]  ;;  %v2049_v12 = vld [vmem:[%s3504_s1 + $0x64] sm:$0xf] }
 0x2b2   : > { %2000 = vst [vmem:[%s3732_s26] sm:$0xf] %v1999_v3  ;;  %v2051_v13 = vld [vmem:[%s3504_s1 + $0x68] sm:$0xf]  ;;  %v2053_v14 = vld [vmem:[%s3504_s1 + $0x6c] sm:$0xf] }
 0x2b3   : > { %2002 = vst [vmem:[%s3732_s26 + $0x8] sm:$0xf] %v2001_v51  ;;  %v2055_v15 = vld [vmem:[%s3504_s1 + $0x70] sm:$0xf]  ;;  %v2057_v16 = vld [vmem:[%s3504_s1 + $0x74] sm:$0xf] }
 0x2b4   : > { %2004 = vst [vmem:[%s3732_s26 + $0x10] sm:$0xf] %v2003_v52  ;;  %v2059_v17 = vld [vmem:[%s3504_s1 + $0x78] sm:$0xf]  ;;  %v2061_v18 = vld [vmem:[%s3504_s1 + $0x7c] sm:$0xf] }
 0x2b5   : > { %2006 = vst [vmem:[%s3732_s26 + $0x18] sm:$0xf] %v2005_v53 }
 0x2b6   : > { %2008 = vst [vmem:[%s3732_s26 + $0x20] sm:$0xf] %v2007_v54 }
 0x2b7   : > { %2010 = vst [vmem:[%s3732_s26 + $0x28] sm:$0xf] %v2009_v55 }
 0x2b8   : > { %2012 = vst [vmem:[%s3732_s26 + $0x30] sm:$0xf] %v2011_v56 }
 0x2b9   : > { %2014 = vst [vmem:[%s3732_s26 + $0x38] sm:$0xf] %v2013_v57 }
 0x2ba   : > { %2016 = vst [vmem:[%s3732_s26 + $0x40] sm:$0xf] %v2015_v58 }
 0x2bb   : > { %2018 = vst [vmem:[%s3732_s26 + $0x48] sm:$0xf] %v2017_v59 }
 0x2bc   : > { %2020 = vst [vmem:[%s3732_s26 + $0x50] sm:$0xf] %v2019_v60 }
 0x2bd   : > { %2022 = vst [vmem:[%s3732_s26 + $0x58] sm:$0xf] %v2021_v61 }
 0x2be   : > { %2024 = vst [vmem:[%s3732_s26 + $0x60] sm:$0xf] %v2023_v62 }
 0x2bf   : > { %2026 = vst [vmem:[%s3732_s26 + $0x68] sm:$0xf] %v2025_v63 }
 0x2c0   : > { %2028 = vst [vmem:[%s3732_s26 + $0x70] sm:$0xf] %v2027_v0 }
 0x2c1   : > { %2030 = vst [vmem:[%s3732_s26 + $0x78] sm:$0xf] %v2029_v1 }
 0x2c2   : > { %2032 = vst [vmem:[%s3732_s26 + $0x80] sm:$0xf] %v2031_v2 }
 0x2c3   : > { %2034 = vst [vmem:[%s3732_s26 + $0x88] sm:$0xf] %v2033_v4 }
 0x2c4   : > { %2036 = vst [vmem:[%s3732_s26 + $0x90] sm:$0xf] %v2035_v5 }
 0x2c5   : > { %2038 = vst [vmem:[%s3732_s26 + $0x98] sm:$0xf] %v2037_v6 }
 0x2c6   : > { %2040 = vst [vmem:[%s3732_s26 + $0xa0] sm:$0xf] %v2039_v7 }
 0x2c7   : > { %2042 = vst [vmem:[%s3732_s26 + $0xa8] sm:$0xf] %v2041_v8 }
 0x2c8   : > { %2044 = vst [vmem:[%s3732_s26 + $0xb0] sm:$0xf] %v2043_v9 }
 0x2c9   : > { %2046 = vst [vmem:[%s3732_s26 + $0xb8] sm:$0xf] %v2045_v10 }
 0x2ca   : > { %2048 = vst [vmem:[%s3732_s26 + $0xc0] sm:$0xf] %v2047_v11 }
 0x2cb   : > { %2050 = vst [vmem:[%s3732_s26 + $0xc8] sm:$0xf] %v2049_v12 }
 0x2cc   : > { %2052 = vst [vmem:[%s3732_s26 + $0xd0] sm:$0xf] %v2051_v13 }
 0x2cd   : > { %2054 = vst [vmem:[%s3732_s26 + $0xd8] sm:$0xf] %v2053_v14 }
 0x2ce   : > { %2056 = vst [vmem:[%s3732_s26 + $0xe0] sm:$0xf] %v2055_v15 }
 0x2cf   : > { %2058 = vst [vmem:[%s3732_s26 + $0xe8] sm:$0xf] %v2057_v16 }
 0x2d0   : > { %2060 = vst [vmem:[%s3732_s26 + $0xf0] sm:$0xf] %v2059_v17 }
 0x2d1   : > { %2062 = vst [vmem:[%s3732_s26 + $0xf8] sm:$0xf] %v2061_v18 }
 0x2d2 PF: > { %s13_s24 = sadd.s32 1, %s3067_s24   ;;  %s3862_s1 = sld [smem:[#allocation7_spill]] }
 0x2d3   : > { %p3797_p7 = scmp.ge.s32.totalorder %s13_s24, 50   ;;  %s3863_s27 = sld [smem:[#allocation8_spill]] }
 0x2d4   : > { %s3865_s12 = smov %s3023_s13  ;;  %s3866_s13 = smov %s3200_s7 }
 0x2d5   : > { %s3867_s14 = smov %s3031_s15  ;;  %s3868_s15 = smov %s3187_s9 }
 0x2d6   : > { %s3869_s16 = smov %s3039_s17  ;;  %s3870_s17 = smov %s3197_s3 }
 0x2d7   : > { %s3871_s18 = smov %s3055_s21  ;;  %s3872_s19 = smov %s3059_s22 }
 0x2d8   : > { %s3873_s20 = smov %s3063_s23  ;;  %s3874_s21 = smov %s3862_s1 }
 0x2d9   : > { %s3875_s22 = smov %s3863_s27  ;;  %s3876_s23 = smov %s3886_s28 }
 0x2da   :  { %12 = sbr.rel (!%p3797_p7) target bundleno = 11 (0xb), region = 191 }

// kernel: my_alexnet_features.7
= control target key start
LH: loop header
LB: loop body
LE: loop exit
PB: predicated region body
PF: predicated region fallthrough
CT: control target
= control target key end

     0   :  { %s3841_s0 = inlined_call_operand.vmem [shape: bf16[512,2048], index: 0, kind: input, shape index: {}]   ;;  %s3842_s1 = inlined_call_operand.vmem [shape: bf16[2048,384], index: 1, kind: input, shape index: {}]   ;;  %s3843_s2 = inlined_call_operand.vmem [shape: f32[1,384], index: 2, kind: input, shape index: {}]   ;;  %s3844_s3 = inlined_call_operand.vmem [shape: bf16[512,384], index: 3, kind: output, shape index: {}]  }
   0x1   :  { %3847 = sst [smem:[#allocation9_spill]] %s3841_s0 }
   0x2   :  { %3848 = sst [smem:[#allocation10_spill]] %s3842_s1 }
   0x3   :  { %3849 = sst [smem:[#allocation11_spill]] %s3844_s3 }
   0x4   :  { %s3090_s12 = smov 0   ;;  %s3092_s13 = smov 0  }
   0x5   :  { %s3094_s14 = smov 0   ;;  %s3096_s15 = smov 0  }
   0x6   :  { %s3098_s16 = smov 0   ;;  %s3100_s17 = smov 0  }
   0x7   :  { %s3102_s18 = smov 0   ;;  %s3104_s19 = smov 0  }
   0x8   :  { %s3106_s20 = smov 0   ;;  %s3108_s21 = smov 0  }
   0x9   :  { %s3110_s22 = smov 0   ;;  %s3112_s23 = smov 0  }
   0xa   :  { %s3114_s24 = smov 0  }
   0xb LB: > { %3850 = sst [smem:[#allocation6_spill]] %s3051_s20  ;;  %s25_s26 = sadd.s32 1, %s3055_s21  ;;  %s3067_s24 = sphi %s3114_s24, %s13_s24   ;;  %s3063_s23 = sphi %s3112_s23, %s3876_s23   ;;  %s3059_s22 = sphi %s3110_s22, %s3875_s22   ;;  %s3055_s21 = sphi %s3108_s21, %s3874_s21   ;;  %s3051_s20 = sphi %s3106_s20, %s3873_s20   ;;  %s3047_s19 = sphi %s3104_s19, %s3872_s19   ;;  %s3043_s18 = sphi %s3102_s18, %s3871_s18   ;;  %s3039_s17 = sphi %s3100_s17, %s3870_s17   ;;  %s3035_s16 = sphi %s3098_s16, %s3869_s16   ;;  %s3031_s15 = sphi %s3096_s15, %s3868_s15   ;;  %s3027_s14 = sphi %s3094_s14, %s3867_s14   ;;  %s3023_s13 = sphi %s3092_s13, %s3866_s13   ;;  %s3019_s12 = sphi %s3090_s12, %s3865_s12  }
   0xc   : > { %p26_p0 = scmp.ge.s32.totalorder %s25_s26, 4  ;;  %s28_s27 = sadd.s32 1, %s3059_s22 }
   0xd   : > { %s32_s28 = sadd.s32 1, %s3063_s23  ;;  %s41_s29 = sadd.s32 1, %s3039_s17 }
   0xe   : > { %s3878_s26 = smov (%p26_p0, %s25_s26), 0  ;;  %s3880_s27 = smov (!%p26_p0, %s28_s27), %s3059_s22 }
   0xf   : > { %3851 = sst [smem:[#allocation7_spill]] %s3878_s26  ;;  %s37_s30 = ssub.s32 %s3055_s21, %s3878_s26 }
  0x10   : > { %p48_p1 = scmp.ne.s32.totalorder %s3039_s17, %s3035_s16  ;;  %p30_p2 = scmp.ge.s32.totalorder %s3880_s27, 3 }
  0x11   : > { %p49_p3 = scmp.eq.s32.totalorder %s3067_s24, 0  ;;  %s69_s4 = sadd.s32 1, %s3031_s15 }
  0x12   : > { %p76_p4 = scmp.ne.s32.totalorder %s3031_s15, %s3027_s14  ;;  %s3882_s27 = smov (%p30_p2, %s3880_s27), 0 }
  0x13   : > { %3852 = sst [smem:[#allocation8_spill]] %s3882_s27  ;;  %s3884_s28 = smov (!%p30_p2, %s32_s28), %s3063_s23 }
  0x14   : > { %p3174_p5 = por %p49_p3, %p48_p1  ;;  %s65_s6 = ssub.s32 %s3059_s22, %s3882_s27 }
  0x15   : > { %p34_p6 = scmp.ge.s32.totalorder %s3884_s28, 2  ;;  %s66_s7 = sor.u32 %s65_s6, %s37_s30 }
  0x16   : > { %p67_p7 = scmp.eq.s32.totalorder %s66_s7, 0  ;;  %p3180_p8 = por %p76_p4, %p49_p3 }
  0x17   : > { %s3886_s28 = smov (%p34_p6, %s3884_s28), 0  ;;  %s123_s11 = sadd.s32 1, %s3023_s13 }
  0x18   : > { %s3187_s9 = scalar_select %p67_p7, %s3031_s15, %s69_s4  }
  0x19   : > { %s36_s10 = ssub.s32 %s3063_s23, %s3886_s28  ;;  %p133_p11 = scmp.ne.s32.totalorder %s3023_s13, %s3019_s12 }
  0x1a   : > { %s38_s25 = sor.u32 %s37_s30, %s36_s10  ;;  %s120_s26 = sor.u32 %s65_s6, %s36_s10 }
  0x1b   : > { %p39_p9 = scmp.eq.s32.totalorder %s38_s25, 0  ;;  %p121_p10 = scmp.eq.s32.totalorder %s120_s26, 0 }
  0x1c   : > { %s3855_s27 = sadd.s32 4294967295, %s3067_s24   ;;  %p2259_p0 = scmp.ge.s32.totalorder %s3067_s24, 24 }
  0x1d   : > { %p134_p12 = scmp.eq.s32.totalorder %s3855_s27, 23 }
  0x1e   : > { %s3197_s3 = scalar_select %p39_p9, %s3039_s17, %s41_s29  }
  0x1f   : > { %s3200_s7 = scalar_select %p121_p10, %s3023_s13, %s123_s11  }
  0x20   : > { %p3202_p13 = por %p134_p12, %p133_p11  ;;  %156 = sbr.rel (%p2259_p0) target bundleno = 185 (0xb9), region = 16 }
  0x25   : > { %159 = sbr.rel (!%p3174_p5) target bundleno = 111 (0x6f), region = 20  ;;  %s161_s25 = sand.u32 (%p3174_p5), 1, %s3039_s17  }
  0x26   : > { %s2262_s26 = sshll.u32 (%p3174_p5), %s3055_s21, 2  ;;  %s2260_s27 = sshll.u32 (%p3174_p5), %s161_s25, 9 }
  0x27   : > { %s2665_s29 = sshll.u32 (%p3174_p5), %s3063_s23, 9  ;;  %s3857_s0 = sld [smem:[#allocation9_spill]] (%p3174_p5) }
  0x28   : > { %s167_s30 = sadd.s32 (%p3174_p5), %s2665_s29, %s2262_s26  ;;  %s3220_s5 = scalar_lea.vmem (%p3174_p5), [#allocation3], %s2260_s27 }
  0x29   : > { %s2264_s4 = sshll.u32 (%p3174_p5), %s167_s30, 2 }
  0x2d   : > { %s3215_s11 = scalar_lea.vmem %s3857_s0, %s2264_s4 }
  0x2e   : > { %v182_v0 = vld [vmem:[%s3215_s11] sm:$0xff]  ;;  %v184_v1 = vld [vmem:[%s3215_s11 + $0x8] sm:$0xff] }
  0x2f   : > { %v186_v2 = vld [vmem:[%s3215_s11 + $0x40] sm:$0xff]  ;;  %183 = vst [vmem:[%s3220_s5] sm:$0xff] %v182_v0  ;;  %v188_v3 = vld [vmem:[%s3215_s11 + $0x48] sm:$0xff] }
  0x30   : > { %185 = vst [vmem:[%s3220_s5 + $0x8] sm:$0xff] %v184_v1  ;;  %v190_v4 = vld [vmem:[%s3215_s11 + $0x80] sm:$0xff]  ;;  %v192_v5 = vld [vmem:[%s3215_s11 + $0x88] sm:$0xff] }
  0x31   : > { %187 = vst [vmem:[%s3220_s5 + $0x10] sm:$0xff] %v186_v2  ;;  %v194_v6 = vld [vmem:[%s3215_s11 + $0xc0] sm:$0xff]  ;;  %v196_v7 = vld [vmem:[%s3215_s11 + $0xc8] sm:$0xff] }
  0x32   : > { %189 = vst [vmem:[%s3220_s5 + $0x18] sm:$0xff] %v188_v3  ;;  %v198_v8 = vld [vmem:[%s3215_s11 + $0x100] sm:$0xff]  ;;  %v200_v9 = vld [vmem:[%s3215_s11 + $0x108] sm:$0xff] }
  0x33   : > { %191 = vst [vmem:[%s3220_s5 + $0x20] sm:$0xff] %v190_v4  ;;  %v202_v10 = vld [vmem:[%s3215_s11 + $0x140] sm:$0xff]  ;;  %v204_v11 = vld [vmem:[%s3215_s11 + $0x148] sm:$0xff] }
  0x34   : > { %193 = vst [vmem:[%s3220_s5 + $0x28] sm:$0xff] %v192_v5  ;;  %v206_v12 = vld [vmem:[%s3215_s11 + $0x180] sm:$0xff]  ;;  %v208_v13 = vld [vmem:[%s3215_s11 + $0x188] sm:$0xff] }
  0x35   : > { %195 = vst [vmem:[%s3220_s5 + $0x30] sm:$0xff] %v194_v6  ;;  %v210_v14 = vld [vmem:[%s3215_s11 + $0x1c0] sm:$0xff]  ;;  %v212_v15 = vld [vmem:[%s3215_s11 + $0x1c8] sm:$0xff] }
  0x36   : > { %197 = vst [vmem:[%s3220_s5 + $0x38] sm:$0xff] %v196_v7  ;;  %v214_v16 = vld [vmem:[%s3215_s11 + $0x200] sm:$0xff]  ;;  %v216_v17 = vld [vmem:[%s3215_s11 + $0x208] sm:$0xff] }
  0x37   : > { %199 = vst [vmem:[%s3220_s5 + $0x40] sm:$0xff] %v198_v8  ;;  %v218_v18 = vld [vmem:[%s3215_s11 + $0x240] sm:$0xff]  ;;  %v220_v19 = vld [vmem:[%s3215_s11 + $0x248] sm:$0xff] }
  0x38   : > { %201 = vst [vmem:[%s3220_s5 + $0x48] sm:$0xff] %v200_v9  ;;  %v222_v20 = vld [vmem:[%s3215_s11 + $0x280] sm:$0xff]  ;;  %v224_v21 = vld [vmem:[%s3215_s11 + $0x288] sm:$0xff] }
  0x39   : > { %203 = vst [vmem:[%s3220_s5 + $0x50] sm:$0xff] %v202_v10  ;;  %v226_v22 = vld [vmem:[%s3215_s11 + $0x2c0] sm:$0xff]  ;;  %v228_v23 = vld [vmem:[%s3215_s11 + $0x2c8] sm:$0xff] }
  0x3a   : > { %205 = vst [vmem:[%s3220_s5 + $0x58] sm:$0xff] %v204_v11  ;;  %v230_v24 = vld [vmem:[%s3215_s11 + $0x300] sm:$0xff]  ;;  %v232_v25 = vld [vmem:[%s3215_s11 + $0x308] sm:$0xff] }
  0x3b   : > { %207 = vst [vmem:[%s3220_s5 + $0x60] sm:$0xff] %v206_v12  ;;  %v234_v26 = vld [vmem:[%s3215_s11 + $0x340] sm:$0xff]  ;;  %v236_v27 = vld [vmem:[%s3215_s11 + $0x348] sm:$0xff] }
  0x3c   : > { %209 = vst [vmem:[%s3220_s5 + $0x68] sm:$0xff] %v208_v13  ;;  %v238_v28 = vld [vmem:[%s3215_s11 + $0x380] sm:$0xff]  ;;  %v240_v29 = vld [vmem:[%s3215_s11 + $0x388] sm:$0xff] }
  0x3d   : > { %211 = vst [vmem:[%s3220_s5 + $0x70] sm:$0xff] %v210_v14  ;;  %v242_v30 = vld [vmem:[%s3215_s11 + $0x3c0] sm:$0xff]  ;;  %v244_v31 = vld [vmem:[%s3215_s11 + $0x3c8] sm:$0xff] }
  0x3e   : > { %213 = vst [vmem:[%s3220_s5 + $0x78] sm:$0xff] %v212_v15  ;;  %v246_v32 = vld [vmem:[%s3215_s11 + $0x400] sm:$0xff]  ;;  %v248_v33 = vld [vmem:[%s3215_s11 + $0x408] sm:$0xff] }
  0x3f   : > { %215 = vst [vmem:[%s3220_s5 + $0x80] sm:$0xff] %v214_v16  ;;  %v250_v34 = vld [vmem:[%s3215_s11 + $0x440] sm:$0xff]  ;;  %v252_v35 = vld [vmem:[%s3215_s11 + $0x448] sm:$0xff] }
  0x40   : > { %217 = vst [vmem:[%s3220_s5 + $0x88] sm:$0xff] %v216_v17  ;;  %v254_v36 = vld [vmem:[%s3215_s11 + $0x480] sm:$0xff]  ;;  %v256_v37 = vld [vmem:[%s3215_s11 + $0x488] sm:$0xff] }
  0x41   : > { %219 = vst [vmem:[%s3220_s5 + $0x90] sm:$0xff] %v218_v18  ;;  %v258_v38 = vld [vmem:[%s3215_s11 + $0x4c0] sm:$0xff]  ;;  %v260_v39 = vld [vmem:[%s3215_s11 + $0x4c8] sm:$0xff] }
  0x42   : > { %221 = vst [vmem:[%s3220_s5 + $0x98] sm:$0xff] %v220_v19  ;;  %v262_v40 = vld [vmem:[%s3215_s11 + $0x500] sm:$0xff]  ;;  %v264_v41 = vld [vmem:[%s3215_s11 + $0x508] sm:$0xff] }
  0x43   : > { %223 = vst [vmem:[%s3220_s5 + $0xa0] sm:$0xff] %v222_v20  ;;  %v266_v42 = vld [vmem:[%s3215_s11 + $0x540] sm:$0xff]  ;;  %v268_v43 = vld [vmem:[%s3215_s11 + $0x548] sm:$0xff] }
  0x44   : > { %225 = vst [vmem:[%s3220_s5 + $0xa8] sm:$0xff] %v224_v21  ;;  %v270_v44 = vld [vmem:[%s3215_s11 + $0x580] sm:$0xff]  ;;  %v272_v45 = vld [vmem:[%s3215_s11 + $0x588] sm:$0xff] }
  0x45   : > { %227 = vst [vmem:[%s3220_s5 + $0xb0] sm:$0xff] %v226_v22  ;;  %v274_v46 = vld [vmem:[%s3215_s11 + $0x5c0] sm:$0xff]  ;;  %v276_v47 = vld [vmem:[%s3215_s11 + $0x5c8] sm:$0xff] }
  0x46   : > { %229 = vst [vmem:[%s3220_s5 + $0xb8] sm:$0xff] %v228_v23  ;;  %v278_v48 = vld [vmem:[%s3215_s11 + $0x600] sm:$0xff]  ;;  %v280_v49 = vld [vmem:[%s3215_s11 + $0x608] sm:$0xff] }
  0x47   : > { %231 = vst [vmem:[%s3220_s5 + $0xc0] sm:$0xff] %v230_v24  ;;  %v282_v50 = vld [vmem:[%s3215_s11 + $0x640] sm:$0xff]  ;;  %v284_v51 = vld [vmem:[%s3215_s11 + $0x648] sm:$0xff] }
  0x48   : > { %233 = vst [vmem:[%s3220_s5 + $0xc8] sm:$0xff] %v232_v25  ;;  %v286_v52 = vld [vmem:[%s3215_s11 + $0x680] sm:$0xff]  ;;  %v288_v53 = vld [vmem:[%s3215_s11 + $0x688] sm:$0xff] }
  0x49   : > { %235 = vst [vmem:[%s3220_s5 + $0xd0] sm:$0xff] %v234_v26  ;;  %v290_v54 = vld [vmem:[%s3215_s11 + $0x6c0] sm:$0xff]  ;;  %v292_v55 = vld [vmem:[%s3215_s11 + $0x6c8] sm:$0xff] }
  0x4a   : > { %237 = vst [vmem:[%s3220_s5 + $0xd8] sm:$0xff] %v236_v27  ;;  %v294_v56 = vld [vmem:[%s3215_s11 + $0x700] sm:$0xff]  ;;  %v296_v57 = vld [vmem:[%s3215_s11 + $0x708] sm:$0xff] }
  0x4b   : > { %239 = vst [vmem:[%s3220_s5 + $0xe0] sm:$0xff] %v238_v28  ;;  %v298_v58 = vld [vmem:[%s3215_s11 + $0x740] sm:$0xff]  ;;  %v300_v59 = vld [vmem:[%s3215_s11 + $0x748] sm:$0xff] }
  0x4c   : > { %241 = vst [vmem:[%s3220_s5 + $0xe8] sm:$0xff] %v240_v29  ;;  %v302_v60 = vld [vmem:[%s3215_s11 + $0x780] sm:$0xff]  ;;  %v304_v61 = vld [vmem:[%s3215_s11 + $0x788] sm:$0xff] }
  0x4d   : > { %243 = vst [vmem:[%s3220_s5 + $0xf0] sm:$0xff] %v242_v30  ;;  %v306_v62 = vld [vmem:[%s3215_s11 + $0x7c0] sm:$0xff]  ;;  %v308_v63 = vld [vmem:[%s3215_s11 + $0x7c8] sm:$0xff] }
  0x4e   : > { %245 = vst [vmem:[%s3220_s5 + $0xf8] sm:$0xff] %v244_v31 }
  0x4f   : > { %247 = vst [vmem:[%s3220_s5 + $0x100] sm:$0xff] %v246_v32 }
  0x50   : > { %249 = vst [vmem:[%s3220_s5 + $0x108] sm:$0xff] %v248_v33 }
  0x51   : > { %251 = vst [vmem:[%s3220_s5 + $0x110] sm:$0xff] %v250_v34 }
  0x52   : > { %253 = vst [vmem:[%s3220_s5 + $0x118] sm:$0xff] %v252_v35 }
  0x53   : > { %255 = vst [vmem:[%s3220_s5 + $0x120] sm:$0xff] %v254_v36 }
  0x54   : > { %257 = vst [vmem:[%s3220_s5 + $0x128] sm:$0xff] %v256_v37 }
  0x55   : > { %259 = vst [vmem:[%s3220_s5 + $0x130] sm:$0xff] %v258_v38 }
  0x56   : > { %261 = vst [vmem:[%s3220_s5 + $0x138] sm:$0xff] %v260_v39 }
  0x57   : > { %263 = vst [vmem:[%s3220_s5 + $0x140] sm:$0xff] %v262_v40 }
  0x58   : > { %265 = vst [vmem:[%s3220_s5 + $0x148] sm:$0xff] %v264_v41 }
  0x59   : > { %267 = vst [vmem:[%s3220_s5 + $0x150] sm:$0xff] %v266_v42 }
  0x5a   : > { %269 = vst [vmem:[%s3220_s5 + $0x158] sm:$0xff] %v268_v43 }
  0x5b   : > { %271 = vst [vmem:[%s3220_s5 + $0x160] sm:$0xff] %v270_v44 }
  0x5c   : > { %273 = vst [vmem:[%s3220_s5 + $0x168] sm:$0xff] %v272_v45 }
  0x5d   : > { %275 = vst [vmem:[%s3220_s5 + $0x170] sm:$0xff] %v274_v46 }
  0x5e   : > { %277 = vst [vmem:[%s3220_s5 + $0x178] sm:$0xff] %v276_v47 }
  0x5f   : > { %279 = vst [vmem:[%s3220_s5 + $0x180] sm:$0xff] %v278_v48 }
  0x60   : > { %281 = vst [vmem:[%s3220_s5 + $0x188] sm:$0xff] %v280_v49 }
  0x61   : > { %283 = vst [vmem:[%s3220_s5 + $0x190] sm:$0xff] %v282_v50 }
  0x62   : > { %285 = vst [vmem:[%s3220_s5 + $0x198] sm:$0xff] %v284_v51 }
  0x63   : > { %287 = vst [vmem:[%s3220_s5 + $0x1a0] sm:$0xff] %v286_v52 }
  0x64   : > { %289 = vst [vmem:[%s3220_s5 + $0x1a8] sm:$0xff] %v288_v53 }
  0x65   : > { %291 = vst [vmem:[%s3220_s5 + $0x1b0] sm:$0xff] %v290_v54 }
  0x66   : > { %293 = vst [vmem:[%s3220_s5 + $0x1b8] sm:$0xff] %v292_v55 }
  0x67   : > { %295 = vst [vmem:[%s3220_s5 + $0x1c0] sm:$0xff] %v294_v56 }
  0x68   : > { %297 = vst [vmem:[%s3220_s5 + $0x1c8] sm:$0xff] %v296_v57 }
  0x69   : > { %299 = vst [vmem:[%s3220_s5 + $0x1d0] sm:$0xff] %v298_v58 }
  0x6a   : > { %301 = vst [vmem:[%s3220_s5 + $0x1d8] sm:$0xff] %v300_v59 }
  0x6b   : > { %303 = vst [vmem:[%s3220_s5 + $0x1e0] sm:$0xff] %v302_v60 }
  0x6c   : > { %305 = vst [vmem:[%s3220_s5 + $0x1e8] sm:$0xff] %v304_v61 }
  0x6d   : > { %307 = vst [vmem:[%s3220_s5 + $0x1f0] sm:$0xff] %v306_v62 }
  0x6e   : > { %309 = vst [vmem:[%s3220_s5 + $0x1f8] sm:$0xff] %v308_v63 }
  0x6f PF: > { %315 = sbr.rel (!%p3180_p8) target bundleno = 185 (0xb9), region = 43  ;;  %s317_s25 = sand.u32 (%p3180_p8), 1, %s3031_s15  }
  0x70   : > { %s2857_s26 = smul.u32 (%p3180_p8), 192, %s3055_s21  ;;  %s2265_s27 = sshll.u32 (%p3180_p8), %s317_s25, 8 }
  0x71   : > { %s3858_s1 = sld [smem:[#allocation10_spill]] (%p3180_p8)  ;;  %s3360_s8 = scalar_lea.vmem (%p3180_p8), [#allocation4], %s2265_s27 }
  0x72   : > { %s322_s29 = sadd.s32 (%p3180_p8), %s3059_s22, %s2857_s26 }
  0x73   : > { %s2268_s30 = sshll.u32 (%p3180_p8), %s322_s29, 2 }
  0x77   : > { %s3355_s10 = scalar_lea.vmem %s3858_s1, %s2268_s30 }
  0x78   : > { %v341_v0 = vld [vmem:[%s3355_s10] sm:$0xf]  ;;  %v343_v1 = vld [vmem:[%s3355_s10 + $0xc] sm:$0xf]  ;;  %v345_v2 = vld [vmem:[%s3355_s10 + $0x18] sm:$0xf] }
  0x79   : > { %342 = vst [vmem:[%s3360_s8] sm:$0xf] %v341_v0  ;;  %v347_v3 = vld [vmem:[%s3355_s10 + $0x24] sm:$0xf]  ;;  %v349_v4 = vld [vmem:[%s3355_s10 + $0x30] sm:$0xf] }
  0x7a   : > { %344 = vst [vmem:[%s3360_s8 + $0x4] sm:$0xf] %v343_v1  ;;  %v351_v5 = vld [vmem:[%s3355_s10 + $0x3c] sm:$0xf]  ;;  %v353_v6 = vld [vmem:[%s3355_s10 + $0x48] sm:$0xf] }
  0x7b   : > { %346 = vst [vmem:[%s3360_s8 + $0x8] sm:$0xf] %v345_v2  ;;  %v355_v7 = vld [vmem:[%s3355_s10 + $0x54] sm:$0xf]  ;;  %v357_v8 = vld [vmem:[%s3355_s10 + $0x60] sm:$0xf] }
  0x7c   : > { %348 = vst [vmem:[%s3360_s8 + $0xc] sm:$0xf] %v347_v3  ;;  %v359_v9 = vld [vmem:[%s3355_s10 + $0x6c] sm:$0xf]  ;;  %v361_v10 = vld [vmem:[%s3355_s10 + $0x78] sm:$0xf] }
  0x7d   : > { %350 = vst [vmem:[%s3360_s8 + $0x10] sm:$0xf] %v349_v4  ;;  %v363_v11 = vld [vmem:[%s3355_s10 + $0x84] sm:$0xf]  ;;  %v365_v12 = vld [vmem:[%s3355_s10 + $0x90] sm:$0xf] }
  0x7e   : > { %352 = vst [vmem:[%s3360_s8 + $0x14] sm:$0xf] %v351_v5  ;;  %v367_v13 = vld [vmem:[%s3355_s10 + $0x9c] sm:$0xf]  ;;  %v369_v14 = vld [vmem:[%s3355_s10 + $0xa8] sm:$0xf] }
  0x7f   : > { %354 = vst [vmem:[%s3360_s8 + $0x18] sm:$0xf] %v353_v6  ;;  %v371_v15 = vld [vmem:[%s3355_s10 + $0xb4] sm:$0xf]  ;;  %v373_v16 = vld [vmem:[%s3355_s10 + $0xc0] sm:$0xf] }
  0x80   : > { %356 = vst [vmem:[%s3360_s8 + $0x1c] sm:$0xf] %v355_v7  ;;  %v375_v17 = vld [vmem:[%s3355_s10 + $0xcc] sm:$0xf]  ;;  %v377_v18 = vld [vmem:[%s3355_s10 + $0xd8] sm:$0xf] }
  0x81   : > { %358 = vst [vmem:[%s3360_s8 + $0x20] sm:$0xf] %v357_v8  ;;  %v379_v19 = vld [vmem:[%s3355_s10 + $0xe4] sm:$0xf]  ;;  %v381_v20 = vld [vmem:[%s3355_s10 + $0xf0] sm:$0xf] }
  0x82   : > { %360 = vst [vmem:[%s3360_s8 + $0x24] sm:$0xf] %v359_v9  ;;  %v383_v21 = vld [vmem:[%s3355_s10 + $0xfc] sm:$0xf]  ;;  %v385_v22 = vld [vmem:[%s3355_s10 + $0x108] sm:$0xf] }
  0x83   : > { %362 = vst [vmem:[%s3360_s8 + $0x28] sm:$0xf] %v361_v10  ;;  %v387_v23 = vld [vmem:[%s3355_s10 + $0x114] sm:$0xf]  ;;  %v389_v24 = vld [vmem:[%s3355_s10 + $0x120] sm:$0xf] }
  0x84   : > { %364 = vst [vmem:[%s3360_s8 + $0x2c] sm:$0xf] %v363_v11  ;;  %v391_v25 = vld [vmem:[%s3355_s10 + $0x12c] sm:$0xf]  ;;  %v393_v26 = vld [vmem:[%s3355_s10 + $0x138] sm:$0xf] }
  0x85   : > { %366 = vst [vmem:[%s3360_s8 + $0x30] sm:$0xf] %v365_v12  ;;  %v395_v27 = vld [vmem:[%s3355_s10 + $0x144] sm:$0xf]  ;;  %v397_v28 = vld [vmem:[%s3355_s10 + $0x150] sm:$0xf] }
  0x86   : > { %368 = vst [vmem:[%s3360_s8 + $0x34] sm:$0xf] %v367_v13  ;;  %v399_v29 = vld [vmem:[%s3355_s10 + $0x15c] sm:$0xf]  ;;  %v401_v30 = vld [vmem:[%s3355_s10 + $0x168] sm:$0xf] }
  0x87   : > { %370 = vst [vmem:[%s3360_s8 + $0x38] sm:$0xf] %v369_v14  ;;  %v403_v31 = vld [vmem:[%s3355_s10 + $0x174] sm:$0xf]  ;;  %v405_v32 = vld [vmem:[%s3355_s10 + $0x180] sm:$0xf] }
  0x88   : > { %372 = vst [vmem:[%s3360_s8 + $0x3c] sm:$0xf] %v371_v15  ;;  %v407_v33 = vld [vmem:[%s3355_s10 + $0x18c] sm:$0xf]  ;;  %v409_v34 = vld [vmem:[%s3355_s10 + $0x198] sm:$0xf] }
  0x89   : > { %374 = vst [vmem:[%s3360_s8 + $0x40] sm:$0xf] %v373_v16  ;;  %v411_v35 = vld [vmem:[%s3355_s10 + $0x1a4] sm:$0xf]  ;;  %v413_v36 = vld [vmem:[%s3355_s10 + $0x1b0] sm:$0xf] }
  0x8a   : > { %376 = vst [vmem:[%s3360_s8 + $0x44] sm:$0xf] %v375_v17  ;;  %v415_v37 = vld [vmem:[%s3355_s10 + $0x1bc] sm:$0xf]  ;;  %v417_v38 = vld [vmem:[%s3355_s10 + $0x1c8] sm:$0xf] }
  0x8b   : > { %378 = vst [vmem:[%s3360_s8 + $0x48] sm:$0xf] %v377_v18  ;;  %v419_v39 = vld [vmem:[%s3355_s10 + $0x1d4] sm:$0xf]  ;;  %v421_v40 = vld [vmem:[%s3355_s10 + $0x1e0] sm:$0xf] }
  0x8c   : > { %380 = vst [vmem:[%s3360_s8 + $0x4c] sm:$0xf] %v379_v19  ;;  %v423_v41 = vld [vmem:[%s3355_s10 + $0x1ec] sm:$0xf]  ;;  %v425_v42 = vld [vmem:[%s3355_s10 + $0x1f8] sm:$0xf] }
  0x8d   : > { %382 = vst [vmem:[%s3360_s8 + $0x50] sm:$0xf] %v381_v20  ;;  %v427_v43 = vld [vmem:[%s3355_s10 + $0x204] sm:$0xf]  ;;  %v429_v44 = vld [vmem:[%s3355_s10 + $0x210] sm:$0xf] }
  0x8e   : > { %384 = vst [vmem:[%s3360_s8 + $0x54] sm:$0xf] %v383_v21  ;;  %v431_v45 = vld [vmem:[%s3355_s10 + $0x21c] sm:$0xf]  ;;  %v433_v46 = vld [vmem:[%s3355_s10 + $0x228] sm:$0xf] }
  0x8f   : > { %386 = vst [vmem:[%s3360_s8 + $0x58] sm:$0xf] %v385_v22  ;;  %v435_v47 = vld [vmem:[%s3355_s10 + $0x234] sm:$0xf]  ;;  %v437_v48 = vld [vmem:[%s3355_s10 + $0x240] sm:$0xf] }
  0x90   : > { %388 = vst [vmem:[%s3360_s8 + $0x5c] sm:$0xf] %v387_v23  ;;  %v439_v49 = vld [vmem:[%s3355_s10 + $0x24c] sm:$0xf]  ;;  %v441_v50 = vld [vmem:[%s3355_s10 + $0x258] sm:$0xf] }
  0x91   : > { %390 = vst [vmem:[%s3360_s8 + $0x60] sm:$0xf] %v389_v24  ;;  %v443_v51 = vld [vmem:[%s3355_s10 + $0x264] sm:$0xf]  ;;  %v445_v52 = vld [vmem:[%s3355_s10 + $0x270] sm:$0xf] }
  0x92   : > { %392 = vst [vmem:[%s3360_s8 + $0x64] sm:$0xf] %v391_v25  ;;  %v447_v53 = vld [vmem:[%s3355_s10 + $0x27c] sm:$0xf]  ;;  %v449_v54 = vld [vmem:[%s3355_s10 + $0x288] sm:$0xf] }
  0x93   : > { %394 = vst [vmem:[%s3360_s8 + $0x68] sm:$0xf] %v393_v26  ;;  %v451_v55 = vld [vmem:[%s3355_s10 + $0x294] sm:$0xf]  ;;  %v453_v56 = vld [vmem:[%s3355_s10 + $0x2a0] sm:$0xf] }
  0x94   : > { %396 = vst [vmem:[%s3360_s8 + $0x6c] sm:$0xf] %v395_v27  ;;  %v455_v57 = vld [vmem:[%s3355_s10 + $0x2ac] sm:$0xf]  ;;  %v457_v58 = vld [vmem:[%s3355_s10 + $0x2b8] sm:$0xf] }
  0x95   : > { %398 = vst [vmem:[%s3360_s8 + $0x70] sm:$0xf] %v397_v28  ;;  %v459_v59 = vld [vmem:[%s3355_s10 + $0x2c4] sm:$0xf]  ;;  %v461_v60 = vld [vmem:[%s3355_s10 + $0x2d0] sm:$0xf] }
  0x96   : > { %400 = vst [vmem:[%s3360_s8 + $0x74] sm:$0xf] %v399_v29  ;;  %v463_v61 = vld [vmem:[%s3355_s10 + $0x2dc] sm:$0xf]  ;;  %v465_v62 = vld [vmem:[%s3355_s10 + $0x2e8] sm:$0xf] }
  0x97   : > { %402 = vst [vmem:[%s3360_s8 + $0x78] sm:$0xf] %v401_v30  ;;  %v467_v63 = vld [vmem:[%s3355_s10 + $0x2f4] sm:$0xf] }
  0x98   : > { %404 = vst [vmem:[%s3360_s8 + $0x7c] sm:$0xf] %v403_v31 }
  0x99   : > { %406 = vst [vmem:[%s3360_s8 + $0x80] sm:$0xf] %v405_v32 }
  0x9a   : > { %408 = vst [vmem:[%s3360_s8 + $0x84] sm:$0xf] %v407_v33 }
  0x9b   : > { %410 = vst [vmem:[%s3360_s8 + $0x88] sm:$0xf] %v409_v34 }
  0x9c   : > { %412 = vst [vmem:[%s3360_s8 + $0x8c] sm:$0xf] %v411_v35 }
  0x9d   : > { %414 = vst [vmem:[%s3360_s8 + $0x90] sm:$0xf] %v413_v36 }
  0x9e   : > { %416 = vst [vmem:[%s3360_s8 + $0x94] sm:$0xf] %v415_v37 }
  0x9f   : > { %418 = vst [vmem:[%s3360_s8 + $0x98] sm:$0xf] %v417_v38 }
  0xa0   : > { %420 = vst [vmem:[%s3360_s8 + $0x9c] sm:$0xf] %v419_v39 }
  0xa1   : > { %422 = vst [vmem:[%s3360_s8 + $0xa0] sm:$0xf] %v421_v40 }
  0xa2   : > { %424 = vst [vmem:[%s3360_s8 + $0xa4] sm:$0xf] %v423_v41 }
  0xa3   : > { %426 = vst [vmem:[%s3360_s8 + $0xa8] sm:$0xf] %v425_v42 }
  0xa4   : > { %428 = vst [vmem:[%s3360_s8 + $0xac] sm:$0xf] %v427_v43 }
  0xa5   : > { %430 = vst [vmem:[%s3360_s8 + $0xb0] sm:$0xf] %v429_v44 }
  0xa6   : > { %432 = vst [vmem:[%s3360_s8 + $0xb4] sm:$0xf] %v431_v45 }
  0xa7   : > { %434 = vst [vmem:[%s3360_s8 + $0xb8] sm:$0xf] %v433_v46 }
  0xa8   : > { %436 = vst [vmem:[%s3360_s8 + $0xbc] sm:$0xf] %v435_v47 }
  0xa9   : > { %438 = vst [vmem:[%s3360_s8 + $0xc0] sm:$0xf] %v437_v48 }
  0xaa   : > { %440 = vst [vmem:[%s3360_s8 + $0xc4] sm:$0xf] %v439_v49 }
  0xab   : > { %442 = vst [vmem:[%s3360_s8 + $0xc8] sm:$0xf] %v441_v50 }
  0xac   : > { %444 = vst [vmem:[%s3360_s8 + $0xcc] sm:$0xf] %v443_v51 }
  0xad   : > { %446 = vst [vmem:[%s3360_s8 + $0xd0] sm:$0xf] %v445_v52 }
  0xae   : > { %448 = vst [vmem:[%s3360_s8 + $0xd4] sm:$0xf] %v447_v53 }
  0xaf   : > { %450 = vst [vmem:[%s3360_s8 + $0xd8] sm:$0xf] %v449_v54 }
  0xb0   : > { %452 = vst [vmem:[%s3360_s8 + $0xdc] sm:$0xf] %v451_v55 }
  0xb1   : > { %454 = vst [vmem:[%s3360_s8 + $0xe0] sm:$0xf] %v453_v56 }
  0xb2   : > { %456 = vst [vmem:[%s3360_s8 + $0xe4] sm:$0xf] %v455_v57 }
  0xb3   : > { %458 = vst [vmem:[%s3360_s8 + $0xe8] sm:$0xf] %v457_v58 }
  0xb4   : > { %460 = vst [vmem:[%s3360_s8 + $0xec] sm:$0xf] %v459_v59 }
  0xb5   : > { %462 = vst [vmem:[%s3360_s8 + $0xf0] sm:$0xf] %v461_v60 }
  0xb6   : > { %464 = vst [vmem:[%s3360_s8 + $0xf4] sm:$0xf] %v463_v61 }
  0xb7   : > { %466 = vst [vmem:[%s3360_s8 + $0xf8] sm:$0xf] %v465_v62 }
  0xb8   : > { %468 = vst [vmem:[%s3360_s8 + $0xfc] sm:$0xf] %v467_v63 }
  0xb9 PF: > { %p2269_p1 = scmp.ge.s32.totalorder %s3067_s24, 1  ;;  %p625_p2 = scmp.lt.s32.totalorder %s3067_s24, 25 }
  0xbb   : > { %p626_p3 = pnand %p2269_p1, %p625_p2 }
  0xbc   : > { %s632_s11 = sand.u32 (!%p626_p3), 1, %s3035_s16   ;;  %s639_s5 = sand.u32 (!%p626_p3), 1, %s3027_s14  }
  0xbd   : > { %629 = sbr.rel (%p626_p3) target bundleno = 723 (0x2d3), region = 88  ;;  %s2270_s25 = sshll.u32 (!%p626_p3), %s632_s11, 9 }
  0xbe   : > { %s2271_s26 = sshll.u32 (!%p626_p3), %s639_s5, 8  ;;  %s665_s27 = sand.u32 (!%p626_p3), 1, %s3019_s12  }
  0xbf   : > { %p671_p4 = scmp.lt.s32.totalorder (!%p626_p3), %s3047_s19, 2  ;;  %s2272_s29 = sshll.u32 (!%p626_p3), %s665_s27, 7 }
  0xc0   : > { %s3500_s8 = scalar_lea.vmem (!%p626_p3), [#allocation3], %s2270_s25  ;;  %s3502_s0 = scalar_lea.vmem (!%p626_p3), [#allocation4], %s2271_s26 }
  0xc1   : > { %s3504_s1 = scalar_lea.vmem (!%p626_p3), [#allocation5], %s2272_s29  ;;  %p2273_p5 = scmp.ne.s32.totalorder (!%p626_p3), %s3043_s18, 0 }
  0xc2   : > { %s3494_s30 = scalar_select %p671_p4, %s3047_s19, 2 }
  0xc3   : > { %678 = sbr.rel (%p2273_p5) target bundleno = 233 (0xe9), region = 100 }
  0xc4   : > { %s673_s10 = scalar_lea.vmem %s3843_s2, %s3494_s30 }
  0xc8   : > { %v3069_v0 = vmov 0.0  }
  0xc9   : > { %679 = vst [vmem:[#allocation2 + $0xb0] sm:$0xff] %v3069_v0 }
  0xca   : > { %680 = vst [vmem:[#allocation2] sm:$0xff] %v3069_v0 }
  0xcb   : > { %681 = vst [vmem:[#allocation2 + $0xd8] sm:$0xff] %v3069_v0 }
  0xcc   : > { %682 = vst [vmem:[#allocation2 + $0x18] sm:$0xff] %v3069_v0 }
  0xcd   : > { %683 = vst [vmem:[#allocation2 + $0x50] sm:$0xff] %v3069_v0 }
  0xce   : > { %684 = vst [vmem:[#allocation2 + $0x68] sm:$0xff] %v3069_v0 }
  0xcf   : > { %685 = vst [vmem:[#allocation2 + $0x30] sm:$0xff] %v3069_v0 }
  0xd0   : > { %686 = vst [vmem:[#allocation2 + $0x48] sm:$0xff] %v3069_v0 }
  0xd1   : > { %687 = vst [vmem:[#allocation2 + $0x80] sm:$0xff] %v3069_v0 }
  0xd2   : > { %688 = vst [vmem:[#allocation2 + $0x88] sm:$0xff] %v3069_v0 }
  0xd3   : > { %689 = vst [vmem:[#allocation2 + $0xe8] sm:$0xff] %v3069_v0 }
  0xd4   : > { %690 = vst [vmem:[#allocation2 + $0xb8] sm:$0xff] %v3069_v0 }
  0xd5   : > { %691 = vst [vmem:[#allocation2 + $0x60] sm:$0xff] %v3069_v0 }
  0xd6   : > { %692 = vst [vmem:[#allocation2 + $0xf0] sm:$0xff] %v3069_v0 }
  0xd7   : > { %693 = vst [vmem:[#allocation2 + $0x8] sm:$0xff] %v3069_v0 }
  0xd8   : > { %694 = vst [vmem:[#allocation2 + $0x78] sm:$0xff] %v3069_v0 }
  0xd9   : > { %695 = vst [vmem:[#allocation2 + $0x38] sm:$0xff] %v3069_v0 }
  0xda   : > { %696 = vst [vmem:[#allocation2 + $0x58] sm:$0xff] %v3069_v0 }
  0xdb   : > { %697 = vst [vmem:[#allocation2 + $0x40] sm:$0xff] %v3069_v0 }
  0xdc   : > { %698 = vst [vmem:[#allocation2 + $0xc8] sm:$0xff] %v3069_v0 }
  0xdd   : > { %699 = vst [vmem:[#allocation2 + $0xe0] sm:$0xff] %v3069_v0 }
  0xde   : > { %700 = vst [vmem:[#allocation2 + $0x90] sm:$0xff] %v3069_v0 }
  0xdf   : > { %701 = vst [vmem:[#allocation2 + $0x70] sm:$0xff] %v3069_v0 }
  0xe0   : > { %702 = vst [vmem:[#allocation2 + $0xc0] sm:$0xff] %v3069_v0 }
  0xe1   : > { %703 = vst [vmem:[#allocation2 + $0xa8] sm:$0xff] %v3069_v0 }
  0xe2   : > { %704 = vst [vmem:[#allocation2 + $0xd0] sm:$0xff] %v3069_v0 }
  0xe3   : > { %705 = vst [vmem:[#allocation2 + $0x10] sm:$0xff] %v3069_v0 }
  0xe4   : > { %706 = vst [vmem:[#allocation2 + $0x28] sm:$0xff] %v3069_v0 }
  0xe5   : > { %707 = vst [vmem:[#allocation2 + $0xa0] sm:$0xff] %v3069_v0 }
  0xe6   : > { %708 = vst [vmem:[#allocation2 + $0xf8] sm:$0xff] %v3069_v0 }
  0xe7   : > { %709 = vst [vmem:[#allocation2 + $0x20] sm:$0xff] %v3069_v0 }
  0xe8   : > { %710 = vst [vmem:[#allocation2 + $0x98] sm:$0xff] %v3069_v0 }
  0xe9 PF: > { %v2737_v1 = vld [vmem:[%s3502_s0 + $0x38] sm:$0xff]  ;;  %v2736_v5 = vld [vmem:[%s3502_s0 + $0x30] sm:$0xff]  ;;  %v2735_v9 = vld [vmem:[%s3502_s0 + $0x28] sm:$0xff]  ;;  %p2658_p6 = scmp.ne.s32.totalorder %s3043_s18, 3 }
  0xea   : > { %v2745_v2 = vld [vmem:[%s3502_s0 + $0x78] sm:$0xff]  ;;  %1383 = vmatpush.bf16.msra.mxu0 %v2737_v1  ;;  %v2744_v6 = vld [vmem:[%s3502_s0 + $0x70] sm:$0xff]  ;;  %v2743_v10 = vld [vmem:[%s3502_s0 + $0x68] sm:$0xff] }
  0xeb   : > { %v2753_v3 = vld [vmem:[%s3502_s0 + $0xb8] sm:$0xff]  ;;  %1472 = vmatpush.bf16.msra.mxu1 %v2745_v2  ;;  %v2752_v7 = vld [vmem:[%s3502_s0 + $0xb0] sm:$0xff]  ;;  %v2751_v11 = vld [vmem:[%s3502_s0 + $0xa8] sm:$0xff] }
  0xec   : > { %v2761_v4 = vld [vmem:[%s3502_s0 + $0xf8] sm:$0xff]  ;;  %1561 = vmatpush.bf16.msra.mxu2 %v2753_v3  ;;  %v2760_v8 = vld [vmem:[%s3502_s0 + $0xf0] sm:$0xff]  ;;  %v2759_v12 = vld [vmem:[%s3502_s0 + $0xe8] sm:$0xff] }
  0xed   : > { %1650 = vmatpush.bf16.msra.mxu3 %v2761_v4  ;;  %v2734_v13 = vld [vmem:[%s3502_s0 + $0x20] sm:$0xff]  ;;  %v2733_v17 = vld [vmem:[%s3502_s0 + $0x18] sm:$0xff]  ;;  %v2732_v21 = vld [vmem:[%s3502_s0 + $0x10] sm:$0xff] }
  0xee   : > { %1384 = vmatpush.bf16.msra.mxu0 %v2736_v5  ;;  %v2742_v14 = vld [vmem:[%s3502_s0 + $0x60] sm:$0xff]  ;;  %v2741_v18 = vld [vmem:[%s3502_s0 + $0x58] sm:$0xff]  ;;  %v2740_v22 = vld [vmem:[%s3502_s0 + $0x50] sm:$0xff] }
  0xef   : > { %1473 = vmatpush.bf16.msra.mxu1 %v2744_v6  ;;  %v2750_v15 = vld [vmem:[%s3502_s0 + $0xa0] sm:$0xff]  ;;  %v2749_v19 = vld [vmem:[%s3502_s0 + $0x98] sm:$0xff]  ;;  %v2748_v23 = vld [vmem:[%s3502_s0 + $0x90] sm:$0xff] }
  0xf0   : > { %1562 = vmatpush.bf16.msra.mxu2 %v2752_v7  ;;  %v2758_v16 = vld [vmem:[%s3502_s0 + $0xe0] sm:$0xff]  ;;  %v2757_v20 = vld [vmem:[%s3502_s0 + $0xd8] sm:$0xff]  ;;  %v2756_v24 = vld [vmem:[%s3502_s0 + $0xd0] sm:$0xff] }
  0xf1   : > { %1651 = vmatpush.bf16.msra.mxu3 %v2760_v8  ;;  %v2731_v25 = vld [vmem:[%s3502_s0 + $0x8] sm:$0xff]  ;;  %v2730_v29 = vld [vmem:[%s3502_s0] sm:$0xff]  ;;  %v2668_v34 = vld [vmem:[%s3500_s8 + $0xc] sm:$0xf0] }
  0xf2   : > { %1385 = vmatpush.bf16.msra.mxu0 %v2735_v9  ;;  %v2739_v26 = vld [vmem:[%s3502_s0 + $0x48] sm:$0xff]  ;;  %v2738_v30 = vld [vmem:[%s3502_s0 + $0x40] sm:$0xff]  ;;  %v2278_v36 = vld [vmem:[%s3500_s8 + $0x10] sm:$0xf0] }
  0xf3   : > { %1474 = vmatpush.bf16.msra.mxu1 %v2743_v10  ;;  %v2747_v27 = vld [vmem:[%s3502_s0 + $0x88] sm:$0xff]  ;;  %v2746_v31 = vld [vmem:[%s3502_s0 + $0x80] sm:$0xff]  ;;  %v2669_v38 = vld [vmem:[%s3500_s8 + $0x14] sm:$0xf0] }
  0xf4   : > { %1563 = vmatpush.bf16.msra.mxu2 %v2751_v11  ;;  %v2755_v28 = vld [vmem:[%s3502_s0 + $0xc8] sm:$0xff]  ;;  %v2754_v32 = vld [vmem:[%s3502_s0 + $0xc0] sm:$0xff]  ;;  %v2286_v40 = vld [vmem:[%s3500_s8 + $0x18] sm:$0xf0] }
  0xf5   : > { %1652 = vmatpush.bf16.msra.mxu3 %v2759_v12  ;;  %v2276_v33 = vld [vmem:[%s3500_s8] sm:$0xf]  ;;  %v2666_v35 = vld [vmem:[%s3500_s8 + $0x4] sm:$0xf]  ;;  %v2284_v37 = vld [vmem:[%s3500_s8 + $0x8] sm:$0xf] }
  0xf6   : > { %1386 = vmatpush.bf16.msra.mxu0 %v2734_v13  ;;  %v2667_v39 = vld [vmem:[%s3500_s8 + $0xc] sm:$0xf]  ;;  %v2277_v41 = vor.u32 %v2668_v34, %v2276_v33  ;;  %v2281_v42 = vor.u32 %v2666_v35, %v2278_v36  ;;  %v2285_v43 = vor.u32 %v2669_v38, %v2284_v37  ;;  %v2292_v45 = vld [vmem:[%s3500_s8 + $0x20] sm:$0xf]  ;;  %v2672_v46 = vld [vmem:[%s3500_s8 + $0x2c] sm:$0xf0] }
  0xf7   : > { %1475 = vmatpush.bf16.msra.mxu1 %v2742_v14  ;;  %v2289_v44 = vor.u32 %v2667_v39, %v2286_v40  ;;  %v2670_v47 = vld [vmem:[%s3500_s8 + $0x24] sm:$0xf]  ;;  %v2294_v48 = vld [vmem:[%s3500_s8 + $0x30] sm:$0xf0]  ;;  %v2300_v49 = vld [vmem:[%s3500_s8 + $0x28] sm:$0xf]  ;;  %v2293_v53 = vor.u32 %v2672_v46, %v2292_v45 }
  0xf8   : > { %1564 = vmatpush.bf16.msra.mxu2 %v2750_v15  ;;  %v2673_v50 = vld [vmem:[%s3500_s8 + $0x34] sm:$0xf0]  ;;  %v2671_v51 = vld [vmem:[%s3500_s8 + $0x2c] sm:$0xf]  ;;  %v2302_v52 = vld [vmem:[%s3500_s8 + $0x38] sm:$0xf0]  ;;  %v2297_v54 = vor.u32 %v2670_v47, %v2294_v48 }
  0xf9   : > { %1653 = vmatpush.bf16.msra.mxu3 %v2758_v16  ;;  %v2301_v55 = vor.u32 %v2673_v50, %v2300_v49  ;;  %v2305_v56 = vor.u32 %v2671_v51, %v2302_v52  ;;  %v2308_v57 = vld [vmem:[%s3500_s8 + $0x40] sm:$0xf]  ;;  %v2676_v58 = vld [vmem:[%s3500_s8 + $0x4c] sm:$0xf0]  ;;  %v2674_v59 = vld [vmem:[%s3500_s8 + $0x44] sm:$0xf] }
  0xfa   : > { %1387 = vmatpush.bf16.msra.mxu0 %v2733_v17  ;;  %v2310_v60 = vld [vmem:[%s3500_s8 + $0x50] sm:$0xf0]  ;;  %v2316_v61 = vld [vmem:[%s3500_s8 + $0x48] sm:$0xf]  ;;  %v2677_v62 = vld [vmem:[%s3500_s8 + $0x54] sm:$0xf0]  ;;  %v2309_v1 = vor.u32 %v2676_v58, %v2308_v57 }
  0xfb   : > { %1476 = vmatpush.bf16.msra.mxu1 %v2741_v18  ;;  %v2675_v63 = vld [vmem:[%s3500_s8 + $0x4c] sm:$0xf]  ;;  %v2318_v0 = vld [vmem:[%s3500_s8 + $0x58] sm:$0xf0]  ;;  %v2313_v2 = vor.u32 %v2674_v59, %v2310_v60  ;;  %v2317_v3 = vor.u32 %v2677_v62, %v2316_v61  ;;  %v2324_v5 = vld [vmem:[%s3500_s8 + $0x60] sm:$0xf] }
  0xfc   : > { %1565 = vmatpush.bf16.msra.mxu2 %v2749_v19  ;;  %v2321_v4 = vor.u32 %v2675_v63, %v2318_v0  ;;  %v2680_v6 = vld [vmem:[%s3500_s8 + $0x6c] sm:$0xf0]  ;;  %v2678_v7 = vld [vmem:[%s3500_s8 + $0x64] sm:$0xf]  ;;  %v2326_v8 = vld [vmem:[%s3500_s8 + $0x70] sm:$0xf0] }
  0xfd   : > { %1654 = vmatpush.bf16.msra.mxu3 %v2757_v20  ;;  %v2332_v9 = vld [vmem:[%s3500_s8 + $0x68] sm:$0xf]  ;;  %v2681_v10 = vld [vmem:[%s3500_s8 + $0x74] sm:$0xf0]  ;;  %v2679_v11 = vld [vmem:[%s3500_s8 + $0x6c] sm:$0xf]  ;;  %v2325_v13 = vor.u32 %v2680_v6, %v2324_v5  ;;  %v2329_v14 = vor.u32 %v2678_v7, %v2326_v8 }
  0xfe   : > { %1388 = vmatpush.bf16.msra.mxu0 %v2732_v21  ;;  %v2334_v12 = vld [vmem:[%s3500_s8 + $0x78] sm:$0xf0]  ;;  %v2333_v15 = vor.u32 %v2681_v10, %v2332_v9  ;;  %v2340_v17 = vld [vmem:[%s3500_s8 + $0x80] sm:$0xf]  ;;  %v2684_v18 = vld [vmem:[%s3500_s8 + $0x8c] sm:$0xf0] }
  0xff   : > { %1477 = vmatpush.bf16.msra.mxu1 %v2740_v22  ;;  %v2337_v16 = vor.u32 %v2679_v11, %v2334_v12  ;;  %v2682_v19 = vld [vmem:[%s3500_s8 + $0x84] sm:$0xf]  ;;  %v2342_v20 = vld [vmem:[%s3500_s8 + $0x90] sm:$0xf0]  ;;  %v2348_v21 = vld [vmem:[%s3500_s8 + $0x88] sm:$0xf] }
 0x100   : > { %1566 = vmatpush.bf16.msra.mxu2 %v2748_v23  ;;  %v2685_v22 = vld [vmem:[%s3500_s8 + $0x94] sm:$0xf0]  ;;  %v2683_v23 = vld [vmem:[%s3500_s8 + $0x8c] sm:$0xf]  ;;  %v2364_v33 = vld [vmem:[%s3500_s8 + $0xa8] sm:$0xf] }
 0x101   : > { %1655 = vmatpush.bf16.msra.mxu3 %v2756_v24  ;;  %v2350_v24 = vld [vmem:[%s3500_s8 + $0x98] sm:$0xf0]  ;;  %v2689_v34 = vld [vmem:[%s3500_s8 + $0xb4] sm:$0xf0]  ;;  %v2687_v35 = vld [vmem:[%s3500_s8 + $0xac] sm:$0xf] }
 0x102   : > { %1389 = vmatpush.bf16.msra.mxu0 %v2731_v25  ;;  %v2341_v25 = vor.u32 %v2684_v18, %v2340_v17  ;;  %v2366_v36 = vld [vmem:[%s3500_s8 + $0xb8] sm:$0xf0]  ;;  %v2365_v39 = vor.u32 %v2689_v34, %v2364_v33  ;;  %v2380_v45 = vld [vmem:[%s3500_s8 + $0xc8] sm:$0xf]  ;;  %v2693_v46 = vld [vmem:[%s3500_s8 + $0xd4] sm:$0xf0] }
 0x103   : > { %1478 = vmatpush.bf16.msra.mxu1 %v2739_v26  ;;  %v2345_v26 = vor.u32 %v2682_v19, %v2342_v20  ;;  %v2369_v40 = vor.u32 %v2687_v35, %v2366_v36  ;;  %v2691_v47 = vld [vmem:[%s3500_s8 + $0xcc] sm:$0xf]  ;;  %v2382_v48 = vld [vmem:[%s3500_s8 + $0xd8] sm:$0xf0]  ;;  %v2381_v51 = vor.u32 %v2693_v46, %v2380_v45  ;;  %v2396_v57 = vld [vmem:[%s3500_s8 + $0xe8] sm:$0xf] }
 0x104   : > { %1567 = vmatpush.bf16.msra.mxu2 %v2747_v27  ;;  %v2349_v27 = vor.u32 %v2685_v22, %v2348_v21  ;;  %v2385_v52 = vor.u32 %v2691_v47, %v2382_v48  ;;  %v2697_v58 = vld [vmem:[%s3500_s8 + $0xf4] sm:$0xf0]  ;;  %v2695_v59 = vld [vmem:[%s3500_s8 + $0xec] sm:$0xf]  ;;  %v2398_v60 = vld [vmem:[%s3500_s8 + $0xf8] sm:$0xf0] }
 0x105   : > { %1656 = vmatpush.bf16.msra.mxu3 %v2755_v28  ;;  %v2353_v28 = vor.u32 %v2683_v23, %v2350_v24  ;;  %v2397_v63 = vor.u32 %v2697_v58, %v2396_v57  ;;  %v2401_v0 = vor.u32 %v2695_v59, %v2398_v60  ;;  %v2412_v5 = vld [vmem:[%s3500_s8 + $0x108] sm:$0xf]  ;;  %v2701_v6 = vld [vmem:[%s3500_s8 + $0x114] sm:$0xf0]  ;;  %v2699_v7 = vld [vmem:[%s3500_s8 + $0x10c] sm:$0xf] }
 0x106   : > { %1390 = vmatpush.bf16.msra.mxu0 %v2730_v29  ;;  %v2356_v29 = vld [vmem:[%s3500_s8 + $0xa0] sm:$0xf]  ;;  %v2414_v8 = vld [vmem:[%s3500_s8 + $0x118] sm:$0xf0]  ;;  %v711_v21 = vld [vmem:[#allocation2 + $0xb0] sm:$0xff] }
 0x107   : > { %1479 = vmatpush.bf16.msra.mxu1 %v2738_v30  ;;  %v2688_v30 = vld [vmem:[%s3500_s8 + $0xac] sm:$0xf0]  ;;  %v2420_v23 = vld [vmem:[%s3500_s8 + $0x120] sm:$0xf]  ;;  %v2438_v57 = vld [vmem:[%s3500_s8 + $0x150] sm:$0xf0] }
 0x108   : > { %1568 = vmatpush.bf16.msra.mxu2 %v2746_v31  ;;  %v2686_v31 = vld [vmem:[%s3500_s8 + $0xa4] sm:$0xf]  ;;  %v2357_v37 = vor.u32 %v2688_v30, %v2356_v29  ;;  %v2704_v24 = vld [vmem:[%s3500_s8 + $0x12c] sm:$0xf0]  ;;  %v2705_v29 = vld [vmem:[%s3500_s8 + $0x134] sm:$0xf0] }
 0x109   : > { %1657 = vmatpush.bf16.msra.mxu3 %v2754_v32  ;;  %1391 = vmatmul.bf16.vlgmr.msra.gmra.mxu0 %v2277_v41  ;;  %v2358_v32 = vld [vmem:[%s3500_s8 + $0xb0] sm:$0xf0]  ;;  %v2372_v41 = vld [vmem:[%s3500_s8 + $0xc0] sm:$0xf]  ;;  %v2703_v30 = vld [vmem:[%s3500_s8 + $0x12c] sm:$0xf]  ;;  %v2421_v35 = vor.u32 %v2704_v24, %v2420_v23 }
 0x10a   : > { %1480 = vmatmul.bf16.vlgmr.msra.gmra.mxu1 %v2281_v42  ;;  %v2361_v38 = vor.u32 %v2686_v31, %v2358_v32  ;;  %v2692_v42 = vld [vmem:[%s3500_s8 + $0xcc] sm:$0xf0]  ;;  %v2430_v31 = vld [vmem:[%s3500_s8 + $0x138] sm:$0xf0]  ;;  %v2444_v58 = vld [vmem:[%s3500_s8 + $0x148] sm:$0xf] }
 0x10b   : > { %1569 = vmatmul.bf16.vlgmr.msra.gmra.mxu2 %v2285_v43  ;;  %v2690_v43 = vld [vmem:[%s3500_s8 + $0xc4] sm:$0xf]  ;;  %v2373_v49 = vor.u32 %v2692_v42, %v2372_v41  ;;  %v2433_v41 = vor.u32 %v2703_v30, %v2430_v31  ;;  %v2709_v59 = vld [vmem:[%s3500_s8 + $0x154] sm:$0xf0]  ;;  %v2707_v60 = vld [vmem:[%s3500_s8 + $0x14c] sm:$0xf] }
 0x10c   : > { %1658 = vmatmul.bf16.vlgmr.msra.gmra.mxu3 %v2289_v44  ;;  %v2374_v44 = vld [vmem:[%s3500_s8 + $0xd0] sm:$0xf0]  ;;  %v712_v42 = vld [vmem:[#allocation2] sm:$0xff]  ;;  %v2460_v24 = vld [vmem:[%s3500_s8 + $0x168] sm:$0xf] }
 0x10d   : > { %v2377_v50 = vor.u32 %v2690_v43, %v2374_v44  ;;  %v2454_v23 = vld [vmem:[%s3500_s8 + $0x170] sm:$0xf0] }
 0x119   : > { %1396 = vmatmul.bf16.gmra.mxu0 %v2293_v53  ;;  %v2388_v53 = vld [vmem:[%s3500_s8 + $0xe0] sm:$0xf] }
 0x11a   : > { %1485 = vmatmul.bf16.gmra.mxu1 %v2297_v54  ;;  %v2696_v54 = vld [vmem:[%s3500_s8 + $0xec] sm:$0xf0] }
 0x11b   : > { %1574 = vmatmul.bf16.gmra.mxu2 %v2301_v55  ;;  %v2694_v55 = vld [vmem:[%s3500_s8 + $0xe4] sm:$0xf]  ;;  %v2389_v61 = vor.u32 %v2696_v54, %v2388_v53  ;;  %v2436_v53 = vld [vmem:[%s3500_s8 + $0x140] sm:$0xf]  ;;  %v2708_v54 = vld [vmem:[%s3500_s8 + $0x14c] sm:$0xf0] }
 0x11c   : > { %1663 = vmatmul.bf16.gmra.mxu3 %v2305_v56  ;;  %v2390_v56 = vld [vmem:[%s3500_s8 + $0xf0] sm:$0xf0] }
 0x11d   : > { %v2393_v62 = vor.u32 %v2694_v55, %v2390_v56  ;;  %v2706_v56 = vld [vmem:[%s3500_s8 + $0x144] sm:$0xf] }
 0x129   : > { %1401 = vmatmul.bf16.gmra.mxu0 %v2309_v1  ;;  %v2404_v1 = vld [vmem:[%s3500_s8 + $0x100] sm:$0xf] }
 0x12a   : > { %1490 = vmatmul.bf16.gmra.mxu1 %v2313_v2  ;;  %v2700_v2 = vld [vmem:[%s3500_s8 + $0x10c] sm:$0xf0] }
 0x12b   : > { %1579 = vmatmul.bf16.gmra.mxu2 %v2317_v3  ;;  %v2698_v3 = vld [vmem:[%s3500_s8 + $0x104] sm:$0xf]  ;;  %v2405_v9 = vor.u32 %v2700_v2, %v2404_v1  ;;  %v2437_v1 = vor.u32 %v2708_v54, %v2436_v53  ;;  %v2441_v2 = vor.u32 %v2706_v56, %v2438_v57  ;;  %v2470_v53 = vld [vmem:[%s3500_s8 + $0x190] sm:$0xf0]  ;;  %v2476_v54 = vld [vmem:[%s3500_s8 + $0x188] sm:$0xf] }
 0x12c   : > { %1668 = vmatmul.bf16.gmra.mxu3 %v2321_v4  ;;  %v2406_v4 = vld [vmem:[%s3500_s8 + $0x110] sm:$0xf0]  ;;  %v2715_v56 = vld [vmem:[%s3500_s8 + $0x18c] sm:$0xf]  ;;  %v2478_v57 = vld [vmem:[%s3500_s8 + $0x198] sm:$0xf0] }
 0x12d   : > { %v2409_v10 = vor.u32 %v2698_v3, %v2406_v4 }
 0x139   : > { %1406 = vmatmul.bf16.gmra.mxu0 %v2325_v13  ;;  %v2413_v13 = vor.u32 %v2701_v6, %v2412_v5  ;;  %v2445_v6 = vor.u32 %v2709_v59, %v2444_v58 }
 0x13a   : > { %1495 = vmatmul.bf16.gmra.mxu1 %v2329_v14  ;;  %v2417_v14 = vor.u32 %v2699_v7, %v2414_v8  ;;  %v714_v8 = vld [vmem:[#allocation2 + $0x18] sm:$0xff] }
 0x13b   : > { %1584 = vmatmul.bf16.gmra.mxu2 %v2333_v15 }
 0x13c   : > { %1673 = vmatmul.bf16.gmra.mxu3 %v2337_v16 }
 0x149   : > { %1411 = vmatmul.bf16.gmra.mxu0 %v2341_v25 }
 0x14a   : > { %1500 = vmatmul.bf16.gmra.mxu1 %v2345_v26  ;;  %v2702_v26 = vld [vmem:[%s3500_s8 + $0x124] sm:$0xf] }
 0x14b   : > { %1589 = vmatmul.bf16.gmra.mxu2 %v2349_v27  ;;  %v2422_v27 = vld [vmem:[%s3500_s8 + $0x130] sm:$0xf0] }
 0x14c   : > { %1678 = vmatmul.bf16.gmra.mxu3 %v2353_v28  ;;  %v2428_v28 = vld [vmem:[%s3500_s8 + $0x128] sm:$0xf]  ;;  %v2425_v36 = vor.u32 %v2702_v26, %v2422_v27  ;;  %v2711_v26 = vld [vmem:[%s3500_s8 + $0x16c] sm:$0xf]  ;;  %v2462_v27 = vld [vmem:[%s3500_s8 + $0x178] sm:$0xf0] }
 0x159   : > { %1416 = vmatmul.bf16.gmra.mxu0 %v2357_v37 }
 0x15a   : > { %1505 = vmatmul.bf16.gmra.mxu1 %v2361_v38 }
 0x15b   : > { %1594 = vmatmul.bf16.gmra.mxu2 %v2365_v39 }
 0x15c   : > { %1683 = vmatmul.bf16.gmra.mxu3 %v2369_v40  ;;  %v2429_v40 = vor.u32 %v2705_v29, %v2428_v28 }
 0x169   : > { %1421 = vmatmul.bf16.gmra.mxu0 %v2373_v49 }
 0x16a   : > { %1510 = vmatmul.bf16.gmra.mxu1 %v2377_v50 }
 0x16b   : > { %1599 = vmatmul.bf16.gmra.mxu2 %v2381_v51  ;;  %v713_v51 = vld [vmem:[#allocation2 + $0xd8] sm:$0xff] }
 0x16c   : > { %1688 = vmatmul.bf16.gmra.mxu3 %v2385_v52 }
 0x179   : > { %1426 = vmatmul.bf16.gmra.mxu0 %v2389_v61  ;;  %v2446_v61 = vld [vmem:[%s3500_s8 + $0x158] sm:$0xf0] }
 0x17a   : > { %1515 = vmatmul.bf16.gmra.mxu1 %v2393_v62  ;;  %v2449_v7 = vor.u32 %v2707_v60, %v2446_v61 }
 0x17b   : > { %1604 = vmatmul.bf16.gmra.mxu2 %v2397_v63 }
 0x17c   : > { %1693 = vmatmul.bf16.gmra.mxu3 %v2401_v0 }
 0x186   : > { %v1392_v11 = vpop.f32.mrf.mxu0 }
 0x187   : > { %v1481_v12 = vpop.f32.mrf.mxu1 }
 0x188   : > { %v1482_v15 = vadd.f32 %v1481_v12, %v1392_v11 }
 0x189   : > { %1431 = vmatmul.bf16.gmra.mxu0 %v2405_v9 }
 0x18a   : > { %1520 = vmatmul.bf16.gmra.mxu1 %v2409_v10 }
 0x18b   : > { %1609 = vmatmul.bf16.gmra.mxu2 %v2413_v13 }
 0x18c   : > { %1698 = vmatmul.bf16.gmra.mxu3 %v2417_v14 }
 0x18e   : > { %v1570_v16 = vpop.f32.mrf.mxu2  ;;  %v1394_v19 = vpop.f32.mrf.mxu0 }
 0x18f   : > { %v1659_v17 = vpop.f32.mrf.mxu3  ;;  %v1571_v18 = vadd.f32 %v1570_v16, %v1482_v15  ;;  %v1483_v20 = vpop.f32.mrf.mxu1 }
 0x190   : > { %v1484_v32 = vadd.f32 %v1483_v20, %v1394_v19  ;;  %v2452_v19 = vld [vmem:[%s3500_s8 + $0x160] sm:$0xf]  ;;  %v2712_v20 = vld [vmem:[%s3500_s8 + $0x16c] sm:$0xf0] }
 0x191   : > { %v1660_v22 = vadd.f32 %v1659_v17, %v1571_v18  ;;  %v715_v17 = vld [vmem:[#allocation2 + $0x50] sm:$0xff]  ;;  %v2453_v31 = vor.u32 %v2712_v20, %v2452_v19  ;;  %v2492_v20 = vld [vmem:[%s3500_s8 + $0x1a8] sm:$0xf] }
 0x192   : > { %v2486_v19 = vld [vmem:[%s3500_s8 + $0x1b0] sm:$0xf0] }
 0x193   : > { %v1739_v25 = vadd.f32 %v1660_v22, %v711_v21  ;;  %v2710_v22 = vld [vmem:[%s3500_s8 + $0x164] sm:$0xf] }
 0x195   : > { %1771 = vst [vmem:[#allocation2 + $0xb0] sm:$0xff] %v1739_v25  ;;  %v2713_v25 = vld [vmem:[%s3500_s8 + $0x174] sm:$0xf0] }
 0x196   : > { %v1572_v33 = vpop.f32.mrf.mxu2  ;;  %v1397_v38 = vpop.f32.mrf.mxu0 }
 0x197   : > { %v1661_v34 = vpop.f32.mrf.mxu3  ;;  %v1573_v37 = vadd.f32 %v1572_v33, %v1484_v32  ;;  %v1486_v39 = vpop.f32.mrf.mxu1  ;;  %v2457_v32 = vor.u32 %v2710_v22, %v2454_v23  ;;  %v2719_v22 = vld [vmem:[%s3500_s8 + $0x1ac] sm:$0xf]  ;;  %v2494_v23 = vld [vmem:[%s3500_s8 + $0x1b8] sm:$0xf0] }
 0x198   : > { %v1487_v45 = vadd.f32 %v1486_v39, %v1397_v38  ;;  %v716_v38 = vld [vmem:[#allocation2 + $0x68] sm:$0xff] }
 0x199   : > { %v1662_v43 = vadd.f32 %v1661_v34, %v1573_v37  ;;  %1436 = vmatmul.bf16.gmra.mxu0 %v2421_v35  ;;  %v2465_v37 = vor.u32 %v2711_v26, %v2462_v27 }
 0x19a   : > { %1525 = vmatmul.bf16.gmra.mxu1 %v2425_v36  ;;  %v2461_v36 = vor.u32 %v2713_v25, %v2460_v24 }
 0x19b   : > { %v1740_v44 = vadd.f32 %v1662_v43, %v712_v42  ;;  %1614 = vmatmul.bf16.gmra.mxu2 %v2429_v40 }
 0x19c   : > { %1703 = vmatmul.bf16.gmra.mxu3 %v2433_v41 }
 0x19d   : > { %1772 = vst [vmem:[#allocation2] sm:$0xff] %v1740_v44 }
 0x19e   : > { %v1575_v46 = vpop.f32.mrf.mxu2  ;;  %v1399_v49 = vpop.f32.mrf.mxu0 }
 0x19f   : > { %v1664_v47 = vpop.f32.mrf.mxu3  ;;  %v1576_v48 = vadd.f32 %v1575_v46, %v1487_v45  ;;  %v1488_v50 = vpop.f32.mrf.mxu1 }
 0x1a0   : > { %v1489_v62 = vadd.f32 %v1488_v50, %v1399_v49  ;;  %v2468_v49 = vld [vmem:[%s3500_s8 + $0x180] sm:$0xf]  ;;  %v2716_v50 = vld [vmem:[%s3500_s8 + $0x18c] sm:$0xf0] }
 0x1a1   : > { %v1665_v52 = vadd.f32 %v1664_v47, %v1576_v48  ;;  %v717_v47 = vld [vmem:[#allocation2 + $0x30] sm:$0xff]  ;;  %v2469_v61 = vor.u32 %v2716_v50, %v2468_v49  ;;  %v2508_v50 = vld [vmem:[%s3500_s8 + $0x1c8] sm:$0xf] }
 0x1a2   : > { %v2502_v49 = vld [vmem:[%s3500_s8 + $0x1d0] sm:$0xf0] }
 0x1a3   : > { %v1741_v55 = vadd.f32 %v1665_v52, %v713_v51  ;;  %v2714_v52 = vld [vmem:[%s3500_s8 + $0x184] sm:$0xf] }
 0x1a5   : > { %1773 = vst [vmem:[#allocation2 + $0xd8] sm:$0xff] %v1741_v55  ;;  %v2717_v55 = vld [vmem:[%s3500_s8 + $0x194] sm:$0xf0] }
 0x1a6   : > { %v1577_v63 = vpop.f32.mrf.mxu2  ;;  %v1402_v4 = vpop.f32.mrf.mxu0 }
 0x1a7   : > { %v1666_v0 = vpop.f32.mrf.mxu3  ;;  %v1578_v3 = vadd.f32 %v1577_v63, %v1489_v62  ;;  %v1491_v5 = vpop.f32.mrf.mxu1  ;;  %v2473_v62 = vor.u32 %v2714_v52, %v2470_v53  ;;  %v2723_v52 = vld [vmem:[%s3500_s8 + $0x1cc] sm:$0xf]  ;;  %v2510_v53 = vld [vmem:[%s3500_s8 + $0x1d8] sm:$0xf0] }
 0x1a8   : > { %v1492_v11 = vadd.f32 %v1491_v5, %v1402_v4  ;;  %v718_v4 = vld [vmem:[#allocation2 + $0x48] sm:$0xff] }
 0x1a9   : > { %v1667_v9 = vadd.f32 %v1666_v0, %v1578_v3  ;;  %1441 = vmatmul.bf16.gmra.mxu0 %v2437_v1  ;;  %v2481_v3 = vor.u32 %v2715_v56, %v2478_v57 }
 0x1aa   : > { %1530 = vmatmul.bf16.gmra.mxu1 %v2441_v2  ;;  %v2477_v2 = vor.u32 %v2717_v55, %v2476_v54 }
 0x1ab   : > { %v1742_v10 = vadd.f32 %v1667_v9, %v714_v8  ;;  %1619 = vmatmul.bf16.gmra.mxu2 %v2445_v6 }
 0x1ac   : > { %1708 = vmatmul.bf16.gmra.mxu3 %v2449_v7 }
 0x1ad   : > { %1774 = vst [vmem:[#allocation2 + $0x18] sm:$0xff] %v1742_v10 }
 0x1ae   : > { %v1580_v12 = vpop.f32.mrf.mxu2  ;;  %v1404_v15 = vpop.f32.mrf.mxu0 }
 0x1af   : > { %v1669_v13 = vpop.f32.mrf.mxu3  ;;  %v1581_v14 = vadd.f32 %v1580_v12, %v1492_v11  ;;  %v1493_v16 = vpop.f32.mrf.mxu1 }
 0x1b0   : > { %v1494_v28 = vadd.f32 %v1493_v16, %v1404_v15  ;;  %v2484_v15 = vld [vmem:[%s3500_s8 + $0x1a0] sm:$0xf]  ;;  %v2720_v16 = vld [vmem:[%s3500_s8 + $0x1ac] sm:$0xf0] }
 0x1b1   : > { %v1670_v18 = vadd.f32 %v1669_v13, %v1581_v14  ;;  %v719_v13 = vld [vmem:[#allocation2 + $0x80] sm:$0xff]  ;;  %v2485_v27 = vor.u32 %v2720_v16, %v2484_v15  ;;  %v2518_v15 = vld [vmem:[%s3500_s8 + $0x1f0] sm:$0xf0]  ;;  %v2524_v16 = vld [vmem:[%s3500_s8 + $0x1e8] sm:$0xf] }
 0x1b3   : > { %v1743_v21 = vadd.f32 %v1670_v18, %v715_v17  ;;  %v2718_v18 = vld [vmem:[%s3500_s8 + $0x1a4] sm:$0xf] }
 0x1b5   : > { %1775 = vst [vmem:[#allocation2 + $0x50] sm:$0xff] %v1743_v21  ;;  %v2721_v21 = vld [vmem:[%s3500_s8 + $0x1b4] sm:$0xf0] }
 0x1b6   : > { %v1582_v29 = vpop.f32.mrf.mxu2  ;;  %v1407_v34 = vpop.f32.mrf.mxu0 }
 0x1b7   : > { %v1671_v30 = vpop.f32.mrf.mxu3  ;;  %v1583_v33 = vadd.f32 %v1582_v29, %v1494_v28  ;;  %v1496_v35 = vpop.f32.mrf.mxu1  ;;  %v2489_v28 = vor.u32 %v2718_v18, %v2486_v19  ;;  %v2727_v18 = vld [vmem:[%s3500_s8 + $0x1ec] sm:$0xf]  ;;  %v2526_v19 = vld [vmem:[%s3500_s8 + $0x1f8] sm:$0xf0] }
 0x1b8   : > { %v1497_v41 = vadd.f32 %v1496_v35, %v1407_v34  ;;  %v720_v34 = vld [vmem:[#allocation2 + $0x88] sm:$0xff] }
 0x1b9   : > { %v1672_v39 = vadd.f32 %v1671_v30, %v1583_v33  ;;  %1446 = vmatmul.bf16.gmra.mxu0 %v2453_v31  ;;  %v2497_v33 = vor.u32 %v2719_v22, %v2494_v23 }
 0x1ba   : > { %1535 = vmatmul.bf16.gmra.mxu1 %v2457_v32  ;;  %v2493_v32 = vor.u32 %v2721_v21, %v2492_v20 }
 0x1bb   : > { %v1744_v40 = vadd.f32 %v1672_v39, %v716_v38  ;;  %1624 = vmatmul.bf16.gmra.mxu2 %v2461_v36 }
 0x1bc   : > { %1713 = vmatmul.bf16.gmra.mxu3 %v2465_v37 }
 0x1bd   : > { %1776 = vst [vmem:[#allocation2 + $0x68] sm:$0xff] %v1744_v40 }
 0x1be   : > { %v1585_v42 = vpop.f32.mrf.mxu2  ;;  %v1409_v45 = vpop.f32.mrf.mxu0 }
 0x1bf   : > { %v1674_v43 = vpop.f32.mrf.mxu3  ;;  %v1586_v44 = vadd.f32 %v1585_v42, %v1497_v41  ;;  %v1498_v46 = vpop.f32.mrf.mxu1 }
 0x1c0   : > { %v1499_v58 = vadd.f32 %v1498_v46, %v1409_v45  ;;  %v2500_v45 = vld [vmem:[%s3500_s8 + $0x1c0] sm:$0xf]  ;;  %v2724_v46 = vld [vmem:[%s3500_s8 + $0x1cc] sm:$0xf0] }
 0x1c1   : > { %v1675_v48 = vadd.f32 %v1674_v43, %v1586_v44  ;;  %v721_v43 = vld [vmem:[#allocation2 + $0xe8] sm:$0xff]  ;;  %v2501_v57 = vor.u32 %v2724_v46, %v2500_v45 }
 0x1c3   : > { %v1745_v51 = vadd.f32 %v1675_v48, %v717_v47  ;;  %v2722_v48 = vld [vmem:[%s3500_s8 + $0x1c4] sm:$0xf] }
 0x1c5   : > { %1777 = vst [vmem:[#allocation2 + $0x30] sm:$0xff] %v1745_v51  ;;  %v2725_v51 = vld [vmem:[%s3500_s8 + $0x1d4] sm:$0xf0] }
 0x1c6   : > { %v1587_v59 = vpop.f32.mrf.mxu2  ;;  %v1412_v0 = vpop.f32.mrf.mxu0 }
 0x1c7   : > { %v1676_v60 = vpop.f32.mrf.mxu3  ;;  %v1588_v63 = vadd.f32 %v1587_v59, %v1499_v58  ;;  %v1501_v1 = vpop.f32.mrf.mxu1  ;;  %v2505_v58 = vor.u32 %v2722_v48, %v2502_v49  ;;  %v726_v48 = vld [vmem:[#allocation2 + $0x78] sm:$0xff] }
 0x1c8   : > { %v1502_v7 = vadd.f32 %v1501_v1, %v1412_v0  ;;  %v722_v0 = vld [vmem:[#allocation2 + $0xb8] sm:$0xff] }
 0x1c9   : > { %v1677_v5 = vadd.f32 %v1676_v60, %v1588_v63  ;;  %1451 = vmatmul.bf16.gmra.mxu0 %v2469_v61  ;;  %v2513_v63 = vor.u32 %v2723_v52, %v2510_v53 }
 0x1ca   : > { %1540 = vmatmul.bf16.gmra.mxu1 %v2473_v62  ;;  %v2509_v62 = vor.u32 %v2725_v51, %v2508_v50 }
 0x1cb   : > { %v1746_v6 = vadd.f32 %v1677_v5, %v718_v4  ;;  %1629 = vmatmul.bf16.gmra.mxu2 %v2477_v2 }
 0x1cc   : > { %1718 = vmatmul.bf16.gmra.mxu3 %v2481_v3 }
 0x1cd   : > { %1778 = vst [vmem:[#allocation2 + $0x48] sm:$0xff] %v1746_v6 }
 0x1ce   : > { %v1590_v8 = vpop.f32.mrf.mxu2  ;;  %v1414_v11 = vpop.f32.mrf.mxu0 }
 0x1cf   : > { %v1679_v9 = vpop.f32.mrf.mxu3  ;;  %v1591_v10 = vadd.f32 %v1590_v8, %v1502_v7  ;;  %v1503_v12 = vpop.f32.mrf.mxu1 }
 0x1d0   : > { %v1504_v24 = vadd.f32 %v1503_v12, %v1414_v11  ;;  %v2516_v11 = vld [vmem:[%s3500_s8 + $0x1e0] sm:$0xf]  ;;  %v2728_v12 = vld [vmem:[%s3500_s8 + $0x1ec] sm:$0xf0] }
 0x1d1   : > { %v1680_v14 = vadd.f32 %v1679_v9, %v1591_v10  ;;  %v723_v9 = vld [vmem:[#allocation2 + $0x60] sm:$0xff]  ;;  %v2517_v23 = vor.u32 %v2728_v12, %v2516_v11 }
 0x1d2   : > { %v729_v11 = vld [vmem:[#allocation2 + $0x40] sm:$0xff] }
 0x1d3   : > { %v1747_v17 = vadd.f32 %v1680_v14, %v719_v13  ;;  %v2726_v14 = vld [vmem:[%s3500_s8 + $0x1e4] sm:$0xf] }
 0x1d5   : > { %1779 = vst [vmem:[#allocation2 + $0x80] sm:$0xff] %v1747_v17  ;;  %v2729_v17 = vld [vmem:[%s3500_s8 + $0x1f4] sm:$0xf0] }
 0x1d6   : > { %v1592_v25 = vpop.f32.mrf.mxu2  ;;  %v1417_v30 = vpop.f32.mrf.mxu0 }
 0x1d7   : > { %v1681_v26 = vpop.f32.mrf.mxu3  ;;  %v1593_v29 = vadd.f32 %v1592_v25, %v1504_v24  ;;  %v1506_v31 = vpop.f32.mrf.mxu1  ;;  %v2521_v24 = vor.u32 %v2726_v14, %v2518_v15 }
 0x1d8   : > { %v1507_v37 = vadd.f32 %v1506_v31, %v1417_v30  ;;  %v724_v30 = vld [vmem:[#allocation2 + $0xf0] sm:$0xff] }
 0x1d9   : > { %v1682_v35 = vadd.f32 %v1681_v26, %v1593_v29  ;;  %1456 = vmatmul.bf16.gmra.mxu0 %v2485_v27  ;;  %v2529_v29 = vor.u32 %v2727_v18, %v2526_v19 }
 0x1da   : > { %1545 = vmatmul.bf16.gmra.mxu1 %v2489_v28  ;;  %v2525_v28 = vor.u32 %v2729_v17, %v2524_v16 }
 0x1db   : > { %v1748_v36 = vadd.f32 %v1682_v35, %v720_v34  ;;  %1634 = vmatmul.bf16.gmra.mxu2 %v2493_v32 }
 0x1dc   : > { %1723 = vmatmul.bf16.gmra.mxu3 %v2497_v33 }
 0x1dd   : > { %1780 = vst [vmem:[#allocation2 + $0x88] sm:$0xff] %v1748_v36 }
 0x1de   : > { %v1595_v38 = vpop.f32.mrf.mxu2  ;;  %v1419_v41 = vpop.f32.mrf.mxu0 }
 0x1df   : > { %v1684_v39 = vpop.f32.mrf.mxu3  ;;  %v1596_v40 = vadd.f32 %v1595_v38, %v1507_v37  ;;  %v1508_v42 = vpop.f32.mrf.mxu1 }
 0x1e0   : > { %v1509_v54 = vadd.f32 %v1508_v42, %v1419_v41 }
 0x1e1   : > { %v1685_v44 = vadd.f32 %v1684_v39, %v1596_v40  ;;  %v725_v39 = vld [vmem:[#allocation2 + $0x8] sm:$0xff] }
 0x1e3   : > { %v1749_v47 = vadd.f32 %v1685_v44, %v721_v43 }
 0x1e5   : > { %1781 = vst [vmem:[#allocation2 + $0xe8] sm:$0xff] %v1749_v47 }
 0x1e6   : > { %v1597_v55 = vpop.f32.mrf.mxu2  ;;  %v1422_v60 = vpop.f32.mrf.mxu0 }
 0x1e7   : > { %v1686_v56 = vpop.f32.mrf.mxu3  ;;  %v1598_v59 = vadd.f32 %v1597_v55, %v1509_v54  ;;  %v1511_v61 = vpop.f32.mrf.mxu1 }
 0x1e8   : > { %v1512_v3 = vadd.f32 %v1511_v61, %v1422_v60 }
 0x1e9   : > { %v1687_v1 = vadd.f32 %v1686_v56, %v1598_v59  ;;  %1461 = vmatmul.bf16.gmra.mxu0 %v2501_v57  ;;  %v727_v57 = vld [vmem:[#allocation2 + $0x38] sm:$0xff] }
 0x1ea   : > { %1550 = vmatmul.bf16.gmra.mxu1 %v2505_v58 }
 0x1eb   : > { %v1750_v2 = vadd.f32 %v1687_v1, %v722_v0  ;;  %1639 = vmatmul.bf16.gmra.mxu2 %v2509_v62 }
 0x1ec   : > { %1728 = vmatmul.bf16.gmra.mxu3 %v2513_v63 }
 0x1ed   : > { %1782 = vst [vmem:[#allocation2 + $0xb8] sm:$0xff] %v1750_v2  ;;  %v728_v2 = vld [vmem:[#allocation2 + $0x58] sm:$0xff] }
 0x1ee   : > { %v1600_v4 = vpop.f32.mrf.mxu2  ;;  %v1424_v7 = vpop.f32.mrf.mxu0 }
 0x1ef   : > { %v1689_v5 = vpop.f32.mrf.mxu3  ;;  %v1601_v6 = vadd.f32 %v1600_v4, %v1512_v3  ;;  %v1513_v8 = vpop.f32.mrf.mxu1 }
 0x1f0   : > { %v1514_v20 = vadd.f32 %v1513_v8, %v1424_v7 }
 0x1f1   : > { %v1690_v10 = vadd.f32 %v1689_v5, %v1601_v6 }
 0x1f3   : > { %v1751_v13 = vadd.f32 %v1690_v10, %v723_v9 }
 0x1f5   : > { %1783 = vst [vmem:[#allocation2 + $0x60] sm:$0xff] %v1751_v13 }
 0x1f6   : > { %v1602_v21 = vpop.f32.mrf.mxu2  ;;  %v1427_v26 = vpop.f32.mrf.mxu0 }
 0x1f7   : > { %v1691_v22 = vpop.f32.mrf.mxu3  ;;  %v1603_v25 = vadd.f32 %v1602_v21, %v1514_v20  ;;  %v1516_v27 = vpop.f32.mrf.mxu1  ;;  %v730_v20 = vld [vmem:[#allocation2 + $0xc8] sm:$0xff] }
 0x1f8   : > { %v1517_v33 = vadd.f32 %v1516_v27, %v1427_v26 }
 0x1f9   : > { %v1692_v31 = vadd.f32 %v1691_v22, %v1603_v25  ;;  %1466 = vmatmul.bf16.gmra.mxu0 %v2517_v23 }
 0x1fa   : > { %1555 = vmatmul.bf16.gmra.mxu1 %v2521_v24 }
 0x1fb   : > { %v1752_v32 = vadd.f32 %v1692_v31, %v724_v30  ;;  %1644 = vmatmul.bf16.gmra.mxu2 %v2525_v28 }
 0x1fc   : > { %1733 = vmatmul.bf16.gmra.mxu3 %v2529_v29  ;;  %v731_v29 = vld [vmem:[#allocation2 + $0xe0] sm:$0xff] }
 0x1fd   : > { %1784 = vst [vmem:[#allocation2 + $0xf0] sm:$0xff] %v1752_v32 }
 0x1fe   : > { %v1605_v34 = vpop.f32.mrf.mxu2  ;;  %v1429_v37 = vpop.f32.mrf.mxu0 }
 0x1ff   : > { %v1694_v35 = vpop.f32.mrf.mxu3  ;;  %v1606_v36 = vadd.f32 %v1605_v34, %v1517_v33  ;;  %v1518_v38 = vpop.f32.mrf.mxu1 }
 0x200   : > { %v1519_v42 = vadd.f32 %v1518_v38, %v1429_v37  ;;  %v732_v38 = vld [vmem:[#allocation2 + $0x90] sm:$0xff] }
 0x201   : > { %v1695_v40 = vadd.f32 %v1694_v35, %v1606_v36 }
 0x203   : > { %v1753_v41 = vadd.f32 %v1695_v40, %v725_v39 }
 0x205   : > { %1785 = vst [vmem:[#allocation2 + $0x8] sm:$0xff] %v1753_v41 }
 0x206   : > { %v1607_v43 = vpop.f32.mrf.mxu2  ;;  %v1432_v46 = vpop.f32.mrf.mxu0 }
 0x207   : > { %v1696_v44 = vpop.f32.mrf.mxu3  ;;  %v1608_v45 = vadd.f32 %v1607_v43, %v1519_v42  ;;  %v1521_v47 = vpop.f32.mrf.mxu1 }
 0x208   : > { %v1522_v51 = vadd.f32 %v1521_v47, %v1432_v46  ;;  %v733_v47 = vld [vmem:[#allocation2 + $0x70] sm:$0xff] }
 0x209   : > { %v1697_v49 = vadd.f32 %v1696_v44, %v1608_v45 }
 0x20b   : > { %v1754_v50 = vadd.f32 %v1697_v49, %v726_v48 }
 0x20d   : > { %1786 = vst [vmem:[#allocation2 + $0x78] sm:$0xff] %v1754_v50 }
 0x20e   : > { %v1610_v52 = vpop.f32.mrf.mxu2  ;;  %v1434_v55 = vpop.f32.mrf.mxu0 }
 0x20f   : > { %v1699_v53 = vpop.f32.mrf.mxu3  ;;  %v1611_v54 = vadd.f32 %v1610_v52, %v1522_v51  ;;  %v1523_v56 = vpop.f32.mrf.mxu1 }
 0x210   : > { %v1524_v60 = vadd.f32 %v1523_v56, %v1434_v55  ;;  %v734_v56 = vld [vmem:[#allocation2 + $0xc0] sm:$0xff] }
 0x211   : > { %v1700_v58 = vadd.f32 %v1699_v53, %v1611_v54 }
 0x213   : > { %v1755_v59 = vadd.f32 %v1700_v58, %v727_v57 }
 0x215   : > { %1787 = vst [vmem:[#allocation2 + $0x38] sm:$0xff] %v1755_v59 }
 0x216   : > { %v1612_v61 = vpop.f32.mrf.mxu2  ;;  %v1437_v0 = vpop.f32.mrf.mxu0 }
 0x217   : > { %v1701_v62 = vpop.f32.mrf.mxu3  ;;  %v1613_v63 = vadd.f32 %v1612_v61, %v1524_v60  ;;  %v1526_v1 = vpop.f32.mrf.mxu1 }
 0x218   : > { %v1527_v5 = vadd.f32 %v1526_v1, %v1437_v0  ;;  %v735_v1 = vld [vmem:[#allocation2 + $0xa8] sm:$0xff] }
 0x219   : > { %v1702_v3 = vadd.f32 %v1701_v62, %v1613_v63 }
 0x21b   : > { %v1756_v4 = vadd.f32 %v1702_v3, %v728_v2 }
 0x21d   : > { %1788 = vst [vmem:[#allocation2 + $0x58] sm:$0xff] %v1756_v4 }
 0x21e   : > { %v1615_v6 = vpop.f32.mrf.mxu2  ;;  %v1439_v9 = vpop.f32.mrf.mxu0 }
 0x21f   : > { %v1704_v7 = vpop.f32.mrf.mxu3  ;;  %v1616_v8 = vadd.f32 %v1615_v6, %v1527_v5  ;;  %v1528_v10 = vpop.f32.mrf.mxu1 }
 0x220   : > { %v1529_v14 = vadd.f32 %v1528_v10, %v1439_v9  ;;  %v736_v10 = vld [vmem:[#allocation2 + $0xd0] sm:$0xff] }
 0x221   : > { %v1705_v12 = vadd.f32 %v1704_v7, %v1616_v8 }
 0x223   : > { %v1757_v13 = vadd.f32 %v1705_v12, %v729_v11 }
 0x225   : > { %1789 = vst [vmem:[#allocation2 + $0x40] sm:$0xff] %v1757_v13 }
 0x226   : > { %v1617_v15 = vpop.f32.mrf.mxu2  ;;  %v1442_v18 = vpop.f32.mrf.mxu0 }
 0x227   : > { %v1706_v16 = vpop.f32.mrf.mxu3  ;;  %v1618_v17 = vadd.f32 %v1617_v15, %v1529_v14  ;;  %v1531_v19 = vpop.f32.mrf.mxu1 }
 0x228   : > { %v1532_v23 = vadd.f32 %v1531_v19, %v1442_v18  ;;  %v737_v19 = vld [vmem:[#allocation2 + $0x10] sm:$0xff] }
 0x229   : > { %v1707_v21 = vadd.f32 %v1706_v16, %v1618_v17 }
 0x22b   : > { %v1758_v22 = vadd.f32 %v1707_v21, %v730_v20 }
 0x22d   : > { %1790 = vst [vmem:[#allocation2 + $0xc8] sm:$0xff] %v1758_v22 }
 0x22e   : > { %v1620_v24 = vpop.f32.mrf.mxu2  ;;  %v1444_v27 = vpop.f32.mrf.mxu0 }
 0x22f   : > { %v1709_v25 = vpop.f32.mrf.mxu3  ;;  %v1621_v26 = vadd.f32 %v1620_v24, %v1532_v23  ;;  %v1533_v28 = vpop.f32.mrf.mxu1 }
 0x230   : > { %v1534_v32 = vadd.f32 %v1533_v28, %v1444_v27  ;;  %v738_v28 = vld [vmem:[#allocation2 + $0x28] sm:$0xff] }
 0x231   : > { %v1710_v30 = vadd.f32 %v1709_v25, %v1621_v26 }
 0x233   : > { %v1759_v31 = vadd.f32 %v1710_v30, %v731_v29 }
 0x235   : > { %1791 = vst [vmem:[#allocation2 + $0xe0] sm:$0xff] %v1759_v31 }
 0x236   : > { %v1622_v33 = vpop.f32.mrf.mxu2  ;;  %v1447_v36 = vpop.f32.mrf.mxu0 }
 0x237   : > { %v1711_v34 = vpop.f32.mrf.mxu3  ;;  %v1623_v35 = vadd.f32 %v1622_v33, %v1534_v32  ;;  %v1536_v37 = vpop.f32.mrf.mxu1 }
 0x238   : > { %v1537_v41 = vadd.f32 %v1536_v37, %v1447_v36  ;;  %v739_v37 = vld [vmem:[#allocation2 + $0xa0] sm:$0xff] }
 0x239   : > { %v1712_v39 = vadd.f32 %v1711_v34, %v1623_v35 }
 0x23b   : > { %v1760_v40 = vadd.f32 %v1712_v39, %v732_v38 }
 0x23d   : > { %1792 = vst [vmem:[#allocation2 + $0x90] sm:$0xff] %v1760_v40 }
 0x23e   : > { %v1625_v42 = vpop.f32.mrf.mxu2  ;;  %v1449_v45 = vpop.f32.mrf.mxu0 }
 0x23f   : > { %v1714_v43 = vpop.f32.mrf.mxu3  ;;  %v1626_v44 = vadd.f32 %v1625_v42, %v1537_v41  ;;  %v1538_v46 = vpop.f32.mrf.mxu1 }
 0x240   : > { %v1539_v50 = vadd.f32 %v1538_v46, %v1449_v45 }
 0x241   : > { %v1715_v48 = vadd.f32 %v1714_v43, %v1626_v44  ;;  %v740_v44 = vld [vmem:[#allocation2 + $0xf8] sm:$0xff] }
 0x243   : > { %v1761_v49 = vadd.f32 %v1715_v48, %v733_v47 }
 0x245   : > { %1793 = vst [vmem:[#allocation2 + $0x70] sm:$0xff] %v1761_v49 }
 0x246   : > { %v1627_v51 = vpop.f32.mrf.mxu2  ;;  %v1452_v54 = vpop.f32.mrf.mxu0 }
 0x247   : > { %v1716_v52 = vpop.f32.mrf.mxu3  ;;  %v1628_v53 = vadd.f32 %v1627_v51, %v1539_v50  ;;  %v1541_v55 = vpop.f32.mrf.mxu1 }
 0x248   : > { %v1542_v59 = vadd.f32 %v1541_v55, %v1452_v54 }
 0x249   : > { %v1717_v57 = vadd.f32 %v1716_v52, %v1628_v53  ;;  %v741_v53 = vld [vmem:[#allocation2 + $0x20] sm:$0xff] }
 0x24b   : > { %v1762_v58 = vadd.f32 %v1717_v57, %v734_v56 }
 0x24d   : > { %1794 = vst [vmem:[#allocation2 + $0xc0] sm:$0xff] %v1762_v58 }
 0x24e   : > { %v1630_v60 = vpop.f32.mrf.mxu2  ;;  %v1454_v63 = vpop.f32.mrf.mxu0 }
 0x24f   : > { %v1719_v61 = vpop.f32.mrf.mxu3  ;;  %v1631_v62 = vadd.f32 %v1630_v60, %v1542_v59  ;;  %v1543_v0 = vpop.f32.mrf.mxu1 }
 0x250   : > { %v1544_v4 = vadd.f32 %v1543_v0, %v1454_v63 }
 0x251   : > { %v1720_v2 = vadd.f32 %v1719_v61, %v1631_v62  ;;  %v742_v61 = vld [vmem:[#allocation2 + $0x98] sm:$0xff] }
 0x253   : > { %v1763_v3 = vadd.f32 %v1720_v2, %v735_v1 }
 0x255   : > { %1795 = vst [vmem:[#allocation2 + $0xa8] sm:$0xff] %v1763_v3 }
 0x256   : > { %v1632_v5 = vpop.f32.mrf.mxu2  ;;  %v1457_v8 = vpop.f32.mrf.mxu0 }
 0x257   : > { %v1721_v6 = vpop.f32.mrf.mxu3  ;;  %v1633_v7 = vadd.f32 %v1632_v5, %v1544_v4  ;;  %v1546_v9 = vpop.f32.mrf.mxu1 }
 0x258   : > { %v1547_v13 = vadd.f32 %v1546_v9, %v1457_v8 }
 0x259   : > { %v1722_v11 = vadd.f32 %v1721_v6, %v1633_v7 }
 0x25b   : > { %v1764_v12 = vadd.f32 %v1722_v11, %v736_v10 }
 0x25d   : > { %1796 = vst [vmem:[#allocation2 + $0xd0] sm:$0xff] %v1764_v12 }
 0x25e   : > { %v1635_v14 = vpop.f32.mrf.mxu2  ;;  %v1459_v17 = vpop.f32.mrf.mxu0 }
 0x25f   : > { %v1724_v15 = vpop.f32.mrf.mxu3  ;;  %v1636_v16 = vadd.f32 %v1635_v14, %v1547_v13  ;;  %v1548_v18 = vpop.f32.mrf.mxu1 }
 0x260   : > { %v1549_v22 = vadd.f32 %v1548_v18, %v1459_v17 }
 0x261   : > { %v1725_v20 = vadd.f32 %v1724_v15, %v1636_v16 }
 0x263   : > { %v1765_v21 = vadd.f32 %v1725_v20, %v737_v19 }
 0x265   : > { %1797 = vst [vmem:[#allocation2 + $0x10] sm:$0xff] %v1765_v21 }
 0x266   : > { %v1637_v23 = vpop.f32.mrf.mxu2  ;;  %v1462_v26 = vpop.f32.mrf.mxu0 }
 0x267   : > { %v1726_v24 = vpop.f32.mrf.mxu3  ;;  %v1638_v25 = vadd.f32 %v1637_v23, %v1549_v22  ;;  %v1551_v27 = vpop.f32.mrf.mxu1 }
 0x268   : > { %v1552_v31 = vadd.f32 %v1551_v27, %v1462_v26 }
 0x269   : > { %v1727_v29 = vadd.f32 %v1726_v24, %v1638_v25 }
 0x26b   : > { %v1766_v30 = vadd.f32 %v1727_v29, %v738_v28 }
 0x26d   : > { %1798 = vst [vmem:[#allocation2 + $0x28] sm:$0xff] %v1766_v30 }
 0x26e   : > { %v1640_v32 = vpop.f32.mrf.mxu2  ;;  %v1464_v35 = vpop.f32.mrf.mxu0 }
 0x26f   : > { %v1729_v33 = vpop.f32.mrf.mxu3  ;;  %v1641_v34 = vadd.f32 %v1640_v32, %v1552_v31  ;;  %v1553_v36 = vpop.f32.mrf.mxu1 }
 0x270   : > { %v1554_v40 = vadd.f32 %v1553_v36, %v1464_v35 }
 0x271   : > { %v1730_v38 = vadd.f32 %v1729_v33, %v1641_v34 }
 0x273   : > { %v1767_v39 = vadd.f32 %v1730_v38, %v739_v37 }
 0x275   : > { %1799 = vst [vmem:[#allocation2 + $0xa0] sm:$0xff] %v1767_v39 }
 0x276   : > { %v1642_v41 = vpop.f32.mrf.mxu2  ;;  %v1467_v45 = vpop.f32.mrf.mxu0 }
 0x277   : > { %v1731_v42 = vpop.f32.mrf.mxu3  ;;  %v1643_v43 = vadd.f32 %v1642_v41, %v1554_v40  ;;  %v1556_v46 = vpop.f32.mrf.mxu1 }
 0x278   : > { %v1557_v49 = vadd.f32 %v1556_v46, %v1467_v45 }
 0x279   : > { %v1732_v47 = vadd.f32 %v1731_v42, %v1643_v43 }
 0x27b   : > { %v1768_v48 = vadd.f32 %v1732_v47, %v740_v44 }
 0x27d   : > { %1800 = vst [vmem:[#allocation2 + $0xf8] sm:$0xff] %v1768_v48 }
 0x27e   : > { %v1645_v50 = vpop.f32.mrf.mxu2  ;;  %v1469_v55 = vpop.f32.mrf.mxu0 }
 0x27f   : > { %v1734_v51 = vpop.f32.mrf.mxu3  ;;  %v1646_v52 = vadd.f32 %v1645_v50, %v1557_v49  ;;  %v1558_v56 = vpop.f32.mrf.mxu1 }
 0x280   : > { %v1559_v58 = vadd.f32 %v1558_v56, %v1469_v55 }
 0x281   : > { %v1735_v54 = vadd.f32 %v1734_v51, %v1646_v52 }
 0x283   : > { %v1769_v57 = vadd.f32 %v1735_v54, %v741_v53 }
 0x285   : > { %1801 = vst [vmem:[#allocation2 + $0x20] sm:$0xff] %v1769_v57 }
 0x286   : > { %v1647_v59 = vpop.f32.mrf.mxu2 }
 0x287   : > { %v1648_v60 = vadd.f32 %v1647_v59, %v1559_v58  ;;  %v1736_v62 = vpop.f32.mrf.mxu3 }
 0x289   : > { %v1737_v63 = vadd.f32 %v1736_v62, %v1648_v60  ;;  %1806 = sbr.rel (%p2658_p6) target bundleno = 680 (0x2a8), region = 104 }
 0x28b   : > { %v1770_v0 = vadd.f32 %v1737_v63, %v742_v61 }
 0x28d   : > { %1802 = vst [vmem:[#allocation2 + $0x98] sm:$0xff] %v1770_v0 }
 0x28e   : > { %v1807_v1 = vld [vmem:[#allocation2 + $0xb0] sm:$0xff]  ;;  %v1808_v2 = vld [vmem:[#allocation2] sm:$0xff]  ;;  %v1809_v4 = vld [vmem:[#allocation2 + $0xd8] sm:$0xff] }
 0x28f   : > { %v3673_v3 = vld [vmem:[%s673_s10] ss:$0 sm:$0xff]  ;;  %v1810_v5 = vld [vmem:[#allocation2 + $0x18] sm:$0xff]  ;;  %v1811_v6 = vld [vmem:[#allocation2 + $0x50] sm:$0xff] }
 0x290   : > { %v1812_v7 = vld [vmem:[#allocation2 + $0x68] sm:$0xff]  ;;  %v1813_v8 = vld [vmem:[#allocation2 + $0x30] sm:$0xff]  ;;  %v1843_v9 = vadd.f32 %v3673_v3, %v1807_v1  ;;  %v1844_v10 = vadd.f32 %v3673_v3, %v1808_v2  ;;  %v1845_v11 = vadd.f32 %v3673_v3, %v1809_v4  ;;  %v1846_v12 = vadd.f32 %v3673_v3, %v1810_v5  ;;  %v1815_v18 = vld [vmem:[#allocation2 + $0x80] sm:$0xff] }
 0x291   : > { %v1814_v13 = vld [vmem:[#allocation2 + $0x48] sm:$0xff]  ;;  %v1847_v14 = vadd.f32 %v3673_v3, %v1811_v6  ;;  %v1848_v15 = vadd.f32 %v3673_v3, %v1812_v7  ;;  %v1849_v16 = vadd.f32 %v3673_v3, %v1813_v8  ;;  %v1818_v25 = vld [vmem:[#allocation2 + $0xb8] sm:$0xff]  ;;  %v1819_v30 = vld [vmem:[#allocation2 + $0x60] sm:$0xff]  ;;  %v1851_v34 = vadd.f32 %v3673_v3, %v1815_v18 }
 0x292   : > { %v1850_v17 = vadd.f32 %v3673_v3, %v1814_v13  ;;  %v1816_v19 = vld [vmem:[#allocation2 + $0x88] sm:$0xff]  ;;  %v1875_v20 = vmax.f32 %v1843_v9, 0.0  ;;  %v1876_v21 = vmax.f32 %v1844_v10, 0.0  ;;  %v1877_v22 = vmax.f32 %v1845_v11, 0.0  ;;  %v1820_v31 = vld [vmem:[#allocation2 + $0xf0] sm:$0xff]  ;;  %v1822_v37 = vld [vmem:[#allocation2 + $0x78] sm:$0xff] }
 0x293   : > { %v1878_v23 = vmax.f32 %v1846_v12, 0.0  ;;  %v1817_v24 = vld [vmem:[#allocation2 + $0xe8] sm:$0xff]  ;;  %v1879_v26 = vmax.f32 %v1847_v14, 0.0  ;;  %v1880_v27 = vmax.f32 %v1848_v15, 0.0  ;;  %v1881_v28 = vmax.f32 %v1849_v16, 0.0  ;;  %v1823_v42 = vld [vmem:[#allocation2 + $0x38] sm:$0xff] }
 0x294   : > { %v1882_v29 = vmax.f32 %v1850_v17, 0.0  ;;  %v2765_v32 = vpack.c.bf16 %v1876_v21, %v1875_v20  ;;  %v1852_v35 = vadd.f32 %v3673_v3, %v1816_v19  ;;  %v1821_v36 = vld [vmem:[#allocation2 + $0x8] sm:$0xff]  ;;  %v1853_v40 = vadd.f32 %v3673_v3, %v1817_v24  ;;  %v1824_v47 = vld [vmem:[#allocation2 + $0x58] sm:$0xff]  ;;  %v1825_v52 = vld [vmem:[#allocation2 + $0x40] sm:$0xff] }
 0x295   : > { %v2770_v33 = vpack.c.bf16 %v1878_v23, %v1877_v22  ;;  %v2775_v38 = vpack.c.bf16 %v1880_v27, %v1879_v26  ;;  %v1854_v41 = vadd.f32 %v3673_v3, %v1818_v25  ;;  %v1883_v43 = vmax.f32 %v1851_v34, 0.0  ;;  %v1826_v53 = vld [vmem:[#allocation2 + $0xc8] sm:$0xff]  ;;  %v1827_v58 = vld [vmem:[#allocation2 + $0xe0] sm:$0xff]  ;;  %v1828_v59 = vld [vmem:[#allocation2 + $0x90] sm:$0xff] }
 0x296   : > { %v2780_v39 = vpack.c.bf16 %v1882_v29, %v1881_v28  ;;  %2766 = vst [vmem:[%s3504_s1] sm:$0xff] %v2765_v32   ;;  %v1884_v44 = vmax.f32 %v1852_v35, 0.0  ;;  %v1855_v45 = vadd.f32 %v3673_v3, %v1819_v30  ;;  %v1856_v46 = vadd.f32 %v3673_v3, %v1820_v31  ;;  %v1829_v0 = vld [vmem:[#allocation2 + $0x70] sm:$0xff]  ;;  %v1830_v1 = vld [vmem:[#allocation2 + $0xc0] sm:$0xff]  ;;  %v1831_v7 = vld [vmem:[#allocation2 + $0xa8] sm:$0xff] }
 0x297   : > { %2842 = vst [vmem:[%s3504_s1 + $0x8] sm:$0xff] %v2770_v33   ;;  %v1885_v48 = vmax.f32 %v1853_v40, 0.0  ;;  %v1886_v49 = vmax.f32 %v1854_v41, 0.0  ;;  %v1857_v50 = vadd.f32 %v3673_v3, %v1821_v36  ;;  %v1858_v51 = vadd.f32 %v3673_v3, %v1822_v37  ;;  %v1832_v12 = vld [vmem:[#allocation2 + $0xd0] sm:$0xff]  ;;  %v1834_v18 = vld [vmem:[#allocation2 + $0x28] sm:$0xff]  ;;  %v1835_v23 = vld [vmem:[#allocation2 + $0xa0] sm:$0xff] }
 0x298   : > { %2843 = vst [vmem:[%s3504_s1 + $0x10] sm:$0xff] %v2775_v38   ;;  %v2785_v54 = vpack.c.bf16 %v1884_v44, %v1883_v43  ;;  %v1887_v55 = vmax.f32 %v1855_v45, 0.0  ;;  %v1888_v56 = vmax.f32 %v1856_v46, 0.0  ;;  %v1859_v57 = vadd.f32 %v3673_v3, %v1823_v42  ;;  %v1833_v17 = vld [vmem:[#allocation2 + $0x10] sm:$0xff]  ;;  %v1836_v24 = vld [vmem:[#allocation2 + $0xf8] sm:$0xff]  ;;  %v1837_v29 = vld [vmem:[#allocation2 + $0x20] sm:$0xff] }
 0x299   : > { %2844 = vst [vmem:[%s3504_s1 + $0x18] sm:$0xff] %v2780_v39   ;;  %v2790_v60 = vpack.c.bf16 %v1886_v49, %v1885_v48  ;;  %v1889_v61 = vmax.f32 %v1857_v50, 0.0  ;;  %v1890_v62 = vmax.f32 %v1858_v51, 0.0  ;;  %v1860_v63 = vadd.f32 %v3673_v3, %v1824_v47  ;;  %v1838_v30 = vld [vmem:[#allocation2 + $0x98] sm:$0xff] }
 0x29a   : > { %2845 = vst [vmem:[%s3504_s1 + $0x20] sm:$0xff] %v2785_v54   ;;  %v2795_v2 = vpack.c.bf16 %v1888_v56, %v1887_v55  ;;  %v1891_v4 = vmax.f32 %v1859_v57, 0.0  ;;  %v1861_v5 = vadd.f32 %v3673_v3, %v1825_v52  ;;  %v1862_v6 = vadd.f32 %v3673_v3, %v1826_v53 }
 0x29b   : > { %2846 = vst [vmem:[%s3504_s1 + $0x28] sm:$0xff] %v2790_v60   ;;  %v2800_v8 = vpack.c.bf16 %v1890_v62, %v1889_v61  ;;  %v1892_v9 = vmax.f32 %v1860_v63, 0.0  ;;  %v1863_v10 = vadd.f32 %v3673_v3, %v1827_v58  ;;  %v1864_v11 = vadd.f32 %v3673_v3, %v1828_v59 }
 0x29c   : > { %2847 = vst [vmem:[%s3504_s1 + $0x30] sm:$0xff] %v2795_v2   ;;  %v1893_v13 = vmax.f32 %v1861_v5, 0.0  ;;  %v1894_v14 = vmax.f32 %v1862_v6, 0.0  ;;  %v1865_v15 = vadd.f32 %v3673_v3, %v1829_v0  ;;  %v1866_v16 = vadd.f32 %v3673_v3, %v1830_v1 }
 0x29d   : > { %2848 = vst [vmem:[%s3504_s1 + $0x38] sm:$0xff] %v2800_v8   ;;  %v2805_v19 = vpack.c.bf16 %v1892_v9, %v1891_v4  ;;  %v1895_v20 = vmax.f32 %v1863_v10, 0.0  ;;  %v1896_v21 = vmax.f32 %v1864_v11, 0.0  ;;  %v1867_v22 = vadd.f32 %v3673_v3, %v1831_v7 }
 0x29e   : > { %v2810_v25 = vpack.c.bf16 %v1894_v14, %v1893_v13  ;;  %v1897_v26 = vmax.f32 %v1865_v15, 0.0  ;;  %v1898_v27 = vmax.f32 %v1866_v16, 0.0  ;;  %v1868_v28 = vadd.f32 %v3673_v3, %v1832_v12 }
 0x29f   : > { %2849 = vst [vmem:[%s3504_s1 + $0x40] sm:$0xff] %v2805_v19   ;;  %v2815_v31 = vpack.c.bf16 %v1896_v21, %v1895_v20  ;;  %v1899_v32 = vmax.f32 %v1867_v22, 0.0  ;;  %v1869_v33 = vadd.f32 %v3673_v3, %v1833_v17  ;;  %v1870_v34 = vadd.f32 %v3673_v3, %v1834_v18 }
 0x2a0   : > { %2850 = vst [vmem:[%s3504_s1 + $0x48] sm:$0xff] %v2810_v25   ;;  %v2820_v35 = vpack.c.bf16 %v1898_v27, %v1897_v26  ;;  %v1900_v36 = vmax.f32 %v1868_v28, 0.0  ;;  %v1871_v37 = vadd.f32 %v3673_v3, %v1835_v23  ;;  %v1872_v38 = vadd.f32 %v3673_v3, %v1836_v24 }
 0x2a1   : > { %2851 = vst [vmem:[%s3504_s1 + $0x50] sm:$0xff] %v2815_v31   ;;  %v1901_v39 = vmax.f32 %v1869_v33, 0.0  ;;  %v1902_v40 = vmax.f32 %v1870_v34, 0.0  ;;  %v1873_v41 = vadd.f32 %v3673_v3, %v1837_v29  ;;  %v1874_v42 = vadd.f32 %v3673_v3, %v1838_v30 }
 0x2a2   : > { %2852 = vst [vmem:[%s3504_s1 + $0x58] sm:$0xff] %v2820_v35   ;;  %v2825_v43 = vpack.c.bf16 %v1900_v36, %v1899_v32  ;;  %v1903_v44 = vmax.f32 %v1871_v37, 0.0  ;;  %v1904_v45 = vmax.f32 %v1872_v38, 0.0 }
 0x2a3   : > { %v2830_v46 = vpack.c.bf16 %v1902_v40, %v1901_v39  ;;  %v1905_v47 = vmax.f32 %v1873_v41, 0.0  ;;  %v1906_v48 = vmax.f32 %v1874_v42, 0.0 }
 0x2a4   : > { %2853 = vst [vmem:[%s3504_s1 + $0x60] sm:$0xff] %v2825_v43   ;;  %v2835_v49 = vpack.c.bf16 %v1904_v45, %v1903_v44 }
 0x2a5   : > { %2854 = vst [vmem:[%s3504_s1 + $0x68] sm:$0xff] %v2830_v46   ;;  %v2840_v50 = vpack.c.bf16 %v1906_v48, %v1905_v47 }
 0x2a6   : > { %2855 = vst [vmem:[%s3504_s1 + $0x70] sm:$0xff] %v2835_v49  }
 0x2a7   : > { %2856 = vst [vmem:[%s3504_s1 + $0x78] sm:$0xff] %v2840_v50  }
 0x2a8 PF: > { %1977 = sbr.rel (!%p3202_p13) target bundleno = 723 (0x2d3), region = 108  ;;  %s3859_s14 = sld [smem:[#allocation6_spill]] (%p3202_p13)  ;;  %v1999_v3 = vld [vmem:[%s3504_s1] sm:$0xf] (%p3202_p13)  ;;  %v2001_v51 = vld [vmem:[%s3504_s1 + $0x4] sm:$0xf] (%p3202_p13) }
 0x2a9   : > { %s3860_s20 = sld [smem:[#allocation11_spill]] (%p3202_p13)  ;;  %v2003_v52 = vld [vmem:[%s3504_s1 + $0x8] sm:$0xf] (%p3202_p13)  ;;  %v2005_v53 = vld [vmem:[%s3504_s1 + $0xc] sm:$0xf] (%p3202_p13) }
 0x2aa   : > { %v2007_v54 = vld [vmem:[%s3504_s1 + $0x10] sm:$0xf] (%p3202_p13)  ;;  %v2009_v55 = vld [vmem:[%s3504_s1 + $0x14] sm:$0xf] (%p3202_p13)  ;;  %v2011_v56 = vld [vmem:[%s3504_s1 + $0x18] sm:$0xf] (%p3202_p13) }
 0x2ab   : > { %v2013_v57 = vld [vmem:[%s3504_s1 + $0x1c] sm:$0xf] (%p3202_p13)  ;;  %v2015_v58 = vld [vmem:[%s3504_s1 + $0x20] sm:$0xf] (%p3202_p13)  ;;  %v2017_v59 = vld [vmem:[%s3504_s1 + $0x24] sm:$0xf] (%p3202_p13) }
 0x2ac   : > { %v2019_v60 = vld [vmem:[%s3504_s1 + $0x28] sm:$0xf] (%p3202_p13)  ;;  %v2021_v61 = vld [vmem:[%s3504_s1 + $0x2c] sm:$0xf] (%p3202_p13)  ;;  %v2023_v62 = vld [vmem:[%s3504_s1 + $0x30] sm:$0xf] (%p3202_p13) }
 0x2ad   : > { %v2025_v63 = vld [vmem:[%s3504_s1 + $0x34] sm:$0xf]  ;;  %v2027_v0 = vld [vmem:[%s3504_s1 + $0x38] sm:$0xf]  ;;  %v2029_v1 = vld [vmem:[%s3504_s1 + $0x3c] sm:$0xf] }
 0x2ae   : > { %s2858_s16 = smul.u32 96, %s3859_s14  ;;  %v2031_v2 = vld [vmem:[%s3504_s1 + $0x40] sm:$0xf]  ;;  %v2033_v4 = vld [vmem:[%s3504_s1 + $0x44] sm:$0xf] }
 0x2af   : > { %v2035_v5 = vld [vmem:[%s3504_s1 + $0x48] sm:$0xf]  ;;  %v2037_v6 = vld [vmem:[%s3504_s1 + $0x4c] sm:$0xf]  ;;  %v2039_v7 = vld [vmem:[%s3504_s1 + $0x50] sm:$0xf] }
 0x2b0   : > { %s1980_s18 = sadd.s32 %s3047_s19, %s2858_s16  ;;  %v2041_v8 = vld [vmem:[%s3504_s1 + $0x54] sm:$0xf]  ;;  %v2043_v9 = vld [vmem:[%s3504_s1 + $0x58] sm:$0xf]  ;;  %v2045_v10 = vld [vmem:[%s3504_s1 + $0x5c] sm:$0xf] }
 0x2b1   : > { %s2662_s11 = sshll.u32 %s1980_s18, 2  ;;  %v2047_v11 = vld [vmem:[%s3504_s1 + $0x60] sm:$0xf]  ;;  %v2049_v12 = vld [vmem:[%s3504_s1 + $0x64] sm:$0xf] }
 0x2b2   : > { %s3732_s26 = scalar_lea.vmem %s3860_s20, %s2662_s11  ;;  %v2051_v13 = vld [vmem:[%s3504_s1 + $0x68] sm:$0xf]  ;;  %v2053_v14 = vld [vmem:[%s3504_s1 + $0x6c] sm:$0xf]  ;;  %v2055_v15 = vld [vmem:[%s3504_s1 + $0x70] sm:$0xf] }
 0x2b3   : > { %2000 = vst [vmem:[%s3732_s26] sm:$0xf] %v1999_v3  ;;  %v2057_v16 = vld [vmem:[%s3504_s1 + $0x74] sm:$0xf]  ;;  %v2059_v17 = vld [vmem:[%s3504_s1 + $0x78] sm:$0xf] }
 0x2b4   : > { %2002 = vst [vmem:[%s3732_s26 + $0xc] sm:$0xf] %v2001_v51  ;;  %v2061_v18 = vld [vmem:[%s3504_s1 + $0x7c] sm:$0xf] }
 0x2b5   : > { %2004 = vst [vmem:[%s3732_s26 + $0x18] sm:$0xf] %v2003_v52 }
 0x2b6   : > { %2006 = vst [vmem:[%s3732_s26 + $0x24] sm:$0xf] %v2005_v53 }
 0x2b7   : > { %2008 = vst [vmem:[%s3732_s26 + $0x30] sm:$0xf] %v2007_v54 }
 0x2b8   : > { %2010 = vst [vmem:[%s3732_s26 + $0x3c] sm:$0xf] %v2009_v55 }
 0x2b9   : > { %2012 = vst [vmem:[%s3732_s26 + $0x48] sm:$0xf] %v2011_v56 }
 0x2ba   : > { %2014 = vst [vmem:[%s3732_s26 + $0x54] sm:$0xf] %v2013_v57 }
 0x2bb   : > { %2016 = vst [vmem:[%s3732_s26 + $0x60] sm:$0xf] %v2015_v58 }
 0x2bc   : > { %2018 = vst [vmem:[%s3732_s26 + $0x6c] sm:$0xf] %v2017_v59 }
 0x2bd   : > { %2020 = vst [vmem:[%s3732_s26 + $0x78] sm:$0xf] %v2019_v60 }
 0x2be   : > { %2022 = vst [vmem:[%s3732_s26 + $0x84] sm:$0xf] %v2021_v61 }
 0x2bf   : > { %2024 = vst [vmem:[%s3732_s26 + $0x90] sm:$0xf] %v2023_v62 }
 0x2c0   : > { %2026 = vst [vmem:[%s3732_s26 + $0x9c] sm:$0xf] %v2025_v63 }
 0x2c1   : > { %2028 = vst [vmem:[%s3732_s26 + $0xa8] sm:$0xf] %v2027_v0 }
 0x2c2   : > { %2030 = vst [vmem:[%s3732_s26 + $0xb4] sm:$0xf] %v2029_v1 }
 0x2c3   : > { %2032 = vst [vmem:[%s3732_s26 + $0xc0] sm:$0xf] %v2031_v2 }
 0x2c4   : > { %2034 = vst [vmem:[%s3732_s26 + $0xcc] sm:$0xf] %v2033_v4 }
 0x2c5   : > { %2036 = vst [vmem:[%s3732_s26 + $0xd8] sm:$0xf] %v2035_v5 }
 0x2c6   : > { %2038 = vst [vmem:[%s3732_s26 + $0xe4] sm:$0xf] %v2037_v6 }
 0x2c7   : > { %2040 = vst [vmem:[%s3732_s26 + $0xf0] sm:$0xf] %v2039_v7 }
 0x2c8   : > { %2042 = vst [vmem:[%s3732_s26 + $0xfc] sm:$0xf] %v2041_v8 }
 0x2c9   : > { %2044 = vst [vmem:[%s3732_s26 + $0x108] sm:$0xf] %v2043_v9 }
 0x2ca   : > { %2046 = vst [vmem:[%s3732_s26 + $0x114] sm:$0xf] %v2045_v10 }
 0x2cb   : > { %2048 = vst [vmem:[%s3732_s26 + $0x120] sm:$0xf] %v2047_v11 }
 0x2cc   : > { %2050 = vst [vmem:[%s3732_s26 + $0x12c] sm:$0xf] %v2049_v12 }
 0x2cd   : > { %2052 = vst [vmem:[%s3732_s26 + $0x138] sm:$0xf] %v2051_v13 }
 0x2ce   : > { %2054 = vst [vmem:[%s3732_s26 + $0x144] sm:$0xf] %v2053_v14 }
 0x2cf   : > { %2056 = vst [vmem:[%s3732_s26 + $0x150] sm:$0xf] %v2055_v15 }
 0x2d0   : > { %2058 = vst [vmem:[%s3732_s26 + $0x15c] sm:$0xf] %v2057_v16 }
 0x2d1   : > { %2060 = vst [vmem:[%s3732_s26 + $0x168] sm:$0xf] %v2059_v17 }
 0x2d2   : > { %2062 = vst [vmem:[%s3732_s26 + $0x174] sm:$0xf] %v2061_v18 }
 0x2d3 PF: > { %s13_s24 = sadd.s32 1, %s3067_s24   ;;  %s3862_s1 = sld [smem:[#allocation7_spill]] }
 0x2d4   : > { %p3797_p7 = scmp.ge.s32.totalorder %s13_s24, 26   ;;  %s3863_s27 = sld [smem:[#allocation8_spill]] }
 0x2d5   : > { %s3865_s12 = smov %s3023_s13  ;;  %s3866_s13 = smov %s3200_s7 }
 0x2d6   : > { %s3867_s14 = smov %s3031_s15  ;;  %s3868_s15 = smov %s3187_s9 }
 0x2d7   : > { %s3869_s16 = smov %s3039_s17  ;;  %s3870_s17 = smov %s3197_s3 }
 0x2d8   : > { %s3871_s18 = smov %s3055_s21  ;;  %s3872_s19 = smov %s3059_s22 }
 0x2d9   : > { %s3873_s20 = smov %s3063_s23  ;;  %s3874_s21 = smov %s3862_s1 }
 0x2da   : > { %s3875_s22 = smov %s3863_s27  ;;  %s3876_s23 = smov %s3886_s28 }
 0x2db   :  { %12 = sbr.rel (!%p3797_p7) target bundleno = 11 (0xb), region = 191 }

// kernel: my_alexnet_features.8
= control target key start
LH: loop header
LB: loop body
LE: loop exit
PB: predicated region body
PF: predicated region fallthrough
CT: control target
= control target key end

     0   :  { %s3351_s12 = smov 0   ;;  %s3353_s13 = smov 0   ;;  %s4262_s0 = inlined_call_operand.vmem [shape: bf16[512,3584], index: 0, kind: input, shape index: {}]   ;;  %s4263_s1 = inlined_call_operand.vmem [shape: bf16[3584,256], index: 1, kind: input, shape index: {}]   ;;  %s4264_s2 = inlined_call_operand.vmem [shape: f32[1,256], index: 2, kind: input, shape index: {}]   ;;  %s4265_s3 = inlined_call_operand.vmem [shape: bf16[512,256], index: 3, kind: output, shape index: {}]  }
   0x1   :  { %s3355_s14 = smov 0   ;;  %s3357_s15 = smov 0  }
   0x2   :  { %s3359_s16 = smov 0   ;;  %s3361_s17 = smov 0  }
   0x3   :  { %s3363_s18 = smov 0  }
   0x4 LB: > { %s25_s19 = sadd.s32 1, %s3320_s16  ;;  %s32_s20 = sadd.s32 1, %s3324_s17  ;;  %s3328_s18 = sphi %s3363_s18, %s13_s18   ;;  %s3324_s17 = sphi %s3361_s17, %s4328_s17   ;;  %s3320_s16 = sphi %s3359_s16, %s4327_s16   ;;  %s3316_s15 = sphi %s3357_s15, %s4326_s15   ;;  %s3312_s14 = sphi %s3355_s14, %s4325_s14   ;;  %s3308_s13 = sphi %s3353_s13, %s4324_s13   ;;  %s3304_s12 = sphi %s3351_s12, %s4323_s12  }
   0x5   : > { %p26_p0 = scmp.ge.s32.totalorder %s25_s19, 7  ;;  %p48_p1 = scmp.ne.s32.totalorder %s3308_s13, %s3304_s12 }
   0x6   : > { %p49_p2 = scmp.eq.s32.totalorder %s3328_s18, 0  ;;  %s41_s24 = sadd.s32 1, %s3308_s13 }
   0x7   : > { %s4330_s19 = smov (%p26_p0, %s25_s19), 0  ;;  %s4332_s20 = smov (!%p26_p0, %s32_s20), %s3324_s17 }
   0x8   : > { %p50_p3 = por %p49_p2, %p48_p1  ;;  %p34_p4 = scmp.ge.s32.totalorder %s4332_s20, 2 }
   0x9   : > { %s37_s21 = ssub.s32 %s3320_s16, %s4330_s19  ;;  %p2556_p6 = scmp.ge.s32.totalorder %s3328_s18, 14 }
   0xa   : > { %s4334_s20 = smov (%p34_p4, %s4332_s20), 0 }
   0xb   : > { %s36_s22 = ssub.s32 %s3324_s17, %s4334_s20  ;;  %164 = sbr.rel (%p2556_p6) target bundleno = 88 (0x58), region = 20 }
   0xc   : > { %s38_s23 = sor.u32 %s37_s21, %s36_s22 }
   0xd   : > { %p39_p5 = scmp.eq.s32.totalorder %s38_s23, 0 }
   0xf   : > { %s3402_s25 = scalar_select %p39_p5, %s3308_s13, %s41_s24  }
  0x10   : > { %167 = sbr.rel (!%p50_p3) target bundleno = 88 (0x58), region = 24  ;;  %s169_s26 = sand.u32 (%p50_p3), 1, %s3308_s13  }
  0x11   : > { %s2559_s27 = sshll.u32 (%p50_p3), %s3320_s16, 2  ;;  %s2557_s28 = sshll.u32 (%p50_p3), %s169_s26, 9 }
  0x12   : > { %s3216_s29 = smul.u32 (%p50_p3), 896, %s3324_s17  ;;  %s3416_s8 = scalar_lea.vmem (%p50_p3), [#allocation3], %s2557_s28 }
  0x14   : > { %s175_s30 = sadd.s32 (%p50_p3), %s3216_s29, %s2559_s27 }
  0x15   : > { %s2561_s4 = sshll.u32 %s175_s30, 2 }
  0x16   : > { %s3411_s7 = scalar_lea.vmem %s4262_s0, %s2561_s4 }
  0x17   : > { %v190_v0 = vld [vmem:[%s3411_s7] sm:$0xff]  ;;  %v192_v1 = vld [vmem:[%s3411_s7 + $0x8] sm:$0xff]  ;;  %v194_v2 = vld [vmem:[%s3411_s7 + $0x70] sm:$0xff] }
  0x18   : > { %191 = vst [vmem:[%s3416_s8] sm:$0xff] %v190_v0  ;;  %v196_v3 = vld [vmem:[%s3411_s7 + $0x78] sm:$0xff]  ;;  %v198_v4 = vld [vmem:[%s3411_s7 + $0xe0] sm:$0xff]  ;;  %v200_v5 = vld [vmem:[%s3411_s7 + $0xe8] sm:$0xff] }
  0x19   : > { %193 = vst [vmem:[%s3416_s8 + $0x8] sm:$0xff] %v192_v1  ;;  %v202_v6 = vld [vmem:[%s3411_s7 + $0x150] sm:$0xff]  ;;  %v204_v7 = vld [vmem:[%s3411_s7 + $0x158] sm:$0xff]  ;;  %v206_v8 = vld [vmem:[%s3411_s7 + $0x1c0] sm:$0xff] }
  0x1a   : > { %195 = vst [vmem:[%s3416_s8 + $0x10] sm:$0xff] %v194_v2  ;;  %v208_v9 = vld [vmem:[%s3411_s7 + $0x1c8] sm:$0xff]  ;;  %v210_v10 = vld [vmem:[%s3411_s7 + $0x230] sm:$0xff]  ;;  %v212_v11 = vld [vmem:[%s3411_s7 + $0x238] sm:$0xff] }
  0x1b   : > { %197 = vst [vmem:[%s3416_s8 + $0x18] sm:$0xff] %v196_v3  ;;  %v214_v12 = vld [vmem:[%s3411_s7 + $0x2a0] sm:$0xff]  ;;  %v216_v13 = vld [vmem:[%s3411_s7 + $0x2a8] sm:$0xff]  ;;  %v218_v14 = vld [vmem:[%s3411_s7 + $0x310] sm:$0xff] }
  0x1c   : > { %199 = vst [vmem:[%s3416_s8 + $0x20] sm:$0xff] %v198_v4  ;;  %v220_v15 = vld [vmem:[%s3411_s7 + $0x318] sm:$0xff]  ;;  %v222_v16 = vld [vmem:[%s3411_s7 + $0x380] sm:$0xff]  ;;  %v224_v17 = vld [vmem:[%s3411_s7 + $0x388] sm:$0xff] }
  0x1d   : > { %201 = vst [vmem:[%s3416_s8 + $0x28] sm:$0xff] %v200_v5  ;;  %v226_v18 = vld [vmem:[%s3411_s7 + $0x3f0] sm:$0xff]  ;;  %v228_v19 = vld [vmem:[%s3411_s7 + $0x3f8] sm:$0xff]  ;;  %v230_v20 = vld [vmem:[%s3411_s7 + $0x460] sm:$0xff] }
  0x1e   : > { %203 = vst [vmem:[%s3416_s8 + $0x30] sm:$0xff] %v202_v6  ;;  %v232_v21 = vld [vmem:[%s3411_s7 + $0x468] sm:$0xff]  ;;  %v234_v22 = vld [vmem:[%s3411_s7 + $0x4d0] sm:$0xff]  ;;  %v236_v23 = vld [vmem:[%s3411_s7 + $0x4d8] sm:$0xff] }
  0x1f   : > { %205 = vst [vmem:[%s3416_s8 + $0x38] sm:$0xff] %v204_v7  ;;  %v238_v24 = vld [vmem:[%s3411_s7 + $0x540] sm:$0xff]  ;;  %v240_v25 = vld [vmem:[%s3411_s7 + $0x548] sm:$0xff]  ;;  %v242_v26 = vld [vmem:[%s3411_s7 + $0x5b0] sm:$0xff] }
  0x20   : > { %207 = vst [vmem:[%s3416_s8 + $0x40] sm:$0xff] %v206_v8  ;;  %v244_v27 = vld [vmem:[%s3411_s7 + $0x5b8] sm:$0xff]  ;;  %v246_v28 = vld [vmem:[%s3411_s7 + $0x620] sm:$0xff]  ;;  %v248_v29 = vld [vmem:[%s3411_s7 + $0x628] sm:$0xff] }
  0x21   : > { %209 = vst [vmem:[%s3416_s8 + $0x48] sm:$0xff] %v208_v9  ;;  %v250_v30 = vld [vmem:[%s3411_s7 + $0x690] sm:$0xff]  ;;  %v252_v31 = vld [vmem:[%s3411_s7 + $0x698] sm:$0xff]  ;;  %v254_v32 = vld [vmem:[%s3411_s7 + $0x700] sm:$0xff] }
  0x22   : > { %211 = vst [vmem:[%s3416_s8 + $0x50] sm:$0xff] %v210_v10  ;;  %v256_v33 = vld [vmem:[%s3411_s7 + $0x708] sm:$0xff]  ;;  %v258_v34 = vld [vmem:[%s3411_s7 + $0x770] sm:$0xff]  ;;  %v260_v35 = vld [vmem:[%s3411_s7 + $0x778] sm:$0xff] }
  0x23   : > { %213 = vst [vmem:[%s3416_s8 + $0x58] sm:$0xff] %v212_v11  ;;  %v262_v36 = vld [vmem:[%s3411_s7 + $0x7e0] sm:$0xff]  ;;  %v264_v37 = vld [vmem:[%s3411_s7 + $0x7e8] sm:$0xff]  ;;  %v266_v38 = vld [vmem:[%s3411_s7 + $0x850] sm:$0xff] }
  0x24   : > { %215 = vst [vmem:[%s3416_s8 + $0x60] sm:$0xff] %v214_v12  ;;  %v268_v39 = vld [vmem:[%s3411_s7 + $0x858] sm:$0xff]  ;;  %v270_v40 = vld [vmem:[%s3411_s7 + $0x8c0] sm:$0xff]  ;;  %v272_v41 = vld [vmem:[%s3411_s7 + $0x8c8] sm:$0xff] }
  0x25   : > { %217 = vst [vmem:[%s3416_s8 + $0x68] sm:$0xff] %v216_v13  ;;  %v274_v42 = vld [vmem:[%s3411_s7 + $0x930] sm:$0xff]  ;;  %v276_v43 = vld [vmem:[%s3411_s7 + $0x938] sm:$0xff]  ;;  %v278_v44 = vld [vmem:[%s3411_s7 + $0x9a0] sm:$0xff] }
  0x26   : > { %219 = vst [vmem:[%s3416_s8 + $0x70] sm:$0xff] %v218_v14  ;;  %v280_v45 = vld [vmem:[%s3411_s7 + $0x9a8] sm:$0xff]  ;;  %v282_v46 = vld [vmem:[%s3411_s7 + $0xa10] sm:$0xff]  ;;  %v284_v47 = vld [vmem:[%s3411_s7 + $0xa18] sm:$0xff] }
  0x27   : > { %221 = vst [vmem:[%s3416_s8 + $0x78] sm:$0xff] %v220_v15  ;;  %v286_v48 = vld [vmem:[%s3411_s7 + $0xa80] sm:$0xff]  ;;  %v288_v49 = vld [vmem:[%s3411_s7 + $0xa88] sm:$0xff]  ;;  %v290_v50 = vld [vmem:[%s3411_s7 + $0xaf0] sm:$0xff] }
  0x28   : > { %223 = vst [vmem:[%s3416_s8 + $0x80] sm:$0xff] %v222_v16  ;;  %v292_v51 = vld [vmem:[%s3411_s7 + $0xaf8] sm:$0xff]  ;;  %v294_v52 = vld [vmem:[%s3411_s7 + $0xb60] sm:$0xff]  ;;  %v296_v53 = vld [vmem:[%s3411_s7 + $0xb68] sm:$0xff] }
  0x29   : > { %225 = vst [vmem:[%s3416_s8 + $0x88] sm:$0xff] %v224_v17  ;;  %v298_v54 = vld [vmem:[%s3411_s7 + $0xbd0] sm:$0xff]  ;;  %v300_v55 = vld [vmem:[%s3411_s7 + $0xbd8] sm:$0xff]  ;;  %v302_v56 = vld [vmem:[%s3411_s7 + $0xc40] sm:$0xff] }
  0x2a   : > { %227 = vst [vmem:[%s3416_s8 + $0x90] sm:$0xff] %v226_v18  ;;  %v304_v57 = vld [vmem:[%s3411_s7 + $0xc48] sm:$0xff]  ;;  %v306_v58 = vld [vmem:[%s3411_s7 + $0xcb0] sm:$0xff]  ;;  %v308_v59 = vld [vmem:[%s3411_s7 + $0xcb8] sm:$0xff] }
  0x2b   : > { %229 = vst [vmem:[%s3416_s8 + $0x98] sm:$0xff] %v228_v19  ;;  %v310_v60 = vld [vmem:[%s3411_s7 + $0xd20] sm:$0xff]  ;;  %v312_v61 = vld [vmem:[%s3411_s7 + $0xd28] sm:$0xff]  ;;  %v314_v62 = vld [vmem:[%s3411_s7 + $0xd90] sm:$0xff] }
  0x2c   : > { %231 = vst [vmem:[%s3416_s8 + $0xa0] sm:$0xff] %v230_v20  ;;  %v316_v63 = vld [vmem:[%s3411_s7 + $0xd98] sm:$0xff] }
  0x2d   : > { %233 = vst [vmem:[%s3416_s8 + $0xa8] sm:$0xff] %v232_v21 }
  0x2e   : > { %235 = vst [vmem:[%s3416_s8 + $0xb0] sm:$0xff] %v234_v22 }
  0x2f   : > { %237 = vst [vmem:[%s3416_s8 + $0xb8] sm:$0xff] %v236_v23 }
  0x30   : > { %239 = vst [vmem:[%s3416_s8 + $0xc0] sm:$0xff] %v238_v24 }
  0x31   : > { %241 = vst [vmem:[%s3416_s8 + $0xc8] sm:$0xff] %v240_v25 }
  0x32   : > { %243 = vst [vmem:[%s3416_s8 + $0xd0] sm:$0xff] %v242_v26 }
  0x33   : > { %245 = vst [vmem:[%s3416_s8 + $0xd8] sm:$0xff] %v244_v27 }
  0x34   : > { %247 = vst [vmem:[%s3416_s8 + $0xe0] sm:$0xff] %v246_v28 }
  0x35   : > { %249 = vst [vmem:[%s3416_s8 + $0xe8] sm:$0xff] %v248_v29 }
  0x36   : > { %251 = vst [vmem:[%s3416_s8 + $0xf0] sm:$0xff] %v250_v30 }
  0x37   : > { %253 = vst [vmem:[%s3416_s8 + $0xf8] sm:$0xff] %v252_v31 }
  0x38   : > { %255 = vst [vmem:[%s3416_s8 + $0x100] sm:$0xff] %v254_v32 }
  0x39   : > { %257 = vst [vmem:[%s3416_s8 + $0x108] sm:$0xff] %v256_v33 }
  0x3a   : > { %259 = vst [vmem:[%s3416_s8 + $0x110] sm:$0xff] %v258_v34 }
  0x3b   : > { %261 = vst [vmem:[%s3416_s8 + $0x118] sm:$0xff] %v260_v35 }
  0x3c   : > { %263 = vst [vmem:[%s3416_s8 + $0x120] sm:$0xff] %v262_v36 }
  0x3d   : > { %265 = vst [vmem:[%s3416_s8 + $0x128] sm:$0xff] %v264_v37 }
  0x3e   : > { %267 = vst [vmem:[%s3416_s8 + $0x130] sm:$0xff] %v266_v38 }
  0x3f   : > { %269 = vst [vmem:[%s3416_s8 + $0x138] sm:$0xff] %v268_v39 }
  0x40   : > { %271 = vst [vmem:[%s3416_s8 + $0x140] sm:$0xff] %v270_v40 }
  0x41   : > { %273 = vst [vmem:[%s3416_s8 + $0x148] sm:$0xff] %v272_v41 }
  0x42   : > { %275 = vst [vmem:[%s3416_s8 + $0x150] sm:$0xff] %v274_v42 }
  0x43   : > { %277 = vst [vmem:[%s3416_s8 + $0x158] sm:$0xff] %v276_v43 }
  0x44   : > { %279 = vst [vmem:[%s3416_s8 + $0x160] sm:$0xff] %v278_v44 }
  0x45   : > { %281 = vst [vmem:[%s3416_s8 + $0x168] sm:$0xff] %v280_v45 }
  0x46   : > { %283 = vst [vmem:[%s3416_s8 + $0x170] sm:$0xff] %v282_v46 }
  0x47   : > { %285 = vst [vmem:[%s3416_s8 + $0x178] sm:$0xff] %v284_v47 }
  0x48   : > { %287 = vst [vmem:[%s3416_s8 + $0x180] sm:$0xff] %v286_v48 }
  0x49   : > { %289 = vst [vmem:[%s3416_s8 + $0x188] sm:$0xff] %v288_v49 }
  0x4a   : > { %291 = vst [vmem:[%s3416_s8 + $0x190] sm:$0xff] %v290_v50 }
  0x4b   : > { %293 = vst [vmem:[%s3416_s8 + $0x198] sm:$0xff] %v292_v51 }
  0x4c   : > { %295 = vst [vmem:[%s3416_s8 + $0x1a0] sm:$0xff] %v294_v52 }
  0x4d   : > { %297 = vst [vmem:[%s3416_s8 + $0x1a8] sm:$0xff] %v296_v53 }
  0x4e   : > { %299 = vst [vmem:[%s3416_s8 + $0x1b0] sm:$0xff] %v298_v54 }
  0x4f   : > { %301 = vst [vmem:[%s3416_s8 + $0x1b8] sm:$0xff] %v300_v55 }
  0x50   : > { %303 = vst [vmem:[%s3416_s8 + $0x1c0] sm:$0xff] %v302_v56 }
  0x51   : > { %305 = vst [vmem:[%s3416_s8 + $0x1c8] sm:$0xff] %v304_v57 }
  0x52   : > { %307 = vst [vmem:[%s3416_s8 + $0x1d0] sm:$0xff] %v306_v58 }
  0x53   : > { %309 = vst [vmem:[%s3416_s8 + $0x1d8] sm:$0xff] %v308_v59 }
  0x54   : > { %311 = vst [vmem:[%s3416_s8 + $0x1e0] sm:$0xff] %v310_v60 }
  0x55   : > { %313 = vst [vmem:[%s3416_s8 + $0x1e8] sm:$0xff] %v312_v61 }
  0x56   : > { %315 = vst [vmem:[%s3416_s8 + $0x1f0] sm:$0xff] %v314_v62 }
  0x57   : > { %317 = vst [vmem:[%s3416_s8 + $0x1f8] sm:$0xff] %v316_v63 }
  0x58 PF: > { %p2562_p7 = scmp.ge.s32.totalorder %s3328_s18, 1  ;;  %p337_p8 = scmp.lt.s32.totalorder %s3328_s18, 15 }
  0x5a   : > { %p338_p9 = pnand %p2562_p7, %p337_p8 }
  0x5c   : > { %341 = sbr.rel (%p338_p9) target bundleno = 899 (0x383), region = 51 }
  0x61   : > { %s344_s9 = sand.u32 1, %s3304_s12   ;;  %s2564_s10 = sshll.u32 %s3312_s14, 6 }
  0x62   : > { %s2563_s11 = sshll.u32 %s344_s9, 9  ;;  %p390_p10 = scmp.lt.s32.totalorder %s2564_s10, 447 }
  0x63   : > { %s2567_s21 = sshll.u32 %s3316_s15, 5  ;;  %s3558_s12 = scalar_lea.vmem [#allocation3], %s2563_s11 }
  0x64   : > { %s4336_s10 = smov (!%p390_p10, %s2564_s10), 447  ;;  %p407_p11 = scmp.lt.s32.totalorder %s2567_s21, 63 }
  0x65   : > { %s3086_s22 = sshll.u32 %s4336_s10, 3  ;;  %p2570_p12 = scmp.ne.s32.totalorder %s3312_s14, 0 }
  0x66   : > { %s3551_s26 = scalar_lea.vmem %s4263_s1, %s3086_s22  ;;  %s4338_s21 = smov (!%p407_p11, %s2567_s21), 63 }
  0x67   : > { %s3087_s27 = sshll.u32 %s4338_s21, 3  ;;  %420 = sbr.rel (%p2570_p12) target bundleno = 173 (0xad), region = 59 }
  0x68   : > { %s3556_s30 = scalar_lea.vmem %s4265_s3, %s3087_s27 }
  0x6c   : > { %v3330_v0 = vmov 0.0  }
  0x6d   : > { %421 = vst [vmem:[#allocation2 + $0xb0] sm:$0xff] %v3330_v0 }
  0x6e   : > { %422 = vst [vmem:[#allocation2 + $0x1b0] sm:$0xff] %v3330_v0 }
  0x6f   : > { %423 = vst [vmem:[#allocation2 + $0xd8] sm:$0xff] %v3330_v0 }
  0x70   : > { %424 = vst [vmem:[#allocation2 + $0x18] sm:$0xff] %v3330_v0 }
  0x71   : > { %425 = vst [vmem:[#allocation2 + $0x50] sm:$0xff] %v3330_v0 }
  0x72   : > { %426 = vst [vmem:[#allocation2 + $0x168] sm:$0xff] %v3330_v0 }
  0x73   : > { %427 = vst [vmem:[#allocation2 + $0x130] sm:$0xff] %v3330_v0 }
  0x74   : > { %428 = vst [vmem:[#allocation2 + $0x48] sm:$0xff] %v3330_v0 }
  0x75   : > { %429 = vst [vmem:[#allocation2 + $0x180] sm:$0xff] %v3330_v0 }
  0x76   : > { %430 = vst [vmem:[#allocation2 + $0x110] sm:$0xff] %v3330_v0 }
  0x77   : > { %431 = vst [vmem:[#allocation2 + $0x118] sm:$0xff] %v3330_v0 }
  0x78   : > { %432 = vst [vmem:[#allocation2 + $0x98] sm:$0xff] %v3330_v0 }
  0x79   : > { %433 = vst [vmem:[#allocation2 + $0x120] sm:$0xff] %v3330_v0 }
  0x7a   : > { %434 = vst [vmem:[#allocation2 + $0x150] sm:$0xff] %v3330_v0 }
  0x7b   : > { %435 = vst [vmem:[#allocation2 + $0x108] sm:$0xff] %v3330_v0 }
  0x7c   : > { %436 = vst [vmem:[#allocation2 + $0x60] sm:$0xff] %v3330_v0 }
  0x7d   : > { %437 = vst [vmem:[#allocation2 + $0xe0] sm:$0xff] %v3330_v0 }
  0x7e   : > { %438 = vst [vmem:[#allocation2 + $0x188] sm:$0xff] %v3330_v0 }
  0x7f   : > { %439 = vst [vmem:[#allocation2 + $0x138] sm:$0xff] %v3330_v0 }
  0x80   : > { %440 = vst [vmem:[#allocation2 + $0x140] sm:$0xff] %v3330_v0 }
  0x81   : > { %441 = vst [vmem:[#allocation2 + $0x80] sm:$0xff] %v3330_v0 }
  0x82   : > { %442 = vst [vmem:[#allocation2 + $0x1a8] sm:$0xff] %v3330_v0 }
  0x83   : > { %443 = vst [vmem:[#allocation2 + $0x1b8] sm:$0xff] %v3330_v0 }
  0x84   : > { %444 = vst [vmem:[#allocation2 + $0x28] sm:$0xff] %v3330_v0 }
  0x85   : > { %445 = vst [vmem:[#allocation2 + $0x1e8] sm:$0xff] %v3330_v0 }
  0x86   : > { %446 = vst [vmem:[#allocation2 + $0xf8] sm:$0xff] %v3330_v0 }
  0x87   : > { %447 = vst [vmem:[#allocation2 + $0x160] sm:$0xff] %v3330_v0 }
  0x88   : > { %448 = vst [vmem:[#allocation2 + $0x30] sm:$0xff] %v3330_v0 }
  0x89   : > { %449 = vst [vmem:[#allocation2 + $0x1e0] sm:$0xff] %v3330_v0 }
  0x8a   : > { %450 = vst [vmem:[#allocation2] sm:$0xff] %v3330_v0 }
  0x8b   : > { %451 = vst [vmem:[#allocation2 + $0xf0] sm:$0xff] %v3330_v0 }
  0x8c   : > { %452 = vst [vmem:[#allocation2 + $0x8] sm:$0xff] %v3330_v0 }
  0x8d   : > { %453 = vst [vmem:[#allocation2 + $0x148] sm:$0xff] %v3330_v0 }
  0x8e   : > { %454 = vst [vmem:[#allocation2 + $0x1d0] sm:$0xff] %v3330_v0 }
  0x8f   : > { %455 = vst [vmem:[#allocation2 + $0x100] sm:$0xff] %v3330_v0 }
  0x90   : > { %456 = vst [vmem:[#allocation2 + $0xc8] sm:$0xff] %v3330_v0 }
  0x91   : > { %457 = vst [vmem:[#allocation2 + $0x40] sm:$0xff] %v3330_v0 }
  0x92   : > { %458 = vst [vmem:[#allocation2 + $0x1f8] sm:$0xff] %v3330_v0 }
  0x93   : > { %459 = vst [vmem:[#allocation2 + $0x20] sm:$0xff] %v3330_v0 }
  0x94   : > { %460 = vst [vmem:[#allocation2 + $0x128] sm:$0xff] %v3330_v0 }
  0x95   : > { %461 = vst [vmem:[#allocation2 + $0x1a0] sm:$0xff] %v3330_v0 }
  0x96   : > { %462 = vst [vmem:[#allocation2 + $0x1f0] sm:$0xff] %v3330_v0 }
  0x97   : > { %463 = vst [vmem:[#allocation2 + $0xe8] sm:$0xff] %v3330_v0 }
  0x98   : > { %464 = vst [vmem:[#allocation2 + $0x78] sm:$0xff] %v3330_v0 }
  0x99   : > { %465 = vst [vmem:[#allocation2 + $0x70] sm:$0xff] %v3330_v0 }
  0x9a   : > { %466 = vst [vmem:[#allocation2 + $0x90] sm:$0xff] %v3330_v0 }
  0x9b   : > { %467 = vst [vmem:[#allocation2 + $0x1d8] sm:$0xff] %v3330_v0 }
  0x9c   : > { %468 = vst [vmem:[#allocation2 + $0xd0] sm:$0xff] %v3330_v0 }
  0x9d   : > { %469 = vst [vmem:[#allocation2 + $0xb8] sm:$0xff] %v3330_v0 }
  0x9e   : > { %470 = vst [vmem:[#allocation2 + $0x88] sm:$0xff] %v3330_v0 }
  0x9f   : > { %471 = vst [vmem:[#allocation2 + $0xa8] sm:$0xff] %v3330_v0 }
  0xa0   : > { %472 = vst [vmem:[#allocation2 + $0x1c8] sm:$0xff] %v3330_v0 }
  0xa1   : > { %473 = vst [vmem:[#allocation2 + $0x170] sm:$0xff] %v3330_v0 }
  0xa2   : > { %474 = vst [vmem:[#allocation2 + $0x178] sm:$0xff] %v3330_v0 }
  0xa3   : > { %475 = vst [vmem:[#allocation2 + $0x68] sm:$0xff] %v3330_v0 }
  0xa4   : > { %476 = vst [vmem:[#allocation2 + $0x190] sm:$0xff] %v3330_v0 }
  0xa5   : > { %477 = vst [vmem:[#allocation2 + $0x198] sm:$0xff] %v3330_v0 }
  0xa6   : > { %478 = vst [vmem:[#allocation2 + $0x38] sm:$0xff] %v3330_v0 }
  0xa7   : > { %479 = vst [vmem:[#allocation2 + $0xc0] sm:$0xff] %v3330_v0 }
  0xa8   : > { %480 = vst [vmem:[#allocation2 + $0x1c0] sm:$0xff] %v3330_v0 }
  0xa9   : > { %481 = vst [vmem:[#allocation2 + $0x158] sm:$0xff] %v3330_v0 }
  0xaa   : > { %482 = vst [vmem:[#allocation2 + $0x10] sm:$0xff] %v3330_v0 }
  0xab   : > { %483 = vst [vmem:[#allocation2 + $0x58] sm:$0xff] %v3330_v0 }
  0xac   : > { %484 = vst [vmem:[#allocation2 + $0xa0] sm:$0xff] %v3330_v0 }
  0xad PF: > { %v2885_v1 = vld [vmem:[%s3551_s26 + $0x70] sm:$0xf]  ;;  %v3167_v2 = vld [vmem:[%s3551_s26 + $0x74] sm:$0xf0]  ;;  %v2877_v12 = vld [vmem:[%s3551_s26 + $0x60] sm:$0xf] }
  0xae   : > { %v2949_v3 = vld [vmem:[%s3551_s26 + $0xf0] sm:$0xf]  ;;  %v2886_v4 = vor.u32 %v3167_v2, %v2885_v1  ;;  %v3183_v5 = vld [vmem:[%s3551_s26 + $0xf4] sm:$0xf0]  ;;  %v3165_v14 = vld [vmem:[%s3551_s26 + $0x64] sm:$0xf0] }
  0xaf   : > { %v3013_v6 = vld [vmem:[%s3551_s26 + $0x170] sm:$0xf]  ;;  %v3199_v7 = vld [vmem:[%s3551_s26 + $0x174] sm:$0xf0]  ;;  %v2950_v8 = vor.u32 %v3183_v5, %v2949_v3  ;;  %v2941_v15 = vld [vmem:[%s3551_s26 + $0xe0] sm:$0xf]  ;;  %v2878_v17 = vor.u32 %v3165_v14, %v2877_v12 }
  0xb0   : > { %v3014_v9 = vor.u32 %v3199_v7, %v3013_v6  ;;  %v3077_v10 = vld [vmem:[%s3551_s26 + $0x1f0] sm:$0xf]  ;;  %v3215_v11 = vld [vmem:[%s3551_s26 + $0x1f4] sm:$0xf0]  ;;  %1317 = vmatpush.bf16.msra.mxu0 %v2886_v4  ;;  %v3181_v16 = vld [vmem:[%s3551_s26 + $0xe4] sm:$0xf0] }
  0xb1   : > { %v3078_v13 = vor.u32 %v3215_v11, %v3077_v10  ;;  %1406 = vmatpush.bf16.msra.mxu1 %v2950_v8  ;;  %v2942_v18 = vor.u32 %v3181_v16, %v2941_v15  ;;  %v3005_v19 = vld [vmem:[%s3551_s26 + $0x160] sm:$0xf]  ;;  %v3197_v20 = vld [vmem:[%s3551_s26 + $0x164] sm:$0xf0]  ;;  %v2869_v24 = vld [vmem:[%s3551_s26 + $0x50] sm:$0xf] }
  0xb2   : > { %1495 = vmatpush.bf16.msra.mxu2 %v3014_v9  ;;  %v3069_v21 = vld [vmem:[%s3551_s26 + $0x1e0] sm:$0xf]  ;;  %v3006_v22 = vor.u32 %v3197_v20, %v3005_v19  ;;  %v3213_v23 = vld [vmem:[%s3551_s26 + $0x1e4] sm:$0xf0]  ;;  %v3163_v25 = vld [vmem:[%s3551_s26 + $0x54] sm:$0xf0] }
  0xb3   : > { %1584 = vmatpush.bf16.msra.mxu3 %v3078_v13  ;;  %v3070_v26 = vor.u32 %v3213_v23, %v3069_v21  ;;  %v2933_v27 = vld [vmem:[%s3551_s26 + $0xd0] sm:$0xf]  ;;  %v3179_v28 = vld [vmem:[%s3551_s26 + $0xd4] sm:$0xf0]  ;;  %v2870_v30 = vor.u32 %v3163_v25, %v2869_v24  ;;  %v2861_v36 = vld [vmem:[%s3551_s26 + $0x40] sm:$0xf] }
  0xb4   : > { %v2997_v29 = vld [vmem:[%s3551_s26 + $0x150] sm:$0xf]  ;;  %1318 = vmatpush.bf16.msra.mxu0 %v2878_v17  ;;  %v3195_v31 = vld [vmem:[%s3551_s26 + $0x154] sm:$0xf0]  ;;  %v2934_v34 = vor.u32 %v3179_v28, %v2933_v27  ;;  %v3161_v37 = vld [vmem:[%s3551_s26 + $0x44] sm:$0xf0] }
  0xb5   : > { %v3061_v32 = vld [vmem:[%s3551_s26 + $0x1d0] sm:$0xf]  ;;  %v3211_v33 = vld [vmem:[%s3551_s26 + $0x1d4] sm:$0xf0]  ;;  %1407 = vmatpush.bf16.msra.mxu1 %v2942_v18  ;;  %v2998_v35 = vor.u32 %v3195_v31, %v2997_v29  ;;  %v2925_v38 = vld [vmem:[%s3551_s26 + $0xc0] sm:$0xf]  ;;  %v2862_v45 = vor.u32 %v3161_v37, %v2861_v36 }
  0xb6   : > { %1496 = vmatpush.bf16.msra.mxu2 %v3006_v22  ;;  %v3062_v39 = vor.u32 %v3211_v33, %v3061_v32  ;;  %v3177_v40 = vld [vmem:[%s3551_s26 + $0xc4] sm:$0xf0]  ;;  %v2989_v41 = vld [vmem:[%s3551_s26 + $0x140] sm:$0xf]  ;;  %v2853_v48 = vld [vmem:[%s3551_s26 + $0x30] sm:$0xf] }
  0xb7   : > { %1585 = vmatpush.bf16.msra.mxu3 %v3070_v26  ;;  %v3193_v42 = vld [vmem:[%s3551_s26 + $0x144] sm:$0xf0]  ;;  %v3053_v43 = vld [vmem:[%s3551_s26 + $0x1c0] sm:$0xf]  ;;  %v2926_v46 = vor.u32 %v3177_v40, %v2925_v38  ;;  %v3159_v49 = vld [vmem:[%s3551_s26 + $0x34] sm:$0xf0] }
  0xb8   : > { %v3209_v44 = vld [vmem:[%s3551_s26 + $0x1c4] sm:$0xf0]  ;;  %1319 = vmatpush.bf16.msra.mxu0 %v2870_v30  ;;  %v2990_v47 = vor.u32 %v3193_v42, %v2989_v41  ;;  %v2917_v50 = vld [vmem:[%s3551_s26 + $0xb0] sm:$0xf]  ;;  %v3175_v52 = vld [vmem:[%s3551_s26 + $0xb4] sm:$0xf0]  ;;  %v2854_v57 = vor.u32 %v3159_v49, %v2853_v48 }
  0xb9   : > { %1408 = vmatpush.bf16.msra.mxu1 %v2934_v34  ;;  %v3054_v51 = vor.u32 %v3209_v44, %v3053_v43  ;;  %v2981_v53 = vld [vmem:[%s3551_s26 + $0x130] sm:$0xf]  ;;  %v3191_v54 = vld [vmem:[%s3551_s26 + $0x134] sm:$0xf0]  ;;  %v2918_v58 = vor.u32 %v3175_v52, %v2917_v50  ;;  %v2845_v60 = vld [vmem:[%s3551_s26 + $0x20] sm:$0xf] }
  0xba   : > { %1497 = vmatpush.bf16.msra.mxu2 %v2998_v35  ;;  %v3045_v55 = vld [vmem:[%s3551_s26 + $0x1b0] sm:$0xf]  ;;  %v3207_v56 = vld [vmem:[%s3551_s26 + $0x1b4] sm:$0xf0]  ;;  %v2982_v59 = vor.u32 %v3191_v54, %v2981_v53  ;;  %v3157_v61 = vld [vmem:[%s3551_s26 + $0x24] sm:$0xf0] }
  0xbb   : > { %1586 = vmatpush.bf16.msra.mxu3 %v3062_v39  ;;  %v2909_v62 = vld [vmem:[%s3551_s26 + $0xa0] sm:$0xf]  ;;  %v3046_v63 = vor.u32 %v3207_v56, %v3045_v55  ;;  %v3173_v0 = vld [vmem:[%s3551_s26 + $0xa4] sm:$0xf0]  ;;  %v2846_v5 = vor.u32 %v3157_v61, %v2845_v60  ;;  %v2837_v8 = vld [vmem:[%s3551_s26 + $0x10] sm:$0xf] }
  0xbc   : > { %1320 = vmatpush.bf16.msra.mxu0 %v2862_v45  ;;  %v2973_v1 = vld [vmem:[%s3551_s26 + $0x120] sm:$0xf]  ;;  %v3189_v2 = vld [vmem:[%s3551_s26 + $0x124] sm:$0xf0]  ;;  %v2910_v6 = vor.u32 %v3173_v0, %v2909_v62  ;;  %v3155_v9 = vld [vmem:[%s3551_s26 + $0x14] sm:$0xf0] }
  0xbd   : > { %1409 = vmatpush.bf16.msra.mxu1 %v2926_v46  ;;  %v3037_v3 = vld [vmem:[%s3551_s26 + $0x1a0] sm:$0xf]  ;;  %v3205_v4 = vld [vmem:[%s3551_s26 + $0x1a4] sm:$0xf0]  ;;  %v2974_v7 = vor.u32 %v3189_v2, %v2973_v1  ;;  %v2901_v10 = vld [vmem:[%s3551_s26 + $0x90] sm:$0xf]  ;;  %v2838_v18 = vor.u32 %v3155_v9, %v2837_v8 }
  0xbe   : > { %1498 = vmatpush.bf16.msra.mxu2 %v2990_v47  ;;  %v3038_v11 = vor.u32 %v3205_v4, %v3037_v3  ;;  %v3171_v12 = vld [vmem:[%s3551_s26 + $0x94] sm:$0xf0]  ;;  %v2965_v13 = vld [vmem:[%s3551_s26 + $0x110] sm:$0xf]  ;;  %v2829_v17 = vld [vmem:[%s3551_s26] sm:$0xf] }
  0xbf   : > { %1587 = vmatpush.bf16.msra.mxu3 %v3054_v51  ;;  %v3187_v14 = vld [vmem:[%s3551_s26 + $0x114] sm:$0xf0]  ;;  %v3029_v15 = vld [vmem:[%s3551_s26 + $0x190] sm:$0xf]  ;;  %v3153_v19 = vld [vmem:[%s3551_s26 + $0x4] sm:$0xf0]  ;;  %v2902_v22 = vor.u32 %v3171_v12, %v2901_v10 }
  0xc0   : > { %1321 = vmatpush.bf16.msra.mxu0 %v2854_v57  ;;  %v3203_v16 = vld [vmem:[%s3551_s26 + $0x194] sm:$0xf0]  ;;  %v2893_v20 = vld [vmem:[%s3551_s26 + $0x80] sm:$0xf]  ;;  %v3169_v21 = vld [vmem:[%s3551_s26 + $0x84] sm:$0xf0]  ;;  %v2966_v23 = vor.u32 %v3187_v14, %v2965_v13  ;;  %v2830_v34 = vor.u32 %v3153_v19, %v2829_v17 }
  0xc1   : > { %1410 = vmatpush.bf16.msra.mxu1 %v2918_v58  ;;  %v2957_v24 = vld [vmem:[%s3551_s26 + $0x100] sm:$0xf]  ;;  %v3185_v25 = vld [vmem:[%s3551_s26 + $0x104] sm:$0xf0]  ;;  %v3030_v27 = vor.u32 %v3203_v16, %v3029_v15  ;;  %v3090_v30 = vld [vmem:[%s3558_s12 + $0xc] sm:$0xf0]  ;;  %v2894_v38 = vor.u32 %v3169_v21, %v2893_v20 }
  0xc2   : > { %1499 = vmatpush.bf16.msra.mxu2 %v2982_v59  ;;  %v3021_v26 = vld [vmem:[%s3551_s26 + $0x180] sm:$0xf]  ;;  %v3201_v28 = vld [vmem:[%s3551_s26 + $0x184] sm:$0xf0]  ;;  %v3088_v31 = vld [vmem:[%s3558_s12 + $0x4] sm:$0xf]  ;;  %v2958_v39 = vor.u32 %v3185_v25, %v2957_v24 }
  0xc3   : > { %1588 = vmatpush.bf16.msra.mxu3 %v3046_v63  ;;  %v2573_v29 = vld [vmem:[%s3558_s12] sm:$0xf]  ;;  %v3198_v32 = vld [vmem:[%s3551_s26 + $0x174] sm:$0xf]  ;;  %v3015_v33 = vld [vmem:[%s3551_s26 + $0x178] sm:$0xf0]  ;;  %v3022_v43 = vor.u32 %v3201_v28, %v3021_v26 }
  0xc4   : > { %1322 = vmatpush.bf16.msra.mxu0 %v2846_v5  ;;  %v2575_v35 = vld [vmem:[%s3558_s12 + $0x10] sm:$0xf0]  ;;  %v3079_v37 = vld [vmem:[%s3551_s26 + $0x1f8] sm:$0xf0]  ;;  %v2581_v40 = vld [vmem:[%s3558_s12 + $0x8] sm:$0xf]  ;;  %v3018_v45 = vor.u32 %v3198_v32, %v3015_v33  ;;  %v3703_v48 = vor.u32 %v3090_v30, %v2573_v29 }
  0xc5   : > { %1411 = vmatpush.bf16.msra.mxu1 %v2910_v6  ;;  %v3214_v36 = vld [vmem:[%s3551_s26 + $0x1f4] sm:$0xf]  ;;  %v3091_v41 = vld [vmem:[%s3558_s12 + $0x14] sm:$0xf0]  ;;  %v3089_v42 = vld [vmem:[%s3558_s12 + $0xc] sm:$0xf]  ;;  %v3707_v52 = vor.u32 %v3088_v31, %v2575_v35 }
  0xc6   : > { %1500 = vmatpush.bf16.msra.mxu2 %v2974_v7  ;;  %v2583_v44 = vld [vmem:[%s3558_s12 + $0x18] sm:$0xf0]  ;;  %v3166_v46 = vld [vmem:[%s3551_s26 + $0x74] sm:$0xf]  ;;  %v3082_v49 = vor.u32 %v3214_v36, %v3079_v37  ;;  %v3709_v53 = vor.u32 %v3091_v41, %v2581_v40  ;;  %v3196_v57 = vld [vmem:[%s3551_s26 + $0x164] sm:$0xf] }
  0xc7   : > { %1589 = vmatpush.bf16.msra.mxu3 %v3038_v11  ;;  %v2887_v47 = vld [vmem:[%s3551_s26 + $0x78] sm:$0xf0]  ;;  %v3182_v50 = vld [vmem:[%s3551_s26 + $0xf4] sm:$0xf]  ;;  %v3711_v54 = vor.u32 %v3089_v42, %v2583_v44  ;;  %v3007_v58 = vld [vmem:[%s3551_s26 + $0x168] sm:$0xf0] }
  0xc8   : > { %1323 = vmatpush.bf16.msra.mxu0 %v2838_v18  ;;  %v2951_v51 = vld [vmem:[%s3551_s26 + $0xf8] sm:$0xf0]  ;;  %v2890_v55 = vor.u32 %v3166_v46, %v2887_v47  ;;  %v3212_v59 = vld [vmem:[%s3551_s26 + $0x1e4] sm:$0xf]  ;;  %v3010_v60 = vor.u32 %v3196_v57, %v3007_v58  ;;  %v3071_v61 = vld [vmem:[%s3551_s26 + $0x1e8] sm:$0xf0] }
  0xc9   : > { %1412 = vmatpush.bf16.msra.mxu1 %v2902_v22  ;;  %v2954_v56 = vor.u32 %v3182_v50, %v2951_v51  ;;  %v3164_v62 = vld [vmem:[%s3551_s26 + $0x64] sm:$0xf]  ;;  %v2879_v63 = vld [vmem:[%s3551_s26 + $0x68] sm:$0xf0]  ;;  %v3074_v0 = vor.u32 %v3212_v59, %v3071_v61  ;;  %v2589_v5 = vld [vmem:[%s3558_s12 + $0x20] sm:$0xf] }
  0xca   : > { %1501 = vmatpush.bf16.msra.mxu2 %v2966_v23  ;;  %v2882_v1 = vor.u32 %v3164_v62, %v2879_v63  ;;  %v3180_v2 = vld [vmem:[%s3551_s26 + $0xe4] sm:$0xf]  ;;  %v2943_v3 = vld [vmem:[%s3551_s26 + $0xe8] sm:$0xf0]  ;;  %v3094_v6 = vld [vmem:[%s3558_s12 + $0x2c] sm:$0xf0] }
  0xcb   : > { %1590 = vmatpush.bf16.msra.mxu3 %v3030_v27  ;;  %v2946_v4 = vor.u32 %v3180_v2, %v2943_v3  ;;  %v3092_v7 = vld [vmem:[%s3558_s12 + $0x24] sm:$0xf]  ;;  %v2591_v8 = vld [vmem:[%s3558_s12 + $0x30] sm:$0xf0]  ;;  %v2597_v9 = vld [vmem:[%s3558_s12 + $0x28] sm:$0xf]  ;;  %v3733_v13 = vor.u32 %v3094_v6, %v2589_v5 }
  0xcc   : > { %1324 = vmatpush.bf16.msra.mxu0 %v2830_v34  ;;  %v3095_v10 = vld [vmem:[%s3558_s12 + $0x34] sm:$0xf0]  ;;  %v3093_v11 = vld [vmem:[%s3558_s12 + $0x2c] sm:$0xf]  ;;  %v2599_v12 = vld [vmem:[%s3558_s12 + $0x38] sm:$0xf0]  ;;  %v3735_v14 = vor.u32 %v3092_v7, %v2591_v8 }
  0xcd   : > { %1413 = vmatpush.bf16.msra.mxu1 %v2894_v38  ;;  %v3737_v15 = vor.u32 %v3095_v10, %v2597_v9  ;;  %v3739_v16 = vor.u32 %v3093_v11, %v2599_v12  ;;  %v2605_v17 = vld [vmem:[%s3558_s12 + $0x40] sm:$0xf]  ;;  %v3098_v18 = vld [vmem:[%s3558_s12 + $0x4c] sm:$0xf0]  ;;  %v3096_v19 = vld [vmem:[%s3558_s12 + $0x44] sm:$0xf] }
  0xce   : > { %1502 = vmatpush.bf16.msra.mxu2 %v2958_v39  ;;  %v2607_v20 = vld [vmem:[%s3558_s12 + $0x50] sm:$0xf0]  ;;  %v2613_v21 = vld [vmem:[%s3558_s12 + $0x48] sm:$0xf]  ;;  %v3099_v22 = vld [vmem:[%s3558_s12 + $0x54] sm:$0xf0]  ;;  %v3753_v25 = vor.u32 %v3098_v18, %v2605_v17 }
  0xcf   : > { %1591 = vmatpush.bf16.msra.mxu3 %v3022_v43  ;;  %1325 = vmatmul.bf16.vlgmr.msra.gmra.mxu0 %v3703_v48  ;;  %v3097_v23 = vld [vmem:[%s3558_s12 + $0x4c] sm:$0xf]  ;;  %v2615_v24 = vld [vmem:[%s3558_s12 + $0x58] sm:$0xf0]  ;;  %v3755_v26 = vor.u32 %v3096_v19, %v2607_v20  ;;  %v3757_v27 = vor.u32 %v3099_v22, %v2613_v21  ;;  %v3194_v29 = vld [vmem:[%s3551_s26 + $0x154] sm:$0xf] }
  0xd0   : > { %1414 = vmatmul.bf16.vlgmr.msra.gmra.mxu1 %v3707_v52  ;;  %1673 = vmatpush.bf16.msrb.mxu0 %v2890_v55  ;;  %v3759_v28 = vor.u32 %v3097_v23, %v2615_v24  ;;  %v2999_v30 = vld [vmem:[%s3551_s26 + $0x158] sm:$0xf0]  ;;  %v3210_v31 = vld [vmem:[%s3551_s26 + $0x1d4] sm:$0xf]  ;;  %v2621_v41 = vld [vmem:[%s3558_s12 + $0x60] sm:$0xf] }
  0xd1   : > { %1503 = vmatmul.bf16.vlgmr.msra.gmra.mxu2 %v3709_v53  ;;  %1762 = vmatpush.bf16.msrb.mxu1 %v2954_v56  ;;  %v3002_v32 = vor.u32 %v3194_v29, %v2999_v30  ;;  %v3063_v33 = vld [vmem:[%s3551_s26 + $0x1d8] sm:$0xf0]  ;;  %v3162_v34 = vld [vmem:[%s3551_s26 + $0x54] sm:$0xf]  ;;  %v3102_v42 = vld [vmem:[%s3558_s12 + $0x6c] sm:$0xf0] }
  0xd2   : > { %1851 = vmatpush.bf16.msrb.mxu2 %v3018_v45  ;;  %1592 = vmatmul.bf16.vlgmr.msra.gmra.mxu3 %v3711_v54  ;;  %v2871_v35 = vld [vmem:[%s3551_s26 + $0x58] sm:$0xf0]  ;;  %v3066_v36 = vor.u32 %v3210_v31, %v3063_v33  ;;  %v3178_v38 = vld [vmem:[%s3551_s26 + $0xd4] sm:$0xf]  ;;  %v3100_v43 = vld [vmem:[%s3558_s12 + $0x64] sm:$0xf]  ;;  %v3781_v50 = vor.u32 %v3102_v42, %v2621_v41 }
  0xd3   : > { %1940 = vmatpush.bf16.msrb.mxu3 %v3082_v49  ;;  %v2874_v37 = vor.u32 %v3162_v34, %v2871_v35  ;;  %v2935_v39 = vld [vmem:[%s3551_s26 + $0xd8] sm:$0xf0]  ;;  %v2623_v44 = vld [vmem:[%s3558_s12 + $0x70] sm:$0xf0]  ;;  %v2629_v45 = vld [vmem:[%s3558_s12 + $0x68] sm:$0xf] }
  0xd4   : > { %1674 = vmatpush.bf16.msrb.mxu0 %v2882_v1  ;;  %v2938_v40 = vor.u32 %v3178_v38, %v2935_v39  ;;  %v3103_v46 = vld [vmem:[%s3558_s12 + $0x74] sm:$0xf0]  ;;  %v3101_v47 = vld [vmem:[%s3558_s12 + $0x6c] sm:$0xf]  ;;  %v2631_v49 = vld [vmem:[%s3558_s12 + $0x78] sm:$0xf0]  ;;  %v3783_v51 = vor.u32 %v3100_v43, %v2623_v44 }
  0xd5   : > { %1763 = vmatpush.bf16.msrb.mxu1 %v2946_v4  ;;  %v3785_v55 = vor.u32 %v3103_v46, %v2629_v45  ;;  %v3787_v56 = vor.u32 %v3101_v47, %v2631_v49  ;;  %v2637_v57 = vld [vmem:[%s3558_s12 + $0x80] sm:$0xf]  ;;  %v3106_v58 = vld [vmem:[%s3558_s12 + $0x8c] sm:$0xf0]  ;;  %v3104_v59 = vld [vmem:[%s3558_s12 + $0x84] sm:$0xf] }
  0xd6   : > { %1852 = vmatpush.bf16.msrb.mxu2 %v3010_v60  ;;  %v2639_v60 = vld [vmem:[%s3558_s12 + $0x90] sm:$0xf0]  ;;  %v2645_v61 = vld [vmem:[%s3558_s12 + $0x88] sm:$0xf]  ;;  %v3107_v62 = vld [vmem:[%s3558_s12 + $0x94] sm:$0xf0]  ;;  %v3801_v1 = vor.u32 %v3106_v58, %v2637_v57 }
  0xd7   : > { %1941 = vmatpush.bf16.msrb.mxu3 %v3074_v0  ;;  %v3105_v63 = vld [vmem:[%s3558_s12 + $0x8c] sm:$0xf]  ;;  %v2647_v0 = vld [vmem:[%s3558_s12 + $0x98] sm:$0xf0]  ;;  %v3803_v2 = vor.u32 %v3104_v59, %v2639_v60  ;;  %v3805_v3 = vor.u32 %v3107_v62, %v2645_v61  ;;  %v3192_v5 = vld [vmem:[%s3551_s26 + $0x144] sm:$0xf] }
  0xd8   : > { %1675 = vmatpush.bf16.msrb.mxu0 %v2874_v37  ;;  %v3807_v4 = vor.u32 %v3105_v63, %v2647_v0  ;;  %v2991_v6 = vld [vmem:[%s3551_s26 + $0x148] sm:$0xf0]  ;;  %v3208_v7 = vld [vmem:[%s3551_s26 + $0x1c4] sm:$0xf]  ;;  %v2653_v21 = vld [vmem:[%s3558_s12 + $0xa0] sm:$0xf] }
  0xd9   : > { %1764 = vmatpush.bf16.msrb.mxu1 %v2938_v40  ;;  %v2994_v8 = vor.u32 %v3192_v5, %v2991_v6  ;;  %v3055_v9 = vld [vmem:[%s3551_s26 + $0x1c8] sm:$0xf0]  ;;  %v3160_v10 = vld [vmem:[%s3551_s26 + $0x44] sm:$0xf]  ;;  %v3110_v22 = vld [vmem:[%s3558_s12 + $0xac] sm:$0xf0] }
  0xda   : > { %1853 = vmatpush.bf16.msrb.mxu2 %v3002_v32  ;;  %v2863_v11 = vld [vmem:[%s3551_s26 + $0x48] sm:$0xf0]  ;;  %v3058_v12 = vor.u32 %v3208_v7, %v3055_v9  ;;  %v3176_v18 = vld [vmem:[%s3551_s26 + $0xc4] sm:$0xf]  ;;  %v2655_v24 = vld [vmem:[%s3558_s12 + $0xb0] sm:$0xf0]  ;;  %v3829_v33 = vor.u32 %v3110_v22, %v2653_v21 }
  0xdb   : > { %1942 = vmatpush.bf16.msrb.mxu3 %v3066_v36  ;;  %v2866_v17 = vor.u32 %v3160_v10, %v2863_v11  ;;  %v2927_v19 = vld [vmem:[%s3551_s26 + $0xc8] sm:$0xf0]  ;;  %v3108_v23 = vld [vmem:[%s3558_s12 + $0xa4] sm:$0xf]  ;;  %v2661_v29 = vld [vmem:[%s3558_s12 + $0xa8] sm:$0xf] }
  0xdc   : > { %v2930_v20 = vor.u32 %v3176_v18, %v2927_v19  ;;  %v3111_v30 = vld [vmem:[%s3558_s12 + $0xb4] sm:$0xf0]  ;;  %v3109_v31 = vld [vmem:[%s3558_s12 + $0xac] sm:$0xf]  ;;  %v2663_v32 = vld [vmem:[%s3558_s12 + $0xb8] sm:$0xf0]  ;;  %v3831_v34 = vor.u32 %v3108_v23, %v2655_v24 }
  0xdd   : > { %1676 = vmatpush.bf16.msrb.mxu0 %v2866_v17  ;;  %v3833_v35 = vor.u32 %v3111_v30, %v2661_v29  ;;  %v3835_v36 = vor.u32 %v3109_v31, %v2663_v32  ;;  %v2669_v37 = vld [vmem:[%s3558_s12 + $0xc0] sm:$0xf]  ;;  %v3114_v38 = vld [vmem:[%s3558_s12 + $0xcc] sm:$0xf0]  ;;  %v3112_v39 = vld [vmem:[%s3558_s12 + $0xc4] sm:$0xf] }
  0xde   : > { %1854 = vmatpush.bf16.msrb.mxu2 %v2994_v8  ;;  %1765 = vmatpush.bf16.msrb.mxu1 %v2930_v20  ;;  %v2671_v40 = vld [vmem:[%s3558_s12 + $0xd0] sm:$0xf0]  ;;  %v2677_v41 = vld [vmem:[%s3558_s12 + $0xc8] sm:$0xf]  ;;  %v3115_v42 = vld [vmem:[%s3558_s12 + $0xd4] sm:$0xf0]  ;;  %v3849_v45 = vor.u32 %v3114_v38, %v2669_v37 }
  0xdf   : > { %1330 = vmatmul.bf16.gmra.mxu0 %v3733_v13  ;;  %1943 = vmatpush.bf16.msrb.mxu3 %v3058_v12  ;;  %v3113_v43 = vld [vmem:[%s3558_s12 + $0xcc] sm:$0xf]  ;;  %v2679_v44 = vld [vmem:[%s3558_s12 + $0xd8] sm:$0xf0]  ;;  %v3851_v46 = vor.u32 %v3112_v39, %v2671_v40  ;;  %v3853_v47 = vor.u32 %v3115_v42, %v2677_v41  ;;  %v3190_v57 = vld [vmem:[%s3551_s26 + $0x134] sm:$0xf] }
  0xe0   : > { %1419 = vmatmul.bf16.gmra.mxu1 %v3735_v14  ;;  %v3855_v49 = vor.u32 %v3113_v43, %v2679_v44  ;;  %v2983_v58 = vld [vmem:[%s3551_s26 + $0x138] sm:$0xf0]  ;;  %v3206_v59 = vld [vmem:[%s3551_s26 + $0x1b4] sm:$0xf]  ;;  %v2685_v63 = vld [vmem:[%s3558_s12 + $0xe0] sm:$0xf] }
  0xe1   : > { %1508 = vmatmul.bf16.gmra.mxu2 %v3737_v15  ;;  %v2986_v60 = vor.u32 %v3190_v57, %v2983_v58  ;;  %v3047_v61 = vld [vmem:[%s3551_s26 + $0x1b8] sm:$0xf0]  ;;  %v3118_v0 = vld [vmem:[%s3558_s12 + $0xec] sm:$0xf0]  ;;  %v3116_v5 = vld [vmem:[%s3558_s12 + $0xe4] sm:$0xf] }
  0xe2   : > { %1597 = vmatmul.bf16.gmra.mxu3 %v3739_v16  ;;  %v3050_v62 = vor.u32 %v3206_v59, %v3047_v61  ;;  %v2687_v6 = vld [vmem:[%s3558_s12 + $0xf0] sm:$0xf0]  ;;  %v2693_v7 = vld [vmem:[%s3558_s12 + $0xe8] sm:$0xf]  ;;  %v3119_v8 = vld [vmem:[%s3558_s12 + $0xf4] sm:$0xf0]  ;;  %v3876_v18 = vor.u32 %v3118_v0, %v2685_v63 }
  0xe3   : > { %1855 = vmatpush.bf16.msrb.mxu2 %v2986_v60  ;;  %v3117_v9 = vld [vmem:[%s3558_s12 + $0xec] sm:$0xf]  ;;  %v2695_v10 = vld [vmem:[%s3558_s12 + $0xf8] sm:$0xf0]  ;;  %v3158_v11 = vld [vmem:[%s3551_s26 + $0x34] sm:$0xf]  ;;  %v3879_v21 = vor.u32 %v3116_v5, %v2687_v6  ;;  %v3881_v22 = vor.u32 %v3119_v8, %v2693_v7 }
  0xe4   : > { %1944 = vmatpush.bf16.msrb.mxu3 %v3050_v62  ;;  %v2855_v12 = vld [vmem:[%s3551_s26 + $0x38] sm:$0xf0]  ;;  %v3174_v17 = vld [vmem:[%s3551_s26 + $0xb4] sm:$0xf]  ;;  %v3883_v24 = vor.u32 %v3117_v9, %v2695_v10  ;;  %v2701_v29 = vld [vmem:[%s3558_s12 + $0x100] sm:$0xf] }
  0xe5   : > { %v2858_v19 = vor.u32 %v3158_v11, %v2855_v12  ;;  %v2919_v20 = vld [vmem:[%s3551_s26 + $0xb8] sm:$0xf0]  ;;  %v3122_v30 = vld [vmem:[%s3558_s12 + $0x10c] sm:$0xf0]  ;;  %v3120_v31 = vld [vmem:[%s3558_s12 + $0x104] sm:$0xf] }
  0xe6   : > { %v2922_v23 = vor.u32 %v3174_v17, %v2919_v20  ;;  %v2703_v32 = vld [vmem:[%s3558_s12 + $0x110] sm:$0xf0]  ;;  %v2709_v37 = vld [vmem:[%s3558_s12 + $0x108] sm:$0xf]  ;;  %v3123_v38 = vld [vmem:[%s3558_s12 + $0x114] sm:$0xf0]  ;;  %v3897_v41 = vor.u32 %v3122_v30, %v2701_v29 }
  0xe7   : > { %1677 = vmatpush.bf16.msrb.mxu0 %v2858_v19  ;;  %v3121_v39 = vld [vmem:[%s3558_s12 + $0x10c] sm:$0xf]  ;;  %v2711_v40 = vld [vmem:[%s3558_s12 + $0x118] sm:$0xf0]  ;;  %v3899_v43 = vor.u32 %v3120_v31, %v2703_v32  ;;  %v3901_v44 = vor.u32 %v3123_v38, %v2709_v37  ;;  %v3188_v60 = vld [vmem:[%s3551_s26 + $0x124] sm:$0xf] }
  0xe8   : > { %1766 = vmatpush.bf16.msrb.mxu1 %v2922_v23  ;;  %v3903_v58 = vor.u32 %v3121_v39, %v2711_v40  ;;  %v2975_v61 = vld [vmem:[%s3551_s26 + $0x128] sm:$0xf0]  ;;  %v3204_v62 = vld [vmem:[%s3551_s26 + $0x1a4] sm:$0xf]  ;;  %v485_v10 = vld [vmem:[#allocation2 + $0xb0] sm:$0xff]  ;;  %p3083_p13 = scmp.ne.s32.totalorder %s3312_s14, 6 }
  0xe9   : > { %v2978_v0 = vor.u32 %v3188_v60, %v2975_v61  ;;  %v3039_v5 = vld [vmem:[%s3551_s26 + $0x1a8] sm:$0xf0]  ;;  %v2717_v17 = vld [vmem:[%s3558_s12 + $0x120] sm:$0xf]  ;;  %v3126_v19 = vld [vmem:[%s3558_s12 + $0x12c] sm:$0xf0] }
  0xea   : > { %v3042_v9 = vor.u32 %v3204_v62, %v3039_v5  ;;  %v3124_v23 = vld [vmem:[%s3558_s12 + $0x124] sm:$0xf]  ;;  %v2719_v29 = vld [vmem:[%s3558_s12 + $0x130] sm:$0xf0]  ;;  %v2725_v30 = vld [vmem:[%s3558_s12 + $0x128] sm:$0xf] }
  0xeb   : > { %1856 = vmatpush.bf16.msrb.mxu2 %v2978_v0  ;;  %v3127_v31 = vld [vmem:[%s3558_s12 + $0x134] sm:$0xf0]  ;;  %v3125_v32 = vld [vmem:[%s3558_s12 + $0x12c] sm:$0xf]  ;;  %v2727_v37 = vld [vmem:[%s3558_s12 + $0x138] sm:$0xf0]  ;;  %v3927_v5 = vor.u32 %v3124_v23, %v2719_v29 }
  0xec   : > { %1945 = vmatpush.bf16.msrb.mxu3 %v3042_v9  ;;  %v3156_v39 = vld [vmem:[%s3551_s26 + $0x24] sm:$0xf]  ;;  %v2847_v40 = vld [vmem:[%s3551_s26 + $0x28] sm:$0xf0]  ;;  %v487_v9 = vld [vmem:[#allocation2 + $0xd8] sm:$0xff] }
  0xed   : > { %v3172_v60 = vld [vmem:[%s3551_s26 + $0xa4] sm:$0xf]  ;;  %v2911_v61 = vld [vmem:[%s3551_s26 + $0xa8] sm:$0xf0]  ;;  %4285 = vst [vmem:[#allocation4_spill] sm:$0xff] %v3927_v5 }
  0xef   : > { %1335 = vmatmul.bf16.gmra.mxu0 %v3753_v25 }
  0xf0   : > { %1424 = vmatmul.bf16.gmra.mxu1 %v3755_v26 }
  0xf1   : > { %1513 = vmatmul.bf16.gmra.mxu2 %v3757_v27 }
  0xf2   : > { %1602 = vmatmul.bf16.gmra.mxu3 %v3759_v28 }
  0xff   : > { %1340 = vmatmul.bf16.gmra.mxu0 %v3781_v50 }
 0x100   : > { %1429 = vmatmul.bf16.gmra.mxu1 %v3783_v51 }
 0x101   : > { %1518 = vmatmul.bf16.gmra.mxu2 %v3785_v55 }
 0x102   : > { %1607 = vmatmul.bf16.gmra.mxu3 %v3787_v56 }
 0x10f   : > { %1345 = vmatmul.bf16.gmra.mxu0 %v3801_v1 }
 0x110   : > { %1434 = vmatmul.bf16.gmra.mxu1 %v3803_v2 }
 0x111   : > { %1523 = vmatmul.bf16.gmra.mxu2 %v3805_v3 }
 0x112   : > { %1612 = vmatmul.bf16.gmra.mxu3 %v3807_v4 }
 0x11f   : > { %1350 = vmatmul.bf16.gmra.mxu0 %v3829_v33 }
 0x120   : > { %1439 = vmatmul.bf16.gmra.mxu1 %v3831_v34 }
 0x121   : > { %1528 = vmatmul.bf16.gmra.mxu2 %v3833_v35 }
 0x122   : > { %1617 = vmatmul.bf16.gmra.mxu3 %v3835_v36 }
 0x12f   : > { %1355 = vmatmul.bf16.gmra.mxu0 %v3849_v45 }
 0x130   : > { %1444 = vmatmul.bf16.gmra.mxu1 %v3851_v46 }
 0x131   : > { %1533 = vmatmul.bf16.gmra.mxu2 %v3853_v47 }
 0x132   : > { %1622 = vmatmul.bf16.gmra.mxu3 %v3855_v49 }
 0x13f   : > { %1360 = vmatmul.bf16.gmra.mxu0 %v3876_v18 }
 0x140   : > { %1449 = vmatmul.bf16.gmra.mxu1 %v3879_v21 }
 0x141   : > { %1538 = vmatmul.bf16.gmra.mxu2 %v3881_v22 }
 0x142   : > { %1627 = vmatmul.bf16.gmra.mxu3 %v3883_v24 }
 0x14c   : > { %v1326_v42 = vpop.f32.mrf.mxu0 }
 0x14d   : > { %v1415_v57 = vpop.f32.mrf.mxu1 }
 0x14e   : > { %v1416_v59 = vadd.f32 %v1415_v57, %v1326_v42  ;;  %v3923_v57 = vor.u32 %v3126_v19, %v2717_v17 }
 0x14f   : > { %1365 = vmatmul.bf16.gmra.mxu0 %v3897_v41 }
 0x150   : > { %1454 = vmatmul.bf16.gmra.mxu1 %v3899_v43 }
 0x151   : > { %1543 = vmatmul.bf16.gmra.mxu2 %v3901_v44 }
 0x152   : > { %1632 = vmatmul.bf16.gmra.mxu3 %v3903_v58 }
 0x154   : > { %v1504_v63 = vpop.f32.mrf.mxu2  ;;  %v1328_v8 = vpop.f32.mrf.mxu0 }
 0x155   : > { %v1505_v6 = vadd.f32 %v1504_v63, %v1416_v59  ;;  %v1593_v7 = vpop.f32.mrf.mxu3  ;;  %v1417_v11 = vpop.f32.mrf.mxu1  ;;  %v2850_v59 = vor.u32 %v3156_v39, %v2847_v40  ;;  %v3130_v39 = vld [vmem:[%s3558_s12 + $0x14c] sm:$0xf0]  ;;  %v3128_v40 = vld [vmem:[%s3558_s12 + $0x144] sm:$0xf] }
 0x156   : > { %v1418_v38 = vadd.f32 %v1417_v11, %v1328_v8 }
 0x157   : > { %v1594_v12 = vadd.f32 %v1593_v7, %v1505_v6  ;;  %v3929_v6 = vor.u32 %v3127_v31, %v2725_v30  ;;  %v2914_v7 = vor.u32 %v3172_v60, %v2911_v61  ;;  %1678 = vmatpush.bf16.msrb.mxu0 %v2850_v59  ;;  %v489_v30 = vld [vmem:[#allocation2 + $0x50] sm:$0xff]  ;;  %v2741_v59 = vld [vmem:[%s3558_s12 + $0x148] sm:$0xf]  ;;  %v3131_v60 = vld [vmem:[%s3558_s12 + $0x154] sm:$0xf0] }
 0x159   : > { %v2029_v20 = vadd.f32 %v1594_v12, %v485_v10  ;;  %4286 = vst [vmem:[#allocation5_spill] sm:$0xff] %v3929_v6  ;;  %v3931_v12 = vor.u32 %v3125_v32, %v2727_v37  ;;  %1767 = vmatpush.bf16.msrb.mxu1 %v2914_v7 }
 0x15b   : > { %2093 = vst [vmem:[#allocation2 + $0xb0] sm:$0xff] %v2029_v20 }
 0x15c   : > { %v1506_v42 = vpop.f32.mrf.mxu2  ;;  %v1331_v0 = vpop.f32.mrf.mxu0  ;;  %4287 = vst [vmem:[#allocation6_spill] sm:$0xff] %v3931_v12 }
 0x15d   : > { %v1507_v62 = vadd.f32 %v1506_v42, %v1418_v38  ;;  %v1595_v63 = vpop.f32.mrf.mxu3  ;;  %v1420_v10 = vpop.f32.mrf.mxu1  ;;  %v2733_v38 = vld [vmem:[%s3558_s12 + $0x140] sm:$0xf]  ;;  %v2735_v42 = vld [vmem:[%s3558_s12 + $0x150] sm:$0xf0] }
 0x15e   : > { %v1421_v17 = vadd.f32 %v1420_v10, %v1331_v0  ;;  %v3945_v7 = vor.u32 %v3130_v39, %v2733_v38 }
 0x15f   : > { %v1596_v8 = vadd.f32 %v1595_v63, %v1507_v62  ;;  %1370 = vmatmul.bf16.gmra.mxu0 %v3923_v57  ;;  %v3129_v62 = vld [vmem:[%s3558_s12 + $0x14c] sm:$0xf]  ;;  %v2743_v63 = vld [vmem:[%s3558_s12 + $0x158] sm:$0xf0] }
 0x160   : > { %1459 = vmatmul.bf16.gmra.mxu1 %v3927_v5  ;;  %4288 = vst [vmem:[#allocation7_spill] sm:$0xff] %v3945_v7 }
 0x161   : > { %v2031_v11 = vadd.f32 %v1596_v8, %v487_v9  ;;  %1548 = vmatmul.bf16.gmra.mxu2 %v3929_v6  ;;  %v495_v6 = vld [vmem:[#allocation2 + $0x118] sm:$0xff] }
 0x162   : > { %1637 = vmatmul.bf16.gmra.mxu3 %v3931_v12 }
 0x163   : > { %2095 = vst [vmem:[#allocation2 + $0xd8] sm:$0xff] %v2031_v11  ;;  %v3947_v11 = vor.u32 %v3128_v40, %v2735_v42  ;;  %v3202_v40 = vld [vmem:[%s3551_s26 + $0x194] sm:$0xf]  ;;  %v3031_v42 = vld [vmem:[%s3551_s26 + $0x198] sm:$0xf0] }
 0x164   : > { %v1509_v19 = vpop.f32.mrf.mxu2  ;;  %v1333_v29 = vpop.f32.mrf.mxu0 }
 0x165   : > { %v1510_v20 = vadd.f32 %v1509_v19, %v1421_v17  ;;  %v1598_v23 = vpop.f32.mrf.mxu3  ;;  %v1422_v31 = vpop.f32.mrf.mxu1  ;;  %4289 = vst [vmem:[#allocation8_spill] sm:$0xff] %v3947_v11  ;;  %v3949_v17 = vor.u32 %v3131_v60, %v2741_v59  ;;  %v491_v19 = vld [vmem:[#allocation2 + $0x130] sm:$0xff] }
 0x166   : > { %v1423_v61 = vadd.f32 %v1422_v31, %v1333_v29 }
 0x167   : > { %v1599_v32 = vadd.f32 %v1598_v23, %v1510_v20  ;;  %4290 = vst [vmem:[#allocation9_spill] sm:$0xff] %v3949_v17  ;;  %v3951_v23 = vor.u32 %v3129_v62, %v2743_v63  ;;  %v3034_v62 = vor.u32 %v3202_v40, %v3031_v42  ;;  %v493_v63 = vld [vmem:[#allocation2 + $0x180] sm:$0xff]  ;;  %v3154_v40 = vld [vmem:[%s3551_s26 + $0x14] sm:$0xf]  ;;  %v2839_v42 = vld [vmem:[%s3551_s26 + $0x18] sm:$0xf0] }
 0x169   : > { %v2033_v37 = vadd.f32 %v1599_v32, %v489_v30  ;;  %4291 = vst [vmem:[#allocation10_spill] sm:$0xff] %v3951_v23  ;;  %v3186_v32 = vld [vmem:[%s3551_s26 + $0x114] sm:$0xf]  ;;  %1946 = vmatpush.bf16.msrb.mxu3 %v3034_v62 }
 0x16b   : > { %2097 = vst [vmem:[#allocation2 + $0x50] sm:$0xff] %v2033_v37  ;;  %v2967_v37 = vld [vmem:[%s3551_s26 + $0x118] sm:$0xf0] }
 0x16c   : > { %v1511_v0 = vpop.f32.mrf.mxu2  ;;  %v1336_v8 = vpop.f32.mrf.mxu0  ;;  %v2970_v39 = vor.u32 %v3186_v32, %v2967_v37  ;;  %v3133_v32 = vld [vmem:[%s3558_s12 + $0x16c] sm:$0xf]  ;;  %v2759_v37 = vld [vmem:[%s3558_s12 + $0x178] sm:$0xf0] }
 0x16d   : > { %v1512_v9 = vadd.f32 %v1511_v0, %v1423_v61  ;;  %v1600_v10 = vpop.f32.mrf.mxu3  ;;  %v1425_v20 = vpop.f32.mrf.mxu1 }
 0x16e   : > { %v1426_v31 = vadd.f32 %v1425_v20, %v1336_v8  ;;  %1857 = vmatpush.bf16.msrb.mxu2 %v2970_v39  ;;  %v3134_v8 = vld [vmem:[%s3558_s12 + $0x16c] sm:$0xf0]  ;;  %v3132_v20 = vld [vmem:[%s3558_s12 + $0x164] sm:$0xf]  ;;  %v2842_v39 = vor.u32 %v3154_v40, %v2839_v42  ;;  %v3137_v42 = vld [vmem:[%s3558_s12 + $0x18c] sm:$0xf] }
 0x16f   : > { %v1601_v29 = vadd.f32 %v1600_v10, %v1512_v9  ;;  %1375 = vmatmul.bf16.gmra.mxu0 %v3945_v7  ;;  %v2749_v10 = vld [vmem:[%s3558_s12 + $0x160] sm:$0xf] }
 0x170   : > { %1464 = vmatmul.bf16.gmra.mxu1 %v3947_v11  ;;  %1679 = vmatpush.bf16.msrb.mxu0 %v2842_v39  ;;  %v2775_v39 = vld [vmem:[%s3558_s12 + $0x198] sm:$0xf0] }
 0x171   : > { %v2035_v30 = vadd.f32 %v1601_v29, %v491_v19  ;;  %1553 = vmatmul.bf16.gmra.mxu2 %v3949_v17  ;;  %v2751_v29 = vld [vmem:[%s3558_s12 + $0x170] sm:$0xf0]  ;;  %v3971_v17 = vor.u32 %v3134_v8, %v2749_v10 }
 0x172   : > { %1642 = vmatmul.bf16.gmra.mxu3 %v3951_v23 }
 0x173   : > { %2099 = vst [vmem:[#allocation2 + $0x130] sm:$0xff] %v2035_v30  ;;  %v2757_v30 = vld [vmem:[%s3558_s12 + $0x168] sm:$0xf] }
 0x174   : > { %v1514_v38 = vpop.f32.mrf.mxu2  ;;  %v1338_v61 = vpop.f32.mrf.mxu0  ;;  %4292 = vst [vmem:[#allocation11_spill] sm:$0xff] %v3971_v17 }
 0x175   : > { %v1515_v59 = vadd.f32 %v1514_v38, %v1426_v31  ;;  %v1603_v60 = vpop.f32.mrf.mxu3  ;;  %v1427_v0 = vpop.f32.mrf.mxu1  ;;  %v3135_v31 = vld [vmem:[%s3558_s12 + $0x174] sm:$0xf0] }
 0x176   : > { %v1428_v38 = vadd.f32 %v1427_v0, %v1338_v61 }
 0x177   : > { %v1604_v9 = vadd.f32 %v1603_v60, %v1515_v59  ;;  %v3170_v59 = vld [vmem:[%s3551_s26 + $0x94] sm:$0xf]  ;;  %v2903_v60 = vld [vmem:[%s3551_s26 + $0x98] sm:$0xf0] }
 0x178   : > { %v2906_v12 = vor.u32 %v3170_v59, %v2903_v60 }
 0x179   : > { %v2037_v19 = vadd.f32 %v1604_v9, %v493_v63  ;;  %v3975_v63 = vor.u32 %v3132_v20, %v2751_v29  ;;  %v3977_v9 = vor.u32 %v3135_v31, %v2757_v30  ;;  %v497_v20 = vld [vmem:[#allocation2 + $0x120] sm:$0xff]  ;;  %v3138_v30 = vld [vmem:[%s3558_s12 + $0x18c] sm:$0xf0] }
 0x17a   : > { %1768 = vmatpush.bf16.msrb.mxu1 %v2906_v12  ;;  %v3136_v31 = vld [vmem:[%s3558_s12 + $0x184] sm:$0xf] }
 0x17b   : > { %2101 = vst [vmem:[#allocation2 + $0x180] sm:$0xff] %v2037_v19  ;;  %v3979_v19 = vor.u32 %v3133_v32, %v2759_v37  ;;  %v2767_v32 = vld [vmem:[%s3558_s12 + $0x190] sm:$0xf0]  ;;  %v2773_v37 = vld [vmem:[%s3558_s12 + $0x188] sm:$0xf] }
 0x17c   : > { %v1516_v23 = vpop.f32.mrf.mxu2  ;;  %v1341_v7 = vpop.f32.mrf.mxu0  ;;  %4293 = vst [vmem:[#allocation12_spill] sm:$0xff] %v3975_v63 }
 0x17d   : > { %v1517_v62 = vadd.f32 %v1516_v23, %v1428_v38  ;;  %v1605_v11 = vpop.f32.mrf.mxu3  ;;  %4294 = vst [vmem:[#allocation13_spill] sm:$0xff] %v3977_v9  ;;  %v1430_v5 = vpop.f32.mrf.mxu1  ;;  %v3139_v38 = vld [vmem:[%s3558_s12 + $0x194] sm:$0xf0] }
 0x17e   : > { %4295 = vst [vmem:[#allocation14_spill] sm:$0xff] %v3979_v19  ;;  %v1431_v23 = vadd.f32 %v1430_v5, %v1341_v7  ;;  %v2765_v7 = vld [vmem:[%s3558_s12 + $0x180] sm:$0xf] }
 0x17f   : > { %v1606_v61 = vadd.f32 %v1605_v11, %v1517_v62  ;;  %1380 = vmatmul.bf16.gmra.mxu0 %v3971_v17  ;;  %v3993_v60 = vor.u32 %v3138_v30, %v2765_v7  ;;  %v2959_v7 = vld [vmem:[%s3551_s26 + $0x108] sm:$0xf0] }
 0x180   : > { %1469 = vmatmul.bf16.gmra.mxu1 %v3975_v63  ;;  %v503_v63 = vld [vmem:[#allocation2 + $0x138] sm:$0xff] }
 0x181   : > { %v2039_v0 = vadd.f32 %v1606_v61, %v495_v6  ;;  %1558 = vmatmul.bf16.gmra.mxu2 %v3977_v9  ;;  %4296 = vst [vmem:[#allocation15_spill] sm:$0xff] %v3993_v60 }
 0x182   : > { %1647 = vmatmul.bf16.gmra.mxu3 %v3979_v19 }
 0x183   : > { %2103 = vst [vmem:[#allocation2 + $0x118] sm:$0xff] %v2039_v0 }
 0x184   : > { %v1519_v10 = vpop.f32.mrf.mxu2  ;;  %v1343_v8 = vpop.f32.mrf.mxu0 }
 0x185   : > { %v1520_v12 = vadd.f32 %v1519_v10, %v1431_v23  ;;  %v1608_v11 = vpop.f32.mrf.mxu3  ;;  %v1432_v6 = vpop.f32.mrf.mxu1  ;;  %v3995_v23 = vor.u32 %v3136_v31, %v2767_v32  ;;  %v3997_v10 = vor.u32 %v3139_v38, %v2773_v37  ;;  %v3200_v32 = vld [vmem:[%s3551_s26 + $0x184] sm:$0xf]  ;;  %v3023_v37 = vld [vmem:[%s3551_s26 + $0x188] sm:$0xf0] }
 0x186   : > { %v1433_v40 = vadd.f32 %v1432_v6, %v1343_v8 }
 0x187   : > { %v1609_v29 = vadd.f32 %v1608_v11, %v1520_v12  ;;  %4297 = vst [vmem:[#allocation16_spill] sm:$0xff] %v3995_v23  ;;  %v499_v12 = vld [vmem:[#allocation2 + $0x108] sm:$0xff] }
 0x188   : > { %4298 = vst [vmem:[#allocation17_spill] sm:$0xff] %v3997_v10 }
 0x189   : > { %v2041_v5 = vadd.f32 %v1609_v29, %v497_v20  ;;  %v3999_v20 = vor.u32 %v3137_v42, %v2775_v39  ;;  %v3026_v39 = vor.u32 %v3200_v32, %v3023_v37  ;;  %v3152_v37 = vld [vmem:[%s3551_s26 + $0x4] sm:$0xf] }
 0x18b   : > { %2105 = vst [vmem:[#allocation2 + $0x120] sm:$0xff] %v2041_v5  ;;  %v3184_v5 = vld [vmem:[%s3551_s26 + $0x104] sm:$0xf]  ;;  %1947 = vmatpush.bf16.msrb.mxu3 %v3026_v39 }
 0x18c   : > { %v1521_v59 = vpop.f32.mrf.mxu2  ;;  %v1346_v0 = vpop.f32.mrf.mxu0  ;;  %4299 = vst [vmem:[#allocation18_spill] sm:$0xff] %v3999_v20  ;;  %v2962_v31 = vor.u32 %v3184_v5, %v2959_v7  ;;  %v3143_v5 = vld [vmem:[%s3558_s12 + $0x1b4] sm:$0xf0]  ;;  %v3141_v7 = vld [vmem:[%s3558_s12 + $0x1ac] sm:$0xf] }
 0x18d   : > { %v1522_v62 = vadd.f32 %v1521_v59, %v1433_v40  ;;  %v1610_v61 = vpop.f32.mrf.mxu3  ;;  %v1435_v11 = vpop.f32.mrf.mxu1  ;;  %v501_v59 = vld [vmem:[#allocation2 + $0xe0] sm:$0xff] }
 0x18e   : > { %v1436_v29 = vadd.f32 %v1435_v11, %v1346_v0  ;;  %1858 = vmatpush.bf16.msrb.mxu2 %v2962_v31  ;;  %v2781_v0 = vld [vmem:[%s3558_s12 + $0x1a0] sm:$0xf] }
 0x18f   : > { %v1611_v8 = vadd.f32 %v1610_v61, %v1522_v62  ;;  %1385 = vmatmul.bf16.gmra.mxu0 %v3993_v60 }
 0x190   : > { %1474 = vmatmul.bf16.gmra.mxu1 %v3995_v23 }
 0x191   : > { %v2043_v6 = vadd.f32 %v1611_v8, %v499_v12  ;;  %1563 = vmatmul.bf16.gmra.mxu2 %v3997_v10  ;;  %v3142_v12 = vld [vmem:[%s3558_s12 + $0x1ac] sm:$0xf0]  ;;  %v3140_v8 = vld [vmem:[%s3558_s12 + $0x1a4] sm:$0xf] }
 0x192   : > { %1652 = vmatmul.bf16.gmra.mxu3 %v3999_v20  ;;  %v2831_v20 = vld [vmem:[%s3551_s26 + $0x8] sm:$0xf0]  ;;  %v4019_v23 = vor.u32 %v3142_v12, %v2781_v0  ;;  %v505_v12 = vld [vmem:[#allocation2 + $0x80] sm:$0xff] }
 0x193   : > { %2107 = vst [vmem:[#allocation2 + $0x108] sm:$0xff] %v2043_v6  ;;  %v2783_v6 = vld [vmem:[%s3558_s12 + $0x1b0] sm:$0xf0]  ;;  %v2834_v31 = vor.u32 %v3152_v37, %v2831_v20  ;;  %v3145_v37 = vld [vmem:[%s3558_s12 + $0x1cc] sm:$0xf] }
 0x194   : > { %v1524_v30 = vpop.f32.mrf.mxu2  ;;  %v1348_v42 = vpop.f32.mrf.mxu0 }
 0x195   : > { %v1525_v38 = vadd.f32 %v1524_v30, %v1436_v29  ;;  %v1613_v40 = vpop.f32.mrf.mxu3  ;;  %v1437_v62 = vpop.f32.mrf.mxu1  ;;  %v2789_v29 = vld [vmem:[%s3558_s12 + $0x1a8] sm:$0xf]  ;;  %v2791_v30 = vld [vmem:[%s3558_s12 + $0x1b8] sm:$0xf0]  ;;  %1680 = vmatpush.bf16.msrb.mxu0 %v2834_v31 }
 0x196   : > { %v1438_v32 = vadd.f32 %v1437_v62, %v1348_v42  ;;  %v2807_v31 = vld [vmem:[%s3558_s12 + $0x1d8] sm:$0xf0] }
 0x197   : > { %v1614_v61 = vadd.f32 %v1613_v40, %v1525_v38  ;;  %v3168_v38 = vld [vmem:[%s3551_s26 + $0x84] sm:$0xf]  ;;  %v2895_v40 = vld [vmem:[%s3551_s26 + $0x88] sm:$0xf0] }
 0x198   : > { %v2898_v9 = vor.u32 %v3168_v38, %v2895_v40 }
 0x199   : > { %v2045_v11 = vadd.f32 %v1614_v61, %v501_v59  ;;  %v4023_v59 = vor.u32 %v3140_v8, %v2783_v6  ;;  %v4025_v61 = vor.u32 %v3143_v5, %v2789_v29  ;;  %v3146_v6 = vld [vmem:[%s3558_s12 + $0x1cc] sm:$0xf0]  ;;  %v3144_v29 = vld [vmem:[%s3558_s12 + $0x1c4] sm:$0xf]  ;;  %v2799_v5 = vld [vmem:[%s3558_s12 + $0x1d0] sm:$0xf0] }
 0x19a   : > { %1769 = vmatpush.bf16.msrb.mxu1 %v2898_v9 }
 0x19b   : > { %2109 = vst [vmem:[#allocation2 + $0xe0] sm:$0xff] %v2045_v11  ;;  %v4027_v11 = vor.u32 %v3141_v7, %v2791_v30  ;;  %v2805_v7 = vld [vmem:[%s3558_s12 + $0x1c8] sm:$0xf]  ;;  %v3147_v30 = vld [vmem:[%s3558_s12 + $0x1d4] sm:$0xf0] }
 0x19c   : > { %v1526_v10 = vpop.f32.mrf.mxu2  ;;  %v1351_v19 = vpop.f32.mrf.mxu0 }
 0x19d   : > { %v1527_v39 = vadd.f32 %v1526_v10, %v1438_v32  ;;  %v1615_v60 = vpop.f32.mrf.mxu3  ;;  %v1440_v17 = vpop.f32.mrf.mxu1 }
 0x19e   : > { %v1441_v10 = vadd.f32 %v1440_v17, %v1351_v19  ;;  %v2797_v19 = vld [vmem:[%s3558_s12 + $0x1c0] sm:$0xf] }
 0x19f   : > { %v1616_v42 = vadd.f32 %v1615_v60, %v1527_v39  ;;  %1390 = vmatmul.bf16.gmra.mxu0 %v4019_v23  ;;  %v4041_v40 = vor.u32 %v3146_v6, %v2797_v19 }
 0x1a0   : > { %1479 = vmatmul.bf16.gmra.mxu1 %v4023_v59 }
 0x1a1   : > { %v2047_v20 = vadd.f32 %v1616_v42, %v503_v63  ;;  %1568 = vmatmul.bf16.gmra.mxu2 %v4025_v61  ;;  %4300 = vst [vmem:[#allocation19_spill] sm:$0xff] %v4041_v40 }
 0x1a2   : > { %1657 = vmatmul.bf16.gmra.mxu3 %v4027_v11 }
 0x1a3   : > { %2111 = vst [vmem:[#allocation2 + $0x138] sm:$0xff] %v2047_v20 }
 0x1a4   : > { %v1529_v62 = vpop.f32.mrf.mxu2  ;;  %v1353_v0 = vpop.f32.mrf.mxu0 }
 0x1a5   : > { %v1530_v9 = vadd.f32 %v1529_v62, %v1441_v10  ;;  %v1618_v60 = vpop.f32.mrf.mxu3  ;;  %v1442_v63 = vpop.f32.mrf.mxu1  ;;  %v4043_v10 = vor.u32 %v3144_v29, %v2799_v5  ;;  %v4045_v62 = vor.u32 %v3147_v30, %v2805_v7  ;;  %v509_v5 = vld [vmem:[#allocation2 + $0x1e8] sm:$0xff] }
 0x1a6   : > { %v1443_v32 = vadd.f32 %v1442_v63, %v1353_v0 }
 0x1a7   : > { %v1619_v8 = vadd.f32 %v1618_v60, %v1530_v9  ;;  %4301 = vst [vmem:[#allocation20_spill] sm:$0xff] %v4043_v10  ;;  %v507_v9 = vld [vmem:[#allocation2 + $0x1b8] sm:$0xff] }
 0x1a8   : > { %4302 = vst [vmem:[#allocation21_spill] sm:$0xff] %v4045_v62 }
 0x1a9   : > { %v2049_v17 = vadd.f32 %v1619_v8, %v505_v12  ;;  %v4047_v12 = vor.u32 %v3145_v37, %v2807_v31  ;;  %v2813_v37 = vld [vmem:[%s3558_s12 + $0x1e0] sm:$0xf]  ;;  %v3150_v31 = vld [vmem:[%s3558_s12 + $0x1ec] sm:$0xf0] }
 0x1ab   : > { %2113 = vst [vmem:[#allocation2 + $0x80] sm:$0xff] %v2049_v17 }
 0x1ac   : > { %v1531_v38 = vpop.f32.mrf.mxu2  ;;  %v1356_v20 = vpop.f32.mrf.mxu0  ;;  %4303 = vst [vmem:[#allocation22_spill] sm:$0xff] %v4047_v12 }
 0x1ad   : > { %v1532_v39 = vadd.f32 %v1531_v38, %v1443_v32  ;;  %v1620_v42 = vpop.f32.mrf.mxu3  ;;  %v1445_v60 = vpop.f32.mrf.mxu1  ;;  %v3148_v38 = vld [vmem:[%s3558_s12 + $0x1e4] sm:$0xf] }
 0x1ae   : > { %v1446_v63 = vadd.f32 %v1445_v60, %v1356_v20  ;;  %v3151_v20 = vld [vmem:[%s3558_s12 + $0x1f4] sm:$0xf0]  ;;  %v3149_v60 = vld [vmem:[%s3558_s12 + $0x1ec] sm:$0xf] }
 0x1af   : > { %v1621_v8 = vadd.f32 %v1620_v42, %v1532_v39  ;;  %1395 = vmatmul.bf16.gmra.mxu0 %v4041_v40  ;;  %v2815_v39 = vld [vmem:[%s3558_s12 + $0x1f0] sm:$0xf0]  ;;  %v2821_v42 = vld [vmem:[%s3558_s12 + $0x1e8] sm:$0xf] }
 0x1b0   : > { %1484 = vmatmul.bf16.gmra.mxu1 %v4043_v10  ;;  %v4063_v10 = vor.u32 %v3148_v38, %v2815_v39  ;;  %v513_v39 = vld [vmem:[#allocation2 + $0x1e0] sm:$0xff] }
 0x1b1   : > { %v2051_v0 = vadd.f32 %v1621_v8, %v507_v9  ;;  %1573 = vmatmul.bf16.gmra.mxu2 %v4045_v62  ;;  %v2823_v8 = vld [vmem:[%s3558_s12 + $0x1f8] sm:$0xf0] }
 0x1b2   : > { %1662 = vmatmul.bf16.gmra.mxu3 %v4047_v12  ;;  %v4061_v12 = vor.u32 %v3150_v31, %v2813_v37 }
 0x1b3   : > { %2115 = vst [vmem:[#allocation2 + $0x1b8] sm:$0xff] %v2051_v0 }
 0x1b4   : > { %v1534_v17 = vpop.f32.mrf.mxu2  ;;  %v1358_v29 = vpop.f32.mrf.mxu0 }
 0x1b5   : > { %v1535_v19 = vadd.f32 %v1534_v17, %v1446_v63  ;;  %v1623_v6 = vpop.f32.mrf.mxu3  ;;  %v1447_v7 = vpop.f32.mrf.mxu1 }
 0x1b6   : > { %v1448_v9 = vadd.f32 %v1447_v7, %v1358_v29 }
 0x1b7   : > { %v1624_v30 = vadd.f32 %v1623_v6, %v1535_v19  ;;  %v4065_v19 = vor.u32 %v3151_v20, %v2821_v42  ;;  %v511_v6 = vld [vmem:[#allocation2 + $0x160] sm:$0xff] }
 0x1b9   : > { %v2053_v32 = vadd.f32 %v1624_v30, %v509_v5  ;;  %v4067_v30 = vor.u32 %v3149_v60, %v2823_v8 }
 0x1bb   : > { %2117 = vst [vmem:[#allocation2 + $0x1e8] sm:$0xff] %v2053_v32 }
 0x1bc   : > { %v1536_v0 = vpop.f32.mrf.mxu2  ;;  %v1361_v62 = vpop.f32.mrf.mxu0 }
 0x1bd   : > { %v1537_v63 = vadd.f32 %v1536_v0, %v1448_v9  ;;  %v1625_v17 = vpop.f32.mrf.mxu3  ;;  %v1450_v5 = vpop.f32.mrf.mxu1 }
 0x1be   : > { %v1451_v7 = vadd.f32 %v1450_v5, %v1361_v62 }
 0x1bf   : > { %v1626_v40 = vadd.f32 %v1625_v17, %v1537_v63  ;;  %1400 = vmatmul.bf16.gmra.mxu0 %v4061_v12  ;;  %v515_v63 = vld [vmem:[#allocation2 + $0xf0] sm:$0xff] }
 0x1c0   : > { %1489 = vmatmul.bf16.gmra.mxu1 %v4063_v10 }
 0x1c1   : > { %v2055_v29 = vadd.f32 %v1626_v40, %v511_v6  ;;  %1578 = vmatmul.bf16.gmra.mxu2 %v4065_v19 }
 0x1c2   : > { %1667 = vmatmul.bf16.gmra.mxu3 %v4067_v30 }
 0x1c3   : > { %2119 = vst [vmem:[#allocation2 + $0x160] sm:$0xff] %v2055_v29 }
 0x1c4   : > { %v1539_v32 = vpop.f32.mrf.mxu2  ;;  %v1363_v38 = vpop.f32.mrf.mxu0 }
 0x1c5   : > { %v1540_v37 = vadd.f32 %v1539_v32, %v1451_v7  ;;  %v1628_v31 = vpop.f32.mrf.mxu3  ;;  %v1452_v42 = vpop.f32.mrf.mxu1 }
 0x1c6   : > { %v1453_v60 = vadd.f32 %v1452_v42, %v1363_v38  ;;  %v517_v38 = vld [vmem:[#allocation2 + $0x148] sm:$0xff] }
 0x1c7   : > { %v1629_v20 = vadd.f32 %v1628_v31, %v1540_v37 }
 0x1c9   : > { %v2057_v9 = vadd.f32 %v1629_v20, %v513_v39 }
 0x1cb   : > { %2121 = vst [vmem:[#allocation2 + $0x1e0] sm:$0xff] %v2057_v9 }
 0x1cc   : > { %v1541_v8 = vpop.f32.mrf.mxu2  ;;  %v1366_v0 = vpop.f32.mrf.mxu0 }
 0x1cd   : > { %v1542_v40 = vadd.f32 %v1541_v8, %v1453_v60  ;;  %v1630_v62 = vpop.f32.mrf.mxu3  ;;  %v1455_v17 = vpop.f32.mrf.mxu1 }
 0x1ce   : > { %v1456_v29 = vadd.f32 %v1455_v17, %v1366_v0 }
 0x1cf   : > { %v1631_v6 = vadd.f32 %v1630_v62, %v1542_v40  ;;  %1681 = vmatmul.bf16.vlgmr.msrb.gmra.mxu0 %v3703_v48 }
 0x1d0   : > { %1770 = vmatmul.bf16.vlgmr.msrb.gmra.mxu1 %v3707_v52  ;;  %v519_v52 = vld [vmem:[#allocation2 + $0x100] sm:$0xff] }
 0x1d1   : > { %v2059_v5 = vadd.f32 %v1631_v6, %v515_v63  ;;  %1859 = vmatmul.bf16.vlgmr.msrb.gmra.mxu2 %v3709_v53 }
 0x1d2   : > { %1948 = vmatmul.bf16.vlgmr.msrb.gmra.mxu3 %v3711_v54 }
 0x1d3   : > { %2123 = vst [vmem:[#allocation2 + $0xf0] sm:$0xff] %v2059_v5 }
 0x1d4   : > { %v1544_v7 = vpop.f32.mrf.mxu2  ;;  %v1368_v31 = vpop.f32.mrf.mxu0 }
 0x1d5   : > { %v1545_v32 = vadd.f32 %v1544_v7, %v1456_v29  ;;  %v1633_v37 = vpop.f32.mrf.mxu3  ;;  %v1457_v39 = vpop.f32.mrf.mxu1  ;;  %v521_v29 = vld [vmem:[#allocation2 + $0x40] sm:$0xff] }
 0x1d6   : > { %v1458_v9 = vadd.f32 %v1457_v39, %v1368_v31 }
 0x1d7   : > { %v1634_v42 = vadd.f32 %v1633_v37, %v1545_v32 }
 0x1d9   : > { %v2061_v20 = vadd.f32 %v1634_v42, %v517_v38 }
 0x1db   : > { %2125 = vst [vmem:[#allocation2 + $0x148] sm:$0xff] %v2061_v20 }
 0x1dc   : > { %v1546_v48 = vpop.f32.mrf.mxu2  ;;  %v1371_v40 = vpop.f32.mrf.mxu0 }
 0x1dd   : > { %v1547_v60 = vadd.f32 %v1546_v48, %v1458_v9  ;;  %v1635_v8 = vpop.f32.mrf.mxu3  ;;  %v1460_v62 = vpop.f32.mrf.mxu1 }
 0x1de   : > { %v1461_v0 = vadd.f32 %v1460_v62, %v1371_v40 }
 0x1df   : > { %v1636_v53 = vadd.f32 %v1635_v8, %v1547_v60  ;;  %1686 = vmatmul.bf16.gmra.mxu0 %v3733_v13 }
 0x1e0   : > { %1775 = vmatmul.bf16.gmra.mxu1 %v3735_v14  ;;  %v523_v14 = vld [vmem:[#allocation2 + $0x20] sm:$0xff] }
 0x1e1   : > { %v2063_v54 = vadd.f32 %v1636_v53, %v519_v52  ;;  %1864 = vmatmul.bf16.gmra.mxu2 %v3737_v15  ;;  %v525_v52 = vld [vmem:[#allocation2 + $0x1a0] sm:$0xff] }
 0x1e2   : > { %1953 = vmatmul.bf16.gmra.mxu3 %v3739_v16 }
 0x1e3   : > { %2127 = vst [vmem:[#allocation2 + $0x100] sm:$0xff] %v2063_v54 }
 0x1e4   : > { %v1549_v63 = vpop.f32.mrf.mxu2  ;;  %v1373_v5 = vpop.f32.mrf.mxu0 }
 0x1e5   : > { %v1550_v17 = vadd.f32 %v1549_v63, %v1461_v0  ;;  %v1638_v6 = vpop.f32.mrf.mxu3  ;;  %v1462_v7 = vpop.f32.mrf.mxu1 }
 0x1e6   : > { %v1463_v31 = vadd.f32 %v1462_v7, %v1373_v5 }
 0x1e7   : > { %v1639_v32 = vadd.f32 %v1638_v6, %v1550_v17 }
 0x1e9   : > { %v2065_v37 = vadd.f32 %v1639_v32, %v521_v29 }
 0x1eb   : > { %2129 = vst [vmem:[#allocation2 + $0x40] sm:$0xff] %v2065_v37 }
 0x1ec   : > { %v1551_v13 = vpop.f32.mrf.mxu2  ;;  %v1376_v42 = vpop.f32.mrf.mxu0 }
 0x1ed   : > { %v1552_v38 = vadd.f32 %v1551_v13, %v1463_v31  ;;  %v1640_v39 = vpop.f32.mrf.mxu3  ;;  %v1465_v20 = vpop.f32.mrf.mxu1  ;;  %v529_v13 = vld [vmem:[#allocation2 + $0x70] sm:$0xff] }
 0x1ee   : > { %v1466_v9 = vadd.f32 %v1465_v20, %v1376_v42 }
 0x1ef   : > { %v1641_v15 = vadd.f32 %v1640_v39, %v1552_v38  ;;  %1691 = vmatmul.bf16.gmra.mxu0 %v3753_v25 }
 0x1f0   : > { %1780 = vmatmul.bf16.gmra.mxu1 %v3755_v26  ;;  %v527_v26 = vld [vmem:[#allocation2 + $0xe8] sm:$0xff] }
 0x1f1   : > { %v2067_v16 = vadd.f32 %v1641_v15, %v523_v14  ;;  %1869 = vmatmul.bf16.gmra.mxu2 %v3757_v27 }
 0x1f2   : > { %1958 = vmatmul.bf16.gmra.mxu3 %v3759_v28 }
 0x1f3   : > { %2131 = vst [vmem:[#allocation2 + $0x20] sm:$0xff] %v2067_v16 }
 0x1f4   : > { %v1554_v48 = vpop.f32.mrf.mxu2  ;;  %v1378_v40 = vpop.f32.mrf.mxu0 }
 0x1f5   : > { %v1555_v60 = vadd.f32 %v1554_v48, %v1466_v9  ;;  %v1643_v8 = vpop.f32.mrf.mxu3  ;;  %v1467_v62 = vpop.f32.mrf.mxu1 }
 0x1f6   : > { %v1468_v0 = vadd.f32 %v1467_v62, %v1378_v40  ;;  %v533_v62 = vld [vmem:[#allocation2 + $0xb8] sm:$0xff] }
 0x1f7   : > { %v1644_v53 = vadd.f32 %v1643_v8, %v1555_v60 }
 0x1f9   : > { %v2069_v54 = vadd.f32 %v1644_v53, %v525_v52 }
 0x1fb   : > { %2133 = vst [vmem:[#allocation2 + $0x1a0] sm:$0xff] %v2069_v54 }
 0x1fc   : > { %v1556_v25 = vpop.f32.mrf.mxu2  ;;  %v1381_v6 = vpop.f32.mrf.mxu0 }
 0x1fd   : > { %v1557_v63 = vadd.f32 %v1556_v25, %v1468_v0  ;;  %v1645_v17 = vpop.f32.mrf.mxu3  ;;  %v1470_v5 = vpop.f32.mrf.mxu1 }
 0x1fe   : > { %v1471_v29 = vadd.f32 %v1470_v5, %v1381_v6 }
 0x1ff   : > { %v1646_v27 = vadd.f32 %v1645_v17, %v1557_v63  ;;  %1696 = vmatmul.bf16.gmra.mxu0 %v3781_v50 }
 0x200   : > { %1785 = vmatmul.bf16.gmra.mxu1 %v3783_v51  ;;  %v531_v51 = vld [vmem:[#allocation2 + $0x1d8] sm:$0xff] }
 0x201   : > { %v2071_v28 = vadd.f32 %v1646_v27, %v527_v26  ;;  %1874 = vmatmul.bf16.gmra.mxu2 %v3785_v55 }
 0x202   : > { %1963 = vmatmul.bf16.gmra.mxu3 %v3787_v56 }
 0x203   : > { %2135 = vst [vmem:[#allocation2 + $0xe8] sm:$0xff] %v2071_v28 }
 0x204   : > { %v1559_v7 = vpop.f32.mrf.mxu2  ;;  %v1383_v31 = vpop.f32.mrf.mxu0 }
 0x205   : > { %v1560_v32 = vadd.f32 %v1559_v7, %v1471_v29  ;;  %v1648_v37 = vpop.f32.mrf.mxu3  ;;  %v1472_v38 = vpop.f32.mrf.mxu1 }
 0x206   : > { %v1473_v14 = vadd.f32 %v1472_v38, %v1383_v31 }
 0x207   : > { %v1649_v39 = vadd.f32 %v1648_v37, %v1560_v32  ;;  %v537_v32 = vld [vmem:[#allocation2 + $0x170] sm:$0xff] }
 0x209   : > { %v2073_v42 = vadd.f32 %v1649_v39, %v529_v13 }
 0x20b   : > { %2137 = vst [vmem:[#allocation2 + $0x70] sm:$0xff] %v2073_v42 }
 0x20c   : > { %v1561_v50 = vpop.f32.mrf.mxu2  ;;  %v1386_v16 = vpop.f32.mrf.mxu0 }
 0x20d   : > { %v1562_v20 = vadd.f32 %v1561_v50, %v1473_v14  ;;  %v1650_v15 = vpop.f32.mrf.mxu3  ;;  %v1475_v9 = vpop.f32.mrf.mxu1 }
 0x20e   : > { %v1476_v48 = vadd.f32 %v1475_v9, %v1386_v16 }
 0x20f   : > { %v1651_v55 = vadd.f32 %v1650_v15, %v1562_v20  ;;  %1701 = vmatmul.bf16.gmra.mxu0 %v3801_v1 }
 0x210   : > { %1790 = vmatmul.bf16.gmra.mxu1 %v3803_v2  ;;  %v535_v2 = vld [vmem:[#allocation2 + $0xa8] sm:$0xff] }
 0x211   : > { %v2075_v56 = vadd.f32 %v1651_v55, %v531_v51  ;;  %1879 = vmatmul.bf16.gmra.mxu2 %v3805_v3  ;;  %v541_v55 = vld [vmem:[#allocation2 + $0x198] sm:$0xff] }
 0x212   : > { %1968 = vmatmul.bf16.gmra.mxu3 %v3807_v4 }
 0x213   : > { %2139 = vst [vmem:[#allocation2 + $0x1d8] sm:$0xff] %v2075_v56 }
 0x214   : > { %v1564_v60 = vpop.f32.mrf.mxu2  ;;  %v1388_v52 = vpop.f32.mrf.mxu0 }
 0x215   : > { %v1565_v8 = vadd.f32 %v1564_v60, %v1476_v48  ;;  %v1653_v40 = vpop.f32.mrf.mxu3  ;;  %v1477_v53 = vpop.f32.mrf.mxu1 }
 0x216   : > { %v1478_v25 = vadd.f32 %v1477_v53, %v1388_v52 }
 0x217   : > { %v1654_v54 = vadd.f32 %v1653_v40, %v1565_v8 }
 0x219   : > { %v2077_v0 = vadd.f32 %v1654_v54, %v533_v62 }
 0x21b   : > { %2141 = vst [vmem:[#allocation2 + $0xb8] sm:$0xff] %v2077_v0 }
 0x21c   : > { %v1566_v1 = vpop.f32.mrf.mxu2  ;;  %v1391_v6 = vpop.f32.mrf.mxu0 }
 0x21d   : > { %v1567_v63 = vadd.f32 %v1566_v1, %v1478_v25  ;;  %v1655_v17 = vpop.f32.mrf.mxu3  ;;  %v1480_v26 = vpop.f32.mrf.mxu1 }
 0x21e   : > { %v1481_v5 = vadd.f32 %v1480_v26, %v1391_v6 }
 0x21f   : > { %v1656_v3 = vadd.f32 %v1655_v17, %v1567_v63  ;;  %1706 = vmatmul.bf16.gmra.mxu0 %v3829_v33  ;;  %v545_v17 = vld [vmem:[#allocation2 + $0x158] sm:$0xff] }
 0x220   : > { %1795 = vmatmul.bf16.gmra.mxu1 %v3831_v34  ;;  %v539_v34 = vld [vmem:[#allocation2 + $0x68] sm:$0xff] }
 0x221   : > { %v2079_v4 = vadd.f32 %v1656_v3, %v535_v2  ;;  %1884 = vmatmul.bf16.gmra.mxu2 %v3833_v35 }
 0x222   : > { %1973 = vmatmul.bf16.gmra.mxu3 %v3835_v36 }
 0x223   : > { %2143 = vst [vmem:[#allocation2 + $0xa8] sm:$0xff] %v2079_v4 }
 0x224   : > { %v1569_v27 = vpop.f32.mrf.mxu2  ;;  %v1393_v7 = vpop.f32.mrf.mxu0 }
 0x225   : > { %v1570_v28 = vadd.f32 %v1569_v27, %v1481_v5  ;;  %v1658_v29 = vpop.f32.mrf.mxu3  ;;  %v1482_v37 = vpop.f32.mrf.mxu1 }
 0x226   : > { %v1483_v38 = vadd.f32 %v1482_v37, %v1393_v7 }
 0x227   : > { %v1659_v31 = vadd.f32 %v1658_v29, %v1570_v28 }
 0x229   : > { %v2081_v13 = vadd.f32 %v1659_v31, %v537_v32 }
 0x22b   : > { %2145 = vst [vmem:[#allocation2 + $0x170] sm:$0xff] %v2081_v13  ;;  %v486_v13 = vld [vmem:[#allocation2 + $0x1b0] sm:$0xff] }
 0x22c   : > { %v1571_v33 = vpop.f32.mrf.mxu2  ;;  %v1396_v14 = vpop.f32.mrf.mxu0 }
 0x22d   : > { %v1572_v39 = vadd.f32 %v1571_v33, %v1483_v38  ;;  %v1660_v42 = vpop.f32.mrf.mxu3  ;;  %v1485_v50 = vpop.f32.mrf.mxu1 }
 0x22e   : > { %v1486_v20 = vadd.f32 %v1485_v50, %v1396_v14 }
 0x22f   : > { %v1661_v35 = vadd.f32 %v1660_v42, %v1572_v39  ;;  %1711 = vmatmul.bf16.gmra.mxu0 %v3849_v45 }
 0x230   : > { %1800 = vmatmul.bf16.gmra.mxu1 %v3851_v46  ;;  %v543_v46 = vld [vmem:[#allocation2 + $0xc0] sm:$0xff] }
 0x231   : > { %v2083_v36 = vadd.f32 %v1661_v35, %v539_v34  ;;  %1889 = vmatmul.bf16.gmra.mxu2 %v3853_v47 }
 0x232   : > { %1978 = vmatmul.bf16.gmra.mxu3 %v3855_v49 }
 0x233   : > { %2147 = vst [vmem:[#allocation2 + $0x68] sm:$0xff] %v2083_v36 }
 0x234   : > { %v1574_v15 = vpop.f32.mrf.mxu2  ;;  %v1398_v9 = vpop.f32.mrf.mxu0 }
 0x235   : > { %v1575_v16 = vadd.f32 %v1574_v15, %v1486_v20  ;;  %v1663_v51 = vpop.f32.mrf.mxu3  ;;  %v1487_v56 = vpop.f32.mrf.mxu1  ;;  %v4304_v20 = vld [vmem:[#allocation4_spill] sm:$0xff]  ;;  %v4305_v15 = vld [vmem:[#allocation5_spill] sm:$0xff] }
 0x236   : > { %v1488_v8 = vadd.f32 %v1487_v56, %v1398_v9 }
 0x237   : > { %v1664_v48 = vadd.f32 %v1663_v51, %v1575_v16  ;;  %v4306_v16 = vld [vmem:[#allocation6_spill] sm:$0xff] }
 0x239   : > { %v2085_v60 = vadd.f32 %v1664_v48, %v541_v55  ;;  %v490_v48 = vld [vmem:[#allocation2 + $0x168] sm:$0xff] }
 0x23b   : > { %2149 = vst [vmem:[#allocation2 + $0x198] sm:$0xff] %v2085_v60 }
 0x23c   : > { %v1576_v45 = vpop.f32.mrf.mxu2  ;;  %v1401_v62 = vpop.f32.mrf.mxu0 }
 0x23d   : > { %v1577_v40 = vadd.f32 %v1576_v45, %v1488_v8  ;;  %v1665_v52 = vpop.f32.mrf.mxu3  ;;  %v1490_v53 = vpop.f32.mrf.mxu1 }
 0x23e   : > { %v1491_v54 = vadd.f32 %v1490_v53, %v1401_v62  ;;  %v492_v53 = vld [vmem:[#allocation2 + $0x48] sm:$0xff] }
 0x23f   : > { %v1666_v47 = vadd.f32 %v1665_v52, %v1577_v40  ;;  %1716 = vmatmul.bf16.gmra.mxu0 %v3876_v18 }
 0x240   : > { %1805 = vmatmul.bf16.gmra.mxu1 %v3879_v21  ;;  %v547_v21 = vld [vmem:[#allocation2 + $0x58] sm:$0xff] }
 0x241   : > { %v2087_v49 = vadd.f32 %v1666_v47, %v543_v46  ;;  %1894 = vmatmul.bf16.gmra.mxu2 %v3881_v22 }
 0x242   : > { %1983 = vmatmul.bf16.gmra.mxu3 %v3883_v24 }
 0x243   : > { %2151 = vst [vmem:[#allocation2 + $0xc0] sm:$0xff] %v2087_v49 }
 0x244   : > { %v1579_v0 = vpop.f32.mrf.mxu2  ;;  %v1403_v63 = vpop.f32.mrf.mxu0 }
 0x245   : > { %v1580_v25 = vadd.f32 %v1579_v0, %v1491_v54  ;;  %v1668_v1 = vpop.f32.mrf.mxu3  ;;  %v1492_v6 = vpop.f32.mrf.mxu1  ;;  %v4307_v54 = vld [vmem:[#allocation7_spill] sm:$0xff] }
 0x246   : > { %v1493_v3 = vadd.f32 %v1492_v6, %v1403_v63  ;;  %v4309_v63 = vld [vmem:[#allocation9_spill] sm:$0xff] }
 0x247   : > { %v1669_v2 = vadd.f32 %v1668_v1, %v1580_v25  ;;  %v4308_v1 = vld [vmem:[#allocation8_spill] sm:$0xff] }
 0x249   : > { %v2089_v26 = vadd.f32 %v1669_v2, %v545_v17  ;;  %v4310_v17 = vld [vmem:[#allocation10_spill] sm:$0xff] }
 0x24b   : > { %2153 = vst [vmem:[#allocation2 + $0x158] sm:$0xff] %v2089_v26 }
 0x24c   : > { %v1581_v18 = vpop.f32.mrf.mxu2  ;;  %v1682_v27 = vpop.f32.mrf.mxu0 }
 0x24d   : > { %v1582_v4 = vadd.f32 %v1581_v18, %v1493_v3  ;;  %v1670_v5 = vpop.f32.mrf.mxu3  ;;  %v1771_v28 = vpop.f32.mrf.mxu1  ;;  %v494_v18 = vld [vmem:[#allocation2 + $0x110] sm:$0xff] }
 0x24e   : > { %v1772_v29 = vadd.f32 %v1771_v28, %v1682_v27 }
 0x24f   : > { %v1671_v22 = vadd.f32 %v1670_v5, %v1582_v4  ;;  %1721 = vmatmul.bf16.gmra.mxu0 %v3897_v41 }
 0x250   : > { %1810 = vmatmul.bf16.gmra.mxu1 %v3899_v43  ;;  %v488_v43 = vld [vmem:[#allocation2 + $0x18] sm:$0xff] }
 0x251   : > { %v2091_v24 = vadd.f32 %v1671_v22, %v547_v21  ;;  %1899 = vmatmul.bf16.gmra.mxu2 %v3901_v44 }
 0x252   : > { %1988 = vmatmul.bf16.gmra.mxu3 %v3903_v58 }
 0x253   : > { %2155 = vst [vmem:[#allocation2 + $0x58] sm:$0xff] %v2091_v24 }
 0x254   : > { %v1860_v7 = vpop.f32.mrf.mxu2  ;;  %v1684_v31 = vpop.f32.mrf.mxu0 }
 0x255   : > { %v1861_v32 = vadd.f32 %v1860_v7, %v1772_v29  ;;  %v1949_v37 = vpop.f32.mrf.mxu3  ;;  %v1773_v38 = vpop.f32.mrf.mxu1  ;;  %v496_v7 = vld [vmem:[#allocation2 + $0x98] sm:$0xff] }
 0x256   : > { %v1774_v42 = vadd.f32 %v1773_v38, %v1684_v31  ;;  %v4311_v31 = vld [vmem:[#allocation11_spill] sm:$0xff] }
 0x257   : > { %v1950_v33 = vadd.f32 %v1949_v37, %v1861_v32 }
 0x259   : > { %v2030_v39 = vadd.f32 %v1950_v33, %v486_v13  ;;  %v4312_v33 = vld [vmem:[#allocation12_spill] sm:$0xff] }
 0x25b   : > { %2094 = vst [vmem:[#allocation2 + $0x1b0] sm:$0xff] %v2030_v39  ;;  %v4313_v39 = vld [vmem:[#allocation13_spill] sm:$0xff] }
 0x25c   : > { %v1862_v41 = vpop.f32.mrf.mxu2  ;;  %v1687_v50 = vpop.f32.mrf.mxu0 }
 0x25d   : > { %v1863_v14 = vadd.f32 %v1862_v41, %v1774_v42  ;;  %v1951_v34 = vpop.f32.mrf.mxu3  ;;  %v1776_v35 = vpop.f32.mrf.mxu1  ;;  %v4314_v42 = vld [vmem:[#allocation14_spill] sm:$0xff] }
 0x25e   : > { %v1777_v36 = vadd.f32 %v1776_v35, %v1687_v50 }
 0x25f   : > { %v1952_v44 = vadd.f32 %v1951_v34, %v1863_v14  ;;  %1726 = vmatmul.bf16.gmra.mxu0 %v3923_v57 }
 0x260   : > { %1815 = vmatmul.bf16.gmra.mxu1 %v4304_v20 }
 0x261   : > { %v2032_v58 = vadd.f32 %v1952_v44, %v488_v43  ;;  %1904 = vmatmul.bf16.gmra.mxu2 %v4305_v15  ;;  %v498_v43 = vld [vmem:[#allocation2 + $0x150] sm:$0xff] }
 0x262   : > { %1993 = vmatmul.bf16.gmra.mxu3 %v4306_v16 }
 0x263   : > { %2096 = vst [vmem:[#allocation2 + $0x18] sm:$0xff] %v2032_v58 }
 0x264   : > { %v1865_v51 = vpop.f32.mrf.mxu2  ;;  %v1689_v56 = vpop.f32.mrf.mxu0 }
 0x265   : > { %v1866_v9 = vadd.f32 %v1865_v51, %v1777_v36  ;;  %v1954_v55 = vpop.f32.mrf.mxu3  ;;  %v1778_v60 = vpop.f32.mrf.mxu1 }
 0x266   : > { %v1779_v40 = vadd.f32 %v1778_v60, %v1689_v56 }
 0x267   : > { %v1955_v8 = vadd.f32 %v1954_v55, %v1866_v9  ;;  %v500_v9 = vld [vmem:[#allocation2 + $0x60] sm:$0xff] }
 0x269   : > { %v2034_v45 = vadd.f32 %v1955_v8, %v490_v48  ;;  %v4315_v48 = vld [vmem:[#allocation15_spill] sm:$0xff] }
 0x26b   : > { %2098 = vst [vmem:[#allocation2 + $0x168] sm:$0xff] %v2034_v45  ;;  %v4316_v45 = vld [vmem:[#allocation16_spill] sm:$0xff] }
 0x26c   : > { %v1867_v57 = vpop.f32.mrf.mxu2  ;;  %v1692_v46 = vpop.f32.mrf.mxu0 }
 0x26d   : > { %v1868_v52 = vadd.f32 %v1867_v57, %v1779_v40  ;;  %v1956_v62 = vpop.f32.mrf.mxu3  ;;  %v1781_v47 = vpop.f32.mrf.mxu1  ;;  %v4317_v40 = vld [vmem:[#allocation17_spill] sm:$0xff]  ;;  %v4318_v57 = vld [vmem:[#allocation18_spill] sm:$0xff] }
 0x26e   : > { %v1782_v25 = vadd.f32 %v1781_v47, %v1692_v46  ;;  %v502_v47 = vld [vmem:[#allocation2 + $0x188] sm:$0xff] }
 0x26f   : > { %v1957_v49 = vadd.f32 %v1956_v62, %v1868_v52  ;;  %1731 = vmatmul.bf16.gmra.mxu0 %v4307_v54 }
 0x270   : > { %1820 = vmatmul.bf16.gmra.mxu1 %v4308_v1 }
 0x271   : > { %v2036_v0 = vadd.f32 %v1957_v49, %v492_v53  ;;  %1909 = vmatmul.bf16.gmra.mxu2 %v4309_v63 }
 0x272   : > { %1998 = vmatmul.bf16.gmra.mxu3 %v4310_v17 }
 0x273   : > { %2100 = vst [vmem:[#allocation2 + $0x48] sm:$0xff] %v2036_v0 }
 0x274   : > { %v1870_v6 = vpop.f32.mrf.mxu2  ;;  %v1694_v3 = vpop.f32.mrf.mxu0 }
 0x275   : > { %v1871_v2 = vadd.f32 %v1870_v6, %v1782_v25  ;;  %v1959_v26 = vpop.f32.mrf.mxu3  ;;  %v1783_v4 = vpop.f32.mrf.mxu1 }
 0x276   : > { %v1784_v21 = vadd.f32 %v1783_v4, %v1694_v3 }
 0x277   : > { %v1960_v5 = vadd.f32 %v1959_v26, %v1871_v2  ;;  %v504_v2 = vld [vmem:[#allocation2 + $0x140] sm:$0xff] }
 0x279   : > { %v2038_v27 = vadd.f32 %v1960_v5, %v494_v18 }
 0x27b   : > { %2102 = vst [vmem:[#allocation2 + $0x110] sm:$0xff] %v2038_v27 }
 0x27c   : > { %v1872_v28 = vpop.f32.mrf.mxu2  ;;  %v1697_v29 = vpop.f32.mrf.mxu0 }
 0x27d   : > { %v1873_v22 = vadd.f32 %v1872_v28, %v1784_v21  ;;  %v1961_v24 = vpop.f32.mrf.mxu3  ;;  %v1786_v32 = vpop.f32.mrf.mxu1 }
 0x27e   : > { %v1787_v38 = vadd.f32 %v1786_v32, %v1697_v29 }
 0x27f   : > { %v1962_v37 = vadd.f32 %v1961_v24, %v1873_v22  ;;  %1736 = vmatmul.bf16.gmra.mxu0 %v4311_v31  ;;  %v506_v22 = vld [vmem:[#allocation2 + $0x1a8] sm:$0xff] }
 0x280   : > { %1825 = vmatmul.bf16.gmra.mxu1 %v4312_v33  ;;  %v4319_v33 = vld [vmem:[#allocation19_spill] sm:$0xff] }
 0x281   : > { %v2040_v13 = vadd.f32 %v1962_v37, %v496_v7  ;;  %1914 = vmatmul.bf16.gmra.mxu2 %v4313_v39 }
 0x282   : > { %2003 = vmatmul.bf16.gmra.mxu3 %v4314_v42  ;;  %v4320_v42 = vld [vmem:[#allocation20_spill] sm:$0xff] }
 0x283   : > { %2104 = vst [vmem:[#allocation2 + $0x98] sm:$0xff] %v2040_v13 }
 0x284   : > { %v1875_v41 = vpop.f32.mrf.mxu2  ;;  %v1699_v50 = vpop.f32.mrf.mxu0 }
 0x285   : > { %v1876_v14 = vadd.f32 %v1875_v41, %v1787_v38  ;;  %v1964_v34 = vpop.f32.mrf.mxu3  ;;  %v1788_v35 = vpop.f32.mrf.mxu1  ;;  %v4321_v41 = vld [vmem:[#allocation21_spill] sm:$0xff] }
 0x286   : > { %v1789_v36 = vadd.f32 %v1788_v35, %v1699_v50 }
 0x287   : > { %v1965_v44 = vadd.f32 %v1964_v34, %v1876_v14  ;;  %v4322_v14 = vld [vmem:[#allocation22_spill] sm:$0xff] }
 0x289   : > { %v2042_v58 = vadd.f32 %v1965_v44, %v498_v43  ;;  %v510_v44 = vld [vmem:[#allocation2 + $0xf8] sm:$0xff] }
 0x28b   : > { %2106 = vst [vmem:[#allocation2 + $0x150] sm:$0xff] %v2042_v58 }
 0x28c   : > { %v1877_v20 = vpop.f32.mrf.mxu2  ;;  %v1702_v51 = vpop.f32.mrf.mxu0 }
 0x28d   : > { %v1878_v15 = vadd.f32 %v1877_v20, %v1789_v36  ;;  %v1966_v16 = vpop.f32.mrf.mxu3  ;;  %v1791_v55 = vpop.f32.mrf.mxu1 }
 0x28e   : > { %v1792_v8 = vadd.f32 %v1791_v55, %v1702_v51 }
 0x28f   : > { %v1967_v56 = vadd.f32 %v1966_v16, %v1878_v15  ;;  %1741 = vmatmul.bf16.gmra.mxu0 %v4315_v48 }
 0x290   : > { %1830 = vmatmul.bf16.gmra.mxu1 %v4316_v45 }
 0x291   : > { %v2044_v60 = vadd.f32 %v1967_v56, %v500_v9  ;;  %1919 = vmatmul.bf16.gmra.mxu2 %v4317_v40  ;;  %v512_v56 = vld [vmem:[#allocation2 + $0x30] sm:$0xff] }
 0x292   : > { %2008 = vmatmul.bf16.gmra.mxu3 %v4318_v57 }
 0x293   : > { %2108 = vst [vmem:[#allocation2 + $0x60] sm:$0xff] %v2044_v60 }
 0x294   : > { %v1880_v52 = vpop.f32.mrf.mxu2  ;;  %v1704_v53 = vpop.f32.mrf.mxu0 }
 0x295   : > { %v1881_v62 = vadd.f32 %v1880_v52, %v1792_v8  ;;  %v1969_v46 = vpop.f32.mrf.mxu3  ;;  %v1793_v49 = vpop.f32.mrf.mxu1 }
 0x296   : > { %v1794_v25 = vadd.f32 %v1793_v49, %v1704_v53 }
 0x297   : > { %v1970_v54 = vadd.f32 %v1969_v46, %v1881_v62  ;;  %v514_v46 = vld [vmem:[#allocation2] sm:$0xff] }
 0x299   : > { %v2046_v0 = vadd.f32 %v1970_v54, %v502_v47 }
 0x29b   : > { %2110 = vst [vmem:[#allocation2 + $0x188] sm:$0xff] %v2046_v0 }
 0x29c   : > { %v1882_v1 = vpop.f32.mrf.mxu2  ;;  %v1707_v6 = vpop.f32.mrf.mxu0 }
 0x29d   : > { %v1883_v63 = vadd.f32 %v1882_v1, %v1794_v25  ;;  %v1971_v17 = vpop.f32.mrf.mxu3  ;;  %v1796_v26 = vpop.f32.mrf.mxu1 }
 0x29e   : > { %v1797_v4 = vadd.f32 %v1796_v26, %v1707_v6 }
 0x29f   : > { %v1972_v3 = vadd.f32 %v1971_v17, %v1883_v63  ;;  %1746 = vmatmul.bf16.gmra.mxu0 %v4019_v23 }
 0x2a0   : > { %1835 = vmatmul.bf16.gmra.mxu1 %v4023_v59  ;;  %v508_v59 = vld [vmem:[#allocation2 + $0x28] sm:$0xff] }
 0x2a1   : > { %v2048_v18 = vadd.f32 %v1972_v3, %v504_v2  ;;  %1924 = vmatmul.bf16.gmra.mxu2 %v4025_v61 }
 0x2a2   : > { %2013 = vmatmul.bf16.gmra.mxu3 %v4027_v11 }
 0x2a3   : > { %2112 = vst [vmem:[#allocation2 + $0x140] sm:$0xff] %v2048_v18  ;;  %v518_v18 = vld [vmem:[#allocation2 + $0x1d0] sm:$0xff] }
 0x2a4   : > { %v1885_v5 = vpop.f32.mrf.mxu2  ;;  %v1709_v28 = vpop.f32.mrf.mxu0 }
 0x2a5   : > { %v1886_v27 = vadd.f32 %v1885_v5, %v1797_v4  ;;  %v1974_v21 = vpop.f32.mrf.mxu3  ;;  %v1798_v24 = vpop.f32.mrf.mxu1 }
 0x2a6   : > { %v1799_v32 = vadd.f32 %v1798_v24, %v1709_v28 }
 0x2a7   : > { %v1975_v29 = vadd.f32 %v1974_v21, %v1886_v27 }
 0x2a9   : > { %v2050_v7 = vadd.f32 %v1975_v29, %v506_v22 }
 0x2ab   : > { %2114 = vst [vmem:[#allocation2 + $0x1a8] sm:$0xff] %v2050_v7  ;;  %v520_v7 = vld [vmem:[#allocation2 + $0xc8] sm:$0xff] }
 0x2ac   : > { %v1887_v23 = vpop.f32.mrf.mxu2  ;;  %v1712_v13 = vpop.f32.mrf.mxu0 }
 0x2ad   : > { %v1888_v37 = vadd.f32 %v1887_v23, %v1799_v32  ;;  %v1976_v31 = vpop.f32.mrf.mxu3  ;;  %v1801_v38 = vpop.f32.mrf.mxu1 }
 0x2ae   : > { %v1802_v39 = vadd.f32 %v1801_v38, %v1712_v13 }
 0x2af   : > { %v1977_v61 = vadd.f32 %v1976_v31, %v1888_v37  ;;  %1751 = vmatmul.bf16.gmra.mxu0 %v4319_v33  ;;  %v522_v33 = vld [vmem:[#allocation2 + $0x1f8] sm:$0xff] }
 0x2b0   : > { %1840 = vmatmul.bf16.gmra.mxu1 %v4320_v42 }
 0x2b1   : > { %v2052_v11 = vadd.f32 %v1977_v61, %v508_v59  ;;  %1929 = vmatmul.bf16.gmra.mxu2 %v4321_v41 }
 0x2b2   : > { %2018 = vmatmul.bf16.gmra.mxu3 %v4322_v14 }
 0x2b3   : > { %2116 = vst [vmem:[#allocation2 + $0x28] sm:$0xff] %v2052_v11 }
 0x2b4   : > { %v1890_v34 = vpop.f32.mrf.mxu2  ;;  %v1714_v35 = vpop.f32.mrf.mxu0 }
 0x2b5   : > { %v1891_v50 = vadd.f32 %v1890_v34, %v1802_v39  ;;  %v1979_v43 = vpop.f32.mrf.mxu3  ;;  %v1803_v58 = vpop.f32.mrf.mxu1 }
 0x2b6   : > { %v1804_v15 = vadd.f32 %v1803_v58, %v1714_v35  ;;  %v524_v35 = vld [vmem:[#allocation2 + $0x128] sm:$0xff] }
 0x2b7   : > { %v1980_v36 = vadd.f32 %v1979_v43, %v1891_v50 }
 0x2b9   : > { %v2054_v20 = vadd.f32 %v1980_v36, %v510_v44 }
 0x2bb   : > { %2118 = vst [vmem:[#allocation2 + $0xf8] sm:$0xff] %v2054_v20 }
 0x2bc   : > { %v1892_v16 = vpop.f32.mrf.mxu2  ;;  %v1717_v55 = vpop.f32.mrf.mxu0 }
 0x2bd   : > { %v1893_v51 = vadd.f32 %v1892_v16, %v1804_v15  ;;  %v1981_v9 = vpop.f32.mrf.mxu3  ;;  %v1806_v48 = vpop.f32.mrf.mxu1 }
 0x2be   : > { %v1807_v45 = vadd.f32 %v1806_v48, %v1717_v55  ;;  %v526_v55 = vld [vmem:[#allocation2 + $0x1f0] sm:$0xff] }
 0x2bf   : > { %v1982_v60 = vadd.f32 %v1981_v9, %v1893_v51  ;;  %1756 = vmatmul.bf16.gmra.mxu0 %v4061_v12 }
 0x2c0   : > { %1845 = vmatmul.bf16.gmra.mxu1 %v4063_v10  ;;  %v516_v10 = vld [vmem:[#allocation2 + $0x8] sm:$0xff] }
 0x2c1   : > { %v2056_v8 = vadd.f32 %v1982_v60, %v512_v56  ;;  %1934 = vmatmul.bf16.gmra.mxu2 %v4065_v19 }
 0x2c2   : > { %2023 = vmatmul.bf16.gmra.mxu3 %v4067_v30 }
 0x2c3   : > { %2120 = vst [vmem:[#allocation2 + $0x30] sm:$0xff] %v2056_v8 }
 0x2c4   : > { %v1895_v40 = vpop.f32.mrf.mxu2  ;;  %v1719_v62 = vpop.f32.mrf.mxu0 }
 0x2c5   : > { %v1896_v57 = vadd.f32 %v1895_v40, %v1807_v45  ;;  %v1984_v52 = vpop.f32.mrf.mxu3  ;;  %v1808_v53 = vpop.f32.mrf.mxu1 }
 0x2c6   : > { %v1809_v54 = vadd.f32 %v1808_v53, %v1719_v62  ;;  %v528_v62 = vld [vmem:[#allocation2 + $0x78] sm:$0xff] }
 0x2c7   : > { %v1985_v47 = vadd.f32 %v1984_v52, %v1896_v57 }
 0x2c9   : > { %v2058_v49 = vadd.f32 %v1985_v47, %v514_v46 }
 0x2cb   : > { %2122 = vst [vmem:[#allocation2] sm:$0xff] %v2058_v49 }
 0x2cc   : > { %v1897_v12 = vpop.f32.mrf.mxu2  ;;  %v1722_v1 = vpop.f32.mrf.mxu0 }
 0x2cd   : > { %v1898_v0 = vadd.f32 %v1897_v12, %v1809_v54  ;;  %v1986_v25 = vpop.f32.mrf.mxu3  ;;  %v1811_v63 = vpop.f32.mrf.mxu1 }
 0x2ce   : > { %v1812_v30 = vadd.f32 %v1811_v63, %v1722_v1  ;;  %v530_v1 = vld [vmem:[#allocation2 + $0x90] sm:$0xff] }
 0x2cf   : > { %v1987_v19 = vadd.f32 %v1986_v25, %v1898_v0 }
 0x2d1   : > { %v2060_v17 = vadd.f32 %v1987_v19, %v516_v10 }
 0x2d3   : > { %2124 = vst [vmem:[#allocation2 + $0x8] sm:$0xff] %v2060_v17 }
 0x2d4   : > { %v1900_v6 = vpop.f32.mrf.mxu2  ;;  %v1724_v3 = vpop.f32.mrf.mxu0 }
 0x2d5   : > { %v1901_v2 = vadd.f32 %v1900_v6, %v1812_v30  ;;  %v1989_v26 = vpop.f32.mrf.mxu3  ;;  %v1813_v4 = vpop.f32.mrf.mxu1 }
 0x2d6   : > { %v1814_v21 = vadd.f32 %v1813_v4, %v1724_v3  ;;  %v532_v3 = vld [vmem:[#allocation2 + $0xd0] sm:$0xff] }
 0x2d7   : > { %v1990_v5 = vadd.f32 %v1989_v26, %v1901_v2 }
 0x2d9   : > { %v2062_v27 = vadd.f32 %v1990_v5, %v518_v18 }
 0x2db   : > { %2126 = vst [vmem:[#allocation2 + $0x1d0] sm:$0xff] %v2062_v27 }
 0x2dc   : > { %v1902_v28 = vpop.f32.mrf.mxu2  ;;  %v1727_v29 = vpop.f32.mrf.mxu0 }
 0x2dd   : > { %v1903_v22 = vadd.f32 %v1902_v28, %v1814_v21  ;;  %v1991_v24 = vpop.f32.mrf.mxu3  ;;  %v1816_v32 = vpop.f32.mrf.mxu1 }
 0x2de   : > { %v1817_v31 = vadd.f32 %v1816_v32, %v1727_v29  ;;  %v534_v29 = vld [vmem:[#allocation2 + $0x88] sm:$0xff] }
 0x2df   : > { %v1992_v23 = vadd.f32 %v1991_v24, %v1903_v22 }
 0x2e1   : > { %v2064_v37 = vadd.f32 %v1992_v23, %v520_v7 }
 0x2e3   : > { %2128 = vst [vmem:[#allocation2 + $0xc8] sm:$0xff] %v2064_v37 }
 0x2e4   : > { %v1905_v13 = vpop.f32.mrf.mxu2  ;;  %v1729_v61 = vpop.f32.mrf.mxu0 }
 0x2e5   : > { %v1906_v59 = vadd.f32 %v1905_v13, %v1817_v31  ;;  %v1994_v38 = vpop.f32.mrf.mxu3  ;;  %v1818_v11 = vpop.f32.mrf.mxu1 }
 0x2e6   : > { %v1819_v41 = vadd.f32 %v1818_v11, %v1729_v61  ;;  %v536_v61 = vld [vmem:[#allocation2 + $0x1c8] sm:$0xff] }
 0x2e7   : > { %v1995_v39 = vadd.f32 %v1994_v38, %v1906_v59 }
 0x2e9   : > { %v2066_v42 = vadd.f32 %v1995_v39, %v522_v33 }
 0x2eb   : > { %2130 = vst [vmem:[#allocation2 + $0x1f8] sm:$0xff] %v2066_v42 }
 0x2ec   : > { %v1907_v14 = vpop.f32.mrf.mxu2  ;;  %v1732_v43 = vpop.f32.mrf.mxu0 }
 0x2ed   : > { %v1908_v34 = vadd.f32 %v1907_v14, %v1819_v41  ;;  %v1996_v50 = vpop.f32.mrf.mxu3  ;;  %v1821_v44 = vpop.f32.mrf.mxu1 }
 0x2ee   : > { %v1822_v20 = vadd.f32 %v1821_v44, %v1732_v43  ;;  %v538_v43 = vld [vmem:[#allocation2 + $0x178] sm:$0xff] }
 0x2ef   : > { %v1997_v58 = vadd.f32 %v1996_v50, %v1908_v34 }
 0x2f1   : > { %v2068_v36 = vadd.f32 %v1997_v58, %v524_v35 }
 0x2f3   : > { %2132 = vst [vmem:[#allocation2 + $0x128] sm:$0xff] %v2068_v36 }
 0x2f4   : > { %v1910_v15 = vpop.f32.mrf.mxu2  ;;  %v1734_v9 = vpop.f32.mrf.mxu0 }
 0x2f5   : > { %v1911_v16 = vadd.f32 %v1910_v15, %v1822_v20  ;;  %v1999_v51 = vpop.f32.mrf.mxu3  ;;  %v1823_v56 = vpop.f32.mrf.mxu1 }
 0x2f6   : > { %v1824_v8 = vadd.f32 %v1823_v56, %v1734_v9  ;;  %v540_v9 = vld [vmem:[#allocation2 + $0x190] sm:$0xff] }
 0x2f7   : > { %v2000_v48 = vadd.f32 %v1999_v51, %v1911_v16 }
 0x2f9   : > { %v2070_v60 = vadd.f32 %v2000_v48, %v526_v55 }
 0x2fb   : > { %2134 = vst [vmem:[#allocation2 + $0x1f0] sm:$0xff] %v2070_v60 }
 0x2fc   : > { %v1912_v45 = vpop.f32.mrf.mxu2  ;;  %v1737_v52 = vpop.f32.mrf.mxu0 }
 0x2fd   : > { %v1913_v40 = vadd.f32 %v1912_v45, %v1824_v8  ;;  %v2001_v57 = vpop.f32.mrf.mxu3  ;;  %v1826_v46 = vpop.f32.mrf.mxu1 }
 0x2fe   : > { %v1827_v49 = vadd.f32 %v1826_v46, %v1737_v52  ;;  %v542_v52 = vld [vmem:[#allocation2 + $0x38] sm:$0xff] }
 0x2ff   : > { %v2002_v53 = vadd.f32 %v2001_v57, %v1913_v40 }
 0x301   : > { %v2072_v47 = vadd.f32 %v2002_v53, %v528_v62 }
 0x303   : > { %2136 = vst [vmem:[#allocation2 + $0x78] sm:$0xff] %v2072_v47 }
 0x304   : > { %v1915_v54 = vpop.f32.mrf.mxu2  ;;  %v1739_v25 = vpop.f32.mrf.mxu0 }
 0x305   : > { %v1916_v12 = vadd.f32 %v1915_v54, %v1827_v49  ;;  %v2004_v0 = vpop.f32.mrf.mxu3  ;;  %v1828_v10 = vpop.f32.mrf.mxu1 }
 0x306   : > { %v1829_v17 = vadd.f32 %v1828_v10, %v1739_v25 }
 0x307   : > { %v2005_v63 = vadd.f32 %v2004_v0, %v1916_v12  ;;  %v544_v0 = vld [vmem:[#allocation2 + $0x1c0] sm:$0xff] }
 0x309   : > { %v2074_v19 = vadd.f32 %v2005_v63, %v530_v1 }
 0x30b   : > { %2138 = vst [vmem:[#allocation2 + $0x90] sm:$0xff] %v2074_v19 }
 0x30c   : > { %v1917_v30 = vpop.f32.mrf.mxu2  ;;  %v1742_v26 = vpop.f32.mrf.mxu0 }
 0x30d   : > { %v1918_v6 = vadd.f32 %v1917_v30, %v1829_v17  ;;  %v2006_v2 = vpop.f32.mrf.mxu3  ;;  %v1831_v18 = vpop.f32.mrf.mxu1 }
 0x30e   : > { %v1832_v27 = vadd.f32 %v1831_v18, %v1742_v26 }
 0x30f   : > { %v2007_v4 = vadd.f32 %v2006_v2, %v1918_v6  ;;  %v546_v2 = vld [vmem:[#allocation2 + $0x10] sm:$0xff] }
 0x311   : > { %v2076_v5 = vadd.f32 %v2007_v4, %v532_v3 }
 0x313   : > { %2140 = vst [vmem:[#allocation2 + $0xd0] sm:$0xff] %v2076_v5 }
 0x314   : > { %v1920_v21 = vpop.f32.mrf.mxu2  ;;  %v1744_v24 = vpop.f32.mrf.mxu0 }
 0x315   : > { %v1921_v28 = vadd.f32 %v1920_v21, %v1832_v27  ;;  %v2009_v22 = vpop.f32.mrf.mxu3  ;;  %v1833_v7 = vpop.f32.mrf.mxu1 }
 0x316   : > { %v1834_v37 = vadd.f32 %v1833_v7, %v1744_v24 }
 0x317   : > { %v2010_v32 = vadd.f32 %v2009_v22, %v1921_v28  ;;  %v548_v28 = vld [vmem:[#allocation2 + $0xa0] sm:$0xff] }
 0x319   : > { %v2078_v23 = vadd.f32 %v2010_v32, %v534_v29 }
 0x31b   : > { %2142 = vst [vmem:[#allocation2 + $0x88] sm:$0xff] %v2078_v23 }
 0x31c   : > { %v1922_v31 = vpop.f32.mrf.mxu2  ;;  %v1747_v38 = vpop.f32.mrf.mxu0 }
 0x31d   : > { %v1923_v13 = vadd.f32 %v1922_v31, %v1834_v37  ;;  %v2011_v59 = vpop.f32.mrf.mxu3  ;;  %v1836_v33 = vpop.f32.mrf.mxu1 }
 0x31e   : > { %v1837_v42 = vadd.f32 %v1836_v33, %v1747_v38 }
 0x31f   : > { %v2012_v11 = vadd.f32 %v2011_v59, %v1923_v13 }
 0x321   : > { %v2080_v39 = vadd.f32 %v2012_v11, %v536_v61 }
 0x323   : > { %2144 = vst [vmem:[#allocation2 + $0x1c8] sm:$0xff] %v2080_v39 }
 0x324   : > { %v1925_v41 = vpop.f32.mrf.mxu2  ;;  %v1749_v50 = vpop.f32.mrf.mxu0 }
 0x325   : > { %v1926_v14 = vadd.f32 %v1925_v41, %v1837_v42  ;;  %v2014_v34 = vpop.f32.mrf.mxu3  ;;  %v1838_v35 = vpop.f32.mrf.mxu1 }
 0x326   : > { %v1839_v36 = vadd.f32 %v1838_v35, %v1749_v50 }
 0x327   : > { %v2015_v44 = vadd.f32 %v2014_v34, %v1926_v14 }
 0x329   : > { %v2082_v58 = vadd.f32 %v2015_v44, %v538_v43 }
 0x32b   : > { %2146 = vst [vmem:[#allocation2 + $0x178] sm:$0xff] %v2082_v58 }
 0x32c   : > { %v1927_v20 = vpop.f32.mrf.mxu2  ;;  %v1752_v51 = vpop.f32.mrf.mxu0 }
 0x32d   : > { %v1928_v15 = vadd.f32 %v1927_v20, %v1839_v36  ;;  %v2016_v16 = vpop.f32.mrf.mxu3  ;;  %v1841_v55 = vpop.f32.mrf.mxu1 }
 0x32e   : > { %v1842_v60 = vadd.f32 %v1841_v55, %v1752_v51 }
 0x32f   : > { %v2017_v56 = vadd.f32 %v2016_v16, %v1928_v15 }
 0x331   : > { %v2084_v48 = vadd.f32 %v2017_v56, %v540_v9 }
 0x333   : > { %2148 = vst [vmem:[#allocation2 + $0x190] sm:$0xff] %v2084_v48 }
 0x334   : > { %v1930_v8 = vpop.f32.mrf.mxu2  ;;  %v1754_v57 = vpop.f32.mrf.mxu0 }
 0x335   : > { %v1931_v45 = vadd.f32 %v1930_v8, %v1842_v60  ;;  %v2019_v40 = vpop.f32.mrf.mxu3  ;;  %v1843_v62 = vpop.f32.mrf.mxu1 }
 0x336   : > { %v1844_v47 = vadd.f32 %v1843_v62, %v1754_v57 }
 0x337   : > { %v2020_v46 = vadd.f32 %v2019_v40, %v1931_v45 }
 0x339   : > { %v2086_v53 = vadd.f32 %v2020_v46, %v542_v52 }
 0x33b   : > { %2150 = vst [vmem:[#allocation2 + $0x38] sm:$0xff] %v2086_v53 }
 0x33c   : > { %v1932_v49 = vpop.f32.mrf.mxu2  ;;  %v1757_v25 = vpop.f32.mrf.mxu0 }
 0x33d   : > { %v1933_v54 = vadd.f32 %v1932_v49, %v1844_v47  ;;  %v2021_v12 = vpop.f32.mrf.mxu3  ;;  %v1846_v1 = vpop.f32.mrf.mxu1 }
 0x33e   : > { %v1847_v19 = vadd.f32 %v1846_v1, %v1757_v25 }
 0x33f   : > { %v2022_v10 = vadd.f32 %v2021_v12, %v1933_v54 }
 0x341   : > { %v2088_v63 = vadd.f32 %v2022_v10, %v544_v0 }
 0x343   : > { %2152 = vst [vmem:[#allocation2 + $0x1c0] sm:$0xff] %v2088_v63 }
 0x344   : > { %v1935_v17 = vpop.f32.mrf.mxu2  ;;  %v1759_v3 = vpop.f32.mrf.mxu0 }
 0x345   : > { %v1936_v30 = vadd.f32 %v1935_v17, %v1847_v19  ;;  %v2024_v6 = vpop.f32.mrf.mxu3  ;;  %v1848_v18 = vpop.f32.mrf.mxu1 }
 0x346   : > { %v1849_v5 = vadd.f32 %v1848_v18, %v1759_v3 }
 0x347   : > { %v2025_v26 = vadd.f32 %v2024_v6, %v1936_v30 }
 0x349   : > { %v2090_v4 = vadd.f32 %v2025_v26, %v546_v2 }
 0x34b   : > { %2154 = vst [vmem:[#allocation2 + $0x10] sm:$0xff] %v2090_v4 }
 0x34c   : > { %v1937_v27 = vpop.f32.mrf.mxu2 }
 0x34d   : > { %v1938_v21 = vadd.f32 %v1937_v27, %v1849_v5  ;;  %v2026_v22 = vpop.f32.mrf.mxu3 }
 0x34f   : > { %v2027_v24 = vadd.f32 %v2026_v22, %v1938_v21  ;;  %2160 = sbr.rel (%p3083_p13) target bundleno = 899 (0x383), region = 63 }
 0x351   : > { %v2092_v29 = vadd.f32 %v2027_v24, %v548_v28 }
 0x353   : > { %2156 = vst [vmem:[#allocation2 + $0xa0] sm:$0xff] %v2092_v29 }
 0x354   : > { %v2161_v7 = vld [vmem:[#allocation2 + $0xb0] sm:$0xff]  ;;  %v2225_v23 = vld [vmem:[%s4264_s2] sm:$0x3]  ;;  %v2163_v13 = vld [vmem:[#allocation2 + $0xd8] sm:$0xff] }
 0x355   : > { %v2162_v32 = vld [vmem:[#allocation2 + $0x1b0] sm:$0xff]  ;;  %v4141_v37 = vperm.slane %v2225_v23, 0  ;;  %v4143_v31 = vperm.slane %v2225_v23, 1  ;;  %v2164_v59 = vld [vmem:[#allocation2 + $0x18] sm:$0xff]  ;;  %v2166_v61 = vld [vmem:[#allocation2 + $0x168] sm:$0xff] }
 0x356   : > { %v2165_v38 = vld [vmem:[#allocation2 + $0x50] sm:$0xff]  ;;  %v2168_v11 = vld [vmem:[#allocation2 + $0x48] sm:$0xff]  ;;  %v2169_v44 = vld [vmem:[#allocation2 + $0x180] sm:$0xff] }
 0x357   : > { %v2167_v33 = vld [vmem:[#allocation2 + $0x130] sm:$0xff]  ;;  %v2231_v39 = vadd.f32 %v4141_v37, %v2161_v7  ;;  %v2232_v42 = vadd.f32 %v4143_v31, %v2162_v32  ;;  %v2233_v41 = vadd.f32 %v4141_v37, %v2163_v13  ;;  %v2234_v14 = vadd.f32 %v4143_v31, %v2164_v59  ;;  %v2171_v51 = vld [vmem:[#allocation2 + $0x118] sm:$0xff]  ;;  %v2173_v8 = vld [vmem:[#allocation2 + $0x120] sm:$0xff] }
 0x358   : > { %v2235_v34 = vadd.f32 %v4141_v37, %v2165_v38  ;;  %v2236_v50 = vadd.f32 %v4143_v31, %v2166_v61  ;;  %v2237_v43 = vadd.f32 %v4141_v37, %v2167_v33  ;;  %v2238_v35 = vadd.f32 %v4143_v31, %v2168_v11  ;;  %v2170_v58 = vld [vmem:[#allocation2 + $0x110] sm:$0xff]  ;;  %v2172_v9 = vld [vmem:[#allocation2 + $0x98] sm:$0xff]  ;;  %v2175_v46 = vld [vmem:[#allocation2 + $0x108] sm:$0xff] }
 0x359   : > { %v2295_v36 = vmax.f32 %v2231_v39, 0.0  ;;  %v2296_v20 = vmax.f32 %v2232_v42, 0.0  ;;  %v2297_v15 = vmax.f32 %v2233_v41, 0.0  ;;  %v2298_v16 = vmax.f32 %v2234_v14, 0.0  ;;  %v2174_v45 = vld [vmem:[#allocation2 + $0x150] sm:$0xff]  ;;  %v2176_v53 = vld [vmem:[#allocation2 + $0x60] sm:$0xff] }
 0x35a   : > { %v2299_v55 = vmax.f32 %v2235_v34, 0.0  ;;  %v2300_v56 = vmax.f32 %v2236_v50, 0.0  ;;  %v2301_v48 = vmax.f32 %v2237_v43, 0.0  ;;  %v2302_v60 = vmax.f32 %v2238_v35, 0.0  ;;  %v2177_v0 = vld [vmem:[#allocation2 + $0xe0] sm:$0xff]  ;;  %v2178_v19 = vld [vmem:[#allocation2 + $0x188] sm:$0xff] }
 0x35b   : > { %v2359_v40 = vpack.c.bf16 %v2296_v20, %v2295_v36  ;;  %v2360_v57 = vpack.c.bf16 %v2298_v16, %v2297_v15  ;;  %v2239_v52 = vadd.f32 %v4141_v37, %v2169_v44  ;;  %v2240_v62 = vadd.f32 %v4143_v31, %v2170_v58  ;;  %v2179_v26 = vld [vmem:[#allocation2 + $0x138] sm:$0xff]  ;;  %v2180_v3 = vld [vmem:[#allocation2 + $0x140] sm:$0xff]  ;;  %v2182_v28 = vld [vmem:[#allocation2 + $0x1a8] sm:$0xff] }
 0x35c   : > { %v2361_v47 = vpack.c.bf16 %v2300_v56, %v2299_v55  ;;  %v2362_v49 = vpack.c.bf16 %v2302_v60, %v2301_v48  ;;  %v2241_v54 = vadd.f32 %v4141_v37, %v2171_v51  ;;  %v2242_v12 = vadd.f32 %v4143_v31, %v2172_v9  ;;  %v2181_v21 = vld [vmem:[#allocation2 + $0x80] sm:$0xff]  ;;  %v2183_v32 = vld [vmem:[#allocation2 + $0x1b8] sm:$0xff]  ;;  %v2184_v23 = vld [vmem:[#allocation2 + $0x28] sm:$0xff] }
 0x35d   : > { %2391 = vst [vmem:[%s3556_s30] sm:$0xff] %v2359_v40  ;;  %v2303_v25 = vmax.f32 %v2239_v52, 0.0  ;;  %v2304_v1 = vmax.f32 %v2240_v62, 0.0  ;;  %v2243_v10 = vadd.f32 %v4141_v37, %v2173_v8  ;;  %v2244_v63 = vadd.f32 %v4143_v31, %v2174_v45  ;;  %v2185_v33 = vld [vmem:[#allocation2 + $0x1e8] sm:$0xff]  ;;  %v2186_v14 = vld [vmem:[#allocation2 + $0xf8] sm:$0xff]  ;;  %v2187_v44 = vld [vmem:[#allocation2 + $0x160] sm:$0xff] }
 0x35e   : > { %2392 = vst [vmem:[%s3556_s30 + $0x8] sm:$0xff] %v2360_v57  ;;  %v2305_v17 = vmax.f32 %v2241_v54, 0.0  ;;  %v2306_v30 = vmax.f32 %v2242_v12, 0.0  ;;  %v2245_v6 = vadd.f32 %v4141_v37, %v2175_v46  ;;  %v2246_v2 = vadd.f32 %v4143_v31, %v2176_v53  ;;  %v2188_v58 = vld [vmem:[#allocation2 + $0x30] sm:$0xff]  ;;  %v2189_v51 = vld [vmem:[#allocation2 + $0x1e0] sm:$0xff]  ;;  %v2192_v45 = vld [vmem:[#allocation2 + $0x8] sm:$0xff] }
 0x35f   : > { %2393 = vst [vmem:[%s3556_s30 + $0x10] sm:$0xff] %v2361_v47  ;;  %v2363_v18 = vpack.c.bf16 %v2304_v1, %v2303_v25  ;;  %v2307_v4 = vmax.f32 %v2243_v10, 0.0  ;;  %v2308_v5 = vmax.f32 %v2244_v63, 0.0  ;;  %v2247_v27 = vadd.f32 %v4141_v37, %v2177_v0  ;;  %v2190_v9 = vld [vmem:[#allocation2] sm:$0xff]  ;;  %v2191_v8 = vld [vmem:[#allocation2 + $0xf0] sm:$0xff]  ;;  %v2193_v46 = vld [vmem:[#allocation2 + $0x148] sm:$0xff] }
 0x360   : > { %2394 = vst [vmem:[%s3556_s30 + $0x18] sm:$0xff] %v2362_v49  ;;  %v2364_v22 = vpack.c.bf16 %v2306_v30, %v2305_v17  ;;  %v2309_v24 = vmax.f32 %v2245_v6, 0.0  ;;  %v2310_v29 = vmax.f32 %v2246_v2, 0.0  ;;  %v2248_v7 = vadd.f32 %v4143_v31, %v2178_v19  ;;  %v2194_v12 = vld [vmem:[#allocation2 + $0x1d0] sm:$0xff]  ;;  %v2195_v63 = vld [vmem:[#allocation2 + $0x100] sm:$0xff]  ;;  %v2196_v19 = vld [vmem:[#allocation2 + $0xc8] sm:$0xff] }
 0x361   : > { %2395 = vst [vmem:[%s3556_s30 + $0x20] sm:$0xff] %v2363_v18  ;;  %v2365_v13 = vpack.c.bf16 %v2308_v5, %v2307_v4  ;;  %v2311_v59 = vmax.f32 %v2247_v27, 0.0  ;;  %v2249_v38 = vadd.f32 %v4141_v37, %v2179_v26  ;;  %v2250_v61 = vadd.f32 %v4143_v31, %v2180_v3  ;;  %v2197_v26 = vld [vmem:[#allocation2 + $0x40] sm:$0xff]  ;;  %v2198_v3 = vld [vmem:[#allocation2 + $0x1f8] sm:$0xff] }
 0x362   : > { %2396 = vst [vmem:[%s3556_s30 + $0x28] sm:$0xff] %v2364_v22  ;;  %v2366_v11 = vpack.c.bf16 %v2310_v29, %v2309_v24  ;;  %v2312_v39 = vmax.f32 %v2248_v7, 0.0  ;;  %v2251_v42 = vadd.f32 %v4141_v37, %v2181_v21  ;;  %v2252_v41 = vadd.f32 %v4143_v31, %v2182_v28  ;;  %v2199_v21 = vld [vmem:[#allocation2 + $0x20] sm:$0xff]  ;;  %v2200_v28 = vld [vmem:[#allocation2 + $0x128] sm:$0xff] }
 0x363   : > { %2397 = vst [vmem:[%s3556_s30 + $0x30] sm:$0xff] %v2365_v13  ;;  %v2313_v34 = vmax.f32 %v2249_v38, 0.0  ;;  %v2314_v50 = vmax.f32 %v2250_v61, 0.0  ;;  %v2253_v43 = vadd.f32 %v4141_v37, %v2183_v32  ;;  %v2254_v35 = vadd.f32 %v4143_v31, %v2184_v23  ;;  %v2201_v32 = vld [vmem:[#allocation2 + $0x1a0] sm:$0xff]  ;;  %v2202_v61 = vld [vmem:[#allocation2 + $0x1f0] sm:$0xff] }
 0x364   : > { %2398 = vst [vmem:[%s3556_s30 + $0x38] sm:$0xff] %v2366_v11  ;;  %v2367_v36 = vpack.c.bf16 %v2312_v39, %v2311_v59  ;;  %v2315_v20 = vmax.f32 %v2251_v42, 0.0  ;;  %v2316_v15 = vmax.f32 %v2252_v41, 0.0  ;;  %v2255_v16 = vadd.f32 %v4141_v37, %v2185_v33  ;;  %v2203_v41 = vld [vmem:[#allocation2 + $0xe8] sm:$0xff] }
 0x365   : > { %v2368_v55 = vpack.c.bf16 %v2314_v50, %v2313_v34  ;;  %v2317_v56 = vmax.f32 %v2253_v43, 0.0  ;;  %v2318_v48 = vmax.f32 %v2254_v35, 0.0  ;;  %v2256_v60 = vadd.f32 %v4143_v31, %v2186_v14  ;;  %v2204_v14 = vld [vmem:[#allocation2 + $0x78] sm:$0xff] }
 0x366   : > { %2399 = vst [vmem:[%s3556_s30 + $0x40] sm:$0xff] %v2367_v36  ;;  %v2369_v40 = vpack.c.bf16 %v2316_v15, %v2315_v20  ;;  %v2319_v57 = vmax.f32 %v2255_v16, 0.0  ;;  %v2257_v52 = vadd.f32 %v4141_v37, %v2187_v44  ;;  %v2258_v62 = vadd.f32 %v4143_v31, %v2188_v58  ;;  %v2205_v44 = vld [vmem:[#allocation2 + $0x70] sm:$0xff] }
 0x367   : > { %2400 = vst [vmem:[%s3556_s30 + $0x48] sm:$0xff] %v2368_v55  ;;  %v2370_v53 = vpack.c.bf16 %v2318_v48, %v2317_v56  ;;  %v2320_v47 = vmax.f32 %v2256_v60, 0.0  ;;  %v2259_v49 = vadd.f32 %v4141_v37, %v2189_v51  ;;  %v2260_v54 = vadd.f32 %v4143_v31, %v2190_v9  ;;  %v2206_v58 = vld [vmem:[#allocation2 + $0x90] sm:$0xff]  ;;  %v2207_v51 = vld [vmem:[#allocation2 + $0x1d8] sm:$0xff] }
 0x368   : > { %2401 = vst [vmem:[%s3556_s30 + $0x50] sm:$0xff] %v2369_v40  ;;  %v2321_v0 = vmax.f32 %v2257_v52, 0.0  ;;  %v2322_v25 = vmax.f32 %v2258_v62, 0.0  ;;  %v2261_v1 = vadd.f32 %v4141_v37, %v2191_v8  ;;  %v2262_v10 = vadd.f32 %v4143_v31, %v2192_v45  ;;  %v2208_v9 = vld [vmem:[#allocation2 + $0xd0] sm:$0xff]  ;;  %v2209_v8 = vld [vmem:[#allocation2 + $0xb8] sm:$0xff]  ;;  %v2210_v62 = vld [vmem:[#allocation2 + $0x88] sm:$0xff] }
 0x369   : > { %2402 = vst [vmem:[%s3556_s30 + $0x58] sm:$0xff] %v2370_v53  ;;  %v2371_v17 = vpack.c.bf16 %v2320_v47, %v2319_v57  ;;  %v2323_v30 = vmax.f32 %v2259_v49, 0.0  ;;  %v2324_v6 = vmax.f32 %v2260_v54, 0.0  ;;  %v2263_v2 = vadd.f32 %v4141_v37, %v2193_v46  ;;  %v2211_v54 = vld [vmem:[#allocation2 + $0xa8] sm:$0xff] }
 0x36a   : > { %v2372_v18 = vpack.c.bf16 %v2322_v25, %v2321_v0  ;;  %v2325_v4 = vmax.f32 %v2261_v1, 0.0  ;;  %v2326_v5 = vmax.f32 %v2262_v10, 0.0  ;;  %v2264_v27 = vadd.f32 %v4143_v31, %v2194_v12  ;;  %v2212_v12 = vld [vmem:[#allocation2 + $0x1c8] sm:$0xff] }
 0x36b   : > { %2403 = vst [vmem:[%s3556_s30 + $0x60] sm:$0xff] %v2371_v17  ;;  %v2373_v22 = vpack.c.bf16 %v2324_v6, %v2323_v30  ;;  %v2327_v24 = vmax.f32 %v2263_v2, 0.0  ;;  %v2265_v29 = vadd.f32 %v4141_v37, %v2195_v63  ;;  %v2266_v7 = vadd.f32 %v4143_v31, %v2196_v19  ;;  %v2213_v63 = vld [vmem:[#allocation2 + $0x170] sm:$0xff]  ;;  %v2214_v19 = vld [vmem:[#allocation2 + $0x178] sm:$0xff] }
 0x36c   : > { %2404 = vst [vmem:[%s3556_s30 + $0x68] sm:$0xff] %v2372_v18  ;;  %v2374_v23 = vpack.c.bf16 %v2326_v5, %v2325_v4  ;;  %v2328_v13 = vmax.f32 %v2264_v27, 0.0  ;;  %v2267_v59 = vadd.f32 %v4141_v37, %v2197_v26  ;;  %v2268_v38 = vadd.f32 %v4143_v31, %v2198_v3  ;;  %v2215_v26 = vld [vmem:[#allocation2 + $0x68] sm:$0xff]  ;;  %v2216_v3 = vld [vmem:[#allocation2 + $0x190] sm:$0xff] }
 0x36d   : > { %2405 = vst [vmem:[%s3556_s30 + $0x70] sm:$0xff] %v2373_v22  ;;  %v2329_v33 = vmax.f32 %v2265_v29, 0.0  ;;  %v2330_v11 = vmax.f32 %v2266_v7, 0.0  ;;  %v2269_v39 = vadd.f32 %v4141_v37, %v2199_v21  ;;  %v2270_v42 = vadd.f32 %v4143_v31, %v2200_v28  ;;  %v2217_v21 = vld [vmem:[#allocation2 + $0x198] sm:$0xff] }
 0x36e   : > { %2406 = vst [vmem:[%s3556_s30 + $0x78] sm:$0xff] %v2374_v23  ;;  %v2375_v34 = vpack.c.bf16 %v2328_v13, %v2327_v24  ;;  %v2331_v50 = vmax.f32 %v2267_v59, 0.0  ;;  %v2332_v43 = vmax.f32 %v2268_v38, 0.0  ;;  %v2271_v35 = vadd.f32 %v4141_v37, %v2201_v32  ;;  %v2218_v7 = vld [vmem:[#allocation2 + $0x38] sm:$0xff]  ;;  %v2219_v38 = vld [vmem:[#allocation2 + $0xc0] sm:$0xff] }
 0x36f   : > { %v2376_v36 = vpack.c.bf16 %v2330_v11, %v2329_v33  ;;  %v2333_v20 = vmax.f32 %v2269_v39, 0.0  ;;  %v2334_v15 = vmax.f32 %v2270_v42, 0.0  ;;  %v2272_v16 = vadd.f32 %v4143_v31, %v2202_v61  ;;  %v2220_v61 = vld [vmem:[#allocation2 + $0x1c0] sm:$0xff] }
 0x370   : > { %2407 = vst [vmem:[%s3556_s30 + $0x80] sm:$0xff] %v2375_v34  ;;  %v2377_v55 = vpack.c.bf16 %v2332_v43, %v2331_v50  ;;  %v2335_v56 = vmax.f32 %v2271_v35, 0.0  ;;  %v2273_v48 = vadd.f32 %v4141_v37, %v2203_v41  ;;  %v2274_v60 = vadd.f32 %v4143_v31, %v2204_v14  ;;  %v2221_v41 = vld [vmem:[#allocation2 + $0x158] sm:$0xff]  ;;  %v2222_v14 = vld [vmem:[#allocation2 + $0x10] sm:$0xff] }
 0x371   : > { %2408 = vst [vmem:[%s3556_s30 + $0x88] sm:$0xff] %v2376_v36  ;;  %v2378_v45 = vpack.c.bf16 %v2334_v15, %v2333_v20  ;;  %v2336_v40 = vmax.f32 %v2272_v16, 0.0  ;;  %v2275_v57 = vadd.f32 %v4141_v37, %v2205_v44  ;;  %v2276_v52 = vadd.f32 %v4143_v31, %v2206_v58  ;;  %v2223_v44 = vld [vmem:[#allocation2 + $0x58] sm:$0xff]  ;;  %v2224_v58 = vld [vmem:[#allocation2 + $0xa0] sm:$0xff] }
 0x372   : > { %2409 = vst [vmem:[%s3556_s30 + $0x90] sm:$0xff] %v2377_v55  ;;  %v2337_v46 = vmax.f32 %v2273_v48, 0.0  ;;  %v2338_v53 = vmax.f32 %v2274_v60, 0.0  ;;  %v2277_v47 = vadd.f32 %v4141_v37, %v2207_v51  ;;  %v2278_v49 = vadd.f32 %v4143_v31, %v2208_v9 }
 0x373   : > { %2410 = vst [vmem:[%s3556_s30 + $0x98] sm:$0xff] %v2378_v45  ;;  %v2379_v0 = vpack.c.bf16 %v2336_v40, %v2335_v56  ;;  %v2339_v25 = vmax.f32 %v2275_v57, 0.0  ;;  %v2340_v1 = vmax.f32 %v2276_v52, 0.0  ;;  %v2279_v10 = vadd.f32 %v4141_v37, %v2209_v8 }
 0x374   : > { %v2380_v17 = vpack.c.bf16 %v2338_v53, %v2337_v46  ;;  %v2341_v30 = vmax.f32 %v2277_v47, 0.0  ;;  %v2342_v6 = vmax.f32 %v2278_v49, 0.0  ;;  %v2280_v2 = vadd.f32 %v4143_v31, %v2210_v62 }
 0x375   : > { %2411 = vst [vmem:[%s3556_s30 + $0xa0] sm:$0xff] %v2379_v0  ;;  %v2381_v18 = vpack.c.bf16 %v2340_v1, %v2339_v25  ;;  %v2343_v4 = vmax.f32 %v2279_v10, 0.0  ;;  %v2281_v5 = vadd.f32 %v4141_v37, %v2211_v54  ;;  %v2282_v27 = vadd.f32 %v4143_v31, %v2212_v12 }
 0x376   : > { %2412 = vst [vmem:[%s3556_s30 + $0xa8] sm:$0xff] %v2380_v17  ;;  %v2382_v28 = vpack.c.bf16 %v2342_v6, %v2341_v30  ;;  %v2344_v22 = vmax.f32 %v2280_v2, 0.0  ;;  %v2283_v24 = vadd.f32 %v4141_v37, %v2213_v63  ;;  %v2284_v29 = vadd.f32 %v4143_v31, %v2214_v19 }
 0x377   : > { %2413 = vst [vmem:[%s3556_s30 + $0xb0] sm:$0xff] %v2381_v18  ;;  %v2345_v32 = vmax.f32 %v2281_v5, 0.0  ;;  %v2346_v23 = vmax.f32 %v2282_v27, 0.0  ;;  %v2285_v13 = vadd.f32 %v4141_v37, %v2215_v26  ;;  %v2286_v59 = vadd.f32 %v4143_v31, %v2216_v3 }
 0x378   : > { %2414 = vst [vmem:[%s3556_s30 + $0xb8] sm:$0xff] %v2382_v28  ;;  %v2383_v33 = vpack.c.bf16 %v2344_v22, %v2343_v4  ;;  %v2347_v11 = vmax.f32 %v2283_v24, 0.0  ;;  %v2348_v39 = vmax.f32 %v2284_v29, 0.0  ;;  %v2287_v42 = vadd.f32 %v4141_v37, %v2217_v21 }
 0x379   : > { %v2384_v34 = vpack.c.bf16 %v2346_v23, %v2345_v32  ;;  %v2349_v50 = vmax.f32 %v2285_v13, 0.0  ;;  %v2350_v43 = vmax.f32 %v2286_v59, 0.0  ;;  %v2288_v35 = vadd.f32 %v4143_v31, %v2218_v7 }
 0x37a   : > { %2415 = vst [vmem:[%s3556_s30 + $0xc0] sm:$0xff] %v2383_v33  ;;  %v2385_v36 = vpack.c.bf16 %v2348_v39, %v2347_v11  ;;  %v2351_v20 = vmax.f32 %v2287_v42, 0.0  ;;  %v2289_v15 = vadd.f32 %v4141_v37, %v2219_v38  ;;  %v2290_v16 = vadd.f32 %v4143_v31, %v2220_v61 }
 0x37b   : > { %2416 = vst [vmem:[%s3556_s30 + $0xc8] sm:$0xff] %v2384_v34  ;;  %v2386_v51 = vpack.c.bf16 %v2350_v43, %v2349_v50  ;;  %v2352_v9 = vmax.f32 %v2288_v35, 0.0  ;;  %v2291_v55 = vadd.f32 %v4141_v37, %v2221_v41  ;;  %v2292_v56 = vadd.f32 %v4143_v31, %v2222_v14 }
 0x37c   : > { %2417 = vst [vmem:[%s3556_s30 + $0xd0] sm:$0xff] %v2385_v36  ;;  %v2353_v48 = vmax.f32 %v2289_v15, 0.0  ;;  %v2354_v60 = vmax.f32 %v2290_v16, 0.0  ;;  %v2293_v8 = vadd.f32 %v4141_v37, %v2223_v44  ;;  %v2294_v45 = vadd.f32 %v4143_v31, %v2224_v58 }
 0x37d   : > { %2418 = vst [vmem:[%s3556_s30 + $0xd8] sm:$0xff] %v2386_v51  ;;  %v2387_v40 = vpack.c.bf16 %v2352_v9, %v2351_v20  ;;  %v2355_v57 = vmax.f32 %v2291_v55, 0.0  ;;  %v2356_v52 = vmax.f32 %v2292_v56, 0.0 }
 0x37e   : > { %v2388_v62 = vpack.c.bf16 %v2354_v60, %v2353_v48  ;;  %v2357_v46 = vmax.f32 %v2293_v8, 0.0  ;;  %v2358_v53 = vmax.f32 %v2294_v45, 0.0 }
 0x37f   : > { %2419 = vst [vmem:[%s3556_s30 + $0xe0] sm:$0xff] %v2387_v40  ;;  %v2389_v47 = vpack.c.bf16 %v2356_v52, %v2355_v57 }
 0x380   : > { %2420 = vst [vmem:[%s3556_s30 + $0xe8] sm:$0xff] %v2388_v62  ;;  %v2390_v49 = vpack.c.bf16 %v2358_v53, %v2357_v46 }
 0x381   : > { %2421 = vst [vmem:[%s3556_s30 + $0xf0] sm:$0xff] %v2389_v47 }
 0x382   : > { %2422 = vst [vmem:[%s3556_s30 + $0xf8] sm:$0xff] %v2390_v49 }
 0x383 PF: > { %s13_s18 = sadd.s32 1, %s3328_s18   ;;  %s4323_s12 = smov %s3308_s13 }
 0x384   : > { %p10_p0 = scmp.ge.s32.totalorder %s13_s18, 16   ;;  %s4324_s13 = smov %s3402_s25 }
 0x385   : > { %s4325_s14 = smov %s3320_s16  ;;  %s4326_s15 = smov %s3324_s17 }
 0x386   : > { %s4327_s16 = smov %s4330_s19  ;;  %s4328_s17 = smov %s4334_s20 }
 0x387   :  { %12 = sbr.rel (!%p10_p0) target bundleno = 4 (0x4), region = 104 }

// kernel: my_alexnet_features.9
= control target key start
LH: loop header
LB: loop body
LE: loop exit
PB: predicated region body
PF: predicated region fallthrough
CT: control target
= control target key end

     0   :  { %s3351_s12 = smov 0   ;;  %s3353_s13 = smov 0   ;;  %s4262_s0 = inlined_call_operand.vmem [shape: bf16[512,2560], index: 0, kind: input, shape index: {}]   ;;  %s4263_s1 = inlined_call_operand.vmem [shape: bf16[2560,256], index: 1, kind: input, shape index: {}]   ;;  %s4264_s2 = inlined_call_operand.vmem [shape: f32[1,256], index: 2, kind: input, shape index: {}]   ;;  %s4265_s3 = inlined_call_operand.vmem [shape: bf16[512,256], index: 3, kind: output, shape index: {}]  }
   0x1   :  { %s3355_s14 = smov 0   ;;  %s3357_s15 = smov 0  }
   0x2   :  { %s3359_s16 = smov 0   ;;  %s3361_s17 = smov 0  }
   0x3   :  { %s3363_s18 = smov 0  }
   0x4 LB: > { %s25_s19 = sadd.s32 1, %s3320_s16  ;;  %s32_s20 = sadd.s32 1, %s3324_s17  ;;  %s3328_s18 = sphi %s3363_s18, %s13_s18   ;;  %s3324_s17 = sphi %s3361_s17, %s4328_s17   ;;  %s3320_s16 = sphi %s3359_s16, %s4327_s16   ;;  %s3316_s15 = sphi %s3357_s15, %s4326_s15   ;;  %s3312_s14 = sphi %s3355_s14, %s4325_s14   ;;  %s3308_s13 = sphi %s3353_s13, %s4324_s13   ;;  %s3304_s12 = sphi %s3351_s12, %s4323_s12  }
   0x5   : > { %p26_p0 = scmp.ge.s32.totalorder %s25_s19, 5  ;;  %p48_p1 = scmp.ne.s32.totalorder %s3308_s13, %s3304_s12 }
   0x6   : > { %p49_p2 = scmp.eq.s32.totalorder %s3328_s18, 0  ;;  %s41_s24 = sadd.s32 1, %s3308_s13 }
   0x7   : > { %s4330_s19 = smov (%p26_p0, %s25_s19), 0  ;;  %s4332_s20 = smov (!%p26_p0, %s32_s20), %s3324_s17 }
   0x8   : > { %p50_p3 = por %p49_p2, %p48_p1  ;;  %p34_p4 = scmp.ge.s32.totalorder %s4332_s20, 2 }
   0x9   : > { %s37_s21 = ssub.s32 %s3320_s16, %s4330_s19  ;;  %p2556_p6 = scmp.ge.s32.totalorder %s3328_s18, 10 }
   0xa   : > { %s4334_s20 = smov (%p34_p4, %s4332_s20), 0 }
   0xb   : > { %s36_s22 = ssub.s32 %s3324_s17, %s4334_s20  ;;  %164 = sbr.rel (%p2556_p6) target bundleno = 88 (0x58), region = 20 }
   0xc   : > { %s38_s23 = sor.u32 %s37_s21, %s36_s22 }
   0xd   : > { %p39_p5 = scmp.eq.s32.totalorder %s38_s23, 0 }
   0xf   : > { %s3402_s25 = scalar_select %p39_p5, %s3308_s13, %s41_s24  }
  0x10   : > { %167 = sbr.rel (!%p50_p3) target bundleno = 88 (0x58), region = 24  ;;  %s169_s26 = sand.u32 (%p50_p3), 1, %s3308_s13  }
  0x11   : > { %s2559_s27 = sshll.u32 (%p50_p3), %s3320_s16, 2  ;;  %s2557_s28 = sshll.u32 (%p50_p3), %s169_s26, 9 }
  0x12   : > { %s3216_s29 = smul.u32 (%p50_p3), 640, %s3324_s17  ;;  %s3416_s8 = scalar_lea.vmem (%p50_p3), [#allocation3], %s2557_s28 }
  0x14   : > { %s175_s30 = sadd.s32 (%p50_p3), %s3216_s29, %s2559_s27 }
  0x15   : > { %s2561_s4 = sshll.u32 %s175_s30, 2 }
  0x16   : > { %s3411_s7 = scalar_lea.vmem %s4262_s0, %s2561_s4 }
  0x17   : > { %v190_v0 = vld [vmem:[%s3411_s7] sm:$0xff]  ;;  %v192_v1 = vld [vmem:[%s3411_s7 + $0x8] sm:$0xff]  ;;  %v194_v2 = vld [vmem:[%s3411_s7 + $0x50] sm:$0xff] }
  0x18   : > { %191 = vst [vmem:[%s3416_s8] sm:$0xff] %v190_v0  ;;  %v196_v3 = vld [vmem:[%s3411_s7 + $0x58] sm:$0xff]  ;;  %v198_v4 = vld [vmem:[%s3411_s7 + $0xa0] sm:$0xff]  ;;  %v200_v5 = vld [vmem:[%s3411_s7 + $0xa8] sm:$0xff] }
  0x19   : > { %193 = vst [vmem:[%s3416_s8 + $0x8] sm:$0xff] %v192_v1  ;;  %v202_v6 = vld [vmem:[%s3411_s7 + $0xf0] sm:$0xff]  ;;  %v204_v7 = vld [vmem:[%s3411_s7 + $0xf8] sm:$0xff]  ;;  %v206_v8 = vld [vmem:[%s3411_s7 + $0x140] sm:$0xff] }
  0x1a   : > { %195 = vst [vmem:[%s3416_s8 + $0x10] sm:$0xff] %v194_v2  ;;  %v208_v9 = vld [vmem:[%s3411_s7 + $0x148] sm:$0xff]  ;;  %v210_v10 = vld [vmem:[%s3411_s7 + $0x190] sm:$0xff]  ;;  %v212_v11 = vld [vmem:[%s3411_s7 + $0x198] sm:$0xff] }
  0x1b   : > { %197 = vst [vmem:[%s3416_s8 + $0x18] sm:$0xff] %v196_v3  ;;  %v214_v12 = vld [vmem:[%s3411_s7 + $0x1e0] sm:$0xff]  ;;  %v216_v13 = vld [vmem:[%s3411_s7 + $0x1e8] sm:$0xff]  ;;  %v218_v14 = vld [vmem:[%s3411_s7 + $0x230] sm:$0xff] }
  0x1c   : > { %199 = vst [vmem:[%s3416_s8 + $0x20] sm:$0xff] %v198_v4  ;;  %v220_v15 = vld [vmem:[%s3411_s7 + $0x238] sm:$0xff]  ;;  %v222_v16 = vld [vmem:[%s3411_s7 + $0x280] sm:$0xff]  ;;  %v224_v17 = vld [vmem:[%s3411_s7 + $0x288] sm:$0xff] }
  0x1d   : > { %201 = vst [vmem:[%s3416_s8 + $0x28] sm:$0xff] %v200_v5  ;;  %v226_v18 = vld [vmem:[%s3411_s7 + $0x2d0] sm:$0xff]  ;;  %v228_v19 = vld [vmem:[%s3411_s7 + $0x2d8] sm:$0xff]  ;;  %v230_v20 = vld [vmem:[%s3411_s7 + $0x320] sm:$0xff] }
  0x1e   : > { %203 = vst [vmem:[%s3416_s8 + $0x30] sm:$0xff] %v202_v6  ;;  %v232_v21 = vld [vmem:[%s3411_s7 + $0x328] sm:$0xff]  ;;  %v234_v22 = vld [vmem:[%s3411_s7 + $0x370] sm:$0xff]  ;;  %v236_v23 = vld [vmem:[%s3411_s7 + $0x378] sm:$0xff] }
  0x1f   : > { %205 = vst [vmem:[%s3416_s8 + $0x38] sm:$0xff] %v204_v7  ;;  %v238_v24 = vld [vmem:[%s3411_s7 + $0x3c0] sm:$0xff]  ;;  %v240_v25 = vld [vmem:[%s3411_s7 + $0x3c8] sm:$0xff]  ;;  %v242_v26 = vld [vmem:[%s3411_s7 + $0x410] sm:$0xff] }
  0x20   : > { %207 = vst [vmem:[%s3416_s8 + $0x40] sm:$0xff] %v206_v8  ;;  %v244_v27 = vld [vmem:[%s3411_s7 + $0x418] sm:$0xff]  ;;  %v246_v28 = vld [vmem:[%s3411_s7 + $0x460] sm:$0xff]  ;;  %v248_v29 = vld [vmem:[%s3411_s7 + $0x468] sm:$0xff] }
  0x21   : > { %209 = vst [vmem:[%s3416_s8 + $0x48] sm:$0xff] %v208_v9  ;;  %v250_v30 = vld [vmem:[%s3411_s7 + $0x4b0] sm:$0xff]  ;;  %v252_v31 = vld [vmem:[%s3411_s7 + $0x4b8] sm:$0xff]  ;;  %v254_v32 = vld [vmem:[%s3411_s7 + $0x500] sm:$0xff] }
  0x22   : > { %211 = vst [vmem:[%s3416_s8 + $0x50] sm:$0xff] %v210_v10  ;;  %v256_v33 = vld [vmem:[%s3411_s7 + $0x508] sm:$0xff]  ;;  %v258_v34 = vld [vmem:[%s3411_s7 + $0x550] sm:$0xff]  ;;  %v260_v35 = vld [vmem:[%s3411_s7 + $0x558] sm:$0xff] }
  0x23   : > { %213 = vst [vmem:[%s3416_s8 + $0x58] sm:$0xff] %v212_v11  ;;  %v262_v36 = vld [vmem:[%s3411_s7 + $0x5a0] sm:$0xff]  ;;  %v264_v37 = vld [vmem:[%s3411_s7 + $0x5a8] sm:$0xff]  ;;  %v266_v38 = vld [vmem:[%s3411_s7 + $0x5f0] sm:$0xff] }
  0x24   : > { %215 = vst [vmem:[%s3416_s8 + $0x60] sm:$0xff] %v214_v12  ;;  %v268_v39 = vld [vmem:[%s3411_s7 + $0x5f8] sm:$0xff]  ;;  %v270_v40 = vld [vmem:[%s3411_s7 + $0x640] sm:$0xff]  ;;  %v272_v41 = vld [vmem:[%s3411_s7 + $0x648] sm:$0xff] }
  0x25   : > { %217 = vst [vmem:[%s3416_s8 + $0x68] sm:$0xff] %v216_v13  ;;  %v274_v42 = vld [vmem:[%s3411_s7 + $0x690] sm:$0xff]  ;;  %v276_v43 = vld [vmem:[%s3411_s7 + $0x698] sm:$0xff]  ;;  %v278_v44 = vld [vmem:[%s3411_s7 + $0x6e0] sm:$0xff] }
  0x26   : > { %219 = vst [vmem:[%s3416_s8 + $0x70] sm:$0xff] %v218_v14  ;;  %v280_v45 = vld [vmem:[%s3411_s7 + $0x6e8] sm:$0xff]  ;;  %v282_v46 = vld [vmem:[%s3411_s7 + $0x730] sm:$0xff]  ;;  %v284_v47 = vld [vmem:[%s3411_s7 + $0x738] sm:$0xff] }
  0x27   : > { %221 = vst [vmem:[%s3416_s8 + $0x78] sm:$0xff] %v220_v15  ;;  %v286_v48 = vld [vmem:[%s3411_s7 + $0x780] sm:$0xff]  ;;  %v288_v49 = vld [vmem:[%s3411_s7 + $0x788] sm:$0xff]  ;;  %v290_v50 = vld [vmem:[%s3411_s7 + $0x7d0] sm:$0xff] }
  0x28   : > { %223 = vst [vmem:[%s3416_s8 + $0x80] sm:$0xff] %v222_v16  ;;  %v292_v51 = vld [vmem:[%s3411_s7 + $0x7d8] sm:$0xff]  ;;  %v294_v52 = vld [vmem:[%s3411_s7 + $0x820] sm:$0xff]  ;;  %v296_v53 = vld [vmem:[%s3411_s7 + $0x828] sm:$0xff] }
  0x29   : > { %225 = vst [vmem:[%s3416_s8 + $0x88] sm:$0xff] %v224_v17  ;;  %v298_v54 = vld [vmem:[%s3411_s7 + $0x870] sm:$0xff]  ;;  %v300_v55 = vld [vmem:[%s3411_s7 + $0x878] sm:$0xff]  ;;  %v302_v56 = vld [vmem:[%s3411_s7 + $0x8c0] sm:$0xff] }
  0x2a   : > { %227 = vst [vmem:[%s3416_s8 + $0x90] sm:$0xff] %v226_v18  ;;  %v304_v57 = vld [vmem:[%s3411_s7 + $0x8c8] sm:$0xff]  ;;  %v306_v58 = vld [vmem:[%s3411_s7 + $0x910] sm:$0xff]  ;;  %v308_v59 = vld [vmem:[%s3411_s7 + $0x918] sm:$0xff] }
  0x2b   : > { %229 = vst [vmem:[%s3416_s8 + $0x98] sm:$0xff] %v228_v19  ;;  %v310_v60 = vld [vmem:[%s3411_s7 + $0x960] sm:$0xff]  ;;  %v312_v61 = vld [vmem:[%s3411_s7 + $0x968] sm:$0xff]  ;;  %v314_v62 = vld [vmem:[%s3411_s7 + $0x9b0] sm:$0xff] }
  0x2c   : > { %231 = vst [vmem:[%s3416_s8 + $0xa0] sm:$0xff] %v230_v20  ;;  %v316_v63 = vld [vmem:[%s3411_s7 + $0x9b8] sm:$0xff] }
  0x2d   : > { %233 = vst [vmem:[%s3416_s8 + $0xa8] sm:$0xff] %v232_v21 }
  0x2e   : > { %235 = vst [vmem:[%s3416_s8 + $0xb0] sm:$0xff] %v234_v22 }
  0x2f   : > { %237 = vst [vmem:[%s3416_s8 + $0xb8] sm:$0xff] %v236_v23 }
  0x30   : > { %239 = vst [vmem:[%s3416_s8 + $0xc0] sm:$0xff] %v238_v24 }
  0x31   : > { %241 = vst [vmem:[%s3416_s8 + $0xc8] sm:$0xff] %v240_v25 }
  0x32   : > { %243 = vst [vmem:[%s3416_s8 + $0xd0] sm:$0xff] %v242_v26 }
  0x33   : > { %245 = vst [vmem:[%s3416_s8 + $0xd8] sm:$0xff] %v244_v27 }
  0x34   : > { %247 = vst [vmem:[%s3416_s8 + $0xe0] sm:$0xff] %v246_v28 }
  0x35   : > { %249 = vst [vmem:[%s3416_s8 + $0xe8] sm:$0xff] %v248_v29 }
  0x36   : > { %251 = vst [vmem:[%s3416_s8 + $0xf0] sm:$0xff] %v250_v30 }
  0x37   : > { %253 = vst [vmem:[%s3416_s8 + $0xf8] sm:$0xff] %v252_v31 }
  0x38   : > { %255 = vst [vmem:[%s3416_s8 + $0x100] sm:$0xff] %v254_v32 }
  0x39   : > { %257 = vst [vmem:[%s3416_s8 + $0x108] sm:$0xff] %v256_v33 }
  0x3a   : > { %259 = vst [vmem:[%s3416_s8 + $0x110] sm:$0xff] %v258_v34 }
  0x3b   : > { %261 = vst [vmem:[%s3416_s8 + $0x118] sm:$0xff] %v260_v35 }
  0x3c   : > { %263 = vst [vmem:[%s3416_s8 + $0x120] sm:$0xff] %v262_v36 }
  0x3d   : > { %265 = vst [vmem:[%s3416_s8 + $0x128] sm:$0xff] %v264_v37 }
  0x3e   : > { %267 = vst [vmem:[%s3416_s8 + $0x130] sm:$0xff] %v266_v38 }
  0x3f   : > { %269 = vst [vmem:[%s3416_s8 + $0x138] sm:$0xff] %v268_v39 }
  0x40   : > { %271 = vst [vmem:[%s3416_s8 + $0x140] sm:$0xff] %v270_v40 }
  0x41   : > { %273 = vst [vmem:[%s3416_s8 + $0x148] sm:$0xff] %v272_v41 }
  0x42   : > { %275 = vst [vmem:[%s3416_s8 + $0x150] sm:$0xff] %v274_v42 }
  0x43   : > { %277 = vst [vmem:[%s3416_s8 + $0x158] sm:$0xff] %v276_v43 }
  0x44   : > { %279 = vst [vmem:[%s3416_s8 + $0x160] sm:$0xff] %v278_v44 }
  0x45   : > { %281 = vst [vmem:[%s3416_s8 + $0x168] sm:$0xff] %v280_v45 }
  0x46   : > { %283 = vst [vmem:[%s3416_s8 + $0x170] sm:$0xff] %v282_v46 }
  0x47   : > { %285 = vst [vmem:[%s3416_s8 + $0x178] sm:$0xff] %v284_v47 }
  0x48   : > { %287 = vst [vmem:[%s3416_s8 + $0x180] sm:$0xff] %v286_v48 }
  0x49   : > { %289 = vst [vmem:[%s3416_s8 + $0x188] sm:$0xff] %v288_v49 }
  0x4a   : > { %291 = vst [vmem:[%s3416_s8 + $0x190] sm:$0xff] %v290_v50 }
  0x4b   : > { %293 = vst [vmem:[%s3416_s8 + $0x198] sm:$0xff] %v292_v51 }
  0x4c   : > { %295 = vst [vmem:[%s3416_s8 + $0x1a0] sm:$0xff] %v294_v52 }
  0x4d   : > { %297 = vst [vmem:[%s3416_s8 + $0x1a8] sm:$0xff] %v296_v53 }
  0x4e   : > { %299 = vst [vmem:[%s3416_s8 + $0x1b0] sm:$0xff] %v298_v54 }
  0x4f   : > { %301 = vst [vmem:[%s3416_s8 + $0x1b8] sm:$0xff] %v300_v55 }
  0x50   : > { %303 = vst [vmem:[%s3416_s8 + $0x1c0] sm:$0xff] %v302_v56 }
  0x51   : > { %305 = vst [vmem:[%s3416_s8 + $0x1c8] sm:$0xff] %v304_v57 }
  0x52   : > { %307 = vst [vmem:[%s3416_s8 + $0x1d0] sm:$0xff] %v306_v58 }
  0x53   : > { %309 = vst [vmem:[%s3416_s8 + $0x1d8] sm:$0xff] %v308_v59 }
  0x54   : > { %311 = vst [vmem:[%s3416_s8 + $0x1e0] sm:$0xff] %v310_v60 }
  0x55   : > { %313 = vst [vmem:[%s3416_s8 + $0x1e8] sm:$0xff] %v312_v61 }
  0x56   : > { %315 = vst [vmem:[%s3416_s8 + $0x1f0] sm:$0xff] %v314_v62 }
  0x57   : > { %317 = vst [vmem:[%s3416_s8 + $0x1f8] sm:$0xff] %v316_v63 }
  0x58 PF: > { %p2562_p7 = scmp.ge.s32.totalorder %s3328_s18, 1  ;;  %p337_p8 = scmp.lt.s32.totalorder %s3328_s18, 11 }
  0x5a   : > { %p338_p9 = pnand %p2562_p7, %p337_p8 }
  0x5c   : > { %341 = sbr.rel (%p338_p9) target bundleno = 899 (0x383), region = 51 }
  0x61   : > { %s344_s9 = sand.u32 1, %s3304_s12   ;;  %s2564_s10 = sshll.u32 %s3312_s14, 6 }
  0x62   : > { %s2563_s11 = sshll.u32 %s344_s9, 9  ;;  %p390_p10 = scmp.lt.s32.totalorder %s2564_s10, 319 }
  0x63   : > { %s2567_s21 = sshll.u32 %s3316_s15, 5  ;;  %s3558_s12 = scalar_lea.vmem [#allocation3], %s2563_s11 }
  0x64   : > { %s4336_s10 = smov (!%p390_p10, %s2564_s10), 319  ;;  %p407_p11 = scmp.lt.s32.totalorder %s2567_s21, 63 }
  0x65   : > { %s3086_s22 = sshll.u32 %s4336_s10, 3  ;;  %p2570_p12 = scmp.ne.s32.totalorder %s3312_s14, 0 }
  0x66   : > { %s3551_s26 = scalar_lea.vmem %s4263_s1, %s3086_s22  ;;  %s4338_s21 = smov (!%p407_p11, %s2567_s21), 63 }
  0x67   : > { %s3087_s27 = sshll.u32 %s4338_s21, 3  ;;  %420 = sbr.rel (%p2570_p12) target bundleno = 173 (0xad), region = 59 }
  0x68   : > { %s3556_s30 = scalar_lea.vmem %s4265_s3, %s3087_s27 }
  0x6c   : > { %v3330_v0 = vmov 0.0  }
  0x6d   : > { %421 = vst [vmem:[#allocation2 + $0xb0] sm:$0xff] %v3330_v0 }
  0x6e   : > { %422 = vst [vmem:[#allocation2 + $0x1b0] sm:$0xff] %v3330_v0 }
  0x6f   : > { %423 = vst [vmem:[#allocation2 + $0xd8] sm:$0xff] %v3330_v0 }
  0x70   : > { %424 = vst [vmem:[#allocation2 + $0x18] sm:$0xff] %v3330_v0 }
  0x71   : > { %425 = vst [vmem:[#allocation2 + $0x50] sm:$0xff] %v3330_v0 }
  0x72   : > { %426 = vst [vmem:[#allocation2 + $0x168] sm:$0xff] %v3330_v0 }
  0x73   : > { %427 = vst [vmem:[#allocation2 + $0x130] sm:$0xff] %v3330_v0 }
  0x74   : > { %428 = vst [vmem:[#allocation2 + $0x48] sm:$0xff] %v3330_v0 }
  0x75   : > { %429 = vst [vmem:[#allocation2 + $0x180] sm:$0xff] %v3330_v0 }
  0x76   : > { %430 = vst [vmem:[#allocation2 + $0x110] sm:$0xff] %v3330_v0 }
  0x77   : > { %431 = vst [vmem:[#allocation2 + $0x118] sm:$0xff] %v3330_v0 }
  0x78   : > { %432 = vst [vmem:[#allocation2 + $0x98] sm:$0xff] %v3330_v0 }
  0x79   : > { %433 = vst [vmem:[#allocation2 + $0x120] sm:$0xff] %v3330_v0 }
  0x7a   : > { %434 = vst [vmem:[#allocation2 + $0x150] sm:$0xff] %v3330_v0 }
  0x7b   : > { %435 = vst [vmem:[#allocation2 + $0x108] sm:$0xff] %v3330_v0 }
  0x7c   : > { %436 = vst [vmem:[#allocation2 + $0x60] sm:$0xff] %v3330_v0 }
  0x7d   : > { %437 = vst [vmem:[#allocation2 + $0xe0] sm:$0xff] %v3330_v0 }
  0x7e   : > { %438 = vst [vmem:[#allocation2 + $0x188] sm:$0xff] %v3330_v0 }
  0x7f   : > { %439 = vst [vmem:[#allocation2 + $0x138] sm:$0xff] %v3330_v0 }
  0x80   : > { %440 = vst [vmem:[#allocation2 + $0x140] sm:$0xff] %v3330_v0 }
  0x81   : > { %441 = vst [vmem:[#allocation2 + $0x80] sm:$0xff] %v3330_v0 }
  0x82   : > { %442 = vst [vmem:[#allocation2 + $0x1a8] sm:$0xff] %v3330_v0 }
  0x83   : > { %443 = vst [vmem:[#allocation2 + $0x1b8] sm:$0xff] %v3330_v0 }
  0x84   : > { %444 = vst [vmem:[#allocation2 + $0x28] sm:$0xff] %v3330_v0 }
  0x85   : > { %445 = vst [vmem:[#allocation2 + $0x1e8] sm:$0xff] %v3330_v0 }
  0x86   : > { %446 = vst [vmem:[#allocation2 + $0xf8] sm:$0xff] %v3330_v0 }
  0x87   : > { %447 = vst [vmem:[#allocation2 + $0x160] sm:$0xff] %v3330_v0 }
  0x88   : > { %448 = vst [vmem:[#allocation2 + $0x30] sm:$0xff] %v3330_v0 }
  0x89   : > { %449 = vst [vmem:[#allocation2 + $0x1e0] sm:$0xff] %v3330_v0 }
  0x8a   : > { %450 = vst [vmem:[#allocation2] sm:$0xff] %v3330_v0 }
  0x8b   : > { %451 = vst [vmem:[#allocation2 + $0xf0] sm:$0xff] %v3330_v0 }
  0x8c   : > { %452 = vst [vmem:[#allocation2 + $0x8] sm:$0xff] %v3330_v0 }
  0x8d   : > { %453 = vst [vmem:[#allocation2 + $0x148] sm:$0xff] %v3330_v0 }
  0x8e   : > { %454 = vst [vmem:[#allocation2 + $0x1d0] sm:$0xff] %v3330_v0 }
  0x8f   : > { %455 = vst [vmem:[#allocation2 + $0x100] sm:$0xff] %v3330_v0 }
  0x90   : > { %456 = vst [vmem:[#allocation2 + $0xc8] sm:$0xff] %v3330_v0 }
  0x91   : > { %457 = vst [vmem:[#allocation2 + $0x40] sm:$0xff] %v3330_v0 }
  0x92   : > { %458 = vst [vmem:[#allocation2 + $0x1f8] sm:$0xff] %v3330_v0 }
  0x93   : > { %459 = vst [vmem:[#allocation2 + $0x20] sm:$0xff] %v3330_v0 }
  0x94   : > { %460 = vst [vmem:[#allocation2 + $0x128] sm:$0xff] %v3330_v0 }
  0x95   : > { %461 = vst [vmem:[#allocation2 + $0x1a0] sm:$0xff] %v3330_v0 }
  0x96   : > { %462 = vst [vmem:[#allocation2 + $0x1f0] sm:$0xff] %v3330_v0 }
  0x97   : > { %463 = vst [vmem:[#allocation2 + $0xe8] sm:$0xff] %v3330_v0 }
  0x98   : > { %464 = vst [vmem:[#allocation2 + $0x78] sm:$0xff] %v3330_v0 }
  0x99   : > { %465 = vst [vmem:[#allocation2 + $0x70] sm:$0xff] %v3330_v0 }
  0x9a   : > { %466 = vst [vmem:[#allocation2 + $0x90] sm:$0xff] %v3330_v0 }
  0x9b   : > { %467 = vst [vmem:[#allocation2 + $0x1d8] sm:$0xff] %v3330_v0 }
  0x9c   : > { %468 = vst [vmem:[#allocation2 + $0xd0] sm:$0xff] %v3330_v0 }
  0x9d   : > { %469 = vst [vmem:[#allocation2 + $0xb8] sm:$0xff] %v3330_v0 }
  0x9e   : > { %470 = vst [vmem:[#allocation2 + $0x88] sm:$0xff] %v3330_v0 }
  0x9f   : > { %471 = vst [vmem:[#allocation2 + $0xa8] sm:$0xff] %v3330_v0 }
  0xa0   : > { %472 = vst [vmem:[#allocation2 + $0x1c8] sm:$0xff] %v3330_v0 }
  0xa1   : > { %473 = vst [vmem:[#allocation2 + $0x170] sm:$0xff] %v3330_v0 }
  0xa2   : > { %474 = vst [vmem:[#allocation2 + $0x178] sm:$0xff] %v3330_v0 }
  0xa3   : > { %475 = vst [vmem:[#allocation2 + $0x68] sm:$0xff] %v3330_v0 }
  0xa4   : > { %476 = vst [vmem:[#allocation2 + $0x190] sm:$0xff] %v3330_v0 }
  0xa5   : > { %477 = vst [vmem:[#allocation2 + $0x198] sm:$0xff] %v3330_v0 }
  0xa6   : > { %478 = vst [vmem:[#allocation2 + $0x38] sm:$0xff] %v3330_v0 }
  0xa7   : > { %479 = vst [vmem:[#allocation2 + $0xc0] sm:$0xff] %v3330_v0 }
  0xa8   : > { %480 = vst [vmem:[#allocation2 + $0x1c0] sm:$0xff] %v3330_v0 }
  0xa9   : > { %481 = vst [vmem:[#allocation2 + $0x158] sm:$0xff] %v3330_v0 }
  0xaa   : > { %482 = vst [vmem:[#allocation2 + $0x10] sm:$0xff] %v3330_v0 }
  0xab   : > { %483 = vst [vmem:[#allocation2 + $0x58] sm:$0xff] %v3330_v0 }
  0xac   : > { %484 = vst [vmem:[#allocation2 + $0xa0] sm:$0xff] %v3330_v0 }
  0xad PF: > { %v2885_v1 = vld [vmem:[%s3551_s26 + $0x70] sm:$0xf]  ;;  %v3167_v2 = vld [vmem:[%s3551_s26 + $0x74] sm:$0xf0]  ;;  %v2877_v12 = vld [vmem:[%s3551_s26 + $0x60] sm:$0xf] }
  0xae   : > { %v2949_v3 = vld [vmem:[%s3551_s26 + $0xf0] sm:$0xf]  ;;  %v2886_v4 = vor.u32 %v3167_v2, %v2885_v1  ;;  %v3183_v5 = vld [vmem:[%s3551_s26 + $0xf4] sm:$0xf0]  ;;  %v3165_v14 = vld [vmem:[%s3551_s26 + $0x64] sm:$0xf0] }
  0xaf   : > { %v3013_v6 = vld [vmem:[%s3551_s26 + $0x170] sm:$0xf]  ;;  %v3199_v7 = vld [vmem:[%s3551_s26 + $0x174] sm:$0xf0]  ;;  %v2950_v8 = vor.u32 %v3183_v5, %v2949_v3  ;;  %v2941_v15 = vld [vmem:[%s3551_s26 + $0xe0] sm:$0xf]  ;;  %v2878_v17 = vor.u32 %v3165_v14, %v2877_v12 }
  0xb0   : > { %v3014_v9 = vor.u32 %v3199_v7, %v3013_v6  ;;  %v3077_v10 = vld [vmem:[%s3551_s26 + $0x1f0] sm:$0xf]  ;;  %v3215_v11 = vld [vmem:[%s3551_s26 + $0x1f4] sm:$0xf0]  ;;  %1317 = vmatpush.bf16.msra.mxu0 %v2886_v4  ;;  %v3181_v16 = vld [vmem:[%s3551_s26 + $0xe4] sm:$0xf0] }
  0xb1   : > { %v3078_v13 = vor.u32 %v3215_v11, %v3077_v10  ;;  %1406 = vmatpush.bf16.msra.mxu1 %v2950_v8  ;;  %v2942_v18 = vor.u32 %v3181_v16, %v2941_v15  ;;  %v3005_v19 = vld [vmem:[%s3551_s26 + $0x160] sm:$0xf]  ;;  %v3197_v20 = vld [vmem:[%s3551_s26 + $0x164] sm:$0xf0]  ;;  %v2869_v24 = vld [vmem:[%s3551_s26 + $0x50] sm:$0xf] }
  0xb2   : > { %1495 = vmatpush.bf16.msra.mxu2 %v3014_v9  ;;  %v3069_v21 = vld [vmem:[%s3551_s26 + $0x1e0] sm:$0xf]  ;;  %v3006_v22 = vor.u32 %v3197_v20, %v3005_v19  ;;  %v3213_v23 = vld [vmem:[%s3551_s26 + $0x1e4] sm:$0xf0]  ;;  %v3163_v25 = vld [vmem:[%s3551_s26 + $0x54] sm:$0xf0] }
  0xb3   : > { %1584 = vmatpush.bf16.msra.mxu3 %v3078_v13  ;;  %v3070_v26 = vor.u32 %v3213_v23, %v3069_v21  ;;  %v2933_v27 = vld [vmem:[%s3551_s26 + $0xd0] sm:$0xf]  ;;  %v3179_v28 = vld [vmem:[%s3551_s26 + $0xd4] sm:$0xf0]  ;;  %v2870_v30 = vor.u32 %v3163_v25, %v2869_v24  ;;  %v2861_v36 = vld [vmem:[%s3551_s26 + $0x40] sm:$0xf] }
  0xb4   : > { %v2997_v29 = vld [vmem:[%s3551_s26 + $0x150] sm:$0xf]  ;;  %1318 = vmatpush.bf16.msra.mxu0 %v2878_v17  ;;  %v3195_v31 = vld [vmem:[%s3551_s26 + $0x154] sm:$0xf0]  ;;  %v2934_v34 = vor.u32 %v3179_v28, %v2933_v27  ;;  %v3161_v37 = vld [vmem:[%s3551_s26 + $0x44] sm:$0xf0] }
  0xb5   : > { %v3061_v32 = vld [vmem:[%s3551_s26 + $0x1d0] sm:$0xf]  ;;  %v3211_v33 = vld [vmem:[%s3551_s26 + $0x1d4] sm:$0xf0]  ;;  %1407 = vmatpush.bf16.msra.mxu1 %v2942_v18  ;;  %v2998_v35 = vor.u32 %v3195_v31, %v2997_v29  ;;  %v2925_v38 = vld [vmem:[%s3551_s26 + $0xc0] sm:$0xf]  ;;  %v2862_v45 = vor.u32 %v3161_v37, %v2861_v36 }
  0xb6   : > { %1496 = vmatpush.bf16.msra.mxu2 %v3006_v22  ;;  %v3062_v39 = vor.u32 %v3211_v33, %v3061_v32  ;;  %v3177_v40 = vld [vmem:[%s3551_s26 + $0xc4] sm:$0xf0]  ;;  %v2989_v41 = vld [vmem:[%s3551_s26 + $0x140] sm:$0xf]  ;;  %v2853_v48 = vld [vmem:[%s3551_s26 + $0x30] sm:$0xf] }
  0xb7   : > { %1585 = vmatpush.bf16.msra.mxu3 %v3070_v26  ;;  %v3193_v42 = vld [vmem:[%s3551_s26 + $0x144] sm:$0xf0]  ;;  %v3053_v43 = vld [vmem:[%s3551_s26 + $0x1c0] sm:$0xf]  ;;  %v2926_v46 = vor.u32 %v3177_v40, %v2925_v38  ;;  %v3159_v49 = vld [vmem:[%s3551_s26 + $0x34] sm:$0xf0] }
  0xb8   : > { %v3209_v44 = vld [vmem:[%s3551_s26 + $0x1c4] sm:$0xf0]  ;;  %1319 = vmatpush.bf16.msra.mxu0 %v2870_v30  ;;  %v2990_v47 = vor.u32 %v3193_v42, %v2989_v41  ;;  %v2917_v50 = vld [vmem:[%s3551_s26 + $0xb0] sm:$0xf]  ;;  %v3175_v52 = vld [vmem:[%s3551_s26 + $0xb4] sm:$0xf0]  ;;  %v2854_v57 = vor.u32 %v3159_v49, %v2853_v48 }
  0xb9   : > { %1408 = vmatpush.bf16.msra.mxu1 %v2934_v34  ;;  %v3054_v51 = vor.u32 %v3209_v44, %v3053_v43  ;;  %v2981_v53 = vld [vmem:[%s3551_s26 + $0x130] sm:$0xf]  ;;  %v3191_v54 = vld [vmem:[%s3551_s26 + $0x134] sm:$0xf0]  ;;  %v2918_v58 = vor.u32 %v3175_v52, %v2917_v50  ;;  %v2845_v60 = vld [vmem:[%s3551_s26 + $0x20] sm:$0xf] }
  0xba   : > { %1497 = vmatpush.bf16.msra.mxu2 %v2998_v35  ;;  %v3045_v55 = vld [vmem:[%s3551_s26 + $0x1b0] sm:$0xf]  ;;  %v3207_v56 = vld [vmem:[%s3551_s26 + $0x1b4] sm:$0xf0]  ;;  %v2982_v59 = vor.u32 %v3191_v54, %v2981_v53  ;;  %v3157_v61 = vld [vmem:[%s3551_s26 + $0x24] sm:$0xf0] }
  0xbb   : > { %1586 = vmatpush.bf16.msra.mxu3 %v3062_v39  ;;  %v2909_v62 = vld [vmem:[%s3551_s26 + $0xa0] sm:$0xf]  ;;  %v3046_v63 = vor.u32 %v3207_v56, %v3045_v55  ;;  %v3173_v0 = vld [vmem:[%s3551_s26 + $0xa4] sm:$0xf0]  ;;  %v2846_v5 = vor.u32 %v3157_v61, %v2845_v60  ;;  %v2837_v8 = vld [vmem:[%s3551_s26 + $0x10] sm:$0xf] }
  0xbc   : > { %1320 = vmatpush.bf16.msra.mxu0 %v2862_v45  ;;  %v2973_v1 = vld [vmem:[%s3551_s26 + $0x120] sm:$0xf]  ;;  %v3189_v2 = vld [vmem:[%s3551_s26 + $0x124] sm:$0xf0]  ;;  %v2910_v6 = vor.u32 %v3173_v0, %v2909_v62  ;;  %v3155_v9 = vld [vmem:[%s3551_s26 + $0x14] sm:$0xf0] }
  0xbd   : > { %1409 = vmatpush.bf16.msra.mxu1 %v2926_v46  ;;  %v3037_v3 = vld [vmem:[%s3551_s26 + $0x1a0] sm:$0xf]  ;;  %v3205_v4 = vld [vmem:[%s3551_s26 + $0x1a4] sm:$0xf0]  ;;  %v2974_v7 = vor.u32 %v3189_v2, %v2973_v1  ;;  %v2901_v10 = vld [vmem:[%s3551_s26 + $0x90] sm:$0xf]  ;;  %v2838_v18 = vor.u32 %v3155_v9, %v2837_v8 }
  0xbe   : > { %1498 = vmatpush.bf16.msra.mxu2 %v2990_v47  ;;  %v3038_v11 = vor.u32 %v3205_v4, %v3037_v3  ;;  %v3171_v12 = vld [vmem:[%s3551_s26 + $0x94] sm:$0xf0]  ;;  %v2965_v13 = vld [vmem:[%s3551_s26 + $0x110] sm:$0xf]  ;;  %v2829_v17 = vld [vmem:[%s3551_s26] sm:$0xf] }
  0xbf   : > { %1587 = vmatpush.bf16.msra.mxu3 %v3054_v51  ;;  %v3187_v14 = vld [vmem:[%s3551_s26 + $0x114] sm:$0xf0]  ;;  %v3029_v15 = vld [vmem:[%s3551_s26 + $0x190] sm:$0xf]  ;;  %v3153_v19 = vld [vmem:[%s3551_s26 + $0x4] sm:$0xf0]  ;;  %v2902_v22 = vor.u32 %v3171_v12, %v2901_v10 }
  0xc0   : > { %1321 = vmatpush.bf16.msra.mxu0 %v2854_v57  ;;  %v3203_v16 = vld [vmem:[%s3551_s26 + $0x194] sm:$0xf0]  ;;  %v2893_v20 = vld [vmem:[%s3551_s26 + $0x80] sm:$0xf]  ;;  %v3169_v21 = vld [vmem:[%s3551_s26 + $0x84] sm:$0xf0]  ;;  %v2966_v23 = vor.u32 %v3187_v14, %v2965_v13  ;;  %v2830_v34 = vor.u32 %v3153_v19, %v2829_v17 }
  0xc1   : > { %1410 = vmatpush.bf16.msra.mxu1 %v2918_v58  ;;  %v2957_v24 = vld [vmem:[%s3551_s26 + $0x100] sm:$0xf]  ;;  %v3185_v25 = vld [vmem:[%s3551_s26 + $0x104] sm:$0xf0]  ;;  %v3030_v27 = vor.u32 %v3203_v16, %v3029_v15  ;;  %v3090_v30 = vld [vmem:[%s3558_s12 + $0xc] sm:$0xf0]  ;;  %v2894_v38 = vor.u32 %v3169_v21, %v2893_v20 }
  0xc2   : > { %1499 = vmatpush.bf16.msra.mxu2 %v2982_v59  ;;  %v3021_v26 = vld [vmem:[%s3551_s26 + $0x180] sm:$0xf]  ;;  %v3201_v28 = vld [vmem:[%s3551_s26 + $0x184] sm:$0xf0]  ;;  %v3088_v31 = vld [vmem:[%s3558_s12 + $0x4] sm:$0xf]  ;;  %v2958_v39 = vor.u32 %v3185_v25, %v2957_v24 }
  0xc3   : > { %1588 = vmatpush.bf16.msra.mxu3 %v3046_v63  ;;  %v2573_v29 = vld [vmem:[%s3558_s12] sm:$0xf]  ;;  %v3198_v32 = vld [vmem:[%s3551_s26 + $0x174] sm:$0xf]  ;;  %v3015_v33 = vld [vmem:[%s3551_s26 + $0x178] sm:$0xf0]  ;;  %v3022_v43 = vor.u32 %v3201_v28, %v3021_v26 }
  0xc4   : > { %1322 = vmatpush.bf16.msra.mxu0 %v2846_v5  ;;  %v2575_v35 = vld [vmem:[%s3558_s12 + $0x10] sm:$0xf0]  ;;  %v3079_v37 = vld [vmem:[%s3551_s26 + $0x1f8] sm:$0xf0]  ;;  %v2581_v40 = vld [vmem:[%s3558_s12 + $0x8] sm:$0xf]  ;;  %v3018_v45 = vor.u32 %v3198_v32, %v3015_v33  ;;  %v3703_v48 = vor.u32 %v3090_v30, %v2573_v29 }
  0xc5   : > { %1411 = vmatpush.bf16.msra.mxu1 %v2910_v6  ;;  %v3214_v36 = vld [vmem:[%s3551_s26 + $0x1f4] sm:$0xf]  ;;  %v3091_v41 = vld [vmem:[%s3558_s12 + $0x14] sm:$0xf0]  ;;  %v3089_v42 = vld [vmem:[%s3558_s12 + $0xc] sm:$0xf]  ;;  %v3707_v52 = vor.u32 %v3088_v31, %v2575_v35 }
  0xc6   : > { %1500 = vmatpush.bf16.msra.mxu2 %v2974_v7  ;;  %v2583_v44 = vld [vmem:[%s3558_s12 + $0x18] sm:$0xf0]  ;;  %v3166_v46 = vld [vmem:[%s3551_s26 + $0x74] sm:$0xf]  ;;  %v3082_v49 = vor.u32 %v3214_v36, %v3079_v37  ;;  %v3709_v53 = vor.u32 %v3091_v41, %v2581_v40  ;;  %v3196_v57 = vld [vmem:[%s3551_s26 + $0x164] sm:$0xf] }
  0xc7   : > { %1589 = vmatpush.bf16.msra.mxu3 %v3038_v11  ;;  %v2887_v47 = vld [vmem:[%s3551_s26 + $0x78] sm:$0xf0]  ;;  %v3182_v50 = vld [vmem:[%s3551_s26 + $0xf4] sm:$0xf]  ;;  %v3711_v54 = vor.u32 %v3089_v42, %v2583_v44  ;;  %v3007_v58 = vld [vmem:[%s3551_s26 + $0x168] sm:$0xf0] }
  0xc8   : > { %1323 = vmatpush.bf16.msra.mxu0 %v2838_v18  ;;  %v2951_v51 = vld [vmem:[%s3551_s26 + $0xf8] sm:$0xf0]  ;;  %v2890_v55 = vor.u32 %v3166_v46, %v2887_v47  ;;  %v3212_v59 = vld [vmem:[%s3551_s26 + $0x1e4] sm:$0xf]  ;;  %v3010_v60 = vor.u32 %v3196_v57, %v3007_v58  ;;  %v3071_v61 = vld [vmem:[%s3551_s26 + $0x1e8] sm:$0xf0] }
  0xc9   : > { %1412 = vmatpush.bf16.msra.mxu1 %v2902_v22  ;;  %v2954_v56 = vor.u32 %v3182_v50, %v2951_v51  ;;  %v3164_v62 = vld [vmem:[%s3551_s26 + $0x64] sm:$0xf]  ;;  %v2879_v63 = vld [vmem:[%s3551_s26 + $0x68] sm:$0xf0]  ;;  %v3074_v0 = vor.u32 %v3212_v59, %v3071_v61  ;;  %v2589_v5 = vld [vmem:[%s3558_s12 + $0x20] sm:$0xf] }
  0xca   : > { %1501 = vmatpush.bf16.msra.mxu2 %v2966_v23  ;;  %v2882_v1 = vor.u32 %v3164_v62, %v2879_v63  ;;  %v3180_v2 = vld [vmem:[%s3551_s26 + $0xe4] sm:$0xf]  ;;  %v2943_v3 = vld [vmem:[%s3551_s26 + $0xe8] sm:$0xf0]  ;;  %v3094_v6 = vld [vmem:[%s3558_s12 + $0x2c] sm:$0xf0] }
  0xcb   : > { %1590 = vmatpush.bf16.msra.mxu3 %v3030_v27  ;;  %v2946_v4 = vor.u32 %v3180_v2, %v2943_v3  ;;  %v3092_v7 = vld [vmem:[%s3558_s12 + $0x24] sm:$0xf]  ;;  %v2591_v8 = vld [vmem:[%s3558_s12 + $0x30] sm:$0xf0]  ;;  %v2597_v9 = vld [vmem:[%s3558_s12 + $0x28] sm:$0xf]  ;;  %v3733_v13 = vor.u32 %v3094_v6, %v2589_v5 }
  0xcc   : > { %1324 = vmatpush.bf16.msra.mxu0 %v2830_v34  ;;  %v3095_v10 = vld [vmem:[%s3558_s12 + $0x34] sm:$0xf0]  ;;  %v3093_v11 = vld [vmem:[%s3558_s12 + $0x2c] sm:$0xf]  ;;  %v2599_v12 = vld [vmem:[%s3558_s12 + $0x38] sm:$0xf0]  ;;  %v3735_v14 = vor.u32 %v3092_v7, %v2591_v8 }
  0xcd   : > { %1413 = vmatpush.bf16.msra.mxu1 %v2894_v38  ;;  %v3737_v15 = vor.u32 %v3095_v10, %v2597_v9  ;;  %v3739_v16 = vor.u32 %v3093_v11, %v2599_v12  ;;  %v2605_v17 = vld [vmem:[%s3558_s12 + $0x40] sm:$0xf]  ;;  %v3098_v18 = vld [vmem:[%s3558_s12 + $0x4c] sm:$0xf0]  ;;  %v3096_v19 = vld [vmem:[%s3558_s12 + $0x44] sm:$0xf] }
  0xce   : > { %1502 = vmatpush.bf16.msra.mxu2 %v2958_v39  ;;  %v2607_v20 = vld [vmem:[%s3558_s12 + $0x50] sm:$0xf0]  ;;  %v2613_v21 = vld [vmem:[%s3558_s12 + $0x48] sm:$0xf]  ;;  %v3099_v22 = vld [vmem:[%s3558_s12 + $0x54] sm:$0xf0]  ;;  %v3753_v25 = vor.u32 %v3098_v18, %v2605_v17 }
  0xcf   : > { %1591 = vmatpush.bf16.msra.mxu3 %v3022_v43  ;;  %1325 = vmatmul.bf16.vlgmr.msra.gmra.mxu0 %v3703_v48  ;;  %v3097_v23 = vld [vmem:[%s3558_s12 + $0x4c] sm:$0xf]  ;;  %v2615_v24 = vld [vmem:[%s3558_s12 + $0x58] sm:$0xf0]  ;;  %v3755_v26 = vor.u32 %v3096_v19, %v2607_v20  ;;  %v3757_v27 = vor.u32 %v3099_v22, %v2613_v21  ;;  %v3194_v29 = vld [vmem:[%s3551_s26 + $0x154] sm:$0xf] }
  0xd0   : > { %1414 = vmatmul.bf16.vlgmr.msra.gmra.mxu1 %v3707_v52  ;;  %1673 = vmatpush.bf16.msrb.mxu0 %v2890_v55  ;;  %v3759_v28 = vor.u32 %v3097_v23, %v2615_v24  ;;  %v2999_v30 = vld [vmem:[%s3551_s26 + $0x158] sm:$0xf0]  ;;  %v3210_v31 = vld [vmem:[%s3551_s26 + $0x1d4] sm:$0xf]  ;;  %v2621_v41 = vld [vmem:[%s3558_s12 + $0x60] sm:$0xf] }
  0xd1   : > { %1503 = vmatmul.bf16.vlgmr.msra.gmra.mxu2 %v3709_v53  ;;  %1762 = vmatpush.bf16.msrb.mxu1 %v2954_v56  ;;  %v3002_v32 = vor.u32 %v3194_v29, %v2999_v30  ;;  %v3063_v33 = vld [vmem:[%s3551_s26 + $0x1d8] sm:$0xf0]  ;;  %v3162_v34 = vld [vmem:[%s3551_s26 + $0x54] sm:$0xf]  ;;  %v3102_v42 = vld [vmem:[%s3558_s12 + $0x6c] sm:$0xf0] }
  0xd2   : > { %1851 = vmatpush.bf16.msrb.mxu2 %v3018_v45  ;;  %1592 = vmatmul.bf16.vlgmr.msra.gmra.mxu3 %v3711_v54  ;;  %v2871_v35 = vld [vmem:[%s3551_s26 + $0x58] sm:$0xf0]  ;;  %v3066_v36 = vor.u32 %v3210_v31, %v3063_v33  ;;  %v3178_v38 = vld [vmem:[%s3551_s26 + $0xd4] sm:$0xf]  ;;  %v3100_v43 = vld [vmem:[%s3558_s12 + $0x64] sm:$0xf]  ;;  %v3781_v50 = vor.u32 %v3102_v42, %v2621_v41 }
  0xd3   : > { %1940 = vmatpush.bf16.msrb.mxu3 %v3082_v49  ;;  %v2874_v37 = vor.u32 %v3162_v34, %v2871_v35  ;;  %v2935_v39 = vld [vmem:[%s3551_s26 + $0xd8] sm:$0xf0]  ;;  %v2623_v44 = vld [vmem:[%s3558_s12 + $0x70] sm:$0xf0]  ;;  %v2629_v45 = vld [vmem:[%s3558_s12 + $0x68] sm:$0xf] }
  0xd4   : > { %1674 = vmatpush.bf16.msrb.mxu0 %v2882_v1  ;;  %v2938_v40 = vor.u32 %v3178_v38, %v2935_v39  ;;  %v3103_v46 = vld [vmem:[%s3558_s12 + $0x74] sm:$0xf0]  ;;  %v3101_v47 = vld [vmem:[%s3558_s12 + $0x6c] sm:$0xf]  ;;  %v2631_v49 = vld [vmem:[%s3558_s12 + $0x78] sm:$0xf0]  ;;  %v3783_v51 = vor.u32 %v3100_v43, %v2623_v44 }
  0xd5   : > { %1763 = vmatpush.bf16.msrb.mxu1 %v2946_v4  ;;  %v3785_v55 = vor.u32 %v3103_v46, %v2629_v45  ;;  %v3787_v56 = vor.u32 %v3101_v47, %v2631_v49  ;;  %v2637_v57 = vld [vmem:[%s3558_s12 + $0x80] sm:$0xf]  ;;  %v3106_v58 = vld [vmem:[%s3558_s12 + $0x8c] sm:$0xf0]  ;;  %v3104_v59 = vld [vmem:[%s3558_s12 + $0x84] sm:$0xf] }
  0xd6   : > { %1852 = vmatpush.bf16.msrb.mxu2 %v3010_v60  ;;  %v2639_v60 = vld [vmem:[%s3558_s12 + $0x90] sm:$0xf0]  ;;  %v2645_v61 = vld [vmem:[%s3558_s12 + $0x88] sm:$0xf]  ;;  %v3107_v62 = vld [vmem:[%s3558_s12 + $0x94] sm:$0xf0]  ;;  %v3801_v1 = vor.u32 %v3106_v58, %v2637_v57 }
  0xd7   : > { %1941 = vmatpush.bf16.msrb.mxu3 %v3074_v0  ;;  %v3105_v63 = vld [vmem:[%s3558_s12 + $0x8c] sm:$0xf]  ;;  %v2647_v0 = vld [vmem:[%s3558_s12 + $0x98] sm:$0xf0]  ;;  %v3803_v2 = vor.u32 %v3104_v59, %v2639_v60  ;;  %v3805_v3 = vor.u32 %v3107_v62, %v2645_v61  ;;  %v3192_v5 = vld [vmem:[%s3551_s26 + $0x144] sm:$0xf] }
  0xd8   : > { %1675 = vmatpush.bf16.msrb.mxu0 %v2874_v37  ;;  %v3807_v4 = vor.u32 %v3105_v63, %v2647_v0  ;;  %v2991_v6 = vld [vmem:[%s3551_s26 + $0x148] sm:$0xf0]  ;;  %v3208_v7 = vld [vmem:[%s3551_s26 + $0x1c4] sm:$0xf]  ;;  %v2653_v21 = vld [vmem:[%s3558_s12 + $0xa0] sm:$0xf] }
  0xd9   : > { %1764 = vmatpush.bf16.msrb.mxu1 %v2938_v40  ;;  %v2994_v8 = vor.u32 %v3192_v5, %v2991_v6  ;;  %v3055_v9 = vld [vmem:[%s3551_s26 + $0x1c8] sm:$0xf0]  ;;  %v3160_v10 = vld [vmem:[%s3551_s26 + $0x44] sm:$0xf]  ;;  %v3110_v22 = vld [vmem:[%s3558_s12 + $0xac] sm:$0xf0] }
  0xda   : > { %1853 = vmatpush.bf16.msrb.mxu2 %v3002_v32  ;;  %v2863_v11 = vld [vmem:[%s3551_s26 + $0x48] sm:$0xf0]  ;;  %v3058_v12 = vor.u32 %v3208_v7, %v3055_v9  ;;  %v3176_v18 = vld [vmem:[%s3551_s26 + $0xc4] sm:$0xf]  ;;  %v2655_v24 = vld [vmem:[%s3558_s12 + $0xb0] sm:$0xf0]  ;;  %v3829_v33 = vor.u32 %v3110_v22, %v2653_v21 }
  0xdb   : > { %1942 = vmatpush.bf16.msrb.mxu3 %v3066_v36  ;;  %v2866_v17 = vor.u32 %v3160_v10, %v2863_v11  ;;  %v2927_v19 = vld [vmem:[%s3551_s26 + $0xc8] sm:$0xf0]  ;;  %v3108_v23 = vld [vmem:[%s3558_s12 + $0xa4] sm:$0xf]  ;;  %v2661_v29 = vld [vmem:[%s3558_s12 + $0xa8] sm:$0xf] }
  0xdc   : > { %v2930_v20 = vor.u32 %v3176_v18, %v2927_v19  ;;  %v3111_v30 = vld [vmem:[%s3558_s12 + $0xb4] sm:$0xf0]  ;;  %v3109_v31 = vld [vmem:[%s3558_s12 + $0xac] sm:$0xf]  ;;  %v2663_v32 = vld [vmem:[%s3558_s12 + $0xb8] sm:$0xf0]  ;;  %v3831_v34 = vor.u32 %v3108_v23, %v2655_v24 }
  0xdd   : > { %1676 = vmatpush.bf16.msrb.mxu0 %v2866_v17  ;;  %v3833_v35 = vor.u32 %v3111_v30, %v2661_v29  ;;  %v3835_v36 = vor.u32 %v3109_v31, %v2663_v32  ;;  %v2669_v37 = vld [vmem:[%s3558_s12 + $0xc0] sm:$0xf]  ;;  %v3114_v38 = vld [vmem:[%s3558_s12 + $0xcc] sm:$0xf0]  ;;  %v3112_v39 = vld [vmem:[%s3558_s12 + $0xc4] sm:$0xf] }
  0xde   : > { %1854 = vmatpush.bf16.msrb.mxu2 %v2994_v8  ;;  %1765 = vmatpush.bf16.msrb.mxu1 %v2930_v20  ;;  %v2671_v40 = vld [vmem:[%s3558_s12 + $0xd0] sm:$0xf0]  ;;  %v2677_v41 = vld [vmem:[%s3558_s12 + $0xc8] sm:$0xf]  ;;  %v3115_v42 = vld [vmem:[%s3558_s12 + $0xd4] sm:$0xf0]  ;;  %v3849_v45 = vor.u32 %v3114_v38, %v2669_v37 }
  0xdf   : > { %1330 = vmatmul.bf16.gmra.mxu0 %v3733_v13  ;;  %1943 = vmatpush.bf16.msrb.mxu3 %v3058_v12  ;;  %v3113_v43 = vld [vmem:[%s3558_s12 + $0xcc] sm:$0xf]  ;;  %v2679_v44 = vld [vmem:[%s3558_s12 + $0xd8] sm:$0xf0]  ;;  %v3851_v46 = vor.u32 %v3112_v39, %v2671_v40  ;;  %v3853_v47 = vor.u32 %v3115_v42, %v2677_v41  ;;  %v3190_v57 = vld [vmem:[%s3551_s26 + $0x134] sm:$0xf] }
  0xe0   : > { %1419 = vmatmul.bf16.gmra.mxu1 %v3735_v14  ;;  %v3855_v49 = vor.u32 %v3113_v43, %v2679_v44  ;;  %v2983_v58 = vld [vmem:[%s3551_s26 + $0x138] sm:$0xf0]  ;;  %v3206_v59 = vld [vmem:[%s3551_s26 + $0x1b4] sm:$0xf]  ;;  %v2685_v63 = vld [vmem:[%s3558_s12 + $0xe0] sm:$0xf] }
  0xe1   : > { %1508 = vmatmul.bf16.gmra.mxu2 %v3737_v15  ;;  %v2986_v60 = vor.u32 %v3190_v57, %v2983_v58  ;;  %v3047_v61 = vld [vmem:[%s3551_s26 + $0x1b8] sm:$0xf0]  ;;  %v3118_v0 = vld [vmem:[%s3558_s12 + $0xec] sm:$0xf0]  ;;  %v3116_v5 = vld [vmem:[%s3558_s12 + $0xe4] sm:$0xf] }
  0xe2   : > { %1597 = vmatmul.bf16.gmra.mxu3 %v3739_v16  ;;  %v3050_v62 = vor.u32 %v3206_v59, %v3047_v61  ;;  %v2687_v6 = vld [vmem:[%s3558_s12 + $0xf0] sm:$0xf0]  ;;  %v2693_v7 = vld [vmem:[%s3558_s12 + $0xe8] sm:$0xf]  ;;  %v3119_v8 = vld [vmem:[%s3558_s12 + $0xf4] sm:$0xf0]  ;;  %v3876_v18 = vor.u32 %v3118_v0, %v2685_v63 }
  0xe3   : > { %1855 = vmatpush.bf16.msrb.mxu2 %v2986_v60  ;;  %v3117_v9 = vld [vmem:[%s3558_s12 + $0xec] sm:$0xf]  ;;  %v2695_v10 = vld [vmem:[%s3558_s12 + $0xf8] sm:$0xf0]  ;;  %v3158_v11 = vld [vmem:[%s3551_s26 + $0x34] sm:$0xf]  ;;  %v3879_v21 = vor.u32 %v3116_v5, %v2687_v6  ;;  %v3881_v22 = vor.u32 %v3119_v8, %v2693_v7 }
  0xe4   : > { %1944 = vmatpush.bf16.msrb.mxu3 %v3050_v62  ;;  %v2855_v12 = vld [vmem:[%s3551_s26 + $0x38] sm:$0xf0]  ;;  %v3174_v17 = vld [vmem:[%s3551_s26 + $0xb4] sm:$0xf]  ;;  %v3883_v24 = vor.u32 %v3117_v9, %v2695_v10  ;;  %v2701_v29 = vld [vmem:[%s3558_s12 + $0x100] sm:$0xf] }
  0xe5   : > { %v2858_v19 = vor.u32 %v3158_v11, %v2855_v12  ;;  %v2919_v20 = vld [vmem:[%s3551_s26 + $0xb8] sm:$0xf0]  ;;  %v3122_v30 = vld [vmem:[%s3558_s12 + $0x10c] sm:$0xf0]  ;;  %v3120_v31 = vld [vmem:[%s3558_s12 + $0x104] sm:$0xf] }
  0xe6   : > { %v2922_v23 = vor.u32 %v3174_v17, %v2919_v20  ;;  %v2703_v32 = vld [vmem:[%s3558_s12 + $0x110] sm:$0xf0]  ;;  %v2709_v37 = vld [vmem:[%s3558_s12 + $0x108] sm:$0xf]  ;;  %v3123_v38 = vld [vmem:[%s3558_s12 + $0x114] sm:$0xf0]  ;;  %v3897_v41 = vor.u32 %v3122_v30, %v2701_v29 }
  0xe7   : > { %1677 = vmatpush.bf16.msrb.mxu0 %v2858_v19  ;;  %v3121_v39 = vld [vmem:[%s3558_s12 + $0x10c] sm:$0xf]  ;;  %v2711_v40 = vld [vmem:[%s3558_s12 + $0x118] sm:$0xf0]  ;;  %v3899_v43 = vor.u32 %v3120_v31, %v2703_v32  ;;  %v3901_v44 = vor.u32 %v3123_v38, %v2709_v37  ;;  %v3188_v60 = vld [vmem:[%s3551_s26 + $0x124] sm:$0xf] }
  0xe8   : > { %1766 = vmatpush.bf16.msrb.mxu1 %v2922_v23  ;;  %v3903_v58 = vor.u32 %v3121_v39, %v2711_v40  ;;  %v2975_v61 = vld [vmem:[%s3551_s26 + $0x128] sm:$0xf0]  ;;  %v3204_v62 = vld [vmem:[%s3551_s26 + $0x1a4] sm:$0xf]  ;;  %v485_v10 = vld [vmem:[#allocation2 + $0xb0] sm:$0xff]  ;;  %p3083_p13 = scmp.ne.s32.totalorder %s3312_s14, 4 }
  0xe9   : > { %v2978_v0 = vor.u32 %v3188_v60, %v2975_v61  ;;  %v3039_v5 = vld [vmem:[%s3551_s26 + $0x1a8] sm:$0xf0]  ;;  %v2717_v17 = vld [vmem:[%s3558_s12 + $0x120] sm:$0xf]  ;;  %v3126_v19 = vld [vmem:[%s3558_s12 + $0x12c] sm:$0xf0] }
  0xea   : > { %v3042_v9 = vor.u32 %v3204_v62, %v3039_v5  ;;  %v3124_v23 = vld [vmem:[%s3558_s12 + $0x124] sm:$0xf]  ;;  %v2719_v29 = vld [vmem:[%s3558_s12 + $0x130] sm:$0xf0]  ;;  %v2725_v30 = vld [vmem:[%s3558_s12 + $0x128] sm:$0xf] }
  0xeb   : > { %1856 = vmatpush.bf16.msrb.mxu2 %v2978_v0  ;;  %v3127_v31 = vld [vmem:[%s3558_s12 + $0x134] sm:$0xf0]  ;;  %v3125_v32 = vld [vmem:[%s3558_s12 + $0x12c] sm:$0xf]  ;;  %v2727_v37 = vld [vmem:[%s3558_s12 + $0x138] sm:$0xf0]  ;;  %v3927_v5 = vor.u32 %v3124_v23, %v2719_v29 }
  0xec   : > { %1945 = vmatpush.bf16.msrb.mxu3 %v3042_v9  ;;  %v3156_v39 = vld [vmem:[%s3551_s26 + $0x24] sm:$0xf]  ;;  %v2847_v40 = vld [vmem:[%s3551_s26 + $0x28] sm:$0xf0]  ;;  %v487_v9 = vld [vmem:[#allocation2 + $0xd8] sm:$0xff] }
  0xed   : > { %v3172_v60 = vld [vmem:[%s3551_s26 + $0xa4] sm:$0xf]  ;;  %v2911_v61 = vld [vmem:[%s3551_s26 + $0xa8] sm:$0xf0]  ;;  %4285 = vst [vmem:[#allocation4_spill] sm:$0xff] %v3927_v5 }
  0xef   : > { %1335 = vmatmul.bf16.gmra.mxu0 %v3753_v25 }
  0xf0   : > { %1424 = vmatmul.bf16.gmra.mxu1 %v3755_v26 }
  0xf1   : > { %1513 = vmatmul.bf16.gmra.mxu2 %v3757_v27 }
  0xf2   : > { %1602 = vmatmul.bf16.gmra.mxu3 %v3759_v28 }
  0xff   : > { %1340 = vmatmul.bf16.gmra.mxu0 %v3781_v50 }
 0x100   : > { %1429 = vmatmul.bf16.gmra.mxu1 %v3783_v51 }
 0x101   : > { %1518 = vmatmul.bf16.gmra.mxu2 %v3785_v55 }
 0x102   : > { %1607 = vmatmul.bf16.gmra.mxu3 %v3787_v56 }
 0x10f   : > { %1345 = vmatmul.bf16.gmra.mxu0 %v3801_v1 }
 0x110   : > { %1434 = vmatmul.bf16.gmra.mxu1 %v3803_v2 }
 0x111   : > { %1523 = vmatmul.bf16.gmra.mxu2 %v3805_v3 }
 0x112   : > { %1612 = vmatmul.bf16.gmra.mxu3 %v3807_v4 }
 0x11f   : > { %1350 = vmatmul.bf16.gmra.mxu0 %v3829_v33 }
 0x120   : > { %1439 = vmatmul.bf16.gmra.mxu1 %v3831_v34 }
 0x121   : > { %1528 = vmatmul.bf16.gmra.mxu2 %v3833_v35 }
 0x122   : > { %1617 = vmatmul.bf16.gmra.mxu3 %v3835_v36 }
 0x12f   : > { %1355 = vmatmul.bf16.gmra.mxu0 %v3849_v45 }
 0x130   : > { %1444 = vmatmul.bf16.gmra.mxu1 %v3851_v46 }
 0x131   : > { %1533 = vmatmul.bf16.gmra.mxu2 %v3853_v47 }
 0x132   : > { %1622 = vmatmul.bf16.gmra.mxu3 %v3855_v49 }
 0x13f   : > { %1360 = vmatmul.bf16.gmra.mxu0 %v3876_v18 }
 0x140   : > { %1449 = vmatmul.bf16.gmra.mxu1 %v3879_v21 }
 0x141   : > { %1538 = vmatmul.bf16.gmra.mxu2 %v3881_v22 }
 0x142   : > { %1627 = vmatmul.bf16.gmra.mxu3 %v3883_v24 }
 0x14c   : > { %v1326_v42 = vpop.f32.mrf.mxu0 }
 0x14d   : > { %v1415_v57 = vpop.f32.mrf.mxu1 }
 0x14e   : > { %v1416_v59 = vadd.f32 %v1415_v57, %v1326_v42  ;;  %v3923_v57 = vor.u32 %v3126_v19, %v2717_v17 }
 0x14f   : > { %1365 = vmatmul.bf16.gmra.mxu0 %v3897_v41 }
 0x150   : > { %1454 = vmatmul.bf16.gmra.mxu1 %v3899_v43 }
 0x151   : > { %1543 = vmatmul.bf16.gmra.mxu2 %v3901_v44 }
 0x152   : > { %1632 = vmatmul.bf16.gmra.mxu3 %v3903_v58 }
 0x154   : > { %v1504_v63 = vpop.f32.mrf.mxu2  ;;  %v1328_v8 = vpop.f32.mrf.mxu0 }
 0x155   : > { %v1505_v6 = vadd.f32 %v1504_v63, %v1416_v59  ;;  %v1593_v7 = vpop.f32.mrf.mxu3  ;;  %v1417_v11 = vpop.f32.mrf.mxu1  ;;  %v2850_v59 = vor.u32 %v3156_v39, %v2847_v40  ;;  %v3130_v39 = vld [vmem:[%s3558_s12 + $0x14c] sm:$0xf0]  ;;  %v3128_v40 = vld [vmem:[%s3558_s12 + $0x144] sm:$0xf] }
 0x156   : > { %v1418_v38 = vadd.f32 %v1417_v11, %v1328_v8 }
 0x157   : > { %v1594_v12 = vadd.f32 %v1593_v7, %v1505_v6  ;;  %v3929_v6 = vor.u32 %v3127_v31, %v2725_v30  ;;  %v2914_v7 = vor.u32 %v3172_v60, %v2911_v61  ;;  %1678 = vmatpush.bf16.msrb.mxu0 %v2850_v59  ;;  %v489_v30 = vld [vmem:[#allocation2 + $0x50] sm:$0xff]  ;;  %v2741_v59 = vld [vmem:[%s3558_s12 + $0x148] sm:$0xf]  ;;  %v3131_v60 = vld [vmem:[%s3558_s12 + $0x154] sm:$0xf0] }
 0x159   : > { %v2029_v20 = vadd.f32 %v1594_v12, %v485_v10  ;;  %4286 = vst [vmem:[#allocation5_spill] sm:$0xff] %v3929_v6  ;;  %v3931_v12 = vor.u32 %v3125_v32, %v2727_v37  ;;  %1767 = vmatpush.bf16.msrb.mxu1 %v2914_v7 }
 0x15b   : > { %2093 = vst [vmem:[#allocation2 + $0xb0] sm:$0xff] %v2029_v20 }
 0x15c   : > { %v1506_v42 = vpop.f32.mrf.mxu2  ;;  %v1331_v0 = vpop.f32.mrf.mxu0  ;;  %4287 = vst [vmem:[#allocation6_spill] sm:$0xff] %v3931_v12 }
 0x15d   : > { %v1507_v62 = vadd.f32 %v1506_v42, %v1418_v38  ;;  %v1595_v63 = vpop.f32.mrf.mxu3  ;;  %v1420_v10 = vpop.f32.mrf.mxu1  ;;  %v2733_v38 = vld [vmem:[%s3558_s12 + $0x140] sm:$0xf]  ;;  %v2735_v42 = vld [vmem:[%s3558_s12 + $0x150] sm:$0xf0] }
 0x15e   : > { %v1421_v17 = vadd.f32 %v1420_v10, %v1331_v0  ;;  %v3945_v7 = vor.u32 %v3130_v39, %v2733_v38 }
 0x15f   : > { %v1596_v8 = vadd.f32 %v1595_v63, %v1507_v62  ;;  %1370 = vmatmul.bf16.gmra.mxu0 %v3923_v57  ;;  %v3129_v62 = vld [vmem:[%s3558_s12 + $0x14c] sm:$0xf]  ;;  %v2743_v63 = vld [vmem:[%s3558_s12 + $0x158] sm:$0xf0] }
 0x160   : > { %1459 = vmatmul.bf16.gmra.mxu1 %v3927_v5  ;;  %4288 = vst [vmem:[#allocation7_spill] sm:$0xff] %v3945_v7 }
 0x161   : > { %v2031_v11 = vadd.f32 %v1596_v8, %v487_v9  ;;  %1548 = vmatmul.bf16.gmra.mxu2 %v3929_v6  ;;  %v495_v6 = vld [vmem:[#allocation2 + $0x118] sm:$0xff] }
 0x162   : > { %1637 = vmatmul.bf16.gmra.mxu3 %v3931_v12 }
 0x163   : > { %2095 = vst [vmem:[#allocation2 + $0xd8] sm:$0xff] %v2031_v11  ;;  %v3947_v11 = vor.u32 %v3128_v40, %v2735_v42  ;;  %v3202_v40 = vld [vmem:[%s3551_s26 + $0x194] sm:$0xf]  ;;  %v3031_v42 = vld [vmem:[%s3551_s26 + $0x198] sm:$0xf0] }
 0x164   : > { %v1509_v19 = vpop.f32.mrf.mxu2  ;;  %v1333_v29 = vpop.f32.mrf.mxu0 }
 0x165   : > { %v1510_v20 = vadd.f32 %v1509_v19, %v1421_v17  ;;  %v1598_v23 = vpop.f32.mrf.mxu3  ;;  %v1422_v31 = vpop.f32.mrf.mxu1  ;;  %4289 = vst [vmem:[#allocation8_spill] sm:$0xff] %v3947_v11  ;;  %v3949_v17 = vor.u32 %v3131_v60, %v2741_v59  ;;  %v491_v19 = vld [vmem:[#allocation2 + $0x130] sm:$0xff] }
 0x166   : > { %v1423_v61 = vadd.f32 %v1422_v31, %v1333_v29 }
 0x167   : > { %v1599_v32 = vadd.f32 %v1598_v23, %v1510_v20  ;;  %4290 = vst [vmem:[#allocation9_spill] sm:$0xff] %v3949_v17  ;;  %v3951_v23 = vor.u32 %v3129_v62, %v2743_v63  ;;  %v3034_v62 = vor.u32 %v3202_v40, %v3031_v42  ;;  %v493_v63 = vld [vmem:[#allocation2 + $0x180] sm:$0xff]  ;;  %v3154_v40 = vld [vmem:[%s3551_s26 + $0x14] sm:$0xf]  ;;  %v2839_v42 = vld [vmem:[%s3551_s26 + $0x18] sm:$0xf0] }
 0x169   : > { %v2033_v37 = vadd.f32 %v1599_v32, %v489_v30  ;;  %4291 = vst [vmem:[#allocation10_spill] sm:$0xff] %v3951_v23  ;;  %v3186_v32 = vld [vmem:[%s3551_s26 + $0x114] sm:$0xf]  ;;  %1946 = vmatpush.bf16.msrb.mxu3 %v3034_v62 }
 0x16b   : > { %2097 = vst [vmem:[#allocation2 + $0x50] sm:$0xff] %v2033_v37  ;;  %v2967_v37 = vld [vmem:[%s3551_s26 + $0x118] sm:$0xf0] }
 0x16c   : > { %v1511_v0 = vpop.f32.mrf.mxu2  ;;  %v1336_v8 = vpop.f32.mrf.mxu0  ;;  %v2970_v39 = vor.u32 %v3186_v32, %v2967_v37  ;;  %v3133_v32 = vld [vmem:[%s3558_s12 + $0x16c] sm:$0xf]  ;;  %v2759_v37 = vld [vmem:[%s3558_s12 + $0x178] sm:$0xf0] }
 0x16d   : > { %v1512_v9 = vadd.f32 %v1511_v0, %v1423_v61  ;;  %v1600_v10 = vpop.f32.mrf.mxu3  ;;  %v1425_v20 = vpop.f32.mrf.mxu1 }
 0x16e   : > { %v1426_v31 = vadd.f32 %v1425_v20, %v1336_v8  ;;  %1857 = vmatpush.bf16.msrb.mxu2 %v2970_v39  ;;  %v3134_v8 = vld [vmem:[%s3558_s12 + $0x16c] sm:$0xf0]  ;;  %v3132_v20 = vld [vmem:[%s3558_s12 + $0x164] sm:$0xf]  ;;  %v2842_v39 = vor.u32 %v3154_v40, %v2839_v42  ;;  %v3137_v42 = vld [vmem:[%s3558_s12 + $0x18c] sm:$0xf] }
 0x16f   : > { %v1601_v29 = vadd.f32 %v1600_v10, %v1512_v9  ;;  %1375 = vmatmul.bf16.gmra.mxu0 %v3945_v7  ;;  %v2749_v10 = vld [vmem:[%s3558_s12 + $0x160] sm:$0xf] }
 0x170   : > { %1464 = vmatmul.bf16.gmra.mxu1 %v3947_v11  ;;  %1679 = vmatpush.bf16.msrb.mxu0 %v2842_v39  ;;  %v2775_v39 = vld [vmem:[%s3558_s12 + $0x198] sm:$0xf0] }
 0x171   : > { %v2035_v30 = vadd.f32 %v1601_v29, %v491_v19  ;;  %1553 = vmatmul.bf16.gmra.mxu2 %v3949_v17  ;;  %v2751_v29 = vld [vmem:[%s3558_s12 + $0x170] sm:$0xf0]  ;;  %v3971_v17 = vor.u32 %v3134_v8, %v2749_v10 }
 0x172   : > { %1642 = vmatmul.bf16.gmra.mxu3 %v3951_v23 }
 0x173   : > { %2099 = vst [vmem:[#allocation2 + $0x130] sm:$0xff] %v2035_v30  ;;  %v2757_v30 = vld [vmem:[%s3558_s12 + $0x168] sm:$0xf] }
 0x174   : > { %v1514_v38 = vpop.f32.mrf.mxu2  ;;  %v1338_v61 = vpop.f32.mrf.mxu0  ;;  %4292 = vst [vmem:[#allocation11_spill] sm:$0xff] %v3971_v17 }
 0x175   : > { %v1515_v59 = vadd.f32 %v1514_v38, %v1426_v31  ;;  %v1603_v60 = vpop.f32.mrf.mxu3  ;;  %v1427_v0 = vpop.f32.mrf.mxu1  ;;  %v3135_v31 = vld [vmem:[%s3558_s12 + $0x174] sm:$0xf0] }
 0x176   : > { %v1428_v38 = vadd.f32 %v1427_v0, %v1338_v61 }
 0x177   : > { %v1604_v9 = vadd.f32 %v1603_v60, %v1515_v59  ;;  %v3170_v59 = vld [vmem:[%s3551_s26 + $0x94] sm:$0xf]  ;;  %v2903_v60 = vld [vmem:[%s3551_s26 + $0x98] sm:$0xf0] }
 0x178   : > { %v2906_v12 = vor.u32 %v3170_v59, %v2903_v60 }
 0x179   : > { %v2037_v19 = vadd.f32 %v1604_v9, %v493_v63  ;;  %v3975_v63 = vor.u32 %v3132_v20, %v2751_v29  ;;  %v3977_v9 = vor.u32 %v3135_v31, %v2757_v30  ;;  %v497_v20 = vld [vmem:[#allocation2 + $0x120] sm:$0xff]  ;;  %v3138_v30 = vld [vmem:[%s3558_s12 + $0x18c] sm:$0xf0] }
 0x17a   : > { %1768 = vmatpush.bf16.msrb.mxu1 %v2906_v12  ;;  %v3136_v31 = vld [vmem:[%s3558_s12 + $0x184] sm:$0xf] }
 0x17b   : > { %2101 = vst [vmem:[#allocation2 + $0x180] sm:$0xff] %v2037_v19  ;;  %v3979_v19 = vor.u32 %v3133_v32, %v2759_v37  ;;  %v2767_v32 = vld [vmem:[%s3558_s12 + $0x190] sm:$0xf0]  ;;  %v2773_v37 = vld [vmem:[%s3558_s12 + $0x188] sm:$0xf] }
 0x17c   : > { %v1516_v23 = vpop.f32.mrf.mxu2  ;;  %v1341_v7 = vpop.f32.mrf.mxu0  ;;  %4293 = vst [vmem:[#allocation12_spill] sm:$0xff] %v3975_v63 }
 0x17d   : > { %v1517_v62 = vadd.f32 %v1516_v23, %v1428_v38  ;;  %v1605_v11 = vpop.f32.mrf.mxu3  ;;  %4294 = vst [vmem:[#allocation13_spill] sm:$0xff] %v3977_v9  ;;  %v1430_v5 = vpop.f32.mrf.mxu1  ;;  %v3139_v38 = vld [vmem:[%s3558_s12 + $0x194] sm:$0xf0] }
 0x17e   : > { %4295 = vst [vmem:[#allocation14_spill] sm:$0xff] %v3979_v19  ;;  %v1431_v23 = vadd.f32 %v1430_v5, %v1341_v7  ;;  %v2765_v7 = vld [vmem:[%s3558_s12 + $0x180] sm:$0xf] }
 0x17f   : > { %v1606_v61 = vadd.f32 %v1605_v11, %v1517_v62  ;;  %1380 = vmatmul.bf16.gmra.mxu0 %v3971_v17  ;;  %v3993_v60 = vor.u32 %v3138_v30, %v2765_v7  ;;  %v2959_v7 = vld [vmem:[%s3551_s26 + $0x108] sm:$0xf0] }
 0x180   : > { %1469 = vmatmul.bf16.gmra.mxu1 %v3975_v63  ;;  %v503_v63 = vld [vmem:[#allocation2 + $0x138] sm:$0xff] }
 0x181   : > { %v2039_v0 = vadd.f32 %v1606_v61, %v495_v6  ;;  %1558 = vmatmul.bf16.gmra.mxu2 %v3977_v9  ;;  %4296 = vst [vmem:[#allocation15_spill] sm:$0xff] %v3993_v60 }
 0x182   : > { %1647 = vmatmul.bf16.gmra.mxu3 %v3979_v19 }
 0x183   : > { %2103 = vst [vmem:[#allocation2 + $0x118] sm:$0xff] %v2039_v0 }
 0x184   : > { %v1519_v10 = vpop.f32.mrf.mxu2  ;;  %v1343_v8 = vpop.f32.mrf.mxu0 }
 0x185   : > { %v1520_v12 = vadd.f32 %v1519_v10, %v1431_v23  ;;  %v1608_v11 = vpop.f32.mrf.mxu3  ;;  %v1432_v6 = vpop.f32.mrf.mxu1  ;;  %v3995_v23 = vor.u32 %v3136_v31, %v2767_v32  ;;  %v3997_v10 = vor.u32 %v3139_v38, %v2773_v37  ;;  %v3200_v32 = vld [vmem:[%s3551_s26 + $0x184] sm:$0xf]  ;;  %v3023_v37 = vld [vmem:[%s3551_s26 + $0x188] sm:$0xf0] }
 0x186   : > { %v1433_v40 = vadd.f32 %v1432_v6, %v1343_v8 }
 0x187   : > { %v1609_v29 = vadd.f32 %v1608_v11, %v1520_v12  ;;  %4297 = vst [vmem:[#allocation16_spill] sm:$0xff] %v3995_v23  ;;  %v499_v12 = vld [vmem:[#allocation2 + $0x108] sm:$0xff] }
 0x188   : > { %4298 = vst [vmem:[#allocation17_spill] sm:$0xff] %v3997_v10 }
 0x189   : > { %v2041_v5 = vadd.f32 %v1609_v29, %v497_v20  ;;  %v3999_v20 = vor.u32 %v3137_v42, %v2775_v39  ;;  %v3026_v39 = vor.u32 %v3200_v32, %v3023_v37  ;;  %v3152_v37 = vld [vmem:[%s3551_s26 + $0x4] sm:$0xf] }
 0x18b   : > { %2105 = vst [vmem:[#allocation2 + $0x120] sm:$0xff] %v2041_v5  ;;  %v3184_v5 = vld [vmem:[%s3551_s26 + $0x104] sm:$0xf]  ;;  %1947 = vmatpush.bf16.msrb.mxu3 %v3026_v39 }
 0x18c   : > { %v1521_v59 = vpop.f32.mrf.mxu2  ;;  %v1346_v0 = vpop.f32.mrf.mxu0  ;;  %4299 = vst [vmem:[#allocation18_spill] sm:$0xff] %v3999_v20  ;;  %v2962_v31 = vor.u32 %v3184_v5, %v2959_v7  ;;  %v3143_v5 = vld [vmem:[%s3558_s12 + $0x1b4] sm:$0xf0]  ;;  %v3141_v7 = vld [vmem:[%s3558_s12 + $0x1ac] sm:$0xf] }
 0x18d   : > { %v1522_v62 = vadd.f32 %v1521_v59, %v1433_v40  ;;  %v1610_v61 = vpop.f32.mrf.mxu3  ;;  %v1435_v11 = vpop.f32.mrf.mxu1  ;;  %v501_v59 = vld [vmem:[#allocation2 + $0xe0] sm:$0xff] }
 0x18e   : > { %v1436_v29 = vadd.f32 %v1435_v11, %v1346_v0  ;;  %1858 = vmatpush.bf16.msrb.mxu2 %v2962_v31  ;;  %v2781_v0 = vld [vmem:[%s3558_s12 + $0x1a0] sm:$0xf] }
 0x18f   : > { %v1611_v8 = vadd.f32 %v1610_v61, %v1522_v62  ;;  %1385 = vmatmul.bf16.gmra.mxu0 %v3993_v60 }
 0x190   : > { %1474 = vmatmul.bf16.gmra.mxu1 %v3995_v23 }
 0x191   : > { %v2043_v6 = vadd.f32 %v1611_v8, %v499_v12  ;;  %1563 = vmatmul.bf16.gmra.mxu2 %v3997_v10  ;;  %v3142_v12 = vld [vmem:[%s3558_s12 + $0x1ac] sm:$0xf0]  ;;  %v3140_v8 = vld [vmem:[%s3558_s12 + $0x1a4] sm:$0xf] }
 0x192   : > { %1652 = vmatmul.bf16.gmra.mxu3 %v3999_v20  ;;  %v2831_v20 = vld [vmem:[%s3551_s26 + $0x8] sm:$0xf0]  ;;  %v4019_v23 = vor.u32 %v3142_v12, %v2781_v0  ;;  %v505_v12 = vld [vmem:[#allocation2 + $0x80] sm:$0xff] }
 0x193   : > { %2107 = vst [vmem:[#allocation2 + $0x108] sm:$0xff] %v2043_v6  ;;  %v2783_v6 = vld [vmem:[%s3558_s12 + $0x1b0] sm:$0xf0]  ;;  %v2834_v31 = vor.u32 %v3152_v37, %v2831_v20  ;;  %v3145_v37 = vld [vmem:[%s3558_s12 + $0x1cc] sm:$0xf] }
 0x194   : > { %v1524_v30 = vpop.f32.mrf.mxu2  ;;  %v1348_v42 = vpop.f32.mrf.mxu0 }
 0x195   : > { %v1525_v38 = vadd.f32 %v1524_v30, %v1436_v29  ;;  %v1613_v40 = vpop.f32.mrf.mxu3  ;;  %v1437_v62 = vpop.f32.mrf.mxu1  ;;  %v2789_v29 = vld [vmem:[%s3558_s12 + $0x1a8] sm:$0xf]  ;;  %v2791_v30 = vld [vmem:[%s3558_s12 + $0x1b8] sm:$0xf0]  ;;  %1680 = vmatpush.bf16.msrb.mxu0 %v2834_v31 }
 0x196   : > { %v1438_v32 = vadd.f32 %v1437_v62, %v1348_v42  ;;  %v2807_v31 = vld [vmem:[%s3558_s12 + $0x1d8] sm:$0xf0] }
 0x197   : > { %v1614_v61 = vadd.f32 %v1613_v40, %v1525_v38  ;;  %v3168_v38 = vld [vmem:[%s3551_s26 + $0x84] sm:$0xf]  ;;  %v2895_v40 = vld [vmem:[%s3551_s26 + $0x88] sm:$0xf0] }
 0x198   : > { %v2898_v9 = vor.u32 %v3168_v38, %v2895_v40 }
 0x199   : > { %v2045_v11 = vadd.f32 %v1614_v61, %v501_v59  ;;  %v4023_v59 = vor.u32 %v3140_v8, %v2783_v6  ;;  %v4025_v61 = vor.u32 %v3143_v5, %v2789_v29  ;;  %v3146_v6 = vld [vmem:[%s3558_s12 + $0x1cc] sm:$0xf0]  ;;  %v3144_v29 = vld [vmem:[%s3558_s12 + $0x1c4] sm:$0xf]  ;;  %v2799_v5 = vld [vmem:[%s3558_s12 + $0x1d0] sm:$0xf0] }
 0x19a   : > { %1769 = vmatpush.bf16.msrb.mxu1 %v2898_v9 }
 0x19b   : > { %2109 = vst [vmem:[#allocation2 + $0xe0] sm:$0xff] %v2045_v11  ;;  %v4027_v11 = vor.u32 %v3141_v7, %v2791_v30  ;;  %v2805_v7 = vld [vmem:[%s3558_s12 + $0x1c8] sm:$0xf]  ;;  %v3147_v30 = vld [vmem:[%s3558_s12 + $0x1d4] sm:$0xf0] }
 0x19c   : > { %v1526_v10 = vpop.f32.mrf.mxu2  ;;  %v1351_v19 = vpop.f32.mrf.mxu0 }
 0x19d   : > { %v1527_v39 = vadd.f32 %v1526_v10, %v1438_v32  ;;  %v1615_v60 = vpop.f32.mrf.mxu3  ;;  %v1440_v17 = vpop.f32.mrf.mxu1 }
 0x19e   : > { %v1441_v10 = vadd.f32 %v1440_v17, %v1351_v19  ;;  %v2797_v19 = vld [vmem:[%s3558_s12 + $0x1c0] sm:$0xf] }
 0x19f   : > { %v1616_v42 = vadd.f32 %v1615_v60, %v1527_v39  ;;  %1390 = vmatmul.bf16.gmra.mxu0 %v4019_v23  ;;  %v4041_v40 = vor.u32 %v3146_v6, %v2797_v19 }
 0x1a0   : > { %1479 = vmatmul.bf16.gmra.mxu1 %v4023_v59 }
 0x1a1   : > { %v2047_v20 = vadd.f32 %v1616_v42, %v503_v63  ;;  %1568 = vmatmul.bf16.gmra.mxu2 %v4025_v61  ;;  %4300 = vst [vmem:[#allocation19_spill] sm:$0xff] %v4041_v40 }
 0x1a2   : > { %1657 = vmatmul.bf16.gmra.mxu3 %v4027_v11 }
 0x1a3   : > { %2111 = vst [vmem:[#allocation2 + $0x138] sm:$0xff] %v2047_v20 }
 0x1a4   : > { %v1529_v62 = vpop.f32.mrf.mxu2  ;;  %v1353_v0 = vpop.f32.mrf.mxu0 }
 0x1a5   : > { %v1530_v9 = vadd.f32 %v1529_v62, %v1441_v10  ;;  %v1618_v60 = vpop.f32.mrf.mxu3  ;;  %v1442_v63 = vpop.f32.mrf.mxu1  ;;  %v4043_v10 = vor.u32 %v3144_v29, %v2799_v5  ;;  %v4045_v62 = vor.u32 %v3147_v30, %v2805_v7  ;;  %v509_v5 = vld [vmem:[#allocation2 + $0x1e8] sm:$0xff] }
 0x1a6   : > { %v1443_v32 = vadd.f32 %v1442_v63, %v1353_v0 }
 0x1a7   : > { %v1619_v8 = vadd.f32 %v1618_v60, %v1530_v9  ;;  %4301 = vst [vmem:[#allocation20_spill] sm:$0xff] %v4043_v10  ;;  %v507_v9 = vld [vmem:[#allocation2 + $0x1b8] sm:$0xff] }
 0x1a8   : > { %4302 = vst [vmem:[#allocation21_spill] sm:$0xff] %v4045_v62 }
 0x1a9   : > { %v2049_v17 = vadd.f32 %v1619_v8, %v505_v12  ;;  %v4047_v12 = vor.u32 %v3145_v37, %v2807_v31  ;;  %v2813_v37 = vld [vmem:[%s3558_s12 + $0x1e0] sm:$0xf]  ;;  %v3150_v31 = vld [vmem:[%s3558_s12 + $0x1ec] sm:$0xf0] }
 0x1ab   : > { %2113 = vst [vmem:[#allocation2 + $0x80] sm:$0xff] %v2049_v17 }
 0x1ac   : > { %v1531_v38 = vpop.f32.mrf.mxu2  ;;  %v1356_v20 = vpop.f32.mrf.mxu0  ;;  %4303 = vst [vmem:[#allocation22_spill] sm:$0xff] %v4047_v12 }
 0x1ad   : > { %v1532_v39 = vadd.f32 %v1531_v38, %v1443_v32  ;;  %v1620_v42 = vpop.f32.mrf.mxu3  ;;  %v1445_v60 = vpop.f32.mrf.mxu1  ;;  %v3148_v38 = vld [vmem:[%s3558_s12 + $0x1e4] sm:$0xf] }
 0x1ae   : > { %v1446_v63 = vadd.f32 %v1445_v60, %v1356_v20  ;;  %v3151_v20 = vld [vmem:[%s3558_s12 + $0x1f4] sm:$0xf0]  ;;  %v3149_v60 = vld [vmem:[%s3558_s12 + $0x1ec] sm:$0xf] }
 0x1af   : > { %v1621_v8 = vadd.f32 %v1620_v42, %v1532_v39  ;;  %1395 = vmatmul.bf16.gmra.mxu0 %v4041_v40  ;;  %v2815_v39 = vld [vmem:[%s3558_s12 + $0x1f0] sm:$0xf0]  ;;  %v2821_v42 = vld [vmem:[%s3558_s12 + $0x1e8] sm:$0xf] }
 0x1b0   : > { %1484 = vmatmul.bf16.gmra.mxu1 %v4043_v10  ;;  %v4063_v10 = vor.u32 %v3148_v38, %v2815_v39  ;;  %v513_v39 = vld [vmem:[#allocation2 + $0x1e0] sm:$0xff] }
 0x1b1   : > { %v2051_v0 = vadd.f32 %v1621_v8, %v507_v9  ;;  %1573 = vmatmul.bf16.gmra.mxu2 %v4045_v62  ;;  %v2823_v8 = vld [vmem:[%s3558_s12 + $0x1f8] sm:$0xf0] }
 0x1b2   : > { %1662 = vmatmul.bf16.gmra.mxu3 %v4047_v12  ;;  %v4061_v12 = vor.u32 %v3150_v31, %v2813_v37 }
 0x1b3   : > { %2115 = vst [vmem:[#allocation2 + $0x1b8] sm:$0xff] %v2051_v0 }
 0x1b4   : > { %v1534_v17 = vpop.f32.mrf.mxu2  ;;  %v1358_v29 = vpop.f32.mrf.mxu0 }
 0x1b5   : > { %v1535_v19 = vadd.f32 %v1534_v17, %v1446_v63  ;;  %v1623_v6 = vpop.f32.mrf.mxu3  ;;  %v1447_v7 = vpop.f32.mrf.mxu1 }
 0x1b6   : > { %v1448_v9 = vadd.f32 %v1447_v7, %v1358_v29 }
 0x1b7   : > { %v1624_v30 = vadd.f32 %v1623_v6, %v1535_v19  ;;  %v4065_v19 = vor.u32 %v3151_v20, %v2821_v42  ;;  %v511_v6 = vld [vmem:[#allocation2 + $0x160] sm:$0xff] }
 0x1b9   : > { %v2053_v32 = vadd.f32 %v1624_v30, %v509_v5  ;;  %v4067_v30 = vor.u32 %v3149_v60, %v2823_v8 }
 0x1bb   : > { %2117 = vst [vmem:[#allocation2 + $0x1e8] sm:$0xff] %v2053_v32 }
 0x1bc   : > { %v1536_v0 = vpop.f32.mrf.mxu2  ;;  %v1361_v62 = vpop.f32.mrf.mxu0 }
 0x1bd   : > { %v1537_v63 = vadd.f32 %v1536_v0, %v1448_v9  ;;  %v1625_v17 = vpop.f32.mrf.mxu3  ;;  %v1450_v5 = vpop.f32.mrf.mxu1 }
 0x1be   : > { %v1451_v7 = vadd.f32 %v1450_v5, %v1361_v62 }
 0x1bf   : > { %v1626_v40 = vadd.f32 %v1625_v17, %v1537_v63  ;;  %1400 = vmatmul.bf16.gmra.mxu0 %v4061_v12  ;;  %v515_v63 = vld [vmem:[#allocation2 + $0xf0] sm:$0xff] }
 0x1c0   : > { %1489 = vmatmul.bf16.gmra.mxu1 %v4063_v10 }
 0x1c1   : > { %v2055_v29 = vadd.f32 %v1626_v40, %v511_v6  ;;  %1578 = vmatmul.bf16.gmra.mxu2 %v4065_v19 }
 0x1c2   : > { %1667 = vmatmul.bf16.gmra.mxu3 %v4067_v30 }
 0x1c3   : > { %2119 = vst [vmem:[#allocation2 + $0x160] sm:$0xff] %v2055_v29 }
 0x1c4   : > { %v1539_v32 = vpop.f32.mrf.mxu2  ;;  %v1363_v38 = vpop.f32.mrf.mxu0 }
 0x1c5   : > { %v1540_v37 = vadd.f32 %v1539_v32, %v1451_v7  ;;  %v1628_v31 = vpop.f32.mrf.mxu3  ;;  %v1452_v42 = vpop.f32.mrf.mxu1 }
 0x1c6   : > { %v1453_v60 = vadd.f32 %v1452_v42, %v1363_v38  ;;  %v517_v38 = vld [vmem:[#allocation2 + $0x148] sm:$0xff] }
 0x1c7   : > { %v1629_v20 = vadd.f32 %v1628_v31, %v1540_v37 }
 0x1c9   : > { %v2057_v9 = vadd.f32 %v1629_v20, %v513_v39 }
 0x1cb   : > { %2121 = vst [vmem:[#allocation2 + $0x1e0] sm:$0xff] %v2057_v9 }
 0x1cc   : > { %v1541_v8 = vpop.f32.mrf.mxu2  ;;  %v1366_v0 = vpop.f32.mrf.mxu0 }
 0x1cd   : > { %v1542_v40 = vadd.f32 %v1541_v8, %v1453_v60  ;;  %v1630_v62 = vpop.f32.mrf.mxu3  ;;  %v1455_v17 = vpop.f32.mrf.mxu1 }
 0x1ce   : > { %v1456_v29 = vadd.f32 %v1455_v17, %v1366_v0 }
 0x1cf   : > { %v1631_v6 = vadd.f32 %v1630_v62, %v1542_v40  ;;  %1681 = vmatmul.bf16.vlgmr.msrb.gmra.mxu0 %v3703_v48 }
 0x1d0   : > { %1770 = vmatmul.bf16.vlgmr.msrb.gmra.mxu1 %v3707_v52  ;;  %v519_v52 = vld [vmem:[#allocation2 + $0x100] sm:$0xff] }
 0x1d1   : > { %v2059_v5 = vadd.f32 %v1631_v6, %v515_v63  ;;  %1859 = vmatmul.bf16.vlgmr.msrb.gmra.mxu2 %v3709_v53 }
 0x1d2   : > { %1948 = vmatmul.bf16.vlgmr.msrb.gmra.mxu3 %v3711_v54 }
 0x1d3   : > { %2123 = vst [vmem:[#allocation2 + $0xf0] sm:$0xff] %v2059_v5 }
 0x1d4   : > { %v1544_v7 = vpop.f32.mrf.mxu2  ;;  %v1368_v31 = vpop.f32.mrf.mxu0 }
 0x1d5   : > { %v1545_v32 = vadd.f32 %v1544_v7, %v1456_v29  ;;  %v1633_v37 = vpop.f32.mrf.mxu3  ;;  %v1457_v39 = vpop.f32.mrf.mxu1  ;;  %v521_v29 = vld [vmem:[#allocation2 + $0x40] sm:$0xff] }
 0x1d6   : > { %v1458_v9 = vadd.f32 %v1457_v39, %v1368_v31 }
 0x1d7   : > { %v1634_v42 = vadd.f32 %v1633_v37, %v1545_v32 }
 0x1d9   : > { %v2061_v20 = vadd.f32 %v1634_v42, %v517_v38 }
 0x1db   : > { %2125 = vst [vmem:[#allocation2 + $0x148] sm:$0xff] %v2061_v20 }
 0x1dc   : > { %v1546_v48 = vpop.f32.mrf.mxu2  ;;  %v1371_v40 = vpop.f32.mrf.mxu0 }
 0x1dd   : > { %v1547_v60 = vadd.f32 %v1546_v48, %v1458_v9  ;;  %v1635_v8 = vpop.f32.mrf.mxu3  ;;  %v1460_v62 = vpop.f32.mrf.mxu1 }
 0x1de   : > { %v1461_v0 = vadd.f32 %v1460_v62, %v1371_v40 }
 0x1df   : > { %v1636_v53 = vadd.f32 %v1635_v8, %v1547_v60  ;;  %1686 = vmatmul.bf16.gmra.mxu0 %v3733_v13 }
 0x1e0   : > { %1775 = vmatmul.bf16.gmra.mxu1 %v3735_v14  ;;  %v523_v14 = vld [vmem:[#allocation2 + $0x20] sm:$0xff] }
 0x1e1   : > { %v2063_v54 = vadd.f32 %v1636_v53, %v519_v52  ;;  %1864 = vmatmul.bf16.gmra.mxu2 %v3737_v15  ;;  %v525_v52 = vld [vmem:[#allocation2 + $0x1a0] sm:$0xff] }
 0x1e2   : > { %1953 = vmatmul.bf16.gmra.mxu3 %v3739_v16 }
 0x1e3   : > { %2127 = vst [vmem:[#allocation2 + $0x100] sm:$0xff] %v2063_v54 }
 0x1e4   : > { %v1549_v63 = vpop.f32.mrf.mxu2  ;;  %v1373_v5 = vpop.f32.mrf.mxu0 }
 0x1e5   : > { %v1550_v17 = vadd.f32 %v1549_v63, %v1461_v0  ;;  %v1638_v6 = vpop.f32.mrf.mxu3  ;;  %v1462_v7 = vpop.f32.mrf.mxu1 }
 0x1e6   : > { %v1463_v31 = vadd.f32 %v1462_v7, %v1373_v5 }
 0x1e7   : > { %v1639_v32 = vadd.f32 %v1638_v6, %v1550_v17 }
 0x1e9   : > { %v2065_v37 = vadd.f32 %v1639_v32, %v521_v29 }
 0x1eb   : > { %2129 = vst [vmem:[#allocation2 + $0x40] sm:$0xff] %v2065_v37 }
 0x1ec   : > { %v1551_v13 = vpop.f32.mrf.mxu2  ;;  %v1376_v42 = vpop.f32.mrf.mxu0 }
 0x1ed   : > { %v1552_v38 = vadd.f32 %v1551_v13, %v1463_v31  ;;  %v1640_v39 = vpop.f32.mrf.mxu3  ;;  %v1465_v20 = vpop.f32.mrf.mxu1  ;;  %v529_v13 = vld [vmem:[#allocation2 + $0x70] sm:$0xff] }
 0x1ee   : > { %v1466_v9 = vadd.f32 %v1465_v20, %v1376_v42 }
 0x1ef   : > { %v1641_v15 = vadd.f32 %v1640_v39, %v1552_v38  ;;  %1691 = vmatmul.bf16.gmra.mxu0 %v3753_v25 }
 0x1f0   : > { %1780 = vmatmul.bf16.gmra.mxu1 %v3755_v26  ;;  %v527_v26 = vld [vmem:[#allocation2 + $0xe8] sm:$0xff] }
 0x1f1   : > { %v2067_v16 = vadd.f32 %v1641_v15, %v523_v14  ;;  %1869 = vmatmul.bf16.gmra.mxu2 %v3757_v27 }
 0x1f2   : > { %1958 = vmatmul.bf16.gmra.mxu3 %v3759_v28 }
 0x1f3   : > { %2131 = vst [vmem:[#allocation2 + $0x20] sm:$0xff] %v2067_v16 }
 0x1f4   : > { %v1554_v48 = vpop.f32.mrf.mxu2  ;;  %v1378_v40 = vpop.f32.mrf.mxu0 }
 0x1f5   : > { %v1555_v60 = vadd.f32 %v1554_v48, %v1466_v9  ;;  %v1643_v8 = vpop.f32.mrf.mxu3  ;;  %v1467_v62 = vpop.f32.mrf.mxu1 }
 0x1f6   : > { %v1468_v0 = vadd.f32 %v1467_v62, %v1378_v40  ;;  %v533_v62 = vld [vmem:[#allocation2 + $0xb8] sm:$0xff] }
 0x1f7   : > { %v1644_v53 = vadd.f32 %v1643_v8, %v1555_v60 }
 0x1f9   : > { %v2069_v54 = vadd.f32 %v1644_v53, %v525_v52 }
 0x1fb   : > { %2133 = vst [vmem:[#allocation2 + $0x1a0] sm:$0xff] %v2069_v54 }
 0x1fc   : > { %v1556_v25 = vpop.f32.mrf.mxu2  ;;  %v1381_v6 = vpop.f32.mrf.mxu0 }
 0x1fd   : > { %v1557_v63 = vadd.f32 %v1556_v25, %v1468_v0  ;;  %v1645_v17 = vpop.f32.mrf.mxu3  ;;  %v1470_v5 = vpop.f32.mrf.mxu1 }
 0x1fe   : > { %v1471_v29 = vadd.f32 %v1470_v5, %v1381_v6 }
 0x1ff   : > { %v1646_v27 = vadd.f32 %v1645_v17, %v1557_v63  ;;  %1696 = vmatmul.bf16.gmra.mxu0 %v3781_v50 }
 0x200   : > { %1785 = vmatmul.bf16.gmra.mxu1 %v3783_v51  ;;  %v531_v51 = vld [vmem:[#allocation2 + $0x1d8] sm:$0xff] }
 0x201   : > { %v2071_v28 = vadd.f32 %v1646_v27, %v527_v26  ;;  %1874 = vmatmul.bf16.gmra.mxu2 %v3785_v55 }
 0x202   : > { %1963 = vmatmul.bf16.gmra.mxu3 %v3787_v56 }
 0x203   : > { %2135 = vst [vmem:[#allocation2 + $0xe8] sm:$0xff] %v2071_v28 }
 0x204   : > { %v1559_v7 = vpop.f32.mrf.mxu2  ;;  %v1383_v31 = vpop.f32.mrf.mxu0 }
 0x205   : > { %v1560_v32 = vadd.f32 %v1559_v7, %v1471_v29  ;;  %v1648_v37 = vpop.f32.mrf.mxu3  ;;  %v1472_v38 = vpop.f32.mrf.mxu1 }
 0x206   : > { %v1473_v14 = vadd.f32 %v1472_v38, %v1383_v31 }
 0x207   : > { %v1649_v39 = vadd.f32 %v1648_v37, %v1560_v32  ;;  %v537_v32 = vld [vmem:[#allocation2 + $0x170] sm:$0xff] }
 0x209   : > { %v2073_v42 = vadd.f32 %v1649_v39, %v529_v13 }
 0x20b   : > { %2137 = vst [vmem:[#allocation2 + $0x70] sm:$0xff] %v2073_v42 }
 0x20c   : > { %v1561_v50 = vpop.f32.mrf.mxu2  ;;  %v1386_v16 = vpop.f32.mrf.mxu0 }
 0x20d   : > { %v1562_v20 = vadd.f32 %v1561_v50, %v1473_v14  ;;  %v1650_v15 = vpop.f32.mrf.mxu3  ;;  %v1475_v9 = vpop.f32.mrf.mxu1 }
 0x20e   : > { %v1476_v48 = vadd.f32 %v1475_v9, %v1386_v16 }
 0x20f   : > { %v1651_v55 = vadd.f32 %v1650_v15, %v1562_v20  ;;  %1701 = vmatmul.bf16.gmra.mxu0 %v3801_v1 }
 0x210   : > { %1790 = vmatmul.bf16.gmra.mxu1 %v3803_v2  ;;  %v535_v2 = vld [vmem:[#allocation2 + $0xa8] sm:$0xff] }
 0x211   : > { %v2075_v56 = vadd.f32 %v1651_v55, %v531_v51  ;;  %1879 = vmatmul.bf16.gmra.mxu2 %v3805_v3  ;;  %v541_v55 = vld [vmem:[#allocation2 + $0x198] sm:$0xff] }
 0x212   : > { %1968 = vmatmul.bf16.gmra.mxu3 %v3807_v4 }
 0x213   : > { %2139 = vst [vmem:[#allocation2 + $0x1d8] sm:$0xff] %v2075_v56 }
 0x214   : > { %v1564_v60 = vpop.f32.mrf.mxu2  ;;  %v1388_v52 = vpop.f32.mrf.mxu0 }
 0x215   : > { %v1565_v8 = vadd.f32 %v1564_v60, %v1476_v48  ;;  %v1653_v40 = vpop.f32.mrf.mxu3  ;;  %v1477_v53 = vpop.f32.mrf.mxu1 }
 0x216   : > { %v1478_v25 = vadd.f32 %v1477_v53, %v1388_v52 }
 0x217   : > { %v1654_v54 = vadd.f32 %v1653_v40, %v1565_v8 }
 0x219   : > { %v2077_v0 = vadd.f32 %v1654_v54, %v533_v62 }
 0x21b   : > { %2141 = vst [vmem:[#allocation2 + $0xb8] sm:$0xff] %v2077_v0 }
 0x21c   : > { %v1566_v1 = vpop.f32.mrf.mxu2  ;;  %v1391_v6 = vpop.f32.mrf.mxu0 }
 0x21d   : > { %v1567_v63 = vadd.f32 %v1566_v1, %v1478_v25  ;;  %v1655_v17 = vpop.f32.mrf.mxu3  ;;  %v1480_v26 = vpop.f32.mrf.mxu1 }
 0x21e   : > { %v1481_v5 = vadd.f32 %v1480_v26, %v1391_v6 }
 0x21f   : > { %v1656_v3 = vadd.f32 %v1655_v17, %v1567_v63  ;;  %1706 = vmatmul.bf16.gmra.mxu0 %v3829_v33  ;;  %v545_v17 = vld [vmem:[#allocation2 + $0x158] sm:$0xff] }
 0x220   : > { %1795 = vmatmul.bf16.gmra.mxu1 %v3831_v34  ;;  %v539_v34 = vld [vmem:[#allocation2 + $0x68] sm:$0xff] }
 0x221   : > { %v2079_v4 = vadd.f32 %v1656_v3, %v535_v2  ;;  %1884 = vmatmul.bf16.gmra.mxu2 %v3833_v35 }
 0x222   : > { %1973 = vmatmul.bf16.gmra.mxu3 %v3835_v36 }
 0x223   : > { %2143 = vst [vmem:[#allocation2 + $0xa8] sm:$0xff] %v2079_v4 }
 0x224   : > { %v1569_v27 = vpop.f32.mrf.mxu2  ;;  %v1393_v7 = vpop.f32.mrf.mxu0 }
 0x225   : > { %v1570_v28 = vadd.f32 %v1569_v27, %v1481_v5  ;;  %v1658_v29 = vpop.f32.mrf.mxu3  ;;  %v1482_v37 = vpop.f32.mrf.mxu1 }
 0x226   : > { %v1483_v38 = vadd.f32 %v1482_v37, %v1393_v7 }
 0x227   : > { %v1659_v31 = vadd.f32 %v1658_v29, %v1570_v28 }
 0x229   : > { %v2081_v13 = vadd.f32 %v1659_v31, %v537_v32 }
 0x22b   : > { %2145 = vst [vmem:[#allocation2 + $0x170] sm:$0xff] %v2081_v13  ;;  %v486_v13 = vld [vmem:[#allocation2 + $0x1b0] sm:$0xff] }
 0x22c   : > { %v1571_v33 = vpop.f32.mrf.mxu2  ;;  %v1396_v14 = vpop.f32.mrf.mxu0 }
 0x22d   : > { %v1572_v39 = vadd.f32 %v1571_v33, %v1483_v38  ;;  %v1660_v42 = vpop.f32.mrf.mxu3  ;;  %v1485_v50 = vpop.f32.mrf.mxu1 }
 0x22e   : > { %v1486_v20 = vadd.f32 %v1485_v50, %v1396_v14 }
 0x22f   : > { %v1661_v35 = vadd.f32 %v1660_v42, %v1572_v39  ;;  %1711 = vmatmul.bf16.gmra.mxu0 %v3849_v45 }
 0x230   : > { %1800 = vmatmul.bf16.gmra.mxu1 %v3851_v46  ;;  %v543_v46 = vld [vmem:[#allocation2 + $0xc0] sm:$0xff] }
 0x231   : > { %v2083_v36 = vadd.f32 %v1661_v35, %v539_v34  ;;  %1889 = vmatmul.bf16.gmra.mxu2 %v3853_v47 }
 0x232   : > { %1978 = vmatmul.bf16.gmra.mxu3 %v3855_v49 }
 0x233   : > { %2147 = vst [vmem:[#allocation2 + $0x68] sm:$0xff] %v2083_v36 }
 0x234   : > { %v1574_v15 = vpop.f32.mrf.mxu2  ;;  %v1398_v9 = vpop.f32.mrf.mxu0 }
 0x235   : > { %v1575_v16 = vadd.f32 %v1574_v15, %v1486_v20  ;;  %v1663_v51 = vpop.f32.mrf.mxu3  ;;  %v1487_v56 = vpop.f32.mrf.mxu1  ;;  %v4304_v20 = vld [vmem:[#allocation4_spill] sm:$0xff]  ;;  %v4305_v15 = vld [vmem:[#allocation5_spill] sm:$0xff] }
 0x236   : > { %v1488_v8 = vadd.f32 %v1487_v56, %v1398_v9 }
 0x237   : > { %v1664_v48 = vadd.f32 %v1663_v51, %v1575_v16  ;;  %v4306_v16 = vld [vmem:[#allocation6_spill] sm:$0xff] }
 0x239   : > { %v2085_v60 = vadd.f32 %v1664_v48, %v541_v55  ;;  %v490_v48 = vld [vmem:[#allocation2 + $0x168] sm:$0xff] }
 0x23b   : > { %2149 = vst [vmem:[#allocation2 + $0x198] sm:$0xff] %v2085_v60 }
 0x23c   : > { %v1576_v45 = vpop.f32.mrf.mxu2  ;;  %v1401_v62 = vpop.f32.mrf.mxu0 }
 0x23d   : > { %v1577_v40 = vadd.f32 %v1576_v45, %v1488_v8  ;;  %v1665_v52 = vpop.f32.mrf.mxu3  ;;  %v1490_v53 = vpop.f32.mrf.mxu1 }
 0x23e   : > { %v1491_v54 = vadd.f32 %v1490_v53, %v1401_v62  ;;  %v492_v53 = vld [vmem:[#allocation2 + $0x48] sm:$0xff] }
 0x23f   : > { %v1666_v47 = vadd.f32 %v1665_v52, %v1577_v40  ;;  %1716 = vmatmul.bf16.gmra.mxu0 %v3876_v18 }
 0x240   : > { %1805 = vmatmul.bf16.gmra.mxu1 %v3879_v21  ;;  %v547_v21 = vld [vmem:[#allocation2 + $0x58] sm:$0xff] }
 0x241   : > { %v2087_v49 = vadd.f32 %v1666_v47, %v543_v46  ;;  %1894 = vmatmul.bf16.gmra.mxu2 %v3881_v22 }
 0x242   : > { %1983 = vmatmul.bf16.gmra.mxu3 %v3883_v24 }
 0x243   : > { %2151 = vst [vmem:[#allocation2 + $0xc0] sm:$0xff] %v2087_v49 }
 0x244   : > { %v1579_v0 = vpop.f32.mrf.mxu2  ;;  %v1403_v63 = vpop.f32.mrf.mxu0 }
 0x245   : > { %v1580_v25 = vadd.f32 %v1579_v0, %v1491_v54  ;;  %v1668_v1 = vpop.f32.mrf.mxu3  ;;  %v1492_v6 = vpop.f32.mrf.mxu1  ;;  %v4307_v54 = vld [vmem:[#allocation7_spill] sm:$0xff] }
 0x246   : > { %v1493_v3 = vadd.f32 %v1492_v6, %v1403_v63  ;;  %v4309_v63 = vld [vmem:[#allocation9_spill] sm:$0xff] }
 0x247   : > { %v1669_v2 = vadd.f32 %v1668_v1, %v1580_v25  ;;  %v4308_v1 = vld [vmem:[#allocation8_spill] sm:$0xff] }
 0x249   : > { %v2089_v26 = vadd.f32 %v1669_v2, %v545_v17  ;;  %v4310_v17 = vld [vmem:[#allocation10_spill] sm:$0xff] }
 0x24b   : > { %2153 = vst [vmem:[#allocation2 + $0x158] sm:$0xff] %v2089_v26 }
 0x24c   : > { %v1581_v18 = vpop.f32.mrf.mxu2  ;;  %v1682_v27 = vpop.f32.mrf.mxu0 }
 0x24d   : > { %v1582_v4 = vadd.f32 %v1581_v18, %v1493_v3  ;;  %v1670_v5 = vpop.f32.mrf.mxu3  ;;  %v1771_v28 = vpop.f32.mrf.mxu1  ;;  %v494_v18 = vld [vmem:[#allocation2 + $0x110] sm:$0xff] }
 0x24e   : > { %v1772_v29 = vadd.f32 %v1771_v28, %v1682_v27 }
 0x24f   : > { %v1671_v22 = vadd.f32 %v1670_v5, %v1582_v4  ;;  %1721 = vmatmul.bf16.gmra.mxu0 %v3897_v41 }
 0x250   : > { %1810 = vmatmul.bf16.gmra.mxu1 %v3899_v43  ;;  %v488_v43 = vld [vmem:[#allocation2 + $0x18] sm:$0xff] }
 0x251   : > { %v2091_v24 = vadd.f32 %v1671_v22, %v547_v21  ;;  %1899 = vmatmul.bf16.gmra.mxu2 %v3901_v44 }
 0x252   : > { %1988 = vmatmul.bf16.gmra.mxu3 %v3903_v58 }
 0x253   : > { %2155 = vst [vmem:[#allocation2 + $0x58] sm:$0xff] %v2091_v24 }
 0x254   : > { %v1860_v7 = vpop.f32.mrf.mxu2  ;;  %v1684_v31 = vpop.f32.mrf.mxu0 }
 0x255   : > { %v1861_v32 = vadd.f32 %v1860_v7, %v1772_v29  ;;  %v1949_v37 = vpop.f32.mrf.mxu3  ;;  %v1773_v38 = vpop.f32.mrf.mxu1  ;;  %v496_v7 = vld [vmem:[#allocation2 + $0x98] sm:$0xff] }
 0x256   : > { %v1774_v42 = vadd.f32 %v1773_v38, %v1684_v31  ;;  %v4311_v31 = vld [vmem:[#allocation11_spill] sm:$0xff] }
 0x257   : > { %v1950_v33 = vadd.f32 %v1949_v37, %v1861_v32 }
 0x259   : > { %v2030_v39 = vadd.f32 %v1950_v33, %v486_v13  ;;  %v4312_v33 = vld [vmem:[#allocation12_spill] sm:$0xff] }
 0x25b   : > { %2094 = vst [vmem:[#allocation2 + $0x1b0] sm:$0xff] %v2030_v39  ;;  %v4313_v39 = vld [vmem:[#allocation13_spill] sm:$0xff] }
 0x25c   : > { %v1862_v41 = vpop.f32.mrf.mxu2  ;;  %v1687_v50 = vpop.f32.mrf.mxu0 }
 0x25d   : > { %v1863_v14 = vadd.f32 %v1862_v41, %v1774_v42  ;;  %v1951_v34 = vpop.f32.mrf.mxu3  ;;  %v1776_v35 = vpop.f32.mrf.mxu1  ;;  %v4314_v42 = vld [vmem:[#allocation14_spill] sm:$0xff] }
 0x25e   : > { %v1777_v36 = vadd.f32 %v1776_v35, %v1687_v50 }
 0x25f   : > { %v1952_v44 = vadd.f32 %v1951_v34, %v1863_v14  ;;  %1726 = vmatmul.bf16.gmra.mxu0 %v3923_v57 }
 0x260   : > { %1815 = vmatmul.bf16.gmra.mxu1 %v4304_v20 }
 0x261   : > { %v2032_v58 = vadd.f32 %v1952_v44, %v488_v43  ;;  %1904 = vmatmul.bf16.gmra.mxu2 %v4305_v15  ;;  %v498_v43 = vld [vmem:[#allocation2 + $0x150] sm:$0xff] }
 0x262   : > { %1993 = vmatmul.bf16.gmra.mxu3 %v4306_v16 }
 0x263   : > { %2096 = vst [vmem:[#allocation2 + $0x18] sm:$0xff] %v2032_v58 }
 0x264   : > { %v1865_v51 = vpop.f32.mrf.mxu2  ;;  %v1689_v56 = vpop.f32.mrf.mxu0 }
 0x265   : > { %v1866_v9 = vadd.f32 %v1865_v51, %v1777_v36  ;;  %v1954_v55 = vpop.f32.mrf.mxu3  ;;  %v1778_v60 = vpop.f32.mrf.mxu1 }
 0x266   : > { %v1779_v40 = vadd.f32 %v1778_v60, %v1689_v56 }
 0x267   : > { %v1955_v8 = vadd.f32 %v1954_v55, %v1866_v9  ;;  %v500_v9 = vld [vmem:[#allocation2 + $0x60] sm:$0xff] }
 0x269   : > { %v2034_v45 = vadd.f32 %v1955_v8, %v490_v48  ;;  %v4315_v48 = vld [vmem:[#allocation15_spill] sm:$0xff] }
 0x26b   : > { %2098 = vst [vmem:[#allocation2 + $0x168] sm:$0xff] %v2034_v45  ;;  %v4316_v45 = vld [vmem:[#allocation16_spill] sm:$0xff] }
 0x26c   : > { %v1867_v57 = vpop.f32.mrf.mxu2  ;;  %v1692_v46 = vpop.f32.mrf.mxu0 }
 0x26d   : > { %v1868_v52 = vadd.f32 %v1867_v57, %v1779_v40  ;;  %v1956_v62 = vpop.f32.mrf.mxu3  ;;  %v1781_v47 = vpop.f32.mrf.mxu1  ;;  %v4317_v40 = vld [vmem:[#allocation17_spill] sm:$0xff]  ;;  %v4318_v57 = vld [vmem:[#allocation18_spill] sm:$0xff] }
 0x26e   : > { %v1782_v25 = vadd.f32 %v1781_v47, %v1692_v46  ;;  %v502_v47 = vld [vmem:[#allocation2 + $0x188] sm:$0xff] }
 0x26f   : > { %v1957_v49 = vadd.f32 %v1956_v62, %v1868_v52  ;;  %1731 = vmatmul.bf16.gmra.mxu0 %v4307_v54 }
 0x270   : > { %1820 = vmatmul.bf16.gmra.mxu1 %v4308_v1 }
 0x271   : > { %v2036_v0 = vadd.f32 %v1957_v49, %v492_v53  ;;  %1909 = vmatmul.bf16.gmra.mxu2 %v4309_v63 }
 0x272   : > { %1998 = vmatmul.bf16.gmra.mxu3 %v4310_v17 }
 0x273   : > { %2100 = vst [vmem:[#allocation2 + $0x48] sm:$0xff] %v2036_v0 }
 0x274   : > { %v1870_v6 = vpop.f32.mrf.mxu2  ;;  %v1694_v3 = vpop.f32.mrf.mxu0 }
 0x275   : > { %v1871_v2 = vadd.f32 %v1870_v6, %v1782_v25  ;;  %v1959_v26 = vpop.f32.mrf.mxu3  ;;  %v1783_v4 = vpop.f32.mrf.mxu1 }
 0x276   : > { %v1784_v21 = vadd.f32 %v1783_v4, %v1694_v3 }
 0x277   : > { %v1960_v5 = vadd.f32 %v1959_v26, %v1871_v2  ;;  %v504_v2 = vld [vmem:[#allocation2 + $0x140] sm:$0xff] }
 0x279   : > { %v2038_v27 = vadd.f32 %v1960_v5, %v494_v18 }
 0x27b   : > { %2102 = vst [vmem:[#allocation2 + $0x110] sm:$0xff] %v2038_v27 }
 0x27c   : > { %v1872_v28 = vpop.f32.mrf.mxu2  ;;  %v1697_v29 = vpop.f32.mrf.mxu0 }
 0x27d   : > { %v1873_v22 = vadd.f32 %v1872_v28, %v1784_v21  ;;  %v1961_v24 = vpop.f32.mrf.mxu3  ;;  %v1786_v32 = vpop.f32.mrf.mxu1 }
 0x27e   : > { %v1787_v38 = vadd.f32 %v1786_v32, %v1697_v29 }
 0x27f   : > { %v1962_v37 = vadd.f32 %v1961_v24, %v1873_v22  ;;  %1736 = vmatmul.bf16.gmra.mxu0 %v4311_v31  ;;  %v506_v22 = vld [vmem:[#allocation2 + $0x1a8] sm:$0xff] }
 0x280   : > { %1825 = vmatmul.bf16.gmra.mxu1 %v4312_v33  ;;  %v4319_v33 = vld [vmem:[#allocation19_spill] sm:$0xff] }
 0x281   : > { %v2040_v13 = vadd.f32 %v1962_v37, %v496_v7  ;;  %1914 = vmatmul.bf16.gmra.mxu2 %v4313_v39 }
 0x282   : > { %2003 = vmatmul.bf16.gmra.mxu3 %v4314_v42  ;;  %v4320_v42 = vld [vmem:[#allocation20_spill] sm:$0xff] }
 0x283   : > { %2104 = vst [vmem:[#allocation2 + $0x98] sm:$0xff] %v2040_v13 }
 0x284   : > { %v1875_v41 = vpop.f32.mrf.mxu2  ;;  %v1699_v50 = vpop.f32.mrf.mxu0 }
 0x285   : > { %v1876_v14 = vadd.f32 %v1875_v41, %v1787_v38  ;;  %v1964_v34 = vpop.f32.mrf.mxu3  ;;  %v1788_v35 = vpop.f32.mrf.mxu1  ;;  %v4321_v41 = vld [vmem:[#allocation21_spill] sm:$0xff] }
 0x286   : > { %v1789_v36 = vadd.f32 %v1788_v35, %v1699_v50 }
 0x287   : > { %v1965_v44 = vadd.f32 %v1964_v34, %v1876_v14  ;;  %v4322_v14 = vld [vmem:[#allocation22_spill] sm:$0xff] }
 0x289   : > { %v2042_v58 = vadd.f32 %v1965_v44, %v498_v43  ;;  %v510_v44 = vld [vmem:[#allocation2 + $0xf8] sm:$0xff] }
 0x28b   : > { %2106 = vst [vmem:[#allocation2 + $0x150] sm:$0xff] %v2042_v58 }
 0x28c   : > { %v1877_v20 = vpop.f32.mrf.mxu2  ;;  %v1702_v51 = vpop.f32.mrf.mxu0 }
 0x28d   : > { %v1878_v15 = vadd.f32 %v1877_v20, %v1789_v36  ;;  %v1966_v16 = vpop.f32.mrf.mxu3  ;;  %v1791_v55 = vpop.f32.mrf.mxu1 }
 0x28e   : > { %v1792_v8 = vadd.f32 %v1791_v55, %v1702_v51 }
 0x28f   : > { %v1967_v56 = vadd.f32 %v1966_v16, %v1878_v15  ;;  %1741 = vmatmul.bf16.gmra.mxu0 %v4315_v48 }
 0x290   : > { %1830 = vmatmul.bf16.gmra.mxu1 %v4316_v45 }
 0x291   : > { %v2044_v60 = vadd.f32 %v1967_v56, %v500_v9  ;;  %1919 = vmatmul.bf16.gmra.mxu2 %v4317_v40  ;;  %v512_v56 = vld [vmem:[#allocation2 + $0x30] sm:$0xff] }
 0x292   : > { %2008 = vmatmul.bf16.gmra.mxu3 %v4318_v57 }
 0x293   : > { %2108 = vst [vmem:[#allocation2 + $0x60] sm:$0xff] %v2044_v60 }
 0x294   : > { %v1880_v52 = vpop.f32.mrf.mxu2  ;;  %v1704_v53 = vpop.f32.mrf.mxu0 }
 0x295   : > { %v1881_v62 = vadd.f32 %v1880_v52, %v1792_v8  ;;  %v1969_v46 = vpop.f32.mrf.mxu3  ;;  %v1793_v49 = vpop.f32.mrf.mxu1 }
 0x296   : > { %v1794_v25 = vadd.f32 %v1793_v49, %v1704_v53 }
 0x297   : > { %v1970_v54 = vadd.f32 %v1969_v46, %v1881_v62  ;;  %v514_v46 = vld [vmem:[#allocation2] sm:$0xff] }
 0x299   : > { %v2046_v0 = vadd.f32 %v1970_v54, %v502_v47 }
 0x29b   : > { %2110 = vst [vmem:[#allocation2 + $0x188] sm:$0xff] %v2046_v0 }
 0x29c   : > { %v1882_v1 = vpop.f32.mrf.mxu2  ;;  %v1707_v6 = vpop.f32.mrf.mxu0 }
 0x29d   : > { %v1883_v63 = vadd.f32 %v1882_v1, %v1794_v25  ;;  %v1971_v17 = vpop.f32.mrf.mxu3  ;;  %v1796_v26 = vpop.f32.mrf.mxu1 }
 0x29e   : > { %v1797_v4 = vadd.f32 %v1796_v26, %v1707_v6 }
 0x29f   : > { %v1972_v3 = vadd.f32 %v1971_v17, %v1883_v63  ;;  %1746 = vmatmul.bf16.gmra.mxu0 %v4019_v23 }
 0x2a0   : > { %1835 = vmatmul.bf16.gmra.mxu1 %v4023_v59  ;;  %v508_v59 = vld [vmem:[#allocation2 + $0x28] sm:$0xff] }
 0x2a1   : > { %v2048_v18 = vadd.f32 %v1972_v3, %v504_v2  ;;  %1924 = vmatmul.bf16.gmra.mxu2 %v4025_v61 }
 0x2a2   : > { %2013 = vmatmul.bf16.gmra.mxu3 %v4027_v11 }
 0x2a3   : > { %2112 = vst [vmem:[#allocation2 + $0x140] sm:$0xff] %v2048_v18  ;;  %v518_v18 = vld [vmem:[#allocation2 + $0x1d0] sm:$0xff] }
 0x2a4   : > { %v1885_v5 = vpop.f32.mrf.mxu2  ;;  %v1709_v28 = vpop.f32.mrf.mxu0 }
 0x2a5   : > { %v1886_v27 = vadd.f32 %v1885_v5, %v1797_v4  ;;  %v1974_v21 = vpop.f32.mrf.mxu3  ;;  %v1798_v24 = vpop.f32.mrf.mxu1 }
 0x2a6   : > { %v1799_v32 = vadd.f32 %v1798_v24, %v1709_v28 }
 0x2a7   : > { %v1975_v29 = vadd.f32 %v1974_v21, %v1886_v27 }
 0x2a9   : > { %v2050_v7 = vadd.f32 %v1975_v29, %v506_v22 }
 0x2ab   : > { %2114 = vst [vmem:[#allocation2 + $0x1a8] sm:$0xff] %v2050_v7  ;;  %v520_v7 = vld [vmem:[#allocation2 + $0xc8] sm:$0xff] }
 0x2ac   : > { %v1887_v23 = vpop.f32.mrf.mxu2  ;;  %v1712_v13 = vpop.f32.mrf.mxu0 }
 0x2ad   : > { %v1888_v37 = vadd.f32 %v1887_v23, %v1799_v32  ;;  %v1976_v31 = vpop.f32.mrf.mxu3  ;;  %v1801_v38 = vpop.f32.mrf.mxu1 }
 0x2ae   : > { %v1802_v39 = vadd.f32 %v1801_v38, %v1712_v13 }
 0x2af   : > { %v1977_v61 = vadd.f32 %v1976_v31, %v1888_v37  ;;  %1751 = vmatmul.bf16.gmra.mxu0 %v4319_v33  ;;  %v522_v33 = vld [vmem:[#allocation2 + $0x1f8] sm:$0xff] }
 0x2b0   : > { %1840 = vmatmul.bf16.gmra.mxu1 %v4320_v42 }
 0x2b1   : > { %v2052_v11 = vadd.f32 %v1977_v61, %v508_v59  ;;  %1929 = vmatmul.bf16.gmra.mxu2 %v4321_v41 }
 0x2b2   : > { %2018 = vmatmul.bf16.gmra.mxu3 %v4322_v14 }
 0x2b3   : > { %2116 = vst [vmem:[#allocation2 + $0x28] sm:$0xff] %v2052_v11 }
 0x2b4   : > { %v1890_v34 = vpop.f32.mrf.mxu2  ;;  %v1714_v35 = vpop.f32.mrf.mxu0 }
 0x2b5   : > { %v1891_v50 = vadd.f32 %v1890_v34, %v1802_v39  ;;  %v1979_v43 = vpop.f32.mrf.mxu3  ;;  %v1803_v58 = vpop.f32.mrf.mxu1 }
 0x2b6   : > { %v1804_v15 = vadd.f32 %v1803_v58, %v1714_v35  ;;  %v524_v35 = vld [vmem:[#allocation2 + $0x128] sm:$0xff] }
 0x2b7   : > { %v1980_v36 = vadd.f32 %v1979_v43, %v1891_v50 }
 0x2b9   : > { %v2054_v20 = vadd.f32 %v1980_v36, %v510_v44 }
 0x2bb   : > { %2118 = vst [vmem:[#allocation2 + $0xf8] sm:$0xff] %v2054_v20 }
 0x2bc   : > { %v1892_v16 = vpop.f32.mrf.mxu2  ;;  %v1717_v55 = vpop.f32.mrf.mxu0 }
 0x2bd   : > { %v1893_v51 = vadd.f32 %v1892_v16, %v1804_v15  ;;  %v1981_v9 = vpop.f32.mrf.mxu3  ;;  %v1806_v48 = vpop.f32.mrf.mxu1 }
 0x2be   : > { %v1807_v45 = vadd.f32 %v1806_v48, %v1717_v55  ;;  %v526_v55 = vld [vmem:[#allocation2 + $0x1f0] sm:$0xff] }
 0x2bf   : > { %v1982_v60 = vadd.f32 %v1981_v9, %v1893_v51  ;;  %1756 = vmatmul.bf16.gmra.mxu0 %v4061_v12 }
 0x2c0   : > { %1845 = vmatmul.bf16.gmra.mxu1 %v4063_v10  ;;  %v516_v10 = vld [vmem:[#allocation2 + $0x8] sm:$0xff] }
 0x2c1   : > { %v2056_v8 = vadd.f32 %v1982_v60, %v512_v56  ;;  %1934 = vmatmul.bf16.gmra.mxu2 %v4065_v19 }
 0x2c2   : > { %2023 = vmatmul.bf16.gmra.mxu3 %v4067_v30 }
 0x2c3   : > { %2120 = vst [vmem:[#allocation2 + $0x30] sm:$0xff] %v2056_v8 }
 0x2c4   : > { %v1895_v40 = vpop.f32.mrf.mxu2  ;;  %v1719_v62 = vpop.f32.mrf.mxu0 }
 0x2c5   : > { %v1896_v57 = vadd.f32 %v1895_v40, %v1807_v45  ;;  %v1984_v52 = vpop.f32.mrf.mxu3  ;;  %v1808_v53 = vpop.f32.mrf.mxu1 }
 0x2c6   : > { %v1809_v54 = vadd.f32 %v1808_v53, %v1719_v62  ;;  %v528_v62 = vld [vmem:[#allocation2 + $0x78] sm:$0xff] }
 0x2c7   : > { %v1985_v47 = vadd.f32 %v1984_v52, %v1896_v57 }
 0x2c9   : > { %v2058_v49 = vadd.f32 %v1985_v47, %v514_v46 }
 0x2cb   : > { %2122 = vst [vmem:[#allocation2] sm:$0xff] %v2058_v49 }
 0x2cc   : > { %v1897_v12 = vpop.f32.mrf.mxu2  ;;  %v1722_v1 = vpop.f32.mrf.mxu0 }
 0x2cd   : > { %v1898_v0 = vadd.f32 %v1897_v12, %v1809_v54  ;;  %v1986_v25 = vpop.f32.mrf.mxu3  ;;  %v1811_v63 = vpop.f32.mrf.mxu1 }
 0x2ce   : > { %v1812_v30 = vadd.f32 %v1811_v63, %v1722_v1  ;;  %v530_v1 = vld [vmem:[#allocation2 + $0x90] sm:$0xff] }
 0x2cf   : > { %v1987_v19 = vadd.f32 %v1986_v25, %v1898_v0 }
 0x2d1   : > { %v2060_v17 = vadd.f32 %v1987_v19, %v516_v10 }
 0x2d3   : > { %2124 = vst [vmem:[#allocation2 + $0x8] sm:$0xff] %v2060_v17 }
 0x2d4   : > { %v1900_v6 = vpop.f32.mrf.mxu2  ;;  %v1724_v3 = vpop.f32.mrf.mxu0 }
 0x2d5   : > { %v1901_v2 = vadd.f32 %v1900_v6, %v1812_v30  ;;  %v1989_v26 = vpop.f32.mrf.mxu3  ;;  %v1813_v4 = vpop.f32.mrf.mxu1 }
 0x2d6   : > { %v1814_v21 = vadd.f32 %v1813_v4, %v1724_v3  ;;  %v532_v3 = vld [vmem:[#allocation2 + $0xd0] sm:$0xff] }
 0x2d7   : > { %v1990_v5 = vadd.f32 %v1989_v26, %v1901_v2 }
 0x2d9   : > { %v2062_v27 = vadd.f32 %v1990_v5, %v518_v18 }
 0x2db   : > { %2126 = vst [vmem:[#allocation2 + $0x1d0] sm:$0xff] %v2062_v27 }
 0x2dc   : > { %v1902_v28 = vpop.f32.mrf.mxu2  ;;  %v1727_v29 = vpop.f32.mrf.mxu0 }
 0x2dd   : > { %v1903_v22 = vadd.f32 %v1902_v28, %v1814_v21  ;;  %v1991_v24 = vpop.f32.mrf.mxu3  ;;  %v1816_v32 = vpop.f32.mrf.mxu1 }
 0x2de   : > { %v1817_v31 = vadd.f32 %v1816_v32, %v1727_v29  ;;  %v534_v29 = vld [vmem:[#allocation2 + $0x88] sm:$0xff] }
 0x2df   : > { %v1992_v23 = vadd.f32 %v1991_v24, %v1903_v22 }
 0x2e1   : > { %v2064_v37 = vadd.f32 %v1992_v23, %v520_v7 }
 0x2e3   : > { %2128 = vst [vmem:[#allocation2 + $0xc8] sm:$0xff] %v2064_v37 }
 0x2e4   : > { %v1905_v13 = vpop.f32.mrf.mxu2  ;;  %v1729_v61 = vpop.f32.mrf.mxu0 }
 0x2e5   : > { %v1906_v59 = vadd.f32 %v1905_v13, %v1817_v31  ;;  %v1994_v38 = vpop.f32.mrf.mxu3  ;;  %v1818_v11 = vpop.f32.mrf.mxu1 }
 0x2e6   : > { %v1819_v41 = vadd.f32 %v1818_v11, %v1729_v61  ;;  %v536_v61 = vld [vmem:[#allocation2 + $0x1c8] sm:$0xff] }
 0x2e7   : > { %v1995_v39 = vadd.f32 %v1994_v38, %v1906_v59 }
 0x2e9   : > { %v2066_v42 = vadd.f32 %v1995_v39, %v522_v33 }
 0x2eb   : > { %2130 = vst [vmem:[#allocation2 + $0x1f8] sm:$0xff] %v2066_v42 }
 0x2ec   : > { %v1907_v14 = vpop.f32.mrf.mxu2  ;;  %v1732_v43 = vpop.f32.mrf.mxu0 }
 0x2ed   : > { %v1908_v34 = vadd.f32 %v1907_v14, %v1819_v41  ;;  %v1996_v50 = vpop.f32.mrf.mxu3  ;;  %v1821_v44 = vpop.f32.mrf.mxu1 }
 0x2ee   : > { %v1822_v20 = vadd.f32 %v1821_v44, %v1732_v43  ;;  %v538_v43 = vld [vmem:[#allocation2 + $0x178] sm:$0xff] }
 0x2ef   : > { %v1997_v58 = vadd.f32 %v1996_v50, %v1908_v34 }
 0x2f1   : > { %v2068_v36 = vadd.f32 %v1997_v58, %v524_v35 }
 0x2f3   : > { %2132 = vst [vmem:[#allocation2 + $0x128] sm:$0xff] %v2068_v36 }
 0x2f4   : > { %v1910_v15 = vpop.f32.mrf.mxu2  ;;  %v1734_v9 = vpop.f32.mrf.mxu0 }
 0x2f5   : > { %v1911_v16 = vadd.f32 %v1910_v15, %v1822_v20  ;;  %v1999_v51 = vpop.f32.mrf.mxu3  ;;  %v1823_v56 = vpop.f32.mrf.mxu1 }
 0x2f6   : > { %v1824_v8 = vadd.f32 %v1823_v56, %v1734_v9  ;;  %v540_v9 = vld [vmem:[#allocation2 + $0x190] sm:$0xff] }
 0x2f7   : > { %v2000_v48 = vadd.f32 %v1999_v51, %v1911_v16 }
 0x2f9   : > { %v2070_v60 = vadd.f32 %v2000_v48, %v526_v55 }
 0x2fb   : > { %2134 = vst [vmem:[#allocation2 + $0x1f0] sm:$0xff] %v2070_v60 }
 0x2fc   : > { %v1912_v45 = vpop.f32.mrf.mxu2  ;;  %v1737_v52 = vpop.f32.mrf.mxu0 }
 0x2fd   : > { %v1913_v40 = vadd.f32 %v1912_v45, %v1824_v8  ;;  %v2001_v57 = vpop.f32.mrf.mxu3  ;;  %v1826_v46 = vpop.f32.mrf.mxu1 }
 0x2fe   : > { %v1827_v49 = vadd.f32 %v1826_v46, %v1737_v52  ;;  %v542_v52 = vld [vmem:[#allocation2 + $0x38] sm:$0xff] }
 0x2ff   : > { %v2002_v53 = vadd.f32 %v2001_v57, %v1913_v40 }
 0x301   : > { %v2072_v47 = vadd.f32 %v2002_v53, %v528_v62 }
 0x303   : > { %2136 = vst [vmem:[#allocation2 + $0x78] sm:$0xff] %v2072_v47 }
 0x304   : > { %v1915_v54 = vpop.f32.mrf.mxu2  ;;  %v1739_v25 = vpop.f32.mrf.mxu0 }
 0x305   : > { %v1916_v12 = vadd.f32 %v1915_v54, %v1827_v49  ;;  %v2004_v0 = vpop.f32.mrf.mxu3  ;;  %v1828_v10 = vpop.f32.mrf.mxu1 }
 0x306   : > { %v1829_v17 = vadd.f32 %v1828_v10, %v1739_v25 }
 0x307   : > { %v2005_v63 = vadd.f32 %v2004_v0, %v1916_v12  ;;  %v544_v0 = vld [vmem:[#allocation2 + $0x1c0] sm:$0xff] }
 0x309   : > { %v2074_v19 = vadd.f32 %v2005_v63, %v530_v1 }
 0x30b   : > { %2138 = vst [vmem:[#allocation2 + $0x90] sm:$0xff] %v2074_v19 }
 0x30c   : > { %v1917_v30 = vpop.f32.mrf.mxu2  ;;  %v1742_v26 = vpop.f32.mrf.mxu0 }
 0x30d   : > { %v1918_v6 = vadd.f32 %v1917_v30, %v1829_v17  ;;  %v2006_v2 = vpop.f32.mrf.mxu3  ;;  %v1831_v18 = vpop.f32.mrf.mxu1 }
 0x30e   : > { %v1832_v27 = vadd.f32 %v1831_v18, %v1742_v26 }
 0x30f   : > { %v2007_v4 = vadd.f32 %v2006_v2, %v1918_v6  ;;  %v546_v2 = vld [vmem:[#allocation2 + $0x10] sm:$0xff] }
 0x311   : > { %v2076_v5 = vadd.f32 %v2007_v4, %v532_v3 }
 0x313   : > { %2140 = vst [vmem:[#allocation2 + $0xd0] sm:$0xff] %v2076_v5 }
 0x314   : > { %v1920_v21 = vpop.f32.mrf.mxu2  ;;  %v1744_v24 = vpop.f32.mrf.mxu0 }
 0x315   : > { %v1921_v28 = vadd.f32 %v1920_v21, %v1832_v27  ;;  %v2009_v22 = vpop.f32.mrf.mxu3  ;;  %v1833_v7 = vpop.f32.mrf.mxu1 }
 0x316   : > { %v1834_v37 = vadd.f32 %v1833_v7, %v1744_v24 }
 0x317   : > { %v2010_v32 = vadd.f32 %v2009_v22, %v1921_v28  ;;  %v548_v28 = vld [vmem:[#allocation2 + $0xa0] sm:$0xff] }
 0x319   : > { %v2078_v23 = vadd.f32 %v2010_v32, %v534_v29 }
 0x31b   : > { %2142 = vst [vmem:[#allocation2 + $0x88] sm:$0xff] %v2078_v23 }
 0x31c   : > { %v1922_v31 = vpop.f32.mrf.mxu2  ;;  %v1747_v38 = vpop.f32.mrf.mxu0 }
 0x31d   : > { %v1923_v13 = vadd.f32 %v1922_v31, %v1834_v37  ;;  %v2011_v59 = vpop.f32.mrf.mxu3  ;;  %v1836_v33 = vpop.f32.mrf.mxu1 }
 0x31e   : > { %v1837_v42 = vadd.f32 %v1836_v33, %v1747_v38 }
 0x31f   : > { %v2012_v11 = vadd.f32 %v2011_v59, %v1923_v13 }
 0x321   : > { %v2080_v39 = vadd.f32 %v2012_v11, %v536_v61 }
 0x323   : > { %2144 = vst [vmem:[#allocation2 + $0x1c8] sm:$0xff] %v2080_v39 }
 0x324   : > { %v1925_v41 = vpop.f32.mrf.mxu2  ;;  %v1749_v50 = vpop.f32.mrf.mxu0 }
 0x325   : > { %v1926_v14 = vadd.f32 %v1925_v41, %v1837_v42  ;;  %v2014_v34 = vpop.f32.mrf.mxu3  ;;  %v1838_v35 = vpop.f32.mrf.mxu1 }
 0x326   : > { %v1839_v36 = vadd.f32 %v1838_v35, %v1749_v50 }
 0x327   : > { %v2015_v44 = vadd.f32 %v2014_v34, %v1926_v14 }
 0x329   : > { %v2082_v58 = vadd.f32 %v2015_v44, %v538_v43 }
 0x32b   : > { %2146 = vst [vmem:[#allocation2 + $0x178] sm:$0xff] %v2082_v58 }
 0x32c   : > { %v1927_v20 = vpop.f32.mrf.mxu2  ;;  %v1752_v51 = vpop.f32.mrf.mxu0 }
 0x32d   : > { %v1928_v15 = vadd.f32 %v1927_v20, %v1839_v36  ;;  %v2016_v16 = vpop.f32.mrf.mxu3  ;;  %v1841_v55 = vpop.f32.mrf.mxu1 }
 0x32e   : > { %v1842_v60 = vadd.f32 %v1841_v55, %v1752_v51 }
 0x32f   : > { %v2017_v56 = vadd.f32 %v2016_v16, %v1928_v15 }
 0x331   : > { %v2084_v48 = vadd.f32 %v2017_v56, %v540_v9 }
 0x333   : > { %2148 = vst [vmem:[#allocation2 + $0x190] sm:$0xff] %v2084_v48 }
 0x334   : > { %v1930_v8 = vpop.f32.mrf.mxu2  ;;  %v1754_v57 = vpop.f32.mrf.mxu0 }
 0x335   : > { %v1931_v45 = vadd.f32 %v1930_v8, %v1842_v60  ;;  %v2019_v40 = vpop.f32.mrf.mxu3  ;;  %v1843_v62 = vpop.f32.mrf.mxu1 }
 0x336   : > { %v1844_v47 = vadd.f32 %v1843_v62, %v1754_v57 }
 0x337   : > { %v2020_v46 = vadd.f32 %v2019_v40, %v1931_v45 }
 0x339   : > { %v2086_v53 = vadd.f32 %v2020_v46, %v542_v52 }
 0x33b   : > { %2150 = vst [vmem:[#allocation2 + $0x38] sm:$0xff] %v2086_v53 }
 0x33c   : > { %v1932_v49 = vpop.f32.mrf.mxu2  ;;  %v1757_v25 = vpop.f32.mrf.mxu0 }
 0x33d   : > { %v1933_v54 = vadd.f32 %v1932_v49, %v1844_v47  ;;  %v2021_v12 = vpop.f32.mrf.mxu3  ;;  %v1846_v1 = vpop.f32.mrf.mxu1 }
 0x33e   : > { %v1847_v19 = vadd.f32 %v1846_v1, %v1757_v25 }
 0x33f   : > { %v2022_v10 = vadd.f32 %v2021_v12, %v1933_v54 }
 0x341   : > { %v2088_v63 = vadd.f32 %v2022_v10, %v544_v0 }
 0x343   : > { %2152 = vst [vmem:[#allocation2 + $0x1c0] sm:$0xff] %v2088_v63 }
 0x344   : > { %v1935_v17 = vpop.f32.mrf.mxu2  ;;  %v1759_v3 = vpop.f32.mrf.mxu0 }
 0x345   : > { %v1936_v30 = vadd.f32 %v1935_v17, %v1847_v19  ;;  %v2024_v6 = vpop.f32.mrf.mxu3  ;;  %v1848_v18 = vpop.f32.mrf.mxu1 }
 0x346   : > { %v1849_v5 = vadd.f32 %v1848_v18, %v1759_v3 }
 0x347   : > { %v2025_v26 = vadd.f32 %v2024_v6, %v1936_v30 }
 0x349   : > { %v2090_v4 = vadd.f32 %v2025_v26, %v546_v2 }
 0x34b   : > { %2154 = vst [vmem:[#allocation2 + $0x10] sm:$0xff] %v2090_v4 }
 0x34c   : > { %v1937_v27 = vpop.f32.mrf.mxu2 }
 0x34d   : > { %v1938_v21 = vadd.f32 %v1937_v27, %v1849_v5  ;;  %v2026_v22 = vpop.f32.mrf.mxu3 }
 0x34f   : > { %v2027_v24 = vadd.f32 %v2026_v22, %v1938_v21  ;;  %2160 = sbr.rel (%p3083_p13) target bundleno = 899 (0x383), region = 63 }
 0x351   : > { %v2092_v29 = vadd.f32 %v2027_v24, %v548_v28 }
 0x353   : > { %2156 = vst [vmem:[#allocation2 + $0xa0] sm:$0xff] %v2092_v29 }
 0x354   : > { %v2161_v7 = vld [vmem:[#allocation2 + $0xb0] sm:$0xff]  ;;  %v2225_v23 = vld [vmem:[%s4264_s2] sm:$0x3]  ;;  %v2163_v13 = vld [vmem:[#allocation2 + $0xd8] sm:$0xff] }
 0x355   : > { %v2162_v32 = vld [vmem:[#allocation2 + $0x1b0] sm:$0xff]  ;;  %v4141_v37 = vperm.slane %v2225_v23, 0  ;;  %v4143_v31 = vperm.slane %v2225_v23, 1  ;;  %v2164_v59 = vld [vmem:[#allocation2 + $0x18] sm:$0xff]  ;;  %v2166_v61 = vld [vmem:[#allocation2 + $0x168] sm:$0xff] }
 0x356   : > { %v2165_v38 = vld [vmem:[#allocation2 + $0x50] sm:$0xff]  ;;  %v2168_v11 = vld [vmem:[#allocation2 + $0x48] sm:$0xff]  ;;  %v2169_v44 = vld [vmem:[#allocation2 + $0x180] sm:$0xff] }
 0x357   : > { %v2167_v33 = vld [vmem:[#allocation2 + $0x130] sm:$0xff]  ;;  %v2231_v39 = vadd.f32 %v4141_v37, %v2161_v7  ;;  %v2232_v42 = vadd.f32 %v4143_v31, %v2162_v32  ;;  %v2233_v41 = vadd.f32 %v4141_v37, %v2163_v13  ;;  %v2234_v14 = vadd.f32 %v4143_v31, %v2164_v59  ;;  %v2171_v51 = vld [vmem:[#allocation2 + $0x118] sm:$0xff]  ;;  %v2173_v8 = vld [vmem:[#allocation2 + $0x120] sm:$0xff] }
 0x358   : > { %v2235_v34 = vadd.f32 %v4141_v37, %v2165_v38  ;;  %v2236_v50 = vadd.f32 %v4143_v31, %v2166_v61  ;;  %v2237_v43 = vadd.f32 %v4141_v37, %v2167_v33  ;;  %v2238_v35 = vadd.f32 %v4143_v31, %v2168_v11  ;;  %v2170_v58 = vld [vmem:[#allocation2 + $0x110] sm:$0xff]  ;;  %v2172_v9 = vld [vmem:[#allocation2 + $0x98] sm:$0xff]  ;;  %v2175_v46 = vld [vmem:[#allocation2 + $0x108] sm:$0xff] }
 0x359   : > { %v2295_v36 = vmax.f32 %v2231_v39, 0.0  ;;  %v2296_v20 = vmax.f32 %v2232_v42, 0.0  ;;  %v2297_v15 = vmax.f32 %v2233_v41, 0.0  ;;  %v2298_v16 = vmax.f32 %v2234_v14, 0.0  ;;  %v2174_v45 = vld [vmem:[#allocation2 + $0x150] sm:$0xff]  ;;  %v2176_v53 = vld [vmem:[#allocation2 + $0x60] sm:$0xff] }
 0x35a   : > { %v2299_v55 = vmax.f32 %v2235_v34, 0.0  ;;  %v2300_v56 = vmax.f32 %v2236_v50, 0.0  ;;  %v2301_v48 = vmax.f32 %v2237_v43, 0.0  ;;  %v2302_v60 = vmax.f32 %v2238_v35, 0.0  ;;  %v2177_v0 = vld [vmem:[#allocation2 + $0xe0] sm:$0xff]  ;;  %v2178_v19 = vld [vmem:[#allocation2 + $0x188] sm:$0xff] }
 0x35b   : > { %v2359_v40 = vpack.c.bf16 %v2296_v20, %v2295_v36  ;;  %v2360_v57 = vpack.c.bf16 %v2298_v16, %v2297_v15  ;;  %v2239_v52 = vadd.f32 %v4141_v37, %v2169_v44  ;;  %v2240_v62 = vadd.f32 %v4143_v31, %v2170_v58  ;;  %v2179_v26 = vld [vmem:[#allocation2 + $0x138] sm:$0xff]  ;;  %v2180_v3 = vld [vmem:[#allocation2 + $0x140] sm:$0xff]  ;;  %v2182_v28 = vld [vmem:[#allocation2 + $0x1a8] sm:$0xff] }
 0x35c   : > { %v2361_v47 = vpack.c.bf16 %v2300_v56, %v2299_v55  ;;  %v2362_v49 = vpack.c.bf16 %v2302_v60, %v2301_v48  ;;  %v2241_v54 = vadd.f32 %v4141_v37, %v2171_v51  ;;  %v2242_v12 = vadd.f32 %v4143_v31, %v2172_v9  ;;  %v2181_v21 = vld [vmem:[#allocation2 + $0x80] sm:$0xff]  ;;  %v2183_v32 = vld [vmem:[#allocation2 + $0x1b8] sm:$0xff]  ;;  %v2184_v23 = vld [vmem:[#allocation2 + $0x28] sm:$0xff] }
 0x35d   : > { %2391 = vst [vmem:[%s3556_s30] sm:$0xff] %v2359_v40  ;;  %v2303_v25 = vmax.f32 %v2239_v52, 0.0  ;;  %v2304_v1 = vmax.f32 %v2240_v62, 0.0  ;;  %v2243_v10 = vadd.f32 %v4141_v37, %v2173_v8  ;;  %v2244_v63 = vadd.f32 %v4143_v31, %v2174_v45  ;;  %v2185_v33 = vld [vmem:[#allocation2 + $0x1e8] sm:$0xff]  ;;  %v2186_v14 = vld [vmem:[#allocation2 + $0xf8] sm:$0xff]  ;;  %v2187_v44 = vld [vmem:[#allocation2 + $0x160] sm:$0xff] }
 0x35e   : > { %2392 = vst [vmem:[%s3556_s30 + $0x8] sm:$0xff] %v2360_v57  ;;  %v2305_v17 = vmax.f32 %v2241_v54, 0.0  ;;  %v2306_v30 = vmax.f32 %v2242_v12, 0.0  ;;  %v2245_v6 = vadd.f32 %v4141_v37, %v2175_v46  ;;  %v2246_v2 = vadd.f32 %v4143_v31, %v2176_v53  ;;  %v2188_v58 = vld [vmem:[#allocation2 + $0x30] sm:$0xff]  ;;  %v2189_v51 = vld [vmem:[#allocation2 + $0x1e0] sm:$0xff]  ;;  %v2192_v45 = vld [vmem:[#allocation2 + $0x8] sm:$0xff] }
 0x35f   : > { %2393 = vst [vmem:[%s3556_s30 + $0x10] sm:$0xff] %v2361_v47  ;;  %v2363_v18 = vpack.c.bf16 %v2304_v1, %v2303_v25  ;;  %v2307_v4 = vmax.f32 %v2243_v10, 0.0  ;;  %v2308_v5 = vmax.f32 %v2244_v63, 0.0  ;;  %v2247_v27 = vadd.f32 %v4141_v37, %v2177_v0  ;;  %v2190_v9 = vld [vmem:[#allocation2] sm:$0xff]  ;;  %v2191_v8 = vld [vmem:[#allocation2 + $0xf0] sm:$0xff]  ;;  %v2193_v46 = vld [vmem:[#allocation2 + $0x148] sm:$0xff] }
 0x360   : > { %2394 = vst [vmem:[%s3556_s30 + $0x18] sm:$0xff] %v2362_v49  ;;  %v2364_v22 = vpack.c.bf16 %v2306_v30, %v2305_v17  ;;  %v2309_v24 = vmax.f32 %v2245_v6, 0.0  ;;  %v2310_v29 = vmax.f32 %v2246_v2, 0.0  ;;  %v2248_v7 = vadd.f32 %v4143_v31, %v2178_v19  ;;  %v2194_v12 = vld [vmem:[#allocation2 + $0x1d0] sm:$0xff]  ;;  %v2195_v63 = vld [vmem:[#allocation2 + $0x100] sm:$0xff]  ;;  %v2196_v19 = vld [vmem:[#allocation2 + $0xc8] sm:$0xff] }
 0x361   : > { %2395 = vst [vmem:[%s3556_s30 + $0x20] sm:$0xff] %v2363_v18  ;;  %v2365_v13 = vpack.c.bf16 %v2308_v5, %v2307_v4  ;;  %v2311_v59 = vmax.f32 %v2247_v27, 0.0  ;;  %v2249_v38 = vadd.f32 %v4141_v37, %v2179_v26  ;;  %v2250_v61 = vadd.f32 %v4143_v31, %v2180_v3  ;;  %v2197_v26 = vld [vmem:[#allocation2 + $0x40] sm:$0xff]  ;;  %v2198_v3 = vld [vmem:[#allocation2 + $0x1f8] sm:$0xff] }
 0x362   : > { %2396 = vst [vmem:[%s3556_s30 + $0x28] sm:$0xff] %v2364_v22  ;;  %v2366_v11 = vpack.c.bf16 %v2310_v29, %v2309_v24  ;;  %v2312_v39 = vmax.f32 %v2248_v7, 0.0  ;;  %v2251_v42 = vadd.f32 %v4141_v37, %v2181_v21  ;;  %v2252_v41 = vadd.f32 %v4143_v31, %v2182_v28  ;;  %v2199_v21 = vld [vmem:[#allocation2 + $0x20] sm:$0xff]  ;;  %v2200_v28 = vld [vmem:[#allocation2 + $0x128] sm:$0xff] }
 0x363   : > { %2397 = vst [vmem:[%s3556_s30 + $0x30] sm:$0xff] %v2365_v13  ;;  %v2313_v34 = vmax.f32 %v2249_v38, 0.0  ;;  %v2314_v50 = vmax.f32 %v2250_v61, 0.0  ;;  %v2253_v43 = vadd.f32 %v4141_v37, %v2183_v32  ;;  %v2254_v35 = vadd.f32 %v4143_v31, %v2184_v23  ;;  %v2201_v32 = vld [vmem:[#allocation2 + $0x1a0] sm:$0xff]  ;;  %v2202_v61 = vld [vmem:[#allocation2 + $0x1f0] sm:$0xff] }
 0x364   : > { %2398 = vst [vmem:[%s3556_s30 + $0x38] sm:$0xff] %v2366_v11  ;;  %v2367_v36 = vpack.c.bf16 %v2312_v39, %v2311_v59  ;;  %v2315_v20 = vmax.f32 %v2251_v42, 0.0  ;;  %v2316_v15 = vmax.f32 %v2252_v41, 0.0  ;;  %v2255_v16 = vadd.f32 %v4141_v37, %v2185_v33  ;;  %v2203_v41 = vld [vmem:[#allocation2 + $0xe8] sm:$0xff] }
 0x365   : > { %v2368_v55 = vpack.c.bf16 %v2314_v50, %v2313_v34  ;;  %v2317_v56 = vmax.f32 %v2253_v43, 0.0  ;;  %v2318_v48 = vmax.f32 %v2254_v35, 0.0  ;;  %v2256_v60 = vadd.f32 %v4143_v31, %v2186_v14  ;;  %v2204_v14 = vld [vmem:[#allocation2 + $0x78] sm:$0xff] }
 0x366   : > { %2399 = vst [vmem:[%s3556_s30 + $0x40] sm:$0xff] %v2367_v36  ;;  %v2369_v40 = vpack.c.bf16 %v2316_v15, %v2315_v20  ;;  %v2319_v57 = vmax.f32 %v2255_v16, 0.0  ;;  %v2257_v52 = vadd.f32 %v4141_v37, %v2187_v44  ;;  %v2258_v62 = vadd.f32 %v4143_v31, %v2188_v58  ;;  %v2205_v44 = vld [vmem:[#allocation2 + $0x70] sm:$0xff] }
 0x367   : > { %2400 = vst [vmem:[%s3556_s30 + $0x48] sm:$0xff] %v2368_v55  ;;  %v2370_v53 = vpack.c.bf16 %v2318_v48, %v2317_v56  ;;  %v2320_v47 = vmax.f32 %v2256_v60, 0.0  ;;  %v2259_v49 = vadd.f32 %v4141_v37, %v2189_v51  ;;  %v2260_v54 = vadd.f32 %v4143_v31, %v2190_v9  ;;  %v2206_v58 = vld [vmem:[#allocation2 + $0x90] sm:$0xff]  ;;  %v2207_v51 = vld [vmem:[#allocation2 + $0x1d8] sm:$0xff] }
 0x368   : > { %2401 = vst [vmem:[%s3556_s30 + $0x50] sm:$0xff] %v2369_v40  ;;  %v2321_v0 = vmax.f32 %v2257_v52, 0.0  ;;  %v2322_v25 = vmax.f32 %v2258_v62, 0.0  ;;  %v2261_v1 = vadd.f32 %v4141_v37, %v2191_v8  ;;  %v2262_v10 = vadd.f32 %v4143_v31, %v2192_v45  ;;  %v2208_v9 = vld [vmem:[#allocation2 + $0xd0] sm:$0xff]  ;;  %v2209_v8 = vld [vmem:[#allocation2 + $0xb8] sm:$0xff]  ;;  %v2210_v62 = vld [vmem:[#allocation2 + $0x88] sm:$0xff] }
 0x369   : > { %2402 = vst [vmem:[%s3556_s30 + $0x58] sm:$0xff] %v2370_v53  ;;  %v2371_v17 = vpack.c.bf16 %v2320_v47, %v2319_v57  ;;  %v2323_v30 = vmax.f32 %v2259_v49, 0.0  ;;  %v2324_v6 = vmax.f32 %v2260_v54, 0.0  ;;  %v2263_v2 = vadd.f32 %v4141_v37, %v2193_v46  ;;  %v2211_v54 = vld [vmem:[#allocation2 + $0xa8] sm:$0xff] }
 0x36a   : > { %v2372_v18 = vpack.c.bf16 %v2322_v25, %v2321_v0  ;;  %v2325_v4 = vmax.f32 %v2261_v1, 0.0  ;;  %v2326_v5 = vmax.f32 %v2262_v10, 0.0  ;;  %v2264_v27 = vadd.f32 %v4143_v31, %v2194_v12  ;;  %v2212_v12 = vld [vmem:[#allocation2 + $0x1c8] sm:$0xff] }
 0x36b   : > { %2403 = vst [vmem:[%s3556_s30 + $0x60] sm:$0xff] %v2371_v17  ;;  %v2373_v22 = vpack.c.bf16 %v2324_v6, %v2323_v30  ;;  %v2327_v24 = vmax.f32 %v2263_v2, 0.0  ;;  %v2265_v29 = vadd.f32 %v4141_v37, %v2195_v63  ;;  %v2266_v7 = vadd.f32 %v4143_v31, %v2196_v19  ;;  %v2213_v63 = vld [vmem:[#allocation2 + $0x170] sm:$0xff]  ;;  %v2214_v19 = vld [vmem:[#allocation2 + $0x178] sm:$0xff] }
 0x36c   : > { %2404 = vst [vmem:[%s3556_s30 + $0x68] sm:$0xff] %v2372_v18  ;;  %v2374_v23 = vpack.c.bf16 %v2326_v5, %v2325_v4  ;;  %v2328_v13 = vmax.f32 %v2264_v27, 0.0  ;;  %v2267_v59 = vadd.f32 %v4141_v37, %v2197_v26  ;;  %v2268_v38 = vadd.f32 %v4143_v31, %v2198_v3  ;;  %v2215_v26 = vld [vmem:[#allocation2 + $0x68] sm:$0xff]  ;;  %v2216_v3 = vld [vmem:[#allocation2 + $0x190] sm:$0xff] }
 0x36d   : > { %2405 = vst [vmem:[%s3556_s30 + $0x70] sm:$0xff] %v2373_v22  ;;  %v2329_v33 = vmax.f32 %v2265_v29, 0.0  ;;  %v2330_v11 = vmax.f32 %v2266_v7, 0.0  ;;  %v2269_v39 = vadd.f32 %v4141_v37, %v2199_v21  ;;  %v2270_v42 = vadd.f32 %v4143_v31, %v2200_v28  ;;  %v2217_v21 = vld [vmem:[#allocation2 + $0x198] sm:$0xff] }
 0x36e   : > { %2406 = vst [vmem:[%s3556_s30 + $0x78] sm:$0xff] %v2374_v23  ;;  %v2375_v34 = vpack.c.bf16 %v2328_v13, %v2327_v24  ;;  %v2331_v50 = vmax.f32 %v2267_v59, 0.0  ;;  %v2332_v43 = vmax.f32 %v2268_v38, 0.0  ;;  %v2271_v35 = vadd.f32 %v4141_v37, %v2201_v32  ;;  %v2218_v7 = vld [vmem:[#allocation2 + $0x38] sm:$0xff]  ;;  %v2219_v38 = vld [vmem:[#allocation2 + $0xc0] sm:$0xff] }
 0x36f   : > { %v2376_v36 = vpack.c.bf16 %v2330_v11, %v2329_v33  ;;  %v2333_v20 = vmax.f32 %v2269_v39, 0.0  ;;  %v2334_v15 = vmax.f32 %v2270_v42, 0.0  ;;  %v2272_v16 = vadd.f32 %v4143_v31, %v2202_v61  ;;  %v2220_v61 = vld [vmem:[#allocation2 + $0x1c0] sm:$0xff] }
 0x370   : > { %2407 = vst [vmem:[%s3556_s30 + $0x80] sm:$0xff] %v2375_v34  ;;  %v2377_v55 = vpack.c.bf16 %v2332_v43, %v2331_v50  ;;  %v2335_v56 = vmax.f32 %v2271_v35, 0.0  ;;  %v2273_v48 = vadd.f32 %v4141_v37, %v2203_v41  ;;  %v2274_v60 = vadd.f32 %v4143_v31, %v2204_v14  ;;  %v2221_v41 = vld [vmem:[#allocation2 + $0x158] sm:$0xff]  ;;  %v2222_v14 = vld [vmem:[#allocation2 + $0x10] sm:$0xff] }
 0x371   : > { %2408 = vst [vmem:[%s3556_s30 + $0x88] sm:$0xff] %v2376_v36  ;;  %v2378_v45 = vpack.c.bf16 %v2334_v15, %v2333_v20  ;;  %v2336_v40 = vmax.f32 %v2272_v16, 0.0  ;;  %v2275_v57 = vadd.f32 %v4141_v37, %v2205_v44  ;;  %v2276_v52 = vadd.f32 %v4143_v31, %v2206_v58  ;;  %v2223_v44 = vld [vmem:[#allocation2 + $0x58] sm:$0xff]  ;;  %v2224_v58 = vld [vmem:[#allocation2 + $0xa0] sm:$0xff] }
 0x372   : > { %2409 = vst [vmem:[%s3556_s30 + $0x90] sm:$0xff] %v2377_v55  ;;  %v2337_v46 = vmax.f32 %v2273_v48, 0.0  ;;  %v2338_v53 = vmax.f32 %v2274_v60, 0.0  ;;  %v2277_v47 = vadd.f32 %v4141_v37, %v2207_v51  ;;  %v2278_v49 = vadd.f32 %v4143_v31, %v2208_v9 }
 0x373   : > { %2410 = vst [vmem:[%s3556_s30 + $0x98] sm:$0xff] %v2378_v45  ;;  %v2379_v0 = vpack.c.bf16 %v2336_v40, %v2335_v56  ;;  %v2339_v25 = vmax.f32 %v2275_v57, 0.0  ;;  %v2340_v1 = vmax.f32 %v2276_v52, 0.0  ;;  %v2279_v10 = vadd.f32 %v4141_v37, %v2209_v8 }
 0x374   : > { %v2380_v17 = vpack.c.bf16 %v2338_v53, %v2337_v46  ;;  %v2341_v30 = vmax.f32 %v2277_v47, 0.0  ;;  %v2342_v6 = vmax.f32 %v2278_v49, 0.0  ;;  %v2280_v2 = vadd.f32 %v4143_v31, %v2210_v62 }
 0x375   : > { %2411 = vst [vmem:[%s3556_s30 + $0xa0] sm:$0xff] %v2379_v0  ;;  %v2381_v18 = vpack.c.bf16 %v2340_v1, %v2339_v25  ;;  %v2343_v4 = vmax.f32 %v2279_v10, 0.0  ;;  %v2281_v5 = vadd.f32 %v4141_v37, %v2211_v54  ;;  %v2282_v27 = vadd.f32 %v4143_v31, %v2212_v12 }
 0x376   : > { %2412 = vst [vmem:[%s3556_s30 + $0xa8] sm:$0xff] %v2380_v17  ;;  %v2382_v28 = vpack.c.bf16 %v2342_v6, %v2341_v30  ;;  %v2344_v22 = vmax.f32 %v2280_v2, 0.0  ;;  %v2283_v24 = vadd.f32 %v4141_v37, %v2213_v63  ;;  %v2284_v29 = vadd.f32 %v4143_v31, %v2214_v19 }
 0x377   : > { %2413 = vst [vmem:[%s3556_s30 + $0xb0] sm:$0xff] %v2381_v18  ;;  %v2345_v32 = vmax.f32 %v2281_v5, 0.0  ;;  %v2346_v23 = vmax.f32 %v2282_v27, 0.0  ;;  %v2285_v13 = vadd.f32 %v4141_v37, %v2215_v26  ;;  %v2286_v59 = vadd.f32 %v4143_v31, %v2216_v3 }
 0x378   : > { %2414 = vst [vmem:[%s3556_s30 + $0xb8] sm:$0xff] %v2382_v28  ;;  %v2383_v33 = vpack.c.bf16 %v2344_v22, %v2343_v4  ;;  %v2347_v11 = vmax.f32 %v2283_v24, 0.0  ;;  %v2348_v39 = vmax.f32 %v2284_v29, 0.0  ;;  %v2287_v42 = vadd.f32 %v4141_v37, %v2217_v21 }
 0x379   : > { %v2384_v34 = vpack.c.bf16 %v2346_v23, %v2345_v32  ;;  %v2349_v50 = vmax.f32 %v2285_v13, 0.0  ;;  %v2350_v43 = vmax.f32 %v2286_v59, 0.0  ;;  %v2288_v35 = vadd.f32 %v4143_v31, %v2218_v7 }
 0x37a   : > { %2415 = vst [vmem:[%s3556_s30 + $0xc0] sm:$0xff] %v2383_v33  ;;  %v2385_v36 = vpack.c.bf16 %v2348_v39, %v2347_v11  ;;  %v2351_v20 = vmax.f32 %v2287_v42, 0.0  ;;  %v2289_v15 = vadd.f32 %v4141_v37, %v2219_v38  ;;  %v2290_v16 = vadd.f32 %v4143_v31, %v2220_v61 }
 0x37b   : > { %2416 = vst [vmem:[%s3556_s30 + $0xc8] sm:$0xff] %v2384_v34  ;;  %v2386_v51 = vpack.c.bf16 %v2350_v43, %v2349_v50  ;;  %v2352_v9 = vmax.f32 %v2288_v35, 0.0  ;;  %v2291_v55 = vadd.f32 %v4141_v37, %v2221_v41  ;;  %v2292_v56 = vadd.f32 %v4143_v31, %v2222_v14 }
 0x37c   : > { %2417 = vst [vmem:[%s3556_s30 + $0xd0] sm:$0xff] %v2385_v36  ;;  %v2353_v48 = vmax.f32 %v2289_v15, 0.0  ;;  %v2354_v60 = vmax.f32 %v2290_v16, 0.0  ;;  %v2293_v8 = vadd.f32 %v4141_v37, %v2223_v44  ;;  %v2294_v45 = vadd.f32 %v4143_v31, %v2224_v58 }
 0x37d   : > { %2418 = vst [vmem:[%s3556_s30 + $0xd8] sm:$0xff] %v2386_v51  ;;  %v2387_v40 = vpack.c.bf16 %v2352_v9, %v2351_v20  ;;  %v2355_v57 = vmax.f32 %v2291_v55, 0.0  ;;  %v2356_v52 = vmax.f32 %v2292_v56, 0.0 }
 0x37e   : > { %v2388_v62 = vpack.c.bf16 %v2354_v60, %v2353_v48  ;;  %v2357_v46 = vmax.f32 %v2293_v8, 0.0  ;;  %v2358_v53 = vmax.f32 %v2294_v45, 0.0 }
 0x37f   : > { %2419 = vst [vmem:[%s3556_s30 + $0xe0] sm:$0xff] %v2387_v40  ;;  %v2389_v47 = vpack.c.bf16 %v2356_v52, %v2355_v57 }
 0x380   : > { %2420 = vst [vmem:[%s3556_s30 + $0xe8] sm:$0xff] %v2388_v62  ;;  %v2390_v49 = vpack.c.bf16 %v2358_v53, %v2357_v46 }
 0x381   : > { %2421 = vst [vmem:[%s3556_s30 + $0xf0] sm:$0xff] %v2389_v47 }
 0x382   : > { %2422 = vst [vmem:[%s3556_s30 + $0xf8] sm:$0xff] %v2390_v49 }
 0x383 PF: > { %s13_s18 = sadd.s32 1, %s3328_s18   ;;  %s4323_s12 = smov %s3308_s13 }
 0x384   : > { %p10_p0 = scmp.ge.s32.totalorder %s13_s18, 12   ;;  %s4324_s13 = smov %s3402_s25 }
 0x385   : > { %s4325_s14 = smov %s3320_s16  ;;  %s4326_s15 = smov %s3324_s17 }
 0x386   : > { %s4327_s16 = smov %s4330_s19  ;;  %s4328_s17 = smov %s4334_s20 }
 0x387   :  { %12 = sbr.rel (!%p10_p0) target bundleno = 4 (0x4), region = 104 }

</bundles_post_ra>
